<compile_context>
chip_gen: v7x
topology: tpu7x:2x2x1
jax: 0.10.0
libtpu: 0.0.40
codegen_flags: <defaults>
</compile_context>

<pallas_src>
import jax
import jax.numpy as jnp
from jax.experimental import pallas as pl
from jax.experimental.pallas import tpu as pltpu


def _round_up(x, m):
    return (x + m - 1) // m * m


# ----------------------------------------------------------------------------
# Fused Pallas kernel: all LSTM layers + final Linear in one call.
# ----------------------------------------------------------------------------
def _make_fused_kernel(n_lstm, S, Bp, HP, OP):
    def kernel(*refs):
        x_ref = refs[0]
        lstm_refs = refs[1:1 + 3 * n_lstm]            # (wih, whh, bias) per layer
        w4_ref = refs[1 + 3 * n_lstm]
        b4_ref = refs[2 + 3 * n_lstm]
        out_ref = refs[3 + 3 * n_lstm]
        h_sc, c_sc, seq_sc, xp_sc = refs[4 + 3 * n_lstm:]

        def run_layer(wih_ref, whh_ref, b_ref, in_ref):
            # Hoisted input projection (+ bias) for ALL timesteps in one matmul:
            #   (S*Bp, Din) @ (Din, 4*HP) + (1, 4*HP)
            xp_sc[...] = (
                jnp.dot(in_ref[...], wih_ref[...],
                        preferred_element_type=jnp.float32)
                + b_ref[...])

            h_sc[...] = jnp.zeros_like(h_sc)
            c_sc[...] = jnp.zeros_like(c_sc)

            # Fully-unrolled in-kernel recurrence (S static & small): only the
            # h @ W_hh matmul is serial; one MXU push/pop per timestep.
            for t in range(S):
                r = t * Bp
                gates = xp_sc[r:r + Bp, :] + jnp.dot(
                    h_sc[...], whh_ref[...],
                    preferred_element_type=jnp.float32)        # (Bp, 4*HP)
                # Lane-aligned (128-wide) gate slices: whole-vreg nonlinearities.
                i_g = jax.nn.sigmoid(gates[:, 0 * HP:1 * HP])
                f_g = jax.nn.sigmoid(gates[:, 1 * HP:2 * HP])
                g_g = jnp.tanh(gates[:, 2 * HP:3 * HP])
                o_g = jax.nn.sigmoid(gates[:, 3 * HP:4 * HP])
                c_new = f_g * c_sc[...] + i_g * g_g
                h_new = o_g * jnp.tanh(c_new)
                c_sc[...] = c_new
                h_sc[...] = h_new
                seq_sc[r:r + Bp, :] = h_new

        # Layer 0 reads the (padded, time-major) input; later layers read the
        # previous layer's output sequence kept in VMEM scratch.
        run_layer(lstm_refs[0], lstm_refs[1], lstm_refs[2], x_ref)
        for l in range(1, n_lstm):
            run_layer(lstm_refs[3 * l], lstm_refs[3 * l + 1],
                      lstm_refs[3 * l + 2], seq_sc)

        # Final Linear folded in:  y = b4 + sum_t h3_t @ W4[t]   (lane-dense output)
        acc = jnp.broadcast_to(b4_ref[...], (Bp, OP))
        for t in range(S):
            acc = acc + jnp.dot(seq_sc[t * Bp:(t + 1) * Bp, :], w4_ref[t],
                                preferred_element_type=jnp.float32)
        out_ref[...] = acc

    return kernel


def _fused_forward_call(x_flat, fp):
    S, Bp, HP, OP = fp["S"], fp["Bp"], fp["HP"], fp["OP"]
    lstm = fp["lstm"]
    n_lstm = len(lstm)

    flat_weights = []
    in_specs = [pl.BlockSpec(x_flat.shape, lambda i: (0, 0))]
    for (wih, whh, b) in lstm:
        flat_weights += [wih, whh, b]
        in_specs += [pl.BlockSpec(wih.shape, lambda i: (0, 0)),
                     pl.BlockSpec(whh.shape, lambda i: (0, 0)),
                     pl.BlockSpec(b.shape, lambda i: (0, 0))]
    in_specs += [pl.BlockSpec(fp["w4"].shape, lambda i: (0, 0, 0)),
                 pl.BlockSpec(fp["b4"].shape, lambda i: (0, 0))]

    kernel = _make_fused_kernel(n_lstm, S, Bp, HP, OP)
    return pl.pallas_call(
        kernel,
        out_shape=jax.ShapeDtypeStruct((Bp, OP), jnp.float32),
        grid_spec=pltpu.PrefetchScalarGridSpec(
            num_scalar_prefetch=0,
            grid=(1,),
            in_specs=in_specs,
            out_specs=pl.BlockSpec((Bp, OP), lambda i: (0, 0)),
            scratch_shapes=[
                pltpu.VMEM((Bp, HP), jnp.float32),           # h carry
                pltpu.VMEM((Bp, HP), jnp.float32),           # c carry
                pltpu.VMEM((S * Bp, HP), jnp.float32),       # layer output sequence
                pltpu.VMEM((S * Bp, 4 * HP), jnp.float32),   # hoisted input projection
            ],
        ),
        compiler_params=pltpu.CompilerParams(
            dimension_semantics=("arbitrary",)),
    )(x_flat, *flat_weights, fp["w4"], fp["b4"])


# ----------------------------------------------------------------------------
# Parameter initialization (deterministic, PyTorch-style uniform(-1/sqrt(H), 1/sqrt(H)))
# ----------------------------------------------------------------------------
def init_lstm_params(key, input_size, hidden, num_layers):
    params = []
    bound = 1.0 / float(hidden) ** 0.5
    in_dim = input_size
    for _ in range(num_layers):
        key, k1, k2, k3, k4 = jax.random.split(key, 5)
        w_ih = jax.random.uniform(k1, (4 * hidden, in_dim), jnp.float32, -bound, bound)
        w_hh = jax.random.uniform(k2, (4 * hidden, hidden), jnp.float32, -bound, bound)
        b_ih = jax.random.uniform(k3, (4 * hidden,), jnp.float32, -bound, bound)
        b_hh = jax.random.uniform(k4, (4 * hidden,), jnp.float32, -bound, bound)
        params.append((w_ih, w_hh, b_ih, b_hh))
        in_dim = hidden
    return key, params


def init_linear_params(key, in_dim, out_dim):
    bound = 1.0 / float(in_dim) ** 0.5
    key, k1, k2 = jax.random.split(key, 3)
    w = jax.random.uniform(k1, (out_dim, in_dim), jnp.float32, -bound, bound)
    b = jax.random.uniform(k2, (out_dim,), jnp.float32, -bound, bound)
    return key, w, b


def init_classifier_params(key, input_size, hidden_dim, num_layers, label_size, seq_length):
    key, p1 = init_lstm_params(key, input_size, hidden_dim, num_layers)
    key, p2 = init_lstm_params(key, hidden_dim, hidden_dim // 2, num_layers)
    key, p3 = init_lstm_params(key, hidden_dim // 2, hidden_dim // 4, num_layers)
    key, w4, b4 = init_linear_params(key, hidden_dim * seq_length // 4, label_size)
    # Note: l_linear1/2/3, l_lineardeter, hidden2label, linear1aa, leakrul, sof
    # in __init__ are unused by forward() and therefore omitted.
    return {"lstmcal": p1, "lstmcala": p2, "lstmcalaa": p3,
            "linear4th_w": w4, "linear4th_b": b4}


# ----------------------------------------------------------------------------
# One-time weight preparation: transpose, combine biases, gate-major lane padding.
# ----------------------------------------------------------------------------
def _pad_lstm_weights(w_ih, w_hh, b_ih, b_hh, in_pad, HP):
    four_h, d_in = w_ih.shape
    H = four_h // 4
    wih_t = jnp.transpose(w_ih)        # (d_in, 4H), gate blocks [i, f, g, o]
    whh_t = jnp.transpose(w_hh)        # (H, 4H)
    bias = b_ih + b_hh                 # (4H,)
    wih_p = jnp.zeros((in_pad, 4 * HP), jnp.float32)
    whh_p = jnp.zeros((HP, 4 * HP), jnp.float32)
    b_p = jnp.zeros((1, 4 * HP), jnp.float32)
    for g in range(4):
        wih_p = wih_p.at[:d_in, g * HP:g * HP + H].set(wih_t[:, g * H:(g + 1) * H])
        whh_p = whh_p.at[:H, g * HP:g * HP + H].set(whh_t[:, g * H:(g + 1) * H])
        b_p = b_p.at[0, g * HP:g * HP + H].set(bias[g * H:(g + 1) * H])
    return wih_p, whh_p, b_p


def _pad_linear_weights(w, b, S, H_last, HP, OP):
    O = w.shape[0]
    # y[b,o] = sum_{t,h} x[b,t,h] * W[o, t*H+h]  ->  W4[t, h, o]
    w_r = jnp.transpose(w.reshape(O, S, H_last), (1, 2, 0))   # (S, H_last, O)
    w_p = jnp.zeros((S, HP, OP), jnp.float32).at[:, :H_last, :O].set(w_r)
    b_p = jnp.zeros((1, OP), jnp.float32).at[0, :O].set(b)
    return w_p, b_p


def prepare_fused_params(params, *, input_size, hidden_dim, label_size,
                         seq_length, batch):
    # Flatten the 3 nn.LSTM stacks into one ordered list of sub-layers
    # (each sub-layer starts from zero h0/c0, matching the PyTorch forward).
    layers = []
    in_dim = input_size
    for stack_key, H in (("lstmcal", hidden_dim),
                         ("lstmcala", hidden_dim // 2),
                         ("lstmcalaa", hidden_dim // 4)):
        for lp in params[stack_key]:
            layers.append((lp, in_dim, H))
            in_dim = H
    H_last = layers[-1][2]

    HP = _round_up(max(h for (_, _, h) in layers), 128)   # per-gate lane padding
    OP = _round_up(label_size, 128)                       # lane-dense final output
    Bp = _round_up(batch, 8)                              # sublane padding

    padded = []
    for idx, ((w_ih, w_hh, b_ih, b_hh), d_in, _H) in enumerate(layers):
        in_pad = d_in if idx == 0 else HP
        padded.append(_pad_lstm_weights(w_ih, w_hh, b_ih, b_hh, in_pad, HP))
    w4p, b4p = _pad_linear_weights(params["linear4th_w"], params["linear4th_b"],
                                   seq_length, H_last, HP, OP)
    return {"lstm": padded, "w4": w4p, "b4": b4p,
            "S": seq_length, "Bp": Bp, "HP": HP, "OP": OP,
            "label_size": label_size}


# ----------------------------------------------------------------------------
# Forward pass matching LSTMClsssifier.forward
# ----------------------------------------------------------------------------
def lstm_classifier_forward(x, fp):
    """x: (batch, seq, input_size) -> (batch, label_size)"""
    B, S, D = x.shape
    Bp = fp["Bp"]
    # Pad batch to a sublane multiple, go time-major, fold time into sublanes.
    x_tm = jnp.transpose(x, (1, 0, 2))                     # (S, B, D)
    x_tm = jnp.pad(x_tm, ((0, 0), (0, Bp - B), (0, 0)))    # (S, Bp, D)
    x_flat = x_tm.reshape(S * Bp, D)
    out = _fused_forward_call(x_flat, fp)                  # (Bp, OP)
    return out[:B, :fp["label_size"]]


# ----------------------------------------------------------------------------
# Pure-JAX reference (for a loose sanity check)
# ----------------------------------------------------------------------------
def _reference_forward(x, params):
    hp = jax.lax.Precision.HIGHEST

    def lstm_layer_ref(x_tm, w_ih, w_hh, b_ih, b_hh):
        S, B, _ = x_tm.shape
        H = w_hh.shape[1]
        h = jnp.zeros((B, H), jnp.float32)
        c = jnp.zeros((B, H), jnp.float32)
        outs = []
        for t in range(S):
            g = (jnp.dot(x_tm[t], w_ih.T, precision=hp)
                 + jnp.dot(h, w_hh.T, precision=hp) + b_ih + b_hh)
            i = jax.nn.sigmoid(g[:, 0 * H:1 * H])
            f = jax.nn.sigmoid(g[:, 1 * H:2 * H])
            gg = jnp.tanh(g[:, 2 * H:3 * H])
            o = jax.nn.sigmoid(g[:, 3 * H:4 * H])
            c = f * c + i * gg
            h = o * jnp.tanh(c)
            outs.append(h)
        return jnp.stack(outs, axis=0)

    B = x.shape[0]
    h = jnp.transpose(x, (1, 0, 2))
    for stack in (params["lstmcal"], params["lstmcala"], params["lstmcalaa"]):
        for (w_ih, w_hh, b_ih, b_hh) in stack:
            h = lstm_layer_ref(h, w_ih, w_hh, b_ih, b_hh)
    y = jnp.transpose(h, (1, 0, 2)).reshape(B, -1)
    return jnp.dot(y, params["linear4th_w"].T, precision=hp) + params["linear4th_b"]


if __name__ == "__main__":
    batch = 2
    seq_length = 8
    input_size = 16
    hidden_dim = 32          # -> 16 -> 8 through the LSTM stack
    num_layers = 1
    label_size = 5

    key = jax.random.PRNGKey(0)
    key, xkey = jax.random.split(key)
    x = jax.random.normal(xkey, (batch, seq_length, input_size), dtype=jnp.float32)

    params = init_classifier_params(
        key, input_size, hidden_dim, num_layers, label_size, seq_length)
    fused = prepare_fused_params(
        params, input_size=input_size, hidden_dim=hidden_dim,
        label_size=label_size, seq_length=seq_length, batch=batch)

    out = lstm_classifier_forward(x, fused)
    out = jax.block_until_ready(out)
    assert out.shape == (batch, label_size), out.shape

    # Loose sanity check against a pure-JAX reference (catches structural bugs).
    ref = _reference_forward(x, params)
    assert jnp.allclose(out, ref, rtol=1e-2, atol=1e-2), (out, ref)

    print("KERNEL_OK")
</pallas_src>

<mosaic_0001>
module attributes {stable_mosaic.version = 11 : i64} {
  func.func @kernel(%arg0: i32, %arg1: memref<64x16xf32, #tpu.memory_space<vmem>>, %arg2: memref<16x512xf32, #tpu.memory_space<vmem>>, %arg3: memref<128x512xf32, #tpu.memory_space<vmem>>, %arg4: memref<1x512xf32, #tpu.memory_space<vmem>>, %arg5: memref<128x512xf32, #tpu.memory_space<vmem>>, %arg6: memref<128x512xf32, #tpu.memory_space<vmem>>, %arg7: memref<1x512xf32, #tpu.memory_space<vmem>>, %arg8: memref<128x512xf32, #tpu.memory_space<vmem>>, %arg9: memref<128x512xf32, #tpu.memory_space<vmem>>, %arg10: memref<1x512xf32, #tpu.memory_space<vmem>>, %arg11: memref<8x128x128xf32, #tpu.memory_space<vmem>>, %arg12: memref<1x128xf32, #tpu.memory_space<vmem>>, %arg13: memref<8x128xf32, #tpu.memory_space<vmem>>, %arg14: memref<8x128xf32, #tpu.memory_space<vmem>>, %arg15: memref<8x128xf32, #tpu.memory_space<vmem>>, %arg16: memref<64x128xf32, #tpu.memory_space<vmem>>, %arg17: memref<64x512xf32, #tpu.memory_space<vmem>>) attributes {dimension_semantics = [#tpu.dimension_semantics<arbitrary>], iteration_bounds = array<i64: 1>, scalar_prefetch = 0 : i64, scratch_operands = 4 : i64, tpu.core_type = #tpu.core_type<tc>, window_params = [{pipeline_mode = #tpu.pipeline_mode<synchronous>, transform_indices = @transform_0, window_bounds = array<i64: 64, 16>}, {pipeline_mode = #tpu.pipeline_mode<synchronous>, transform_indices = @transform_1, window_bounds = array<i64: 16, 512>}, {pipeline_mode = #tpu.pipeline_mode<synchronous>, transform_indices = @transform_2, window_bounds = array<i64: 128, 512>}, {pipeline_mode = #tpu.pipeline_mode<synchronous>, transform_indices = @transform_3, window_bounds = array<i64: 1, 512>}, {pipeline_mode = #tpu.pipeline_mode<synchronous>, transform_indices = @transform_4, window_bounds = array<i64: 128, 512>}, {pipeline_mode = #tpu.pipeline_mode<synchronous>, transform_indices = @transform_5, window_bounds = array<i64: 128, 512>}, {pipeline_mode = #tpu.pipeline_mode<synchronous>, transform_indices = @transform_6, window_bounds = array<i64: 1, 512>}, {pipeline_mode = #tpu.pipeline_mode<synchronous>, transform_indices = @transform_7, window_bounds = array<i64: 128, 512>}, {pipeline_mode = #tpu.pipeline_mode<synchronous>, transform_indices = @transform_8, window_bounds = array<i64: 128, 512>}, {pipeline_mode = #tpu.pipeline_mode<synchronous>, transform_indices = @transform_9, window_bounds = array<i64: 1, 512>}, {pipeline_mode = #tpu.pipeline_mode<synchronous>, transform_indices = @transform_10, window_bounds = array<i64: 8, 128, 128>}, {pipeline_mode = #tpu.pipeline_mode<synchronous>, transform_indices = @transform_11, window_bounds = array<i64: 1, 128>}, {pipeline_mode = #tpu.pipeline_mode<synchronous>, transform_indices = @transform_12, window_bounds = array<i64: 8, 128>}]} {
    %c0 = arith.constant 0 : index
    %c0_0 = arith.constant 0 : index
    %0 = vector.load %arg1[%c0, %c0_0] : memref<64x16xf32, #tpu.memory_space<vmem>>, vector<64x16xf32>
    %c0_1 = arith.constant 0 : index
    %c0_2 = arith.constant 0 : index
    %1 = vector.load %arg2[%c0_1, %c0_2] : memref<16x512xf32, #tpu.memory_space<vmem>>, vector<16x512xf32>
    %cst = arith.constant dense<0.000000e+00> : vector<64x512xf32>
    %2 = tpu.matmul %0, %1, %cst {dimension_numbers = #tpu.dot_dimension_numbers<[1], [0], [0], [1], [0, 0, 1, 1], [], []>} : vector<64x16xf32>, vector<16x512xf32>, vector<64x512xf32> -> vector<64x512xf32>
    %c0_3 = arith.constant 0 : index
    %c0_4 = arith.constant 0 : index
    %3 = vector.load %arg4[%c0_3, %c0_4] : memref<1x512xf32, #tpu.memory_space<vmem>>, vector<1x512xf32>
    %4 = vector.broadcast %3 : vector<1x512xf32> to vector<64x512xf32>
    %5 = arith.addf %2, %4 : vector<64x512xf32>
    %c0_5 = arith.constant 0 : index
    %c0_6 = arith.constant 0 : index
    %6 = vector.load %arg17[%c0_5, %c0_6] : memref<64x512xf32, #tpu.memory_space<vmem>>, vector<64x512xf32>
    tpu.vector_store %arg17[%c0_5, %c0_6], %5 {strides = array<i32>} : memref<64x512xf32, #tpu.memory_space<vmem>>, vector<64x512xf32>,
    %cst_7 = arith.constant 0.000000e+00 : f32
    %7 = vector.broadcast %cst_7 : f32 to vector<8x128xf32>
    %c0_8 = arith.constant 0 : index
    %c0_9 = arith.constant 0 : index
    %8 = vector.load %arg14[%c0_8, %c0_9] : memref<8x128xf32, #tpu.memory_space<vmem>>, vector<8x128xf32>
    tpu.vector_store %arg14[%c0_8, %c0_9], %7 {strides = array<i32>} : memref<8x128xf32, #tpu.memory_space<vmem>>, vector<8x128xf32>,
    %cst_10 = arith.constant 0.000000e+00 : f32
    %9 = vector.broadcast %cst_10 : f32 to vector<8x128xf32>
    %c0_11 = arith.constant 0 : index
    %c0_12 = arith.constant 0 : index
    %10 = vector.load %arg15[%c0_11, %c0_12] : memref<8x128xf32, #tpu.memory_space<vmem>>, vector<8x128xf32>
    tpu.vector_store %arg15[%c0_11, %c0_12], %9 {strides = array<i32>} : memref<8x128xf32, #tpu.memory_space<vmem>>, vector<8x128xf32>,
    %c0_13 = arith.constant 0 : index
    %c0_14 = arith.constant 0 : index
    %11 = vector.load %arg17[%c0_13, %c0_14] : memref<64x512xf32, #tpu.memory_space<vmem>>, vector<8x512xf32>
    %c0_15 = arith.constant 0 : index
    %c0_16 = arith.constant 0 : index
    %12 = vector.load %arg14[%c0_15, %c0_16] : memref<8x128xf32, #tpu.memory_space<vmem>>, vector<8x128xf32>
    %c0_17 = arith.constant 0 : index
    %c0_18 = arith.constant 0 : index
    %13 = vector.load %arg3[%c0_17, %c0_18] : memref<128x512xf32, #tpu.memory_space<vmem>>, vector<128x512xf32>
    %cst_19 = arith.constant dense<0.000000e+00> : vector<8x512xf32>
    %14 = tpu.matmul %12, %13, %cst_19 {dimension_numbers = #tpu.dot_dimension_numbers<[1], [0], [0], [1], [0, 0, 1, 1], [], []>} : vector<8x128xf32>, vector<128x512xf32>, vector<8x512xf32> -> vector<8x512xf32>
    %15 = arith.addf %11, %14 : vector<8x512xf32>
    %16 = vector.extract_strided_slice %15 {offsets = [0, 0], sizes = [8, 128], strides = [1, 1]} : vector<8x512xf32> to vector<8x128xf32>
    %17 = arith.negf %16 : vector<8x128xf32>
    %18 = math.exp %17 : vector<8x128xf32>
    %cst_20 = arith.constant 1.000000e+00 : f32
    %19 = vector.broadcast %cst_20 : f32 to vector<8x128xf32>
    %20 = arith.addf %19, %18 : vector<8x128xf32>
    %21 = arith.divf %19, %20 : vector<8x128xf32>
    %22 = vector.extract_strided_slice %15 {offsets = [0, 128], sizes = [8, 128], strides = [1, 1]} : vector<8x512xf32> to vector<8x128xf32>
    %23 = arith.negf %22 : vector<8x128xf32>
    %24 = math.exp %23 : vector<8x128xf32>
    %cst_21 = arith.constant 1.000000e+00 : f32
    %25 = vector.broadcast %cst_21 : f32 to vector<8x128xf32>
    %26 = arith.addf %25, %24 : vector<8x128xf32>
    %27 = arith.divf %25, %26 : vector<8x128xf32>
    %28 = vector.extract_strided_slice %15 {offsets = [0, 256], sizes = [8, 128], strides = [1, 1]} : vector<8x512xf32> to vector<8x128xf32>
    %29 = math.tanh %28 : vector<8x128xf32>
    %30 = vector.extract_strided_slice %15 {offsets = [0, 384], sizes = [8, 128], strides = [1, 1]} : vector<8x512xf32> to vector<8x128xf32>
    %31 = arith.negf %30 : vector<8x128xf32>
    %32 = math.exp %31 : vector<8x128xf32>
    %cst_22 = arith.constant 1.000000e+00 : f32
    %33 = vector.broadcast %cst_22 : f32 to vector<8x128xf32>
    %34 = arith.addf %33, %32 : vector<8x128xf32>
    %35 = arith.divf %33, %34 : vector<8x128xf32>
    %c0_23 = arith.constant 0 : index
    %c0_24 = arith.constant 0 : index
    %36 = vector.load %arg15[%c0_23, %c0_24] : memref<8x128xf32, #tpu.memory_space<vmem>>, vector<8x128xf32>
    %37 = arith.mulf %27, %36 : vector<8x128xf32>
    %38 = arith.mulf %21, %29 : vector<8x128xf32>
    %39 = arith.addf %37, %38 : vector<8x128xf32>
    %40 = math.tanh %39 : vector<8x128xf32>
    %41 = arith.mulf %35, %40 : vector<8x128xf32>
    %c0_25 = arith.constant 0 : index
    %c0_26 = arith.constant 0 : index
    %42 = vector.load %arg15[%c0_25, %c0_26] : memref<8x128xf32, #tpu.memory_space<vmem>>, vector<8x128xf32>
    tpu.vector_store %arg15[%c0_25, %c0_26], %39 {strides = array<i32>} : memref<8x128xf32, #tpu.memory_space<vmem>>, vector<8x128xf32>,
    %c0_27 = arith.constant 0 : index
    %c0_28 = arith.constant 0 : index
    %43 = vector.load %arg14[%c0_27, %c0_28] : memref<8x128xf32, #tpu.memory_space<vmem>>, vector<8x128xf32>
    tpu.vector_store %arg14[%c0_27, %c0_28], %41 {strides = array<i32>} : memref<8x128xf32, #tpu.memory_space<vmem>>, vector<8x128xf32>,
    %c0_29 = arith.constant 0 : index
    %c0_30 = arith.constant 0 : index
    %44 = vector.load %arg16[%c0_29, %c0_30] : memref<64x128xf32, #tpu.memory_space<vmem>>, vector<8x128xf32>
    tpu.vector_store %arg16[%c0_29, %c0_30], %41 {strides = array<i32>} : memref<64x128xf32, #tpu.memory_space<vmem>>, vector<8x128xf32>,
    %c8 = arith.constant 8 : index
    %c0_31 = arith.constant 0 : index
    %45 = vector.load %arg17[%c8, %c0_31] : memref<64x512xf32, #tpu.memory_space<vmem>>, vector<8x512xf32>
    %c0_32 = arith.constant 0 : index
    %c0_33 = arith.constant 0 : index
    %46 = vector.load %arg14[%c0_32, %c0_33] : memref<8x128xf32, #tpu.memory_space<vmem>>, vector<8x128xf32>
    %c0_34 = arith.constant 0 : index
    %c0_35 = arith.constant 0 : index
    %47 = vector.load %arg3[%c0_34, %c0_35] : memref<128x512xf32, #tpu.memory_space<vmem>>, vector<128x512xf32>
    %cst_36 = arith.constant dense<0.000000e+00> : vector<8x512xf32>
    %48 = tpu.matmul %46, %47, %cst_36 {dimension_numbers = #tpu.dot_dimension_numbers<[1], [0], [0], [1], [0, 0, 1, 1], [], []>} : vector<8x128xf32>, vector<128x512xf32>, vector<8x512xf32> -> vector<8x512xf32>
    %49 = arith.addf %45, %48 : vector<8x512xf32>
    %50 = vector.extract_strided_slice %49 {offsets = [0, 0], sizes = [8, 128], strides = [1, 1]} : vector<8x512xf32> to vector<8x128xf32>
    %51 = arith.negf %50 : vector<8x128xf32>
    %52 = math.exp %51 : vector<8x128xf32>
    %cst_37 = arith.constant 1.000000e+00 : f32
    %53 = vector.broadcast %cst_37 : f32 to vector<8x128xf32>
    %54 = arith.addf %53, %52 : vector<8x128xf32>
    %55 = arith.divf %53, %54 : vector<8x128xf32>
    %56 = vector.extract_strided_slice %49 {offsets = [0, 128], sizes = [8, 128], strides = [1, 1]} : vector<8x512xf32> to vector<8x128xf32>
    %57 = arith.negf %56 : vector<8x128xf32>
    %58 = math.exp %57 : vector<8x128xf32>
    %cst_38 = arith.constant 1.000000e+00 : f32
    %59 = vector.broadcast %cst_38 : f32 to vector<8x128xf32>
    %60 = arith.addf %59, %58 : vector<8x128xf32>
    %61 = arith.divf %59, %60 : vector<8x128xf32>
    %62 = vector.extract_strided_slice %49 {offsets = [0, 256], sizes = [8, 128], strides = [1, 1]} : vector<8x512xf32> to vector<8x128xf32>
    %63 = math.tanh %62 : vector<8x128xf32>
    %64 = vector.extract_strided_slice %49 {offsets = [0, 384], sizes = [8, 128], strides = [1, 1]} : vector<8x512xf32> to vector<8x128xf32>
    %65 = arith.negf %64 : vector<8x128xf32>
    %66 = math.exp %65 : vector<8x128xf32>
    %cst_39 = arith.constant 1.000000e+00 : f32
    %67 = vector.broadcast %cst_39 : f32 to vector<8x128xf32>
    %68 = arith.addf %67, %66 : vector<8x128xf32>
    %69 = arith.divf %67, %68 : vector<8x128xf32>
    %c0_40 = arith.constant 0 : index
    %c0_41 = arith.constant 0 : index
    %70 = vector.load %arg15[%c0_40, %c0_41] : memref<8x128xf32, #tpu.memory_space<vmem>>, vector<8x128xf32>
    %71 = arith.mulf %61, %70 : vector<8x128xf32>
    %72 = arith.mulf %55, %63 : vector<8x128xf32>
    %73 = arith.addf %71, %72 : vector<8x128xf32>
    %74 = math.tanh %73 : vector<8x128xf32>
    %75 = arith.mulf %69, %74 : vector<8x128xf32>
    %c0_42 = arith.constant 0 : index
    %c0_43 = arith.constant 0 : index
    %76 = vector.load %arg15[%c0_42, %c0_43] : memref<8x128xf32, #tpu.memory_space<vmem>>, vector<8x128xf32>
    tpu.vector_store %arg15[%c0_42, %c0_43], %73 {strides = array<i32>} : memref<8x128xf32, #tpu.memory_space<vmem>>, vector<8x128xf32>,
    %c0_44 = arith.constant 0 : index
    %c0_45 = arith.constant 0 : index
    %77 = vector.load %arg14[%c0_44, %c0_45] : memref<8x128xf32, #tpu.memory_space<vmem>>, vector<8x128xf32>
    tpu.vector_store %arg14[%c0_44, %c0_45], %75 {strides = array<i32>} : memref<8x128xf32, #tpu.memory_space<vmem>>, vector<8x128xf32>,
    %c8_46 = arith.constant 8 : index
    %c0_47 = arith.constant 0 : index
    %78 = vector.load %arg16[%c8_46, %c0_47] : memref<64x128xf32, #tpu.memory_space<vmem>>, vector<8x128xf32>
    tpu.vector_store %arg16[%c8_46, %c0_47], %75 {strides = array<i32>} : memref<64x128xf32, #tpu.memory_space<vmem>>, vector<8x128xf32>,
    %c16 = arith.constant 16 : index
    %c0_48 = arith.constant 0 : index
    %79 = vector.load %arg17[%c16, %c0_48] : memref<64x512xf32, #tpu.memory_space<vmem>>, vector<8x512xf32>
    %c0_49 = arith.constant 0 : index
    %c0_50 = arith.constant 0 : index
    %80 = vector.load %arg14[%c0_49, %c0_50] : memref<8x128xf32, #tpu.memory_space<vmem>>, vector<8x128xf32>
    %c0_51 = arith.constant 0 : index
    %c0_52 = arith.constant 0 : index
    %81 = vector.load %arg3[%c0_51, %c0_52] : memref<128x512xf32, #tpu.memory_space<vmem>>, vector<128x512xf32>
    %cst_53 = arith.constant dense<0.000000e+00> : vector<8x512xf32>
    %82 = tpu.matmul %80, %81, %cst_53 {dimension_numbers = #tpu.dot_dimension_numbers<[1], [0], [0], [1], [0, 0, 1, 1], [], []>} : vector<8x128xf32>, vector<128x512xf32>, vector<8x512xf32> -> vector<8x512xf32>
    %83 = arith.addf %79, %82 : vector<8x512xf32>
    %84 = vector.extract_strided_slice %83 {offsets = [0, 0], sizes = [8, 128], strides = [1, 1]} : vector<8x512xf32> to vector<8x128xf32>
    %85 = arith.negf %84 : vector<8x128xf32>
    %86 = math.exp %85 : vector<8x128xf32>
    %cst_54 = arith.constant 1.000000e+00 : f32
    %87 = vector.broadcast %cst_54 : f32 to vector<8x128xf32>
    %88 = arith.addf %87, %86 : vector<8x128xf32>
    %89 = arith.divf %87, %88 : vector<8x128xf32>
    %90 = vector.extract_strided_slice %83 {offsets = [0, 128], sizes = [8, 128], strides = [1, 1]} : vector<8x512xf32> to vector<8x128xf32>
    %91 = arith.negf %90 : vector<8x128xf32>
    %92 = math.exp %91 : vector<8x128xf32>
    %cst_55 = arith.constant 1.000000e+00 : f32
    %93 = vector.broadcast %cst_55 : f32 to vector<8x128xf32>
    %94 = arith.addf %93, %92 : vector<8x128xf32>
    %95 = arith.divf %93, %94 : vector<8x128xf32>
    %96 = vector.extract_strided_slice %83 {offsets = [0, 256], sizes = [8, 128], strides = [1, 1]} : vector<8x512xf32> to vector<8x128xf32>
    %97 = math.tanh %96 : vector<8x128xf32>
    %98 = vector.extract_strided_slice %83 {offsets = [0, 384], sizes = [8, 128], strides = [1, 1]} : vector<8x512xf32> to vector<8x128xf32>
    %99 = arith.negf %98 : vector<8x128xf32>
    %100 = math.exp %99 : vector<8x128xf32>
    %cst_56 = arith.constant 1.000000e+00 : f32
    %101 = vector.broadcast %cst_56 : f32 to vector<8x128xf32>
    %102 = arith.addf %101, %100 : vector<8x128xf32>
    %103 = arith.divf %101, %102 : vector<8x128xf32>
    %c0_57 = arith.constant 0 : index
    %c0_58 = arith.constant 0 : index
    %104 = vector.load %arg15[%c0_57, %c0_58] : memref<8x128xf32, #tpu.memory_space<vmem>>, vector<8x128xf32>
    %105 = arith.mulf %95, %104 : vector<8x128xf32>
    %106 = arith.mulf %89, %97 : vector<8x128xf32>
    %107 = arith.addf %105, %106 : vector<8x128xf32>
    %108 = math.tanh %107 : vector<8x128xf32>
    %109 = arith.mulf %103, %108 : vector<8x128xf32>
    %c0_59 = arith.constant 0 : index
    %c0_60 = arith.constant 0 : index
    %110 = vector.load %arg15[%c0_59, %c0_60] : memref<8x128xf32, #tpu.memory_space<vmem>>, vector<8x128xf32>
    tpu.vector_store %arg15[%c0_59, %c0_60], %107 {strides = array<i32>} : memref<8x128xf32, #tpu.memory_space<vmem>>, vector<8x128xf32>,
    %c0_61 = arith.constant 0 : index
    %c0_62 = arith.constant 0 : index
    %111 = vector.load %arg14[%c0_61, %c0_62] : memref<8x128xf32, #tpu.memory_space<vmem>>, vector<8x128xf32>
    tpu.vector_store %arg14[%c0_61, %c0_62], %109 {strides = array<i32>} : memref<8x128xf32, #tpu.memory_space<vmem>>, vector<8x128xf32>,
    %c16_63 = arith.constant 16 : index
    %c0_64 = arith.constant 0 : index
    %112 = vector.load %arg16[%c16_63, %c0_64] : memref<64x128xf32, #tpu.memory_space<vmem>>, vector<8x128xf32>
    tpu.vector_store %arg16[%c16_63, %c0_64], %109 {strides = array<i32>} : memref<64x128xf32, #tpu.memory_space<vmem>>, vector<8x128xf32>,
    %c24 = arith.constant 24 : index
    %c0_65 = arith.constant 0 : index
    %113 = vector.load %arg17[%c24, %c0_65] : memref<64x512xf32, #tpu.memory_space<vmem>>, vector<8x512xf32>
    %c0_66 = arith.constant 0 : index
    %c0_67 = arith.constant 0 : index
    %114 = vector.load %arg14[%c0_66, %c0_67] : memref<8x128xf32, #tpu.memory_space<vmem>>, vector<8x128xf32>
    %c0_68 = arith.constant 0 : index
    %c0_69 = arith.constant 0 : index
    %115 = vector.load %arg3[%c0_68, %c0_69] : memref<128x512xf32, #tpu.memory_space<vmem>>, vector<128x512xf32>
    %cst_70 = arith.constant dense<0.000000e+00> : vector<8x512xf32>
    %116 = tpu.matmul %114, %115, %cst_70 {dimension_numbers = #tpu.dot_dimension_numbers<[1], [0], [0], [1], [0, 0, 1, 1], [], []>} : vector<8x128xf32>, vector<128x512xf32>, vector<8x512xf32> -> vector<8x512xf32>
    %117 = arith.addf %113, %116 : vector<8x512xf32>
    %118 = vector.extract_strided_slice %117 {offsets = [0, 0], sizes = [8, 128], strides = [1, 1]} : vector<8x512xf32> to vector<8x128xf32>
    %119 = arith.negf %118 : vector<8x128xf32>
    %120 = math.exp %119 : vector<8x128xf32>
    %cst_71 = arith.constant 1.000000e+00 : f32
    %121 = vector.broadcast %cst_71 : f32 to vector<8x128xf32>
    %122 = arith.addf %121, %120 : vector<8x128xf32>
    %123 = arith.divf %121, %122 : vector<8x128xf32>
    %124 = vector.extract_strided_slice %117 {offsets = [0, 128], sizes = [8, 128], strides = [1, 1]} : vector<8x512xf32> to vector<8x128xf32>
    %125 = arith.negf %124 : vector<8x128xf32>
    %126 = math.exp %125 : vector<8x128xf32>
    %cst_72 = arith.constant 1.000000e+00 : f32
    %127 = vector.broadcast %cst_72 : f32 to vector<8x128xf32>
    %128 = arith.addf %127, %126 : vector<8x128xf32>
    %129 = arith.divf %127, %128 : vector<8x128xf32>
    %130 = vector.extract_strided_slice %117 {offsets = [0, 256], sizes = [8, 128], strides = [1, 1]} : vector<8x512xf32> to vector<8x128xf32>
    %131 = math.tanh %130 : vector<8x128xf32>
    %132 = vector.extract_strided_slice %117 {offsets = [0, 384], sizes = [8, 128], strides = [1, 1]} : vector<8x512xf32> to vector<8x128xf32>
    %133 = arith.negf %132 : vector<8x128xf32>
    %134 = math.exp %133 : vector<8x128xf32>
    %cst_73 = arith.constant 1.000000e+00 : f32
    %135 = vector.broadcast %cst_73 : f32 to vector<8x128xf32>
    %136 = arith.addf %135, %134 : vector<8x128xf32>
    %137 = arith.divf %135, %136 : vector<8x128xf32>
    %c0_74 = arith.constant 0 : index
    %c0_75 = arith.constant 0 : index
    %138 = vector.load %arg15[%c0_74, %c0_75] : memref<8x128xf32, #tpu.memory_space<vmem>>, vector<8x128xf32>
    %139 = arith.mulf %129, %138 : vector<8x128xf32>
    %140 = arith.mulf %123, %131 : vector<8x128xf32>
    %141 = arith.addf %139, %140 : vector<8x128xf32>
    %142 = math.tanh %141 : vector<8x128xf32>
    %143 = arith.mulf %137, %142 : vector<8x128xf32>
    %c0_76 = arith.constant 0 : index
    %c0_77 = arith.constant 0 : index
    %144 = vector.load %arg15[%c0_76, %c0_77] : memref<8x128xf32, #tpu.memory_space<vmem>>, vector<8x128xf32>
    tpu.vector_store %arg15[%c0_76, %c0_77], %141 {strides = array<i32>} : memref<8x128xf32, #tpu.memory_space<vmem>>, vector<8x128xf32>,
    %c0_78 = arith.constant 0 : index
    %c0_79 = arith.constant 0 : index
    %145 = vector.load %arg14[%c0_78, %c0_79] : memref<8x128xf32, #tpu.memory_space<vmem>>, vector<8x128xf32>
    tpu.vector_store %arg14[%c0_78, %c0_79], %143 {strides = array<i32>} : memref<8x128xf32, #tpu.memory_space<vmem>>, vector<8x128xf32>,
    %c24_80 = arith.constant 24 : index
    %c0_81 = arith.constant 0 : index
    %146 = vector.load %arg16[%c24_80, %c0_81] : memref<64x128xf32, #tpu.memory_space<vmem>>, vector<8x128xf32>
    tpu.vector_store %arg16[%c24_80, %c0_81], %143 {strides = array<i32>} : memref<64x128xf32, #tpu.memory_space<vmem>>, vector<8x128xf32>,
    %c32 = arith.constant 32 : index
    %c0_82 = arith.constant 0 : index
    %147 = vector.load %arg17[%c32, %c0_82] : memref<64x512xf32, #tpu.memory_space<vmem>>, vector<8x512xf32>
    %c0_83 = arith.constant 0 : index
    %c0_84 = arith.constant 0 : index
    %148 = vector.load %arg14[%c0_83, %c0_84] : memref<8x128xf32, #tpu.memory_space<vmem>>, vector<8x128xf32>
    %c0_85 = arith.constant 0 : index
    %c0_86 = arith.constant 0 : index
    %149 = vector.load %arg3[%c0_85, %c0_86] : memref<128x512xf32, #tpu.memory_space<vmem>>, vector<128x512xf32>
    %cst_87 = arith.constant dense<0.000000e+00> : vector<8x512xf32>
    %150 = tpu.matmul %148, %149, %cst_87 {dimension_numbers = #tpu.dot_dimension_numbers<[1], [0], [0], [1], [0, 0, 1, 1], [], []>} : vector<8x128xf32>, vector<128x512xf32>, vector<8x512xf32> -> vector<8x512xf32>
    %151 = arith.addf %147, %150 : vector<8x512xf32>
    %152 = vector.extract_strided_slice %151 {offsets = [0, 0], sizes = [8, 128], strides = [1, 1]} : vector<8x512xf32> to vector<8x128xf32>
    %153 = arith.negf %152 : vector<8x128xf32>
    %154 = math.exp %153 : vector<8x128xf32>
    %cst_88 = arith.constant 1.000000e+00 : f32
    %155 = vector.broadcast %cst_88 : f32 to vector<8x128xf32>
    %156 = arith.addf %155, %154 : vector<8x128xf32>
    %157 = arith.divf %155, %156 : vector<8x128xf32>
    %158 = vector.extract_strided_slice %151 {offsets = [0, 128], sizes = [8, 128], strides = [1, 1]} : vector<8x512xf32> to vector<8x128xf32>
    %159 = arith.negf %158 : vector<8x128xf32>
    %160 = math.exp %159 : vector<8x128xf32>
    %cst_89 = arith.constant 1.000000e+00 : f32
    %161 = vector.broadcast %cst_89 : f32 to vector<8x128xf32>
    %162 = arith.addf %161, %160 : vector<8x128xf32>
    %163 = arith.divf %161, %162 : vector<8x128xf32>
    %164 = vector.extract_strided_slice %151 {offsets = [0, 256], sizes = [8, 128], strides = [1, 1]} : vector<8x512xf32> to vector<8x128xf32>
    %165 = math.tanh %164 : vector<8x128xf32>
    %166 = vector.extract_strided_slice %151 {offsets = [0, 384], sizes = [8, 128], strides = [1, 1]} : vector<8x512xf32> to vector<8x128xf32>
    %167 = arith.negf %166 : vector<8x128xf32>
    %168 = math.exp %167 : vector<8x128xf32>
    %cst_90 = arith.constant 1.000000e+00 : f32
    %169 = vector.broadcast %cst_90 : f32 to vector<8x128xf32>
    %170 = arith.addf %169, %168 : vector<8x128xf32>
    %171 = arith.divf %169, %170 : vector<8x128xf32>
    %c0_91 = arith.constant 0 : index
    %c0_92 = arith.constant 0 : index
    %172 = vector.load %arg15[%c0_91, %c0_92] : memref<8x128xf32, #tpu.memory_space<vmem>>, vector<8x128xf32>
    %173 = arith.mulf %163, %172 : vector<8x128xf32>
    %174 = arith.mulf %157, %165 : vector<8x128xf32>
    %175 = arith.addf %173, %174 : vector<8x128xf32>
    %176 = math.tanh %175 : vector<8x128xf32>
    %177 = arith.mulf %171, %176 : vector<8x128xf32>
    %c0_93 = arith.constant 0 : index
    %c0_94 = arith.constant 0 : index
    %178 = vector.load %arg15[%c0_93, %c0_94] : memref<8x128xf32, #tpu.memory_space<vmem>>, vector<8x128xf32>
    tpu.vector_store %arg15[%c0_93, %c0_94], %175 {strides = array<i32>} : memref<8x128xf32, #tpu.memory_space<vmem>>, vector<8x128xf32>,
    %c0_95 = arith.constant 0 : index
    %c0_96 = arith.constant 0 : index
    %179 = vector.load %arg14[%c0_95, %c0_96] : memref<8x128xf32, #tpu.memory_space<vmem>>, vector<8x128xf32>
    tpu.vector_store %arg14[%c0_95, %c0_96], %177 {strides = array<i32>} : memref<8x128xf32, #tpu.memory_space<vmem>>, vector<8x128xf32>,
    %c32_97 = arith.constant 32 : index
    %c0_98 = arith.constant 0 : index
    %180 = vector.load %arg16[%c32_97, %c0_98] : memref<64x128xf32, #tpu.memory_space<vmem>>, vector<8x128xf32>
    tpu.vector_store %arg16[%c32_97, %c0_98], %177 {strides = array<i32>} : memref<64x128xf32, #tpu.memory_space<vmem>>, vector<8x128xf32>,
    %c40 = arith.constant 40 : index
    %c0_99 = arith.constant 0 : index
    %181 = vector.load %arg17[%c40, %c0_99] : memref<64x512xf32, #tpu.memory_space<vmem>>, vector<8x512xf32>
    %c0_100 = arith.constant 0 : index
    %c0_101 = arith.constant 0 : index
    %182 = vector.load %arg14[%c0_100, %c0_101] : memref<8x128xf32, #tpu.memory_space<vmem>>, vector<8x128xf32>
    %c0_102 = arith.constant 0 : index
    %c0_103 = arith.constant 0 : index
    %183 = vector.load %arg3[%c0_102, %c0_103] : memref<128x512xf32, #tpu.memory_space<vmem>>, vector<128x512xf32>
    %cst_104 = arith.constant dense<0.000000e+00> : vector<8x512xf32>
    %184 = tpu.matmul %182, %183, %cst_104 {dimension_numbers = #tpu.dot_dimension_numbers<[1], [0], [0], [1], [0, 0, 1, 1], [], []>} : vector<8x128xf32>, vector<128x512xf32>, vector<8x512xf32> -> vector<8x512xf32>
    %185 = arith.addf %181, %184 : vector<8x512xf32>
    %186 = vector.extract_strided_slice %185 {offsets = [0, 0], sizes = [8, 128], strides = [1, 1]} : vector<8x512xf32> to vector<8x128xf32>
    %187 = arith.negf %186 : vector<8x128xf32>
    %188 = math.exp %187 : vector<8x128xf32>
    %cst_105 = arith.constant 1.000000e+00 : f32
    %189 = vector.broadcast %cst_105 : f32 to vector<8x128xf32>
    %190 = arith.addf %189, %188 : vector<8x128xf32>
    %191 = arith.divf %189, %190 : vector<8x128xf32>
    %192 = vector.extract_strided_slice %185 {offsets = [0, 128], sizes = [8, 128], strides = [1, 1]} : vector<8x512xf32> to vector<8x128xf32>
    %193 = arith.negf %192 : vector<8x128xf32>
    %194 = math.exp %193 : vector<8x128xf32>
    %cst_106 = arith.constant 1.000000e+00 : f32
    %195 = vector.broadcast %cst_106 : f32 to vector<8x128xf32>
    %196 = arith.addf %195, %194 : vector<8x128xf32>
    %197 = arith.divf %195, %196 : vector<8x128xf32>
    %198 = vector.extract_strided_slice %185 {offsets = [0, 256], sizes = [8, 128], strides = [1, 1]} : vector<8x512xf32> to vector<8x128xf32>
    %199 = math.tanh %198 : vector<8x128xf32>
    %200 = vector.extract_strided_slice %185 {offsets = [0, 384], sizes = [8, 128], strides = [1, 1]} : vector<8x512xf32> to vector<8x128xf32>
    %201 = arith.negf %200 : vector<8x128xf32>
    %202 = math.exp %201 : vector<8x128xf32>
    %cst_107 = arith.constant 1.000000e+00 : f32
    %203 = vector.broadcast %cst_107 : f32 to vector<8x128xf32>
    %204 = arith.addf %203, %202 : vector<8x128xf32>
    %205 = arith.divf %203, %204 : vector<8x128xf32>
    %c0_108 = arith.constant 0 : index
    %c0_109 = arith.constant 0 : index
    %206 = vector.load %arg15[%c0_108, %c0_109] : memref<8x128xf32, #tpu.memory_space<vmem>>, vector<8x128xf32>
    %207 = arith.mulf %197, %206 : vector<8x128xf32>
    %208 = arith.mulf %191, %199 : vector<8x128xf32>
    %209 = arith.addf %207, %208 : vector<8x128xf32>
    %210 = math.tanh %209 : vector<8x128xf32>
    %211 = arith.mulf %205, %210 : vector<8x128xf32>
    %c0_110 = arith.constant 0 : index
    %c0_111 = arith.constant 0 : index
    %212 = vector.load %arg15[%c0_110, %c0_111] : memref<8x128xf32, #tpu.memory_space<vmem>>, vector<8x128xf32>
    tpu.vector_store %arg15[%c0_110, %c0_111], %209 {strides = array<i32>} : memref<8x128xf32, #tpu.memory_space<vmem>>, vector<8x128xf32>,
    %c0_112 = arith.constant 0 : index
    %c0_113 = arith.constant 0 : index
    %213 = vector.load %arg14[%c0_112, %c0_113] : memref<8x128xf32, #tpu.memory_space<vmem>>, vector<8x128xf32>
    tpu.vector_store %arg14[%c0_112, %c0_113], %211 {strides = array<i32>} : memref<8x128xf32, #tpu.memory_space<vmem>>, vector<8x128xf32>,
    %c40_114 = arith.constant 40 : index
    %c0_115 = arith.constant 0 : index
    %214 = vector.load %arg16[%c40_114, %c0_115] : memref<64x128xf32, #tpu.memory_space<vmem>>, vector<8x128xf32>
    tpu.vector_store %arg16[%c40_114, %c0_115], %211 {strides = array<i32>} : memref<64x128xf32, #tpu.memory_space<vmem>>, vector<8x128xf32>,
    %c48 = arith.constant 48 : index
    %c0_116 = arith.constant 0 : index
    %215 = vector.load %arg17[%c48, %c0_116] : memref<64x512xf32, #tpu.memory_space<vmem>>, vector<8x512xf32>
    %c0_117 = arith.constant 0 : index
    %c0_118 = arith.constant 0 : index
    %216 = vector.load %arg14[%c0_117, %c0_118] : memref<8x128xf32, #tpu.memory_space<vmem>>, vector<8x128xf32>
    %c0_119 = arith.constant 0 : index
    %c0_120 = arith.constant 0 : index
    %217 = vector.load %arg3[%c0_119, %c0_120] : memref<128x512xf32, #tpu.memory_space<vmem>>, vector<128x512xf32>
    %cst_121 = arith.constant dense<0.000000e+00> : vector<8x512xf32>
    %218 = tpu.matmul %216, %217, %cst_121 {dimension_numbers = #tpu.dot_dimension_numbers<[1], [0], [0], [1], [0, 0, 1, 1], [], []>} : vector<8x128xf32>, vector<128x512xf32>, vector<8x512xf32> -> vector<8x512xf32>
    %219 = arith.addf %215, %218 : vector<8x512xf32>
    %220 = vector.extract_strided_slice %219 {offsets = [0, 0], sizes = [8, 128], strides = [1, 1]} : vector<8x512xf32> to vector<8x128xf32>
    %221 = arith.negf %220 : vector<8x128xf32>
    %222 = math.exp %221 : vector<8x128xf32>
    %cst_122 = arith.constant 1.000000e+00 : f32
    %223 = vector.broadcast %cst_122 : f32 to vector<8x128xf32>
    %224 = arith.addf %223, %222 : vector<8x128xf32>
    %225 = arith.divf %223, %224 : vector<8x128xf32>
    %226 = vector.extract_strided_slice %219 {offsets = [0, 128], sizes = [8, 128], strides = [1, 1]} : vector<8x512xf32> to vector<8x128xf32>
    %227 = arith.negf %226 : vector<8x128xf32>
    %228 = math.exp %227 : vector<8x128xf32>
    %cst_123 = arith.constant 1.000000e+00 : f32
    %229 = vector.broadcast %cst_123 : f32 to vector<8x128xf32>
    %230 = arith.addf %229, %228 : vector<8x128xf32>
    %231 = arith.divf %229, %230 : vector<8x128xf32>
    %232 = vector.extract_strided_slice %219 {offsets = [0, 256], sizes = [8, 128], strides = [1, 1]} : vector<8x512xf32> to vector<8x128xf32>
    %233 = math.tanh %232 : vector<8x128xf32>
    %234 = vector.extract_strided_slice %219 {offsets = [0, 384], sizes = [8, 128], strides = [1, 1]} : vector<8x512xf32> to vector<8x128xf32>
    %235 = arith.negf %234 : vector<8x128xf32>
    %236 = math.exp %235 : vector<8x128xf32>
    %cst_124 = arith.constant 1.000000e+00 : f32
    %237 = vector.broadcast %cst_124 : f32 to vector<8x128xf32>
    %238 = arith.addf %237, %236 : vector<8x128xf32>
    %239 = arith.divf %237, %238 : vector<8x128xf32>
    %c0_125 = arith.constant 0 : index
    %c0_126 = arith.constant 0 : index
    %240 = vector.load %arg15[%c0_125, %c0_126] : memref<8x128xf32, #tpu.memory_space<vmem>>, vector<8x128xf32>
    %241 = arith.mulf %231, %240 : vector<8x128xf32>
    %242 = arith.mulf %225, %233 : vector<8x128xf32>
    %243 = arith.addf %241, %242 : vector<8x128xf32>
    %244 = math.tanh %243 : vector<8x128xf32>
    %245 = arith.mulf %239, %244 : vector<8x128xf32>
    %c0_127 = arith.constant 0 : index
    %c0_128 = arith.constant 0 : index
    %246 = vector.load %arg15[%c0_127, %c0_128] : memref<8x128xf32, #tpu.memory_space<vmem>>, vector<8x128xf32>
    tpu.vector_store %arg15[%c0_127, %c0_128], %243 {strides = array<i32>} : memref<8x128xf32, #tpu.memory_space<vmem>>, vector<8x128xf32>,
    %c0_129 = arith.constant 0 : index
    %c0_130 = arith.constant 0 : index
    %247 = vector.load %arg14[%c0_129, %c0_130] : memref<8x128xf32, #tpu.memory_space<vmem>>, vector<8x128xf32>
    tpu.vector_store %arg14[%c0_129, %c0_130], %245 {strides = array<i32>} : memref<8x128xf32, #tpu.memory_space<vmem>>, vector<8x128xf32>,
    %c48_131 = arith.constant 48 : index
    %c0_132 = arith.constant 0 : index
    %248 = vector.load %arg16[%c48_131, %c0_132] : memref<64x128xf32, #tpu.memory_space<vmem>>, vector<8x128xf32>
    tpu.vector_store %arg16[%c48_131, %c0_132], %245 {strides = array<i32>} : memref<64x128xf32, #tpu.memory_space<vmem>>, vector<8x128xf32>,
    %c56 = arith.constant 56 : index
    %c0_133 = arith.constant 0 : index
    %249 = vector.load %arg17[%c56, %c0_133] : memref<64x512xf32, #tpu.memory_space<vmem>>, vector<8x512xf32>
    %c0_134 = arith.constant 0 : index
    %c0_135 = arith.constant 0 : index
    %250 = vector.load %arg14[%c0_134, %c0_135] : memref<8x128xf32, #tpu.memory_space<vmem>>, vector<8x128xf32>
    %c0_136 = arith.constant 0 : index
    %c0_137 = arith.constant 0 : index
    %251 = vector.load %arg3[%c0_136, %c0_137] : memref<128x512xf32, #tpu.memory_space<vmem>>, vector<128x512xf32>
    %cst_138 = arith.constant dense<0.000000e+00> : vector<8x512xf32>
    %252 = tpu.matmul %250, %251, %cst_138 {dimension_numbers = #tpu.dot_dimension_numbers<[1], [0], [0], [1], [0, 0, 1, 1], [], []>} : vector<8x128xf32>, vector<128x512xf32>, vector<8x512xf32> -> vector<8x512xf32>
    %253 = arith.addf %249, %252 : vector<8x512xf32>
    %254 = vector.extract_strided_slice %253 {offsets = [0, 0], sizes = [8, 128], strides = [1, 1]} : vector<8x512xf32> to vector<8x128xf32>
    %255 = arith.negf %254 : vector<8x128xf32>
    %256 = math.exp %255 : vector<8x128xf32>
    %cst_139 = arith.constant 1.000000e+00 : f32
    %257 = vector.broadcast %cst_139 : f32 to vector<8x128xf32>
    %258 = arith.addf %257, %256 : vector<8x128xf32>
    %259 = arith.divf %257, %258 : vector<8x128xf32>
    %260 = vector.extract_strided_slice %253 {offsets = [0, 128], sizes = [8, 128], strides = [1, 1]} : vector<8x512xf32> to vector<8x128xf32>
    %261 = arith.negf %260 : vector<8x128xf32>
    %262 = math.exp %261 : vector<8x128xf32>
    %cst_140 = arith.constant 1.000000e+00 : f32
    %263 = vector.broadcast %cst_140 : f32 to vector<8x128xf32>
    %264 = arith.addf %263, %262 : vector<8x128xf32>
    %265 = arith.divf %263, %264 : vector<8x128xf32>
    %266 = vector.extract_strided_slice %253 {offsets = [0, 256], sizes = [8, 128], strides = [1, 1]} : vector<8x512xf32> to vector<8x128xf32>
    %267 = math.tanh %266 : vector<8x128xf32>
    %268 = vector.extract_strided_slice %253 {offsets = [0, 384], sizes = [8, 128], strides = [1, 1]} : vector<8x512xf32> to vector<8x128xf32>
    %269 = arith.negf %268 : vector<8x128xf32>
    %270 = math.exp %269 : vector<8x128xf32>
    %cst_141 = arith.constant 1.000000e+00 : f32
    %271 = vector.broadcast %cst_141 : f32 to vector<8x128xf32>
    %272 = arith.addf %271, %270 : vector<8x128xf32>
    %273 = arith.divf %271, %272 : vector<8x128xf32>
    %c0_142 = arith.constant 0 : index
    %c0_143 = arith.constant 0 : index
    %274 = vector.load %arg15[%c0_142, %c0_143] : memref<8x128xf32, #tpu.memory_space<vmem>>, vector<8x128xf32>
    %275 = arith.mulf %265, %274 : vector<8x128xf32>
    %276 = arith.mulf %259, %267 : vector<8x128xf32>
    %277 = arith.addf %275, %276 : vector<8x128xf32>
    %278 = math.tanh %277 : vector<8x128xf32>
    %279 = arith.mulf %273, %278 : vector<8x128xf32>
    %c0_144 = arith.constant 0 : index
    %c0_145 = arith.constant 0 : index
    %280 = vector.load %arg15[%c0_144, %c0_145] : memref<8x128xf32, #tpu.memory_space<vmem>>, vector<8x128xf32>
    tpu.vector_store %arg15[%c0_144, %c0_145], %277 {strides = array<i32>} : memref<8x128xf32, #tpu.memory_space<vmem>>, vector<8x128xf32>,
    %c0_146 = arith.constant 0 : index
    %c0_147 = arith.constant 0 : index
    %281 = vector.load %arg14[%c0_146, %c0_147] : memref<8x128xf32, #tpu.memory_space<vmem>>, vector<8x128xf32>
    tpu.vector_store %arg14[%c0_146, %c0_147], %279 {strides = array<i32>} : memref<8x128xf32, #tpu.memory_space<vmem>>, vector<8x128xf32>,
    %c56_148 = arith.constant 56 : index
    %c0_149 = arith.constant 0 : index
    %282 = vector.load %arg16[%c56_148, %c0_149] : memref<64x128xf32, #tpu.memory_space<vmem>>, vector<8x128xf32>
    tpu.vector_store %arg16[%c56_148, %c0_149], %279 {strides = array<i32>} : memref<64x128xf32, #tpu.memory_space<vmem>>, vector<8x128xf32>,
    %c0_150 = arith.constant 0 : index
    %c0_151 = arith.constant 0 : index
    %283 = vector.load %arg16[%c0_150, %c0_151] : memref<64x128xf32, #tpu.memory_space<vmem>>, vector<64x128xf32>
    %c0_152 = arith.constant 0 : index
    %c0_153 = arith.constant 0 : index
    %284 = vector.load %arg5[%c0_152, %c0_153] : memref<128x512xf32, #tpu.memory_space<vmem>>, vector<128x512xf32>
    %cst_154 = arith.constant dense<0.000000e+00> : vector<64x512xf32>
    %285 = tpu.matmul %283, %284, %cst_154 {dimension_numbers = #tpu.dot_dimension_numbers<[1], [0], [0], [1], [0, 0, 1, 1], [], []>} : vector<64x128xf32>, vector<128x512xf32>, vector<64x512xf32> -> vector<64x512xf32>
    %c0_155 = arith.constant 0 : index
    %c0_156 = arith.constant 0 : index
    %286 = vector.load %arg7[%c0_155, %c0_156] : memref<1x512xf32, #tpu.memory_space<vmem>>, vector<1x512xf32>
    %287 = vector.broadcast %286 : vector<1x512xf32> to vector<64x512xf32>
    %288 = arith.addf %285, %287 : vector<64x512xf32>
    %c0_157 = arith.constant 0 : index
    %c0_158 = arith.constant 0 : index
    %289 = vector.load %arg17[%c0_157, %c0_158] : memref<64x512xf32, #tpu.memory_space<vmem>>, vector<64x512xf32>
    tpu.vector_store %arg17[%c0_157, %c0_158], %288 {strides = array<i32>} : memref<64x512xf32, #tpu.memory_space<vmem>>, vector<64x512xf32>,
    %cst_159 = arith.constant 0.000000e+00 : f32
    %290 = vector.broadcast %cst_159 : f32 to vector<8x128xf32>
    %c0_160 = arith.constant 0 : index
    %c0_161 = arith.constant 0 : index
    %291 = vector.load %arg14[%c0_160, %c0_161] : memref<8x128xf32, #tpu.memory_space<vmem>>, vector<8x128xf32>
    tpu.vector_store %arg14[%c0_160, %c0_161], %290 {strides = array<i32>} : memref<8x128xf32, #tpu.memory_space<vmem>>, vector<8x128xf32>,
    %cst_162 = arith.constant 0.000000e+00 : f32
    %292 = vector.broadcast %cst_162 : f32 to vector<8x128xf32>
    %c0_163 = arith.constant 0 : index
    %c0_164 = arith.constant 0 : index
    %293 = vector.load %arg15[%c0_163, %c0_164] : memref<8x128xf32, #tpu.memory_space<vmem>>, vector<8x128xf32>
    tpu.vector_store %arg15[%c0_163, %c0_164], %292 {strides = array<i32>} : memref<8x128xf32, #tpu.memory_space<vmem>>, vector<8x128xf32>,
    %c0_165 = arith.constant 0 : index
    %c0_166 = arith.constant 0 : index
    %294 = vector.load %arg17[%c0_165, %c0_166] : memref<64x512xf32, #tpu.memory_space<vmem>>, vector<8x512xf32>
    %c0_167 = arith.constant 0 : index
    %c0_168 = arith.constant 0 : index
    %295 = vector.load %arg14[%c0_167, %c0_168] : memref<8x128xf32, #tpu.memory_space<vmem>>, vector<8x128xf32>
    %c0_169 = arith.constant 0 : index
    %c0_170 = arith.constant 0 : index
    %296 = vector.load %arg6[%c0_169, %c0_170] : memref<128x512xf32, #tpu.memory_space<vmem>>, vector<128x512xf32>
    %cst_171 = arith.constant dense<0.000000e+00> : vector<8x512xf32>
    %297 = tpu.matmul %295, %296, %cst_171 {dimension_numbers = #tpu.dot_dimension_numbers<[1], [0], [0], [1], [0, 0, 1, 1], [], []>} : vector<8x128xf32>, vector<128x512xf32>, vector<8x512xf32> -> vector<8x512xf32>
    %298 = arith.addf %294, %297 : vector<8x512xf32>
    %299 = vector.extract_strided_slice %298 {offsets = [0, 0], sizes = [8, 128], strides = [1, 1]} : vector<8x512xf32> to vector<8x128xf32>
    %300 = arith.negf %299 : vector<8x128xf32>
    %301 = math.exp %300 : vector<8x128xf32>
    %cst_172 = arith.constant 1.000000e+00 : f32
    %302 = vector.broadcast %cst_172 : f32 to vector<8x128xf32>
    %303 = arith.addf %302, %301 : vector<8x128xf32>
    %304 = arith.divf %302, %303 : vector<8x128xf32>
    %305 = vector.extract_strided_slice %298 {offsets = [0, 128], sizes = [8, 128], strides = [1, 1]} : vector<8x512xf32> to vector<8x128xf32>
    %306 = arith.negf %305 : vector<8x128xf32>
    %307 = math.exp %306 : vector<8x128xf32>
    %cst_173 = arith.constant 1.000000e+00 : f32
    %308 = vector.broadcast %cst_173 : f32 to vector<8x128xf32>
    %309 = arith.addf %308, %307 : vector<8x128xf32>
    %310 = arith.divf %308, %309 : vector<8x128xf32>
    %311 = vector.extract_strided_slice %298 {offsets = [0, 256], sizes = [8, 128], strides = [1, 1]} : vector<8x512xf32> to vector<8x128xf32>
    %312 = math.tanh %311 : vector<8x128xf32>
    %313 = vector.extract_strided_slice %298 {offsets = [0, 384], sizes = [8, 128], strides = [1, 1]} : vector<8x512xf32> to vector<8x128xf32>
    %314 = arith.negf %313 : vector<8x128xf32>
    %315 = math.exp %314 : vector<8x128xf32>
    %cst_174 = arith.constant 1.000000e+00 : f32
    %316 = vector.broadcast %cst_174 : f32 to vector<8x128xf32>
    %317 = arith.addf %316, %315 : vector<8x128xf32>
    %318 = arith.divf %316, %317 : vector<8x128xf32>
    %c0_175 = arith.constant 0 : index
    %c0_176 = arith.constant 0 : index
    %319 = vector.load %arg15[%c0_175, %c0_176] : memref<8x128xf32, #tpu.memory_space<vmem>>, vector<8x128xf32>
    %320 = arith.mulf %310, %319 : vector<8x128xf32>
    %321 = arith.mulf %304, %312 : vector<8x128xf32>
    %322 = arith.addf %320, %321 : vector<8x128xf32>
    %323 = math.tanh %322 : vector<8x128xf32>
    %324 = arith.mulf %318, %323 : vector<8x128xf32>
    %c0_177 = arith.constant 0 : index
    %c0_178 = arith.constant 0 : index
    %325 = vector.load %arg15[%c0_177, %c0_178] : memref<8x128xf32, #tpu.memory_space<vmem>>, vector<8x128xf32>
    tpu.vector_store %arg15[%c0_177, %c0_178], %322 {strides = array<i32>} : memref<8x128xf32, #tpu.memory_space<vmem>>, vector<8x128xf32>,
    %c0_179 = arith.constant 0 : index
    %c0_180 = arith.constant 0 : index
    %326 = vector.load %arg14[%c0_179, %c0_180] : memref<8x128xf32, #tpu.memory_space<vmem>>, vector<8x128xf32>
    tpu.vector_store %arg14[%c0_179, %c0_180], %324 {strides = array<i32>} : memref<8x128xf32, #tpu.memory_space<vmem>>, vector<8x128xf32>,
    %c0_181 = arith.constant 0 : index
    %c0_182 = arith.constant 0 : index
    %327 = vector.load %arg16[%c0_181, %c0_182] : memref<64x128xf32, #tpu.memory_space<vmem>>, vector<8x128xf32>
    tpu.vector_store %arg16[%c0_181, %c0_182], %324 {strides = array<i32>} : memref<64x128xf32, #tpu.memory_space<vmem>>, vector<8x128xf32>,
    %c8_183 = arith.constant 8 : index
    %c0_184 = arith.constant 0 : index
    %328 = vector.load %arg17[%c8_183, %c0_184] : memref<64x512xf32, #tpu.memory_space<vmem>>, vector<8x512xf32>
    %c0_185 = arith.constant 0 : index
    %c0_186 = arith.constant 0 : index
    %329 = vector.load %arg14[%c0_185, %c0_186] : memref<8x128xf32, #tpu.memory_space<vmem>>, vector<8x128xf32>
    %c0_187 = arith.constant 0 : index
    %c0_188 = arith.constant 0 : index
    %330 = vector.load %arg6[%c0_187, %c0_188] : memref<128x512xf32, #tpu.memory_space<vmem>>, vector<128x512xf32>
    %cst_189 = arith.constant dense<0.000000e+00> : vector<8x512xf32>
    %331 = tpu.matmul %329, %330, %cst_189 {dimension_numbers = #tpu.dot_dimension_numbers<[1], [0], [0], [1], [0, 0, 1, 1], [], []>} : vector<8x128xf32>, vector<128x512xf32>, vector<8x512xf32> -> vector<8x512xf32>
    %332 = arith.addf %328, %331 : vector<8x512xf32>
    %333 = vector.extract_strided_slice %332 {offsets = [0, 0], sizes = [8, 128], strides = [1, 1]} : vector<8x512xf32> to vector<8x128xf32>
    %334 = arith.negf %333 : vector<8x128xf32>
    %335 = math.exp %334 : vector<8x128xf32>
    %cst_190 = arith.constant 1.000000e+00 : f32
    %336 = vector.broadcast %cst_190 : f32 to vector<8x128xf32>
    %337 = arith.addf %336, %335 : vector<8x128xf32>
    %338 = arith.divf %336, %337 : vector<8x128xf32>
    %339 = vector.extract_strided_slice %332 {offsets = [0, 128], sizes = [8, 128], strides = [1, 1]} : vector<8x512xf32> to vector<8x128xf32>
    %340 = arith.negf %339 : vector<8x128xf32>
    %341 = math.exp %340 : vector<8x128xf32>
    %cst_191 = arith.constant 1.000000e+00 : f32
    %342 = vector.broadcast %cst_191 : f32 to vector<8x128xf32>
    %343 = arith.addf %342, %341 : vector<8x128xf32>
    %344 = arith.divf %342, %343 : vector<8x128xf32>
    %345 = vector.extract_strided_slice %332 {offsets = [0, 256], sizes = [8, 128], strides = [1, 1]} : vector<8x512xf32> to vector<8x128xf32>
    %346 = math.tanh %345 : vector<8x128xf32>
    %347 = vector.extract_strided_slice %332 {offsets = [0, 384], sizes = [8, 128], strides = [1, 1]} : vector<8x512xf32> to vector<8x128xf32>
    %348 = arith.negf %347 : vector<8x128xf32>
    %349 = math.exp %348 : vector<8x128xf32>
    %cst_192 = arith.constant 1.000000e+00 : f32
    %350 = vector.broadcast %cst_192 : f32 to vector<8x128xf32>
    %351 = arith.addf %350, %349 : vector<8x128xf32>
    %352 = arith.divf %350, %351 : vector<8x128xf32>
    %c0_193 = arith.constant 0 : index
    %c0_194 = arith.constant 0 : index
    %353 = vector.load %arg15[%c0_193, %c0_194] : memref<8x128xf32, #tpu.memory_space<vmem>>, vector<8x128xf32>
    %354 = arith.mulf %344, %353 : vector<8x128xf32>
    %355 = arith.mulf %338, %346 : vector<8x128xf32>
    %356 = arith.addf %354, %355 : vector<8x128xf32>
    %357 = math.tanh %356 : vector<8x128xf32>
    %358 = arith.mulf %352, %357 : vector<8x128xf32>
    %c0_195 = arith.constant 0 : index
    %c0_196 = arith.constant 0 : index
    %359 = vector.load %arg15[%c0_195, %c0_196] : memref<8x128xf32, #tpu.memory_space<vmem>>, vector<8x128xf32>
    tpu.vector_store %arg15[%c0_195, %c0_196], %356 {strides = array<i32>} : memref<8x128xf32, #tpu.memory_space<vmem>>, vector<8x128xf32>,
    %c0_197 = arith.constant 0 : index
    %c0_198 = arith.constant 0 : index
    %360 = vector.load %arg14[%c0_197, %c0_198] : memref<8x128xf32, #tpu.memory_space<vmem>>, vector<8x128xf32>
    tpu.vector_store %arg14[%c0_197, %c0_198], %358 {strides = array<i32>} : memref<8x128xf32, #tpu.memory_space<vmem>>, vector<8x128xf32>,
    %c8_199 = arith.constant 8 : index
    %c0_200 = arith.constant 0 : index
    %361 = vector.load %arg16[%c8_199, %c0_200] : memref<64x128xf32, #tpu.memory_space<vmem>>, vector<8x128xf32>
    tpu.vector_store %arg16[%c8_199, %c0_200], %358 {strides = array<i32>} : memref<64x128xf32, #tpu.memory_space<vmem>>, vector<8x128xf32>,
    %c16_201 = arith.constant 16 : index
    %c0_202 = arith.constant 0 : index
    %362 = vector.load %arg17[%c16_201, %c0_202] : memref<64x512xf32, #tpu.memory_space<vmem>>, vector<8x512xf32>
    %c0_203 = arith.constant 0 : index
    %c0_204 = arith.constant 0 : index
    %363 = vector.load %arg14[%c0_203, %c0_204] : memref<8x128xf32, #tpu.memory_space<vmem>>, vector<8x128xf32>
    %c0_205 = arith.constant 0 : index
    %c0_206 = arith.constant 0 : index
    %364 = vector.load %arg6[%c0_205, %c0_206] : memref<128x512xf32, #tpu.memory_space<vmem>>, vector<128x512xf32>
    %cst_207 = arith.constant dense<0.000000e+00> : vector<8x512xf32>
    %365 = tpu.matmul %363, %364, %cst_207 {dimension_numbers = #tpu.dot_dimension_numbers<[1], [0], [0], [1], [0, 0, 1, 1], [], []>} : vector<8x128xf32>, vector<128x512xf32>, vector<8x512xf32> -> vector<8x512xf32>
    %366 = arith.addf %362, %365 : vector<8x512xf32>
    %367 = vector.extract_strided_slice %366 {offsets = [0, 0], sizes = [8, 128], strides = [1, 1]} : vector<8x512xf32> to vector<8x128xf32>
    %368 = arith.negf %367 : vector<8x128xf32>
    %369 = math.exp %368 : vector<8x128xf32>
    %cst_208 = arith.constant 1.000000e+00 : f32
    %370 = vector.broadcast %cst_208 : f32 to vector<8x128xf32>
    %371 = arith.addf %370, %369 : vector<8x128xf32>
    %372 = arith.divf %370, %371 : vector<8x128xf32>
    %373 = vector.extract_strided_slice %366 {offsets = [0, 128], sizes = [8, 128], strides = [1, 1]} : vector<8x512xf32> to vector<8x128xf32>
    %374 = arith.negf %373 : vector<8x128xf32>
    %375 = math.exp %374 : vector<8x128xf32>
    %cst_209 = arith.constant 1.000000e+00 : f32
    %376 = vector.broadcast %cst_209 : f32 to vector<8x128xf32>
    %377 = arith.addf %376, %375 : vector<8x128xf32>
    %378 = arith.divf %376, %377 : vector<8x128xf32>
    %379 = vector.extract_strided_slice %366 {offsets = [0, 256], sizes = [8, 128], strides = [1, 1]} : vector<8x512xf32> to vector<8x128xf32>
    %380 = math.tanh %379 : vector<8x128xf32>
    %381 = vector.extract_strided_slice %366 {offsets = [0, 384], sizes = [8, 128], strides = [1, 1]} : vector<8x512xf32> to vector<8x128xf32>
    %382 = arith.negf %381 : vector<8x128xf32>
    %383 = math.exp %382 : vector<8x128xf32>
    %cst_210 = arith.constant 1.000000e+00 : f32
    %384 = vector.broadcast %cst_210 : f32 to vector<8x128xf32>
    %385 = arith.addf %384, %383 : vector<8x128xf32>
    %386 = arith.divf %384, %385 : vector<8x128xf32>
    %c0_211 = arith.constant 0 : index
    %c0_212 = arith.constant 0 : index
    %387 = vector.load %arg15[%c0_211, %c0_212] : memref<8x128xf32, #tpu.memory_space<vmem>>, vector<8x128xf32>
    %388 = arith.mulf %378, %387 : vector<8x128xf32>
    %389 = arith.mulf %372, %380 : vector<8x128xf32>
    %390 = arith.addf %388, %389 : vector<8x128xf32>
    %391 = math.tanh %390 : vector<8x128xf32>
    %392 = arith.mulf %386, %391 : vector<8x128xf32>
    %c0_213 = arith.constant 0 : index
    %c0_214 = arith.constant 0 : index
    %393 = vector.load %arg15[%c0_213, %c0_214] : memref<8x128xf32, #tpu.memory_space<vmem>>, vector<8x128xf32>
    tpu.vector_store %arg15[%c0_213, %c0_214], %390 {strides = array<i32>} : memref<8x128xf32, #tpu.memory_space<vmem>>, vector<8x128xf32>,
    %c0_215 = arith.constant 0 : index
    %c0_216 = arith.constant 0 : index
    %394 = vector.load %arg14[%c0_215, %c0_216] : memref<8x128xf32, #tpu.memory_space<vmem>>, vector<8x128xf32>
    tpu.vector_store %arg14[%c0_215, %c0_216], %392 {strides = array<i32>} : memref<8x128xf32, #tpu.memory_space<vmem>>, vector<8x128xf32>,
    %c16_217 = arith.constant 16 : index
    %c0_218 = arith.constant 0 : index
    %395 = vector.load %arg16[%c16_217, %c0_218] : memref<64x128xf32, #tpu.memory_space<vmem>>, vector<8x128xf32>
    tpu.vector_store %arg16[%c16_217, %c0_218], %392 {strides = array<i32>} : memref<64x128xf32, #tpu.memory_space<vmem>>, vector<8x128xf32>,
    %c24_219 = arith.constant 24 : index
    %c0_220 = arith.constant 0 : index
    %396 = vector.load %arg17[%c24_219, %c0_220] : memref<64x512xf32, #tpu.memory_space<vmem>>, vector<8x512xf32>
    %c0_221 = arith.constant 0 : index
    %c0_222 = arith.constant 0 : index
    %397 = vector.load %arg14[%c0_221, %c0_222] : memref<8x128xf32, #tpu.memory_space<vmem>>, vector<8x128xf32>
    %c0_223 = arith.constant 0 : index
    %c0_224 = arith.constant 0 : index
    %398 = vector.load %arg6[%c0_223, %c0_224] : memref<128x512xf32, #tpu.memory_space<vmem>>, vector<128x512xf32>
    %cst_225 = arith.constant dense<0.000000e+00> : vector<8x512xf32>
    %399 = tpu.matmul %397, %398, %cst_225 {dimension_numbers = #tpu.dot_dimension_numbers<[1], [0], [0], [1], [0, 0, 1, 1], [], []>} : vector<8x128xf32>, vector<128x512xf32>, vector<8x512xf32> -> vector<8x512xf32>
    %400 = arith.addf %396, %399 : vector<8x512xf32>
    %401 = vector.extract_strided_slice %400 {offsets = [0, 0], sizes = [8, 128], strides = [1, 1]} : vector<8x512xf32> to vector<8x128xf32>
    %402 = arith.negf %401 : vector<8x128xf32>
    %403 = math.exp %402 : vector<8x128xf32>
    %cst_226 = arith.constant 1.000000e+00 : f32
    %404 = vector.broadcast %cst_226 : f32 to vector<8x128xf32>
    %405 = arith.addf %404, %403 : vector<8x128xf32>
    %406 = arith.divf %404, %405 : vector<8x128xf32>
    %407 = vector.extract_strided_slice %400 {offsets = [0, 128], sizes = [8, 128], strides = [1, 1]} : vector<8x512xf32> to vector<8x128xf32>
    %408 = arith.negf %407 : vector<8x128xf32>
    %409 = math.exp %408 : vector<8x128xf32>
    %cst_227 = arith.constant 1.000000e+00 : f32
    %410 = vector.broadcast %cst_227 : f32 to vector<8x128xf32>
    %411 = arith.addf %410, %409 : vector<8x128xf32>
    %412 = arith.divf %410, %411 : vector<8x128xf32>
    %413 = vector.extract_strided_slice %400 {offsets = [0, 256], sizes = [8, 128], strides = [1, 1]} : vector<8x512xf32> to vector<8x128xf32>
    %414 = math.tanh %413 : vector<8x128xf32>
    %415 = vector.extract_strided_slice %400 {offsets = [0, 384], sizes = [8, 128], strides = [1, 1]} : vector<8x512xf32> to vector<8x128xf32>
    %416 = arith.negf %415 : vector<8x128xf32>
    %417 = math.exp %416 : vector<8x128xf32>
    %cst_228 = arith.constant 1.000000e+00 : f32
    %418 = vector.broadcast %cst_228 : f32 to vector<8x128xf32>
    %419 = arith.addf %418, %417 : vector<8x128xf32>
    %420 = arith.divf %418, %419 : vector<8x128xf32>
    %c0_229 = arith.constant 0 : index
    %c0_230 = arith.constant 0 : index
    %421 = vector.load %arg15[%c0_229, %c0_230] : memref<8x128xf32, #tpu.memory_space<vmem>>, vector<8x128xf32>
    %422 = arith.mulf %412, %421 : vector<8x128xf32>
    %423 = arith.mulf %406, %414 : vector<8x128xf32>
    %424 = arith.addf %422, %423 : vector<8x128xf32>
    %425 = math.tanh %424 : vector<8x128xf32>
    %426 = arith.mulf %420, %425 : vector<8x128xf32>
    %c0_231 = arith.constant 0 : index
    %c0_232 = arith.constant 0 : index
    %427 = vector.load %arg15[%c0_231, %c0_232] : memref<8x128xf32, #tpu.memory_space<vmem>>, vector<8x128xf32>
    tpu.vector_store %arg15[%c0_231, %c0_232], %424 {strides = array<i32>} : memref<8x128xf32, #tpu.memory_space<vmem>>, vector<8x128xf32>,
    %c0_233 = arith.constant 0 : index
    %c0_234 = arith.constant 0 : index
    %428 = vector.load %arg14[%c0_233, %c0_234] : memref<8x128xf32, #tpu.memory_space<vmem>>, vector<8x128xf32>
    tpu.vector_store %arg14[%c0_233, %c0_234], %426 {strides = array<i32>} : memref<8x128xf32, #tpu.memory_space<vmem>>, vector<8x128xf32>,
    %c24_235 = arith.constant 24 : index
    %c0_236 = arith.constant 0 : index
    %429 = vector.load %arg16[%c24_235, %c0_236] : memref<64x128xf32, #tpu.memory_space<vmem>>, vector<8x128xf32>
    tpu.vector_store %arg16[%c24_235, %c0_236], %426 {strides = array<i32>} : memref<64x128xf32, #tpu.memory_space<vmem>>, vector<8x128xf32>,
    %c32_237 = arith.constant 32 : index
    %c0_238 = arith.constant 0 : index
    %430 = vector.load %arg17[%c32_237, %c0_238] : memref<64x512xf32, #tpu.memory_space<vmem>>, vector<8x512xf32>
    %c0_239 = arith.constant 0 : index
    %c0_240 = arith.constant 0 : index
    %431 = vector.load %arg14[%c0_239, %c0_240] : memref<8x128xf32, #tpu.memory_space<vmem>>, vector<8x128xf32>
    %c0_241 = arith.constant 0 : index
    %c0_242 = arith.constant 0 : index
    %432 = vector.load %arg6[%c0_241, %c0_242] : memref<128x512xf32, #tpu.memory_space<vmem>>, vector<128x512xf32>
    %cst_243 = arith.constant dense<0.000000e+00> : vector<8x512xf32>
    %433 = tpu.matmul %431, %432, %cst_243 {dimension_numbers = #tpu.dot_dimension_numbers<[1], [0], [0], [1], [0, 0, 1, 1], [], []>} : vector<8x128xf32>, vector<128x512xf32>, vector<8x512xf32> -> vector<8x512xf32>
    %434 = arith.addf %430, %433 : vector<8x512xf32>
    %435 = vector.extract_strided_slice %434 {offsets = [0, 0], sizes = [8, 128], strides = [1, 1]} : vector<8x512xf32> to vector<8x128xf32>
    %436 = arith.negf %435 : vector<8x128xf32>
    %437 = math.exp %436 : vector<8x128xf32>
    %cst_244 = arith.constant 1.000000e+00 : f32
    %438 = vector.broadcast %cst_244 : f32 to vector<8x128xf32>
    %439 = arith.addf %438, %437 : vector<8x128xf32>
    %440 = arith.divf %438, %439 : vector<8x128xf32>
    %441 = vector.extract_strided_slice %434 {offsets = [0, 128], sizes = [8, 128], strides = [1, 1]} : vector<8x512xf32> to vector<8x128xf32>
    %442 = arith.negf %441 : vector<8x128xf32>
    %443 = math.exp %442 : vector<8x128xf32>
    %cst_245 = arith.constant 1.000000e+00 : f32
    %444 = vector.broadcast %cst_245 : f32 to vector<8x128xf32>
    %445 = arith.addf %444, %443 : vector<8x128xf32>
    %446 = arith.divf %444, %445 : vector<8x128xf32>
    %447 = vector.extract_strided_slice %434 {offsets = [0, 256], sizes = [8, 128], strides = [1, 1]} : vector<8x512xf32> to vector<8x128xf32>
    %448 = math.tanh %447 : vector<8x128xf32>
    %449 = vector.extract_strided_slice %434 {offsets = [0, 384], sizes = [8, 128], strides = [1, 1]} : vector<8x512xf32> to vector<8x128xf32>
    %450 = arith.negf %449 : vector<8x128xf32>
    %451 = math.exp %450 : vector<8x128xf32>
    %cst_246 = arith.constant 1.000000e+00 : f32
    %452 = vector.broadcast %cst_246 : f32 to vector<8x128xf32>
    %453 = arith.addf %452, %451 : vector<8x128xf32>
    %454 = arith.divf %452, %453 : vector<8x128xf32>
    %c0_247 = arith.constant 0 : index
    %c0_248 = arith.constant 0 : index
    %455 = vector.load %arg15[%c0_247, %c0_248] : memref<8x128xf32, #tpu.memory_space<vmem>>, vector<8x128xf32>
    %456 = arith.mulf %446, %455 : vector<8x128xf32>
    %457 = arith.mulf %440, %448 : vector<8x128xf32>
    %458 = arith.addf %456, %457 : vector<8x128xf32>
    %459 = math.tanh %458 : vector<8x128xf32>
    %460 = arith.mulf %454, %459 : vector<8x128xf32>
    %c0_249 = arith.constant 0 : index
    %c0_250 = arith.constant 0 : index
    %461 = vector.load %arg15[%c0_249, %c0_250] : memref<8x128xf32, #tpu.memory_space<vmem>>, vector<8x128xf32>
    tpu.vector_store %arg15[%c0_249, %c0_250], %458 {strides = array<i32>} : memref<8x128xf32, #tpu.memory_space<vmem>>, vector<8x128xf32>,
    %c0_251 = arith.constant 0 : index
    %c0_252 = arith.constant 0 : index
    %462 = vector.load %arg14[%c0_251, %c0_252] : memref<8x128xf32, #tpu.memory_space<vmem>>, vector<8x128xf32>
    tpu.vector_store %arg14[%c0_251, %c0_252], %460 {strides = array<i32>} : memref<8x128xf32, #tpu.memory_space<vmem>>, vector<8x128xf32>,
    %c32_253 = arith.constant 32 : index
    %c0_254 = arith.constant 0 : index
    %463 = vector.load %arg16[%c32_253, %c0_254] : memref<64x128xf32, #tpu.memory_space<vmem>>, vector<8x128xf32>
    tpu.vector_store %arg16[%c32_253, %c0_254], %460 {strides = array<i32>} : memref<64x128xf32, #tpu.memory_space<vmem>>, vector<8x128xf32>,
    %c40_255 = arith.constant 40 : index
    %c0_256 = arith.constant 0 : index
    %464 = vector.load %arg17[%c40_255, %c0_256] : memref<64x512xf32, #tpu.memory_space<vmem>>, vector<8x512xf32>
    %c0_257 = arith.constant 0 : index
    %c0_258 = arith.constant 0 : index
    %465 = vector.load %arg14[%c0_257, %c0_258] : memref<8x128xf32, #tpu.memory_space<vmem>>, vector<8x128xf32>
    %c0_259 = arith.constant 0 : index
    %c0_260 = arith.constant 0 : index
    %466 = vector.load %arg6[%c0_259, %c0_260] : memref<128x512xf32, #tpu.memory_space<vmem>>, vector<128x512xf32>
    %cst_261 = arith.constant dense<0.000000e+00> : vector<8x512xf32>
    %467 = tpu.matmul %465, %466, %cst_261 {dimension_numbers = #tpu.dot_dimension_numbers<[1], [0], [0], [1], [0, 0, 1, 1], [], []>} : vector<8x128xf32>, vector<128x512xf32>, vector<8x512xf32> -> vector<8x512xf32>
    %468 = arith.addf %464, %467 : vector<8x512xf32>
    %469 = vector.extract_strided_slice %468 {offsets = [0, 0], sizes = [8, 128], strides = [1, 1]} : vector<8x512xf32> to vector<8x128xf32>
    %470 = arith.negf %469 : vector<8x128xf32>
    %471 = math.exp %470 : vector<8x128xf32>
    %cst_262 = arith.constant 1.000000e+00 : f32
    %472 = vector.broadcast %cst_262 : f32 to vector<8x128xf32>
    %473 = arith.addf %472, %471 : vector<8x128xf32>
    %474 = arith.divf %472, %473 : vector<8x128xf32>
    %475 = vector.extract_strided_slice %468 {offsets = [0, 128], sizes = [8, 128], strides = [1, 1]} : vector<8x512xf32> to vector<8x128xf32>
    %476 = arith.negf %475 : vector<8x128xf32>
    %477 = math.exp %476 : vector<8x128xf32>
    %cst_263 = arith.constant 1.000000e+00 : f32
    %478 = vector.broadcast %cst_263 : f32 to vector<8x128xf32>
    %479 = arith.addf %478, %477 : vector<8x128xf32>
    %480 = arith.divf %478, %479 : vector<8x128xf32>
    %481 = vector.extract_strided_slice %468 {offsets = [0, 256], sizes = [8, 128], strides = [1, 1]} : vector<8x512xf32> to vector<8x128xf32>
    %482 = math.tanh %481 : vector<8x128xf32>
    %483 = vector.extract_strided_slice %468 {offsets = [0, 384], sizes = [8, 128], strides = [1, 1]} : vector<8x512xf32> to vector<8x128xf32>
    %484 = arith.negf %483 : vector<8x128xf32>
    %485 = math.exp %484 : vector<8x128xf32>
    %cst_264 = arith.constant 1.000000e+00 : f32
    %486 = vector.broadcast %cst_264 : f32 to vector<8x128xf32>
    %487 = arith.addf %486, %485 : vector<8x128xf32>
    %488 = arith.divf %486, %487 : vector<8x128xf32>
    %c0_265 = arith.constant 0 : index
    %c0_266 = arith.constant 0 : index
    %489 = vector.load %arg15[%c0_265, %c0_266] : memref<8x128xf32, #tpu.memory_space<vmem>>, vector<8x128xf32>
    %490 = arith.mulf %480, %489 : vector<8x128xf32>
    %491 = arith.mulf %474, %482 : vector<8x128xf32>
    %492 = arith.addf %490, %491 : vector<8x128xf32>
    %493 = math.tanh %492 : vector<8x128xf32>
    %494 = arith.mulf %488, %493 : vector<8x128xf32>
    %c0_267 = arith.constant 0 : index
    %c0_268 = arith.constant 0 : index
    %495 = vector.load %arg15[%c0_267, %c0_268] : memref<8x128xf32, #tpu.memory_space<vmem>>, vector<8x128xf32>
    tpu.vector_store %arg15[%c0_267, %c0_268], %492 {strides = array<i32>} : memref<8x128xf32, #tpu.memory_space<vmem>>, vector<8x128xf32>,
    %c0_269 = arith.constant 0 : index
    %c0_270 = arith.constant 0 : index
    %496 = vector.load %arg14[%c0_269, %c0_270] : memref<8x128xf32, #tpu.memory_space<vmem>>, vector<8x128xf32>
    tpu.vector_store %arg14[%c0_269, %c0_270], %494 {strides = array<i32>} : memref<8x128xf32, #tpu.memory_space<vmem>>, vector<8x128xf32>,
    %c40_271 = arith.constant 40 : index
    %c0_272 = arith.constant 0 : index
    %497 = vector.load %arg16[%c40_271, %c0_272] : memref<64x128xf32, #tpu.memory_space<vmem>>, vector<8x128xf32>
    tpu.vector_store %arg16[%c40_271, %c0_272], %494 {strides = array<i32>} : memref<64x128xf32, #tpu.memory_space<vmem>>, vector<8x128xf32>,
    %c48_273 = arith.constant 48 : index
    %c0_274 = arith.constant 0 : index
    %498 = vector.load %arg17[%c48_273, %c0_274] : memref<64x512xf32, #tpu.memory_space<vmem>>, vector<8x512xf32>
    %c0_275 = arith.constant 0 : index
    %c0_276 = arith.constant 0 : index
    %499 = vector.load %arg14[%c0_275, %c0_276] : memref<8x128xf32, #tpu.memory_space<vmem>>, vector<8x128xf32>
    %c0_277 = arith.constant 0 : index
    %c0_278 = arith.constant 0 : index
    %500 = vector.load %arg6[%c0_277, %c0_278] : memref<128x512xf32, #tpu.memory_space<vmem>>, vector<128x512xf32>
    %cst_279 = arith.constant dense<0.000000e+00> : vector<8x512xf32>
    %501 = tpu.matmul %499, %500, %cst_279 {dimension_numbers = #tpu.dot_dimension_numbers<[1], [0], [0], [1], [0, 0, 1, 1], [], []>} : vector<8x128xf32>, vector<128x512xf32>, vector<8x512xf32> -> vector<8x512xf32>
    %502 = arith.addf %498, %501 : vector<8x512xf32>
    %503 = vector.extract_strided_slice %502 {offsets = [0, 0], sizes = [8, 128], strides = [1, 1]} : vector<8x512xf32> to vector<8x128xf32>
    %504 = arith.negf %503 : vector<8x128xf32>
    %505 = math.exp %504 : vector<8x128xf32>
    %cst_280 = arith.constant 1.000000e+00 : f32
    %506 = vector.broadcast %cst_280 : f32 to vector<8x128xf32>
    %507 = arith.addf %506, %505 : vector<8x128xf32>
    %508 = arith.divf %506, %507 : vector<8x128xf32>
    %509 = vector.extract_strided_slice %502 {offsets = [0, 128], sizes = [8, 128], strides = [1, 1]} : vector<8x512xf32> to vector<8x128xf32>
    %510 = arith.negf %509 : vector<8x128xf32>
    %511 = math.exp %510 : vector<8x128xf32>
    %cst_281 = arith.constant 1.000000e+00 : f32
    %512 = vector.broadcast %cst_281 : f32 to vector<8x128xf32>
    %513 = arith.addf %512, %511 : vector<8x128xf32>
    %514 = arith.divf %512, %513 : vector<8x128xf32>
    %515 = vector.extract_strided_slice %502 {offsets = [0, 256], sizes = [8, 128], strides = [1, 1]} : vector<8x512xf32> to vector<8x128xf32>
    %516 = math.tanh %515 : vector<8x128xf32>
    %517 = vector.extract_strided_slice %502 {offsets = [0, 384], sizes = [8, 128], strides = [1, 1]} : vector<8x512xf32> to vector<8x128xf32>
    %518 = arith.negf %517 : vector<8x128xf32>
    %519 = math.exp %518 : vector<8x128xf32>
    %cst_282 = arith.constant 1.000000e+00 : f32
    %520 = vector.broadcast %cst_282 : f32 to vector<8x128xf32>
    %521 = arith.addf %520, %519 : vector<8x128xf32>
    %522 = arith.divf %520, %521 : vector<8x128xf32>
    %c0_283 = arith.constant 0 : index
    %c0_284 = arith.constant 0 : index
    %523 = vector.load %arg15[%c0_283, %c0_284] : memref<8x128xf32, #tpu.memory_space<vmem>>, vector<8x128xf32>
    %524 = arith.mulf %514, %523 : vector<8x128xf32>
    %525 = arith.mulf %508, %516 : vector<8x128xf32>
    %526 = arith.addf %524, %525 : vector<8x128xf32>
    %527 = math.tanh %526 : vector<8x128xf32>
    %528 = arith.mulf %522, %527 : vector<8x128xf32>
    %c0_285 = arith.constant 0 : index
    %c0_286 = arith.constant 0 : index
    %529 = vector.load %arg15[%c0_285, %c0_286] : memref<8x128xf32, #tpu.memory_space<vmem>>, vector<8x128xf32>
    tpu.vector_store %arg15[%c0_285, %c0_286], %526 {strides = array<i32>} : memref<8x128xf32, #tpu.memory_space<vmem>>, vector<8x128xf32>,
    %c0_287 = arith.constant 0 : index
    %c0_288 = arith.constant 0 : index
    %530 = vector.load %arg14[%c0_287, %c0_288] : memref<8x128xf32, #tpu.memory_space<vmem>>, vector<8x128xf32>
    tpu.vector_store %arg14[%c0_287, %c0_288], %528 {strides = array<i32>} : memref<8x128xf32, #tpu.memory_space<vmem>>, vector<8x128xf32>,
    %c48_289 = arith.constant 48 : index
    %c0_290 = arith.constant 0 : index
    %531 = vector.load %arg16[%c48_289, %c0_290] : memref<64x128xf32, #tpu.memory_space<vmem>>, vector<8x128xf32>
    tpu.vector_store %arg16[%c48_289, %c0_290], %528 {strides = array<i32>} : memref<64x128xf32, #tpu.memory_space<vmem>>, vector<8x128xf32>,
    %c56_291 = arith.constant 56 : index
    %c0_292 = arith.constant 0 : index
    %532 = vector.load %arg17[%c56_291, %c0_292] : memref<64x512xf32, #tpu.memory_space<vmem>>, vector<8x512xf32>
    %c0_293 = arith.constant 0 : index
    %c0_294 = arith.constant 0 : index
    %533 = vector.load %arg14[%c0_293, %c0_294] : memref<8x128xf32, #tpu.memory_space<vmem>>, vector<8x128xf32>
    %c0_295 = arith.constant 0 : index
    %c0_296 = arith.constant 0 : index
    %534 = vector.load %arg6[%c0_295, %c0_296] : memref<128x512xf32, #tpu.memory_space<vmem>>, vector<128x512xf32>
    %cst_297 = arith.constant dense<0.000000e+00> : vector<8x512xf32>
    %535 = tpu.matmul %533, %534, %cst_297 {dimension_numbers = #tpu.dot_dimension_numbers<[1], [0], [0], [1], [0, 0, 1, 1], [], []>} : vector<8x128xf32>, vector<128x512xf32>, vector<8x512xf32> -> vector<8x512xf32>
    %536 = arith.addf %532, %535 : vector<8x512xf32>
    %537 = vector.extract_strided_slice %536 {offsets = [0, 0], sizes = [8, 128], strides = [1, 1]} : vector<8x512xf32> to vector<8x128xf32>
    %538 = arith.negf %537 : vector<8x128xf32>
    %539 = math.exp %538 : vector<8x128xf32>
    %cst_298 = arith.constant 1.000000e+00 : f32
    %540 = vector.broadcast %cst_298 : f32 to vector<8x128xf32>
    %541 = arith.addf %540, %539 : vector<8x128xf32>
    %542 = arith.divf %540, %541 : vector<8x128xf32>
    %543 = vector.extract_strided_slice %536 {offsets = [0, 128], sizes = [8, 128], strides = [1, 1]} : vector<8x512xf32> to vector<8x128xf32>
    %544 = arith.negf %543 : vector<8x128xf32>
    %545 = math.exp %544 : vector<8x128xf32>
    %cst_299 = arith.constant 1.000000e+00 : f32
    %546 = vector.broadcast %cst_299 : f32 to vector<8x128xf32>
    %547 = arith.addf %546, %545 : vector<8x128xf32>
    %548 = arith.divf %546, %547 : vector<8x128xf32>
    %549 = vector.extract_strided_slice %536 {offsets = [0, 256], sizes = [8, 128], strides = [1, 1]} : vector<8x512xf32> to vector<8x128xf32>
    %550 = math.tanh %549 : vector<8x128xf32>
    %551 = vector.extract_strided_slice %536 {offsets = [0, 384], sizes = [8, 128], strides = [1, 1]} : vector<8x512xf32> to vector<8x128xf32>
    %552 = arith.negf %551 : vector<8x128xf32>
    %553 = math.exp %552 : vector<8x128xf32>
    %cst_300 = arith.constant 1.000000e+00 : f32
    %554 = vector.broadcast %cst_300 : f32 to vector<8x128xf32>
    %555 = arith.addf %554, %553 : vector<8x128xf32>
    %556 = arith.divf %554, %555 : vector<8x128xf32>
    %c0_301 = arith.constant 0 : index
    %c0_302 = arith.constant 0 : index
    %557 = vector.load %arg15[%c0_301, %c0_302] : memref<8x128xf32, #tpu.memory_space<vmem>>, vector<8x128xf32>
    %558 = arith.mulf %548, %557 : vector<8x128xf32>
    %559 = arith.mulf %542, %550 : vector<8x128xf32>
    %560 = arith.addf %558, %559 : vector<8x128xf32>
    %561 = math.tanh %560 : vector<8x128xf32>
    %562 = arith.mulf %556, %561 : vector<8x128xf32>
    %c0_303 = arith.constant 0 : index
    %c0_304 = arith.constant 0 : index
    %563 = vector.load %arg15[%c0_303, %c0_304] : memref<8x128xf32, #tpu.memory_space<vmem>>, vector<8x128xf32>
    tpu.vector_store %arg15[%c0_303, %c0_304], %560 {strides = array<i32>} : memref<8x128xf32, #tpu.memory_space<vmem>>, vector<8x128xf32>,
    %c0_305 = arith.constant 0 : index
    %c0_306 = arith.constant 0 : index
    %564 = vector.load %arg14[%c0_305, %c0_306] : memref<8x128xf32, #tpu.memory_space<vmem>>, vector<8x128xf32>
    tpu.vector_store %arg14[%c0_305, %c0_306], %562 {strides = array<i32>} : memref<8x128xf32, #tpu.memory_space<vmem>>, vector<8x128xf32>,
    %c56_307 = arith.constant 56 : index
    %c0_308 = arith.constant 0 : index
    %565 = vector.load %arg16[%c56_307, %c0_308] : memref<64x128xf32, #tpu.memory_space<vmem>>, vector<8x128xf32>
    tpu.vector_store %arg16[%c56_307, %c0_308], %562 {strides = array<i32>} : memref<64x128xf32, #tpu.memory_space<vmem>>, vector<8x128xf32>,
    %c0_309 = arith.constant 0 : index
    %c0_310 = arith.constant 0 : index
    %566 = vector.load %arg16[%c0_309, %c0_310] : memref<64x128xf32, #tpu.memory_space<vmem>>, vector<64x128xf32>
    %c0_311 = arith.constant 0 : index
    %c0_312 = arith.constant 0 : index
    %567 = vector.load %arg8[%c0_311, %c0_312] : memref<128x512xf32, #tpu.memory_space<vmem>>, vector<128x512xf32>
    %cst_313 = arith.constant dense<0.000000e+00> : vector<64x512xf32>
    %568 = tpu.matmul %566, %567, %cst_313 {dimension_numbers = #tpu.dot_dimension_numbers<[1], [0], [0], [1], [0, 0, 1, 1], [], []>} : vector<64x128xf32>, vector<128x512xf32>, vector<64x512xf32> -> vector<64x512xf32>
    %c0_314 = arith.constant 0 : index
    %c0_315 = arith.constant 0 : index
    %569 = vector.load %arg10[%c0_314, %c0_315] : memref<1x512xf32, #tpu.memory_space<vmem>>, vector<1x512xf32>
    %570 = vector.broadcast %569 : vector<1x512xf32> to vector<64x512xf32>
    %571 = arith.addf %568, %570 : vector<64x512xf32>
    %c0_316 = arith.constant 0 : index
    %c0_317 = arith.constant 0 : index
    %572 = vector.load %arg17[%c0_316, %c0_317] : memref<64x512xf32, #tpu.memory_space<vmem>>, vector<64x512xf32>
    tpu.vector_store %arg17[%c0_316, %c0_317], %571 {strides = array<i32>} : memref<64x512xf32, #tpu.memory_space<vmem>>, vector<64x512xf32>,
    %cst_318 = arith.constant 0.000000e+00 : f32
    %573 = vector.broadcast %cst_318 : f32 to vector<8x128xf32>
    %c0_319 = arith.constant 0 : index
    %c0_320 = arith.constant 0 : index
    %574 = vector.load %arg14[%c0_319, %c0_320] : memref<8x128xf32, #tpu.memory_space<vmem>>, vector<8x128xf32>
    tpu.vector_store %arg14[%c0_319, %c0_320], %573 {strides = array<i32>} : memref<8x128xf32, #tpu.memory_space<vmem>>, vector<8x128xf32>,
    %cst_321 = arith.constant 0.000000e+00 : f32
    %575 = vector.broadcast %cst_321 : f32 to vector<8x128xf32>
    %c0_322 = arith.constant 0 : index
    %c0_323 = arith.constant 0 : index
    %576 = vector.load %arg15[%c0_322, %c0_323] : memref<8x128xf32, #tpu.memory_space<vmem>>, vector<8x128xf32>
    tpu.vector_store %arg15[%c0_322, %c0_323], %575 {strides = array<i32>} : memref<8x128xf32, #tpu.memory_space<vmem>>, vector<8x128xf32>,
    %c0_324 = arith.constant 0 : index
    %c0_325 = arith.constant 0 : index
    %577 = vector.load %arg17[%c0_324, %c0_325] : memref<64x512xf32, #tpu.memory_space<vmem>>, vector<8x512xf32>
    %c0_326 = arith.constant 0 : index
    %c0_327 = arith.constant 0 : index
    %578 = vector.load %arg14[%c0_326, %c0_327] : memref<8x128xf32, #tpu.memory_space<vmem>>, vector<8x128xf32>
    %c0_328 = arith.constant 0 : index
    %c0_329 = arith.constant 0 : index
    %579 = vector.load %arg9[%c0_328, %c0_329] : memref<128x512xf32, #tpu.memory_space<vmem>>, vector<128x512xf32>
    %cst_330 = arith.constant dense<0.000000e+00> : vector<8x512xf32>
    %580 = tpu.matmul %578, %579, %cst_330 {dimension_numbers = #tpu.dot_dimension_numbers<[1], [0], [0], [1], [0, 0, 1, 1], [], []>} : vector<8x128xf32>, vector<128x512xf32>, vector<8x512xf32> -> vector<8x512xf32>
    %581 = arith.addf %577, %580 : vector<8x512xf32>
    %582 = vector.extract_strided_slice %581 {offsets = [0, 0], sizes = [8, 128], strides = [1, 1]} : vector<8x512xf32> to vector<8x128xf32>
    %583 = arith.negf %582 : vector<8x128xf32>
    %584 = math.exp %583 : vector<8x128xf32>
    %cst_331 = arith.constant 1.000000e+00 : f32
    %585 = vector.broadcast %cst_331 : f32 to vector<8x128xf32>
    %586 = arith.addf %585, %584 : vector<8x128xf32>
    %587 = arith.divf %585, %586 : vector<8x128xf32>
    %588 = vector.extract_strided_slice %581 {offsets = [0, 128], sizes = [8, 128], strides = [1, 1]} : vector<8x512xf32> to vector<8x128xf32>
    %589 = arith.negf %588 : vector<8x128xf32>
    %590 = math.exp %589 : vector<8x128xf32>
    %cst_332 = arith.constant 1.000000e+00 : f32
    %591 = vector.broadcast %cst_332 : f32 to vector<8x128xf32>
    %592 = arith.addf %591, %590 : vector<8x128xf32>
    %593 = arith.divf %591, %592 : vector<8x128xf32>
    %594 = vector.extract_strided_slice %581 {offsets = [0, 256], sizes = [8, 128], strides = [1, 1]} : vector<8x512xf32> to vector<8x128xf32>
    %595 = math.tanh %594 : vector<8x128xf32>
    %596 = vector.extract_strided_slice %581 {offsets = [0, 384], sizes = [8, 128], strides = [1, 1]} : vector<8x512xf32> to vector<8x128xf32>
    %597 = arith.negf %596 : vector<8x128xf32>
    %598 = math.exp %597 : vector<8x128xf32>
    %cst_333 = arith.constant 1.000000e+00 : f32
    %599 = vector.broadcast %cst_333 : f32 to vector<8x128xf32>
    %600 = arith.addf %599, %598 : vector<8x128xf32>
    %601 = arith.divf %599, %600 : vector<8x128xf32>
    %c0_334 = arith.constant 0 : index
    %c0_335 = arith.constant 0 : index
    %602 = vector.load %arg15[%c0_334, %c0_335] : memref<8x128xf32, #tpu.memory_space<vmem>>, vector<8x128xf32>
    %603 = arith.mulf %593, %602 : vector<8x128xf32>
    %604 = arith.mulf %587, %595 : vector<8x128xf32>
    %605 = arith.addf %603, %604 : vector<8x128xf32>
    %606 = math.tanh %605 : vector<8x128xf32>
    %607 = arith.mulf %601, %606 : vector<8x128xf32>
    %c0_336 = arith.constant 0 : index
    %c0_337 = arith.constant 0 : index
    %608 = vector.load %arg15[%c0_336, %c0_337] : memref<8x128xf32, #tpu.memory_space<vmem>>, vector<8x128xf32>
    tpu.vector_store %arg15[%c0_336, %c0_337], %605 {strides = array<i32>} : memref<8x128xf32, #tpu.memory_space<vmem>>, vector<8x128xf32>,
    %c0_338 = arith.constant 0 : index
    %c0_339 = arith.constant 0 : index
    %609 = vector.load %arg14[%c0_338, %c0_339] : memref<8x128xf32, #tpu.memory_space<vmem>>, vector<8x128xf32>
    tpu.vector_store %arg14[%c0_338, %c0_339], %607 {strides = array<i32>} : memref<8x128xf32, #tpu.memory_space<vmem>>, vector<8x128xf32>,
    %c0_340 = arith.constant 0 : index
    %c0_341 = arith.constant 0 : index
    %610 = vector.load %arg16[%c0_340, %c0_341] : memref<64x128xf32, #tpu.memory_space<vmem>>, vector<8x128xf32>
    tpu.vector_store %arg16[%c0_340, %c0_341], %607 {strides = array<i32>} : memref<64x128xf32, #tpu.memory_space<vmem>>, vector<8x128xf32>,
    %c8_342 = arith.constant 8 : index
    %c0_343 = arith.constant 0 : index
    %611 = vector.load %arg17[%c8_342, %c0_343] : memref<64x512xf32, #tpu.memory_space<vmem>>, vector<8x512xf32>
    %c0_344 = arith.constant 0 : index
    %c0_345 = arith.constant 0 : index
    %612 = vector.load %arg14[%c0_344, %c0_345] : memref<8x128xf32, #tpu.memory_space<vmem>>, vector<8x128xf32>
    %c0_346 = arith.constant 0 : index
    %c0_347 = arith.constant 0 : index
    %613 = vector.load %arg9[%c0_346, %c0_347] : memref<128x512xf32, #tpu.memory_space<vmem>>, vector<128x512xf32>
    %cst_348 = arith.constant dense<0.000000e+00> : vector<8x512xf32>
    %614 = tpu.matmul %612, %613, %cst_348 {dimension_numbers = #tpu.dot_dimension_numbers<[1], [0], [0], [1], [0, 0, 1, 1], [], []>} : vector<8x128xf32>, vector<128x512xf32>, vector<8x512xf32> -> vector<8x512xf32>
    %615 = arith.addf %611, %614 : vector<8x512xf32>
    %616 = vector.extract_strided_slice %615 {offsets = [0, 0], sizes = [8, 128], strides = [1, 1]} : vector<8x512xf32> to vector<8x128xf32>
    %617 = arith.negf %616 : vector<8x128xf32>
    %618 = math.exp %617 : vector<8x128xf32>
    %cst_349 = arith.constant 1.000000e+00 : f32
    %619 = vector.broadcast %cst_349 : f32 to vector<8x128xf32>
    %620 = arith.addf %619, %618 : vector<8x128xf32>
    %621 = arith.divf %619, %620 : vector<8x128xf32>
    %622 = vector.extract_strided_slice %615 {offsets = [0, 128], sizes = [8, 128], strides = [1, 1]} : vector<8x512xf32> to vector<8x128xf32>
    %623 = arith.negf %622 : vector<8x128xf32>
    %624 = math.exp %623 : vector<8x128xf32>
    %cst_350 = arith.constant 1.000000e+00 : f32
    %625 = vector.broadcast %cst_350 : f32 to vector<8x128xf32>
    %626 = arith.addf %625, %624 : vector<8x128xf32>
    %627 = arith.divf %625, %626 : vector<8x128xf32>
    %628 = vector.extract_strided_slice %615 {offsets = [0, 256], sizes = [8, 128], strides = [1, 1]} : vector<8x512xf32> to vector<8x128xf32>
    %629 = math.tanh %628 : vector<8x128xf32>
    %630 = vector.extract_strided_slice %615 {offsets = [0, 384], sizes = [8, 128], strides = [1, 1]} : vector<8x512xf32> to vector<8x128xf32>
    %631 = arith.negf %630 : vector<8x128xf32>
    %632 = math.exp %631 : vector<8x128xf32>
    %cst_351 = arith.constant 1.000000e+00 : f32
    %633 = vector.broadcast %cst_351 : f32 to vector<8x128xf32>
    %634 = arith.addf %633, %632 : vector<8x128xf32>
    %635 = arith.divf %633, %634 : vector<8x128xf32>
    %c0_352 = arith.constant 0 : index
    %c0_353 = arith.constant 0 : index
    %636 = vector.load %arg15[%c0_352, %c0_353] : memref<8x128xf32, #tpu.memory_space<vmem>>, vector<8x128xf32>
    %637 = arith.mulf %627, %636 : vector<8x128xf32>
    %638 = arith.mulf %621, %629 : vector<8x128xf32>
    %639 = arith.addf %637, %638 : vector<8x128xf32>
    %640 = math.tanh %639 : vector<8x128xf32>
    %641 = arith.mulf %635, %640 : vector<8x128xf32>
    %c0_354 = arith.constant 0 : index
    %c0_355 = arith.constant 0 : index
    %642 = vector.load %arg15[%c0_354, %c0_355] : memref<8x128xf32, #tpu.memory_space<vmem>>, vector<8x128xf32>
    tpu.vector_store %arg15[%c0_354, %c0_355], %639 {strides = array<i32>} : memref<8x128xf32, #tpu.memory_space<vmem>>, vector<8x128xf32>,
    %c0_356 = arith.constant 0 : index
    %c0_357 = arith.constant 0 : index
    %643 = vector.load %arg14[%c0_356, %c0_357] : memref<8x128xf32, #tpu.memory_space<vmem>>, vector<8x128xf32>
    tpu.vector_store %arg14[%c0_356, %c0_357], %641 {strides = array<i32>} : memref<8x128xf32, #tpu.memory_space<vmem>>, vector<8x128xf32>,
    %c8_358 = arith.constant 8 : index
    %c0_359 = arith.constant 0 : index
    %644 = vector.load %arg16[%c8_358, %c0_359] : memref<64x128xf32, #tpu.memory_space<vmem>>, vector<8x128xf32>
    tpu.vector_store %arg16[%c8_358, %c0_359], %641 {strides = array<i32>} : memref<64x128xf32, #tpu.memory_space<vmem>>, vector<8x128xf32>,
    %c16_360 = arith.constant 16 : index
    %c0_361 = arith.constant 0 : index
    %645 = vector.load %arg17[%c16_360, %c0_361] : memref<64x512xf32, #tpu.memory_space<vmem>>, vector<8x512xf32>
    %c0_362 = arith.constant 0 : index
    %c0_363 = arith.constant 0 : index
    %646 = vector.load %arg14[%c0_362, %c0_363] : memref<8x128xf32, #tpu.memory_space<vmem>>, vector<8x128xf32>
    %c0_364 = arith.constant 0 : index
    %c0_365 = arith.constant 0 : index
    %647 = vector.load %arg9[%c0_364, %c0_365] : memref<128x512xf32, #tpu.memory_space<vmem>>, vector<128x512xf32>
    %cst_366 = arith.constant dense<0.000000e+00> : vector<8x512xf32>
    %648 = tpu.matmul %646, %647, %cst_366 {dimension_numbers = #tpu.dot_dimension_numbers<[1], [0], [0], [1], [0, 0, 1, 1], [], []>} : vector<8x128xf32>, vector<128x512xf32>, vector<8x512xf32> -> vector<8x512xf32>
    %649 = arith.addf %645, %648 : vector<8x512xf32>
    %650 = vector.extract_strided_slice %649 {offsets = [0, 0], sizes = [8, 128], strides = [1, 1]} : vector<8x512xf32> to vector<8x128xf32>
    %651 = arith.negf %650 : vector<8x128xf32>
    %652 = math.exp %651 : vector<8x128xf32>
    %cst_367 = arith.constant 1.000000e+00 : f32
    %653 = vector.broadcast %cst_367 : f32 to vector<8x128xf32>
    %654 = arith.addf %653, %652 : vector<8x128xf32>
    %655 = arith.divf %653, %654 : vector<8x128xf32>
    %656 = vector.extract_strided_slice %649 {offsets = [0, 128], sizes = [8, 128], strides = [1, 1]} : vector<8x512xf32> to vector<8x128xf32>
    %657 = arith.negf %656 : vector<8x128xf32>
    %658 = math.exp %657 : vector<8x128xf32>
    %cst_368 = arith.constant 1.000000e+00 : f32
    %659 = vector.broadcast %cst_368 : f32 to vector<8x128xf32>
    %660 = arith.addf %659, %658 : vector<8x128xf32>
    %661 = arith.divf %659, %660 : vector<8x128xf32>
    %662 = vector.extract_strided_slice %649 {offsets = [0, 256], sizes = [8, 128], strides = [1, 1]} : vector<8x512xf32> to vector<8x128xf32>
    %663 = math.tanh %662 : vector<8x128xf32>
    %664 = vector.extract_strided_slice %649 {offsets = [0, 384], sizes = [8, 128], strides = [1, 1]} : vector<8x512xf32> to vector<8x128xf32>
    %665 = arith.negf %664 : vector<8x128xf32>
    %666 = math.exp %665 : vector<8x128xf32>
    %cst_369 = arith.constant 1.000000e+00 : f32
    %667 = vector.broadcast %cst_369 : f32 to vector<8x128xf32>
    %668 = arith.addf %667, %666 : vector<8x128xf32>
    %669 = arith.divf %667, %668 : vector<8x128xf32>
    %c0_370 = arith.constant 0 : index
    %c0_371 = arith.constant 0 : index
    %670 = vector.load %arg15[%c0_370, %c0_371] : memref<8x128xf32, #tpu.memory_space<vmem>>, vector<8x128xf32>
    %671 = arith.mulf %661, %670 : vector<8x128xf32>
    %672 = arith.mulf %655, %663 : vector<8x128xf32>
    %673 = arith.addf %671, %672 : vector<8x128xf32>
    %674 = math.tanh %673 : vector<8x128xf32>
    %675 = arith.mulf %669, %674 : vector<8x128xf32>
    %c0_372 = arith.constant 0 : index
    %c0_373 = arith.constant 0 : index
    %676 = vector.load %arg15[%c0_372, %c0_373] : memref<8x128xf32, #tpu.memory_space<vmem>>, vector<8x128xf32>
    tpu.vector_store %arg15[%c0_372, %c0_373], %673 {strides = array<i32>} : memref<8x128xf32, #tpu.memory_space<vmem>>, vector<8x128xf32>,
    %c0_374 = arith.constant 0 : index
    %c0_375 = arith.constant 0 : index
    %677 = vector.load %arg14[%c0_374, %c0_375] : memref<8x128xf32, #tpu.memory_space<vmem>>, vector<8x128xf32>
    tpu.vector_store %arg14[%c0_374, %c0_375], %675 {strides = array<i32>} : memref<8x128xf32, #tpu.memory_space<vmem>>, vector<8x128xf32>,
    %c16_376 = arith.constant 16 : index
    %c0_377 = arith.constant 0 : index
    %678 = vector.load %arg16[%c16_376, %c0_377] : memref<64x128xf32, #tpu.memory_space<vmem>>, vector<8x128xf32>
    tpu.vector_store %arg16[%c16_376, %c0_377], %675 {strides = array<i32>} : memref<64x128xf32, #tpu.memory_space<vmem>>, vector<8x128xf32>,
    %c24_378 = arith.constant 24 : index
    %c0_379 = arith.constant 0 : index
    %679 = vector.load %arg17[%c24_378, %c0_379] : memref<64x512xf32, #tpu.memory_space<vmem>>, vector<8x512xf32>
    %c0_380 = arith.constant 0 : index
    %c0_381 = arith.constant 0 : index
    %680 = vector.load %arg14[%c0_380, %c0_381] : memref<8x128xf32, #tpu.memory_space<vmem>>, vector<8x128xf32>
    %c0_382 = arith.constant 0 : index
    %c0_383 = arith.constant 0 : index
    %681 = vector.load %arg9[%c0_382, %c0_383] : memref<128x512xf32, #tpu.memory_space<vmem>>, vector<128x512xf32>
    %cst_384 = arith.constant dense<0.000000e+00> : vector<8x512xf32>
    %682 = tpu.matmul %680, %681, %cst_384 {dimension_numbers = #tpu.dot_dimension_numbers<[1], [0], [0], [1], [0, 0, 1, 1], [], []>} : vector<8x128xf32>, vector<128x512xf32>, vector<8x512xf32> -> vector<8x512xf32>
    %683 = arith.addf %679, %682 : vector<8x512xf32>
    %684 = vector.extract_strided_slice %683 {offsets = [0, 0], sizes = [8, 128], strides = [1, 1]} : vector<8x512xf32> to vector<8x128xf32>
    %685 = arith.negf %684 : vector<8x128xf32>
    %686 = math.exp %685 : vector<8x128xf32>
    %cst_385 = arith.constant 1.000000e+00 : f32
    %687 = vector.broadcast %cst_385 : f32 to vector<8x128xf32>
    %688 = arith.addf %687, %686 : vector<8x128xf32>
    %689 = arith.divf %687, %688 : vector<8x128xf32>
    %690 = vector.extract_strided_slice %683 {offsets = [0, 128], sizes = [8, 128], strides = [1, 1]} : vector<8x512xf32> to vector<8x128xf32>
    %691 = arith.negf %690 : vector<8x128xf32>
    %692 = math.exp %691 : vector<8x128xf32>
    %cst_386 = arith.constant 1.000000e+00 : f32
    %693 = vector.broadcast %cst_386 : f32 to vector<8x128xf32>
    %694 = arith.addf %693, %692 : vector<8x128xf32>
    %695 = arith.divf %693, %694 : vector<8x128xf32>
    %696 = vector.extract_strided_slice %683 {offsets = [0, 256], sizes = [8, 128], strides = [1, 1]} : vector<8x512xf32> to vector<8x128xf32>
    %697 = math.tanh %696 : vector<8x128xf32>
    %698 = vector.extract_strided_slice %683 {offsets = [0, 384], sizes = [8, 128], strides = [1, 1]} : vector<8x512xf32> to vector<8x128xf32>
    %699 = arith.negf %698 : vector<8x128xf32>
    %700 = math.exp %699 : vector<8x128xf32>
    %cst_387 = arith.constant 1.000000e+00 : f32
    %701 = vector.broadcast %cst_387 : f32 to vector<8x128xf32>
    %702 = arith.addf %701, %700 : vector<8x128xf32>
    %703 = arith.divf %701, %702 : vector<8x128xf32>
    %c0_388 = arith.constant 0 : index
    %c0_389 = arith.constant 0 : index
    %704 = vector.load %arg15[%c0_388, %c0_389] : memref<8x128xf32, #tpu.memory_space<vmem>>, vector<8x128xf32>
    %705 = arith.mulf %695, %704 : vector<8x128xf32>
    %706 = arith.mulf %689, %697 : vector<8x128xf32>
    %707 = arith.addf %705, %706 : vector<8x128xf32>
    %708 = math.tanh %707 : vector<8x128xf32>
    %709 = arith.mulf %703, %708 : vector<8x128xf32>
    %c0_390 = arith.constant 0 : index
    %c0_391 = arith.constant 0 : index
    %710 = vector.load %arg15[%c0_390, %c0_391] : memref<8x128xf32, #tpu.memory_space<vmem>>, vector<8x128xf32>
    tpu.vector_store %arg15[%c0_390, %c0_391], %707 {strides = array<i32>} : memref<8x128xf32, #tpu.memory_space<vmem>>, vector<8x128xf32>,
    %c0_392 = arith.constant 0 : index
    %c0_393 = arith.constant 0 : index
    %711 = vector.load %arg14[%c0_392, %c0_393] : memref<8x128xf32, #tpu.memory_space<vmem>>, vector<8x128xf32>
    tpu.vector_store %arg14[%c0_392, %c0_393], %709 {strides = array<i32>} : memref<8x128xf32, #tpu.memory_space<vmem>>, vector<8x128xf32>,
    %c24_394 = arith.constant 24 : index
    %c0_395 = arith.constant 0 : index
    %712 = vector.load %arg16[%c24_394, %c0_395] : memref<64x128xf32, #tpu.memory_space<vmem>>, vector<8x128xf32>
    tpu.vector_store %arg16[%c24_394, %c0_395], %709 {strides = array<i32>} : memref<64x128xf32, #tpu.memory_space<vmem>>, vector<8x128xf32>,
    %c32_396 = arith.constant 32 : index
    %c0_397 = arith.constant 0 : index
    %713 = vector.load %arg17[%c32_396, %c0_397] : memref<64x512xf32, #tpu.memory_space<vmem>>, vector<8x512xf32>
    %c0_398 = arith.constant 0 : index
    %c0_399 = arith.constant 0 : index
    %714 = vector.load %arg14[%c0_398, %c0_399] : memref<8x128xf32, #tpu.memory_space<vmem>>, vector<8x128xf32>
    %c0_400 = arith.constant 0 : index
    %c0_401 = arith.constant 0 : index
    %715 = vector.load %arg9[%c0_400, %c0_401] : memref<128x512xf32, #tpu.memory_space<vmem>>, vector<128x512xf32>
    %cst_402 = arith.constant dense<0.000000e+00> : vector<8x512xf32>
    %716 = tpu.matmul %714, %715, %cst_402 {dimension_numbers = #tpu.dot_dimension_numbers<[1], [0], [0], [1], [0, 0, 1, 1], [], []>} : vector<8x128xf32>, vector<128x512xf32>, vector<8x512xf32> -> vector<8x512xf32>
    %717 = arith.addf %713, %716 : vector<8x512xf32>
    %718 = vector.extract_strided_slice %717 {offsets = [0, 0], sizes = [8, 128], strides = [1, 1]} : vector<8x512xf32> to vector<8x128xf32>
    %719 = arith.negf %718 : vector<8x128xf32>
    %720 = math.exp %719 : vector<8x128xf32>
    %cst_403 = arith.constant 1.000000e+00 : f32
    %721 = vector.broadcast %cst_403 : f32 to vector<8x128xf32>
    %722 = arith.addf %721, %720 : vector<8x128xf32>
    %723 = arith.divf %721, %722 : vector<8x128xf32>
    %724 = vector.extract_strided_slice %717 {offsets = [0, 128], sizes = [8, 128], strides = [1, 1]} : vector<8x512xf32> to vector<8x128xf32>
    %725 = arith.negf %724 : vector<8x128xf32>
    %726 = math.exp %725 : vector<8x128xf32>
    %cst_404 = arith.constant 1.000000e+00 : f32
    %727 = vector.broadcast %cst_404 : f32 to vector<8x128xf32>
    %728 = arith.addf %727, %726 : vector<8x128xf32>
    %729 = arith.divf %727, %728 : vector<8x128xf32>
    %730 = vector.extract_strided_slice %717 {offsets = [0, 256], sizes = [8, 128], strides = [1, 1]} : vector<8x512xf32> to vector<8x128xf32>
    %731 = math.tanh %730 : vector<8x128xf32>
    %732 = vector.extract_strided_slice %717 {offsets = [0, 384], sizes = [8, 128], strides = [1, 1]} : vector<8x512xf32> to vector<8x128xf32>
    %733 = arith.negf %732 : vector<8x128xf32>
    %734 = math.exp %733 : vector<8x128xf32>
    %cst_405 = arith.constant 1.000000e+00 : f32
    %735 = vector.broadcast %cst_405 : f32 to vector<8x128xf32>
    %736 = arith.addf %735, %734 : vector<8x128xf32>
    %737 = arith.divf %735, %736 : vector<8x128xf32>
    %c0_406 = arith.constant 0 : index
    %c0_407 = arith.constant 0 : index
    %738 = vector.load %arg15[%c0_406, %c0_407] : memref<8x128xf32, #tpu.memory_space<vmem>>, vector<8x128xf32>
    %739 = arith.mulf %729, %738 : vector<8x128xf32>
    %740 = arith.mulf %723, %731 : vector<8x128xf32>
    %741 = arith.addf %739, %740 : vector<8x128xf32>
    %742 = math.tanh %741 : vector<8x128xf32>
    %743 = arith.mulf %737, %742 : vector<8x128xf32>
    %c0_408 = arith.constant 0 : index
    %c0_409 = arith.constant 0 : index
    %744 = vector.load %arg15[%c0_408, %c0_409] : memref<8x128xf32, #tpu.memory_space<vmem>>, vector<8x128xf32>
    tpu.vector_store %arg15[%c0_408, %c0_409], %741 {strides = array<i32>} : memref<8x128xf32, #tpu.memory_space<vmem>>, vector<8x128xf32>,
    %c0_410 = arith.constant 0 : index
    %c0_411 = arith.constant 0 : index
    %745 = vector.load %arg14[%c0_410, %c0_411] : memref<8x128xf32, #tpu.memory_space<vmem>>, vector<8x128xf32>
    tpu.vector_store %arg14[%c0_410, %c0_411], %743 {strides = array<i32>} : memref<8x128xf32, #tpu.memory_space<vmem>>, vector<8x128xf32>,
    %c32_412 = arith.constant 32 : index
    %c0_413 = arith.constant 0 : index
    %746 = vector.load %arg16[%c32_412, %c0_413] : memref<64x128xf32, #tpu.memory_space<vmem>>, vector<8x128xf32>
    tpu.vector_store %arg16[%c32_412, %c0_413], %743 {strides = array<i32>} : memref<64x128xf32, #tpu.memory_space<vmem>>, vector<8x128xf32>,
    %c40_414 = arith.constant 40 : index
    %c0_415 = arith.constant 0 : index
    %747 = vector.load %arg17[%c40_414, %c0_415] : memref<64x512xf32, #tpu.memory_space<vmem>>, vector<8x512xf32>
    %c0_416 = arith.constant 0 : index
    %c0_417 = arith.constant 0 : index
    %748 = vector.load %arg14[%c0_416, %c0_417] : memref<8x128xf32, #tpu.memory_space<vmem>>, vector<8x128xf32>
    %c0_418 = arith.constant 0 : index
    %c0_419 = arith.constant 0 : index
    %749 = vector.load %arg9[%c0_418, %c0_419] : memref<128x512xf32, #tpu.memory_space<vmem>>, vector<128x512xf32>
    %cst_420 = arith.constant dense<0.000000e+00> : vector<8x512xf32>
    %750 = tpu.matmul %748, %749, %cst_420 {dimension_numbers = #tpu.dot_dimension_numbers<[1], [0], [0], [1], [0, 0, 1, 1], [], []>} : vector<8x128xf32>, vector<128x512xf32>, vector<8x512xf32> -> vector<8x512xf32>
    %751 = arith.addf %747, %750 : vector<8x512xf32>
    %752 = vector.extract_strided_slice %751 {offsets = [0, 0], sizes = [8, 128], strides = [1, 1]} : vector<8x512xf32> to vector<8x128xf32>
    %753 = arith.negf %752 : vector<8x128xf32>
    %754 = math.exp %753 : vector<8x128xf32>
    %cst_421 = arith.constant 1.000000e+00 : f32
    %755 = vector.broadcast %cst_421 : f32 to vector<8x128xf32>
    %756 = arith.addf %755, %754 : vector<8x128xf32>
    %757 = arith.divf %755, %756 : vector<8x128xf32>
    %758 = vector.extract_strided_slice %751 {offsets = [0, 128], sizes = [8, 128], strides = [1, 1]} : vector<8x512xf32> to vector<8x128xf32>
    %759 = arith.negf %758 : vector<8x128xf32>
    %760 = math.exp %759 : vector<8x128xf32>
    %cst_422 = arith.constant 1.000000e+00 : f32
    %761 = vector.broadcast %cst_422 : f32 to vector<8x128xf32>
    %762 = arith.addf %761, %760 : vector<8x128xf32>
    %763 = arith.divf %761, %762 : vector<8x128xf32>
    %764 = vector.extract_strided_slice %751 {offsets = [0, 256], sizes = [8, 128], strides = [1, 1]} : vector<8x512xf32> to vector<8x128xf32>
    %765 = math.tanh %764 : vector<8x128xf32>
    %766 = vector.extract_strided_slice %751 {offsets = [0, 384], sizes = [8, 128], strides = [1, 1]} : vector<8x512xf32> to vector<8x128xf32>
    %767 = arith.negf %766 : vector<8x128xf32>
    %768 = math.exp %767 : vector<8x128xf32>
    %cst_423 = arith.constant 1.000000e+00 : f32
    %769 = vector.broadcast %cst_423 : f32 to vector<8x128xf32>
    %770 = arith.addf %769, %768 : vector<8x128xf32>
    %771 = arith.divf %769, %770 : vector<8x128xf32>
    %c0_424 = arith.constant 0 : index
    %c0_425 = arith.constant 0 : index
    %772 = vector.load %arg15[%c0_424, %c0_425] : memref<8x128xf32, #tpu.memory_space<vmem>>, vector<8x128xf32>
    %773 = arith.mulf %763, %772 : vector<8x128xf32>
    %774 = arith.mulf %757, %765 : vector<8x128xf32>
    %775 = arith.addf %773, %774 : vector<8x128xf32>
    %776 = math.tanh %775 : vector<8x128xf32>
    %777 = arith.mulf %771, %776 : vector<8x128xf32>
    %c0_426 = arith.constant 0 : index
    %c0_427 = arith.constant 0 : index
    %778 = vector.load %arg15[%c0_426, %c0_427] : memref<8x128xf32, #tpu.memory_space<vmem>>, vector<8x128xf32>
    tpu.vector_store %arg15[%c0_426, %c0_427], %775 {strides = array<i32>} : memref<8x128xf32, #tpu.memory_space<vmem>>, vector<8x128xf32>,
    %c0_428 = arith.constant 0 : index
    %c0_429 = arith.constant 0 : index
    %779 = vector.load %arg14[%c0_428, %c0_429] : memref<8x128xf32, #tpu.memory_space<vmem>>, vector<8x128xf32>
    tpu.vector_store %arg14[%c0_428, %c0_429], %777 {strides = array<i32>} : memref<8x128xf32, #tpu.memory_space<vmem>>, vector<8x128xf32>,
    %c40_430 = arith.constant 40 : index
    %c0_431 = arith.constant 0 : index
    %780 = vector.load %arg16[%c40_430, %c0_431] : memref<64x128xf32, #tpu.memory_space<vmem>>, vector<8x128xf32>
    tpu.vector_store %arg16[%c40_430, %c0_431], %777 {strides = array<i32>} : memref<64x128xf32, #tpu.memory_space<vmem>>, vector<8x128xf32>,
    %c48_432 = arith.constant 48 : index
    %c0_433 = arith.constant 0 : index
    %781 = vector.load %arg17[%c48_432, %c0_433] : memref<64x512xf32, #tpu.memory_space<vmem>>, vector<8x512xf32>
    %c0_434 = arith.constant 0 : index
    %c0_435 = arith.constant 0 : index
    %782 = vector.load %arg14[%c0_434, %c0_435] : memref<8x128xf32, #tpu.memory_space<vmem>>, vector<8x128xf32>
    %c0_436 = arith.constant 0 : index
    %c0_437 = arith.constant 0 : index
    %783 = vector.load %arg9[%c0_436, %c0_437] : memref<128x512xf32, #tpu.memory_space<vmem>>, vector<128x512xf32>
    %cst_438 = arith.constant dense<0.000000e+00> : vector<8x512xf32>
    %784 = tpu.matmul %782, %783, %cst_438 {dimension_numbers = #tpu.dot_dimension_numbers<[1], [0], [0], [1], [0, 0, 1, 1], [], []>} : vector<8x128xf32>, vector<128x512xf32>, vector<8x512xf32> -> vector<8x512xf32>
    %785 = arith.addf %781, %784 : vector<8x512xf32>
    %786 = vector.extract_strided_slice %785 {offsets = [0, 0], sizes = [8, 128], strides = [1, 1]} : vector<8x512xf32> to vector<8x128xf32>
    %787 = arith.negf %786 : vector<8x128xf32>
    %788 = math.exp %787 : vector<8x128xf32>
    %cst_439 = arith.constant 1.000000e+00 : f32
    %789 = vector.broadcast %cst_439 : f32 to vector<8x128xf32>
    %790 = arith.addf %789, %788 : vector<8x128xf32>
    %791 = arith.divf %789, %790 : vector<8x128xf32>
    %792 = vector.extract_strided_slice %785 {offsets = [0, 128], sizes = [8, 128], strides = [1, 1]} : vector<8x512xf32> to vector<8x128xf32>
    %793 = arith.negf %792 : vector<8x128xf32>
    %794 = math.exp %793 : vector<8x128xf32>
    %cst_440 = arith.constant 1.000000e+00 : f32
    %795 = vector.broadcast %cst_440 : f32 to vector<8x128xf32>
    %796 = arith.addf %795, %794 : vector<8x128xf32>
    %797 = arith.divf %795, %796 : vector<8x128xf32>
    %798 = vector.extract_strided_slice %785 {offsets = [0, 256], sizes = [8, 128], strides = [1, 1]} : vector<8x512xf32> to vector<8x128xf32>
    %799 = math.tanh %798 : vector<8x128xf32>
    %800 = vector.extract_strided_slice %785 {offsets = [0, 384], sizes = [8, 128], strides = [1, 1]} : vector<8x512xf32> to vector<8x128xf32>
    %801 = arith.negf %800 : vector<8x128xf32>
    %802 = math.exp %801 : vector<8x128xf32>
    %cst_441 = arith.constant 1.000000e+00 : f32
    %803 = vector.broadcast %cst_441 : f32 to vector<8x128xf32>
    %804 = arith.addf %803, %802 : vector<8x128xf32>
    %805 = arith.divf %803, %804 : vector<8x128xf32>
    %c0_442 = arith.constant 0 : index
    %c0_443 = arith.constant 0 : index
    %806 = vector.load %arg15[%c0_442, %c0_443] : memref<8x128xf32, #tpu.memory_space<vmem>>, vector<8x128xf32>
    %807 = arith.mulf %797, %806 : vector<8x128xf32>
    %808 = arith.mulf %791, %799 : vector<8x128xf32>
    %809 = arith.addf %807, %808 : vector<8x128xf32>
    %810 = math.tanh %809 : vector<8x128xf32>
    %811 = arith.mulf %805, %810 : vector<8x128xf32>
    %c0_444 = arith.constant 0 : index
    %c0_445 = arith.constant 0 : index
    %812 = vector.load %arg15[%c0_444, %c0_445] : memref<8x128xf32, #tpu.memory_space<vmem>>, vector<8x128xf32>
    tpu.vector_store %arg15[%c0_444, %c0_445], %809 {strides = array<i32>} : memref<8x128xf32, #tpu.memory_space<vmem>>, vector<8x128xf32>,
    %c0_446 = arith.constant 0 : index
    %c0_447 = arith.constant 0 : index
    %813 = vector.load %arg14[%c0_446, %c0_447] : memref<8x128xf32, #tpu.memory_space<vmem>>, vector<8x128xf32>
    tpu.vector_store %arg14[%c0_446, %c0_447], %811 {strides = array<i32>} : memref<8x128xf32, #tpu.memory_space<vmem>>, vector<8x128xf32>,
    %c48_448 = arith.constant 48 : index
    %c0_449 = arith.constant 0 : index
    %814 = vector.load %arg16[%c48_448, %c0_449] : memref<64x128xf32, #tpu.memory_space<vmem>>, vector<8x128xf32>
    tpu.vector_store %arg16[%c48_448, %c0_449], %811 {strides = array<i32>} : memref<64x128xf32, #tpu.memory_space<vmem>>, vector<8x128xf32>,
    %c56_450 = arith.constant 56 : index
    %c0_451 = arith.constant 0 : index
    %815 = vector.load %arg17[%c56_450, %c0_451] : memref<64x512xf32, #tpu.memory_space<vmem>>, vector<8x512xf32>
    %c0_452 = arith.constant 0 : index
    %c0_453 = arith.constant 0 : index
    %816 = vector.load %arg14[%c0_452, %c0_453] : memref<8x128xf32, #tpu.memory_space<vmem>>, vector<8x128xf32>
    %c0_454 = arith.constant 0 : index
    %c0_455 = arith.constant 0 : index
    %817 = vector.load %arg9[%c0_454, %c0_455] : memref<128x512xf32, #tpu.memory_space<vmem>>, vector<128x512xf32>
    %cst_456 = arith.constant dense<0.000000e+00> : vector<8x512xf32>
    %818 = tpu.matmul %816, %817, %cst_456 {dimension_numbers = #tpu.dot_dimension_numbers<[1], [0], [0], [1], [0, 0, 1, 1], [], []>} : vector<8x128xf32>, vector<128x512xf32>, vector<8x512xf32> -> vector<8x512xf32>
    %819 = arith.addf %815, %818 : vector<8x512xf32>
    %820 = vector.extract_strided_slice %819 {offsets = [0, 0], sizes = [8, 128], strides = [1, 1]} : vector<8x512xf32> to vector<8x128xf32>
    %821 = arith.negf %820 : vector<8x128xf32>
    %822 = math.exp %821 : vector<8x128xf32>
    %cst_457 = arith.constant 1.000000e+00 : f32
    %823 = vector.broadcast %cst_457 : f32 to vector<8x128xf32>
    %824 = arith.addf %823, %822 : vector<8x128xf32>
    %825 = arith.divf %823, %824 : vector<8x128xf32>
    %826 = vector.extract_strided_slice %819 {offsets = [0, 128], sizes = [8, 128], strides = [1, 1]} : vector<8x512xf32> to vector<8x128xf32>
    %827 = arith.negf %826 : vector<8x128xf32>
    %828 = math.exp %827 : vector<8x128xf32>
    %cst_458 = arith.constant 1.000000e+00 : f32
    %829 = vector.broadcast %cst_458 : f32 to vector<8x128xf32>
    %830 = arith.addf %829, %828 : vector<8x128xf32>
    %831 = arith.divf %829, %830 : vector<8x128xf32>
    %832 = vector.extract_strided_slice %819 {offsets = [0, 256], sizes = [8, 128], strides = [1, 1]} : vector<8x512xf32> to vector<8x128xf32>
    %833 = math.tanh %832 : vector<8x128xf32>
    %834 = vector.extract_strided_slice %819 {offsets = [0, 384], sizes = [8, 128], strides = [1, 1]} : vector<8x512xf32> to vector<8x128xf32>
    %835 = arith.negf %834 : vector<8x128xf32>
    %836 = math.exp %835 : vector<8x128xf32>
    %cst_459 = arith.constant 1.000000e+00 : f32
    %837 = vector.broadcast %cst_459 : f32 to vector<8x128xf32>
    %838 = arith.addf %837, %836 : vector<8x128xf32>
    %839 = arith.divf %837, %838 : vector<8x128xf32>
    %c0_460 = arith.constant 0 : index
    %c0_461 = arith.constant 0 : index
    %840 = vector.load %arg15[%c0_460, %c0_461] : memref<8x128xf32, #tpu.memory_space<vmem>>, vector<8x128xf32>
    %841 = arith.mulf %831, %840 : vector<8x128xf32>
    %842 = arith.mulf %825, %833 : vector<8x128xf32>
    %843 = arith.addf %841, %842 : vector<8x128xf32>
    %844 = math.tanh %843 : vector<8x128xf32>
    %845 = arith.mulf %839, %844 : vector<8x128xf32>
    %c0_462 = arith.constant 0 : index
    %c0_463 = arith.constant 0 : index
    %846 = vector.load %arg15[%c0_462, %c0_463] : memref<8x128xf32, #tpu.memory_space<vmem>>, vector<8x128xf32>
    tpu.vector_store %arg15[%c0_462, %c0_463], %843 {strides = array<i32>} : memref<8x128xf32, #tpu.memory_space<vmem>>, vector<8x128xf32>,
    %c0_464 = arith.constant 0 : index
    %c0_465 = arith.constant 0 : index
    %847 = vector.load %arg14[%c0_464, %c0_465] : memref<8x128xf32, #tpu.memory_space<vmem>>, vector<8x128xf32>
    tpu.vector_store %arg14[%c0_464, %c0_465], %845 {strides = array<i32>} : memref<8x128xf32, #tpu.memory_space<vmem>>, vector<8x128xf32>,
    %c56_466 = arith.constant 56 : index
    %c0_467 = arith.constant 0 : index
    %848 = vector.load %arg16[%c56_466, %c0_467] : memref<64x128xf32, #tpu.memory_space<vmem>>, vector<8x128xf32>
    tpu.vector_store %arg16[%c56_466, %c0_467], %845 {strides = array<i32>} : memref<64x128xf32, #tpu.memory_space<vmem>>, vector<8x128xf32>,
    %c0_468 = arith.constant 0 : index
    %c0_469 = arith.constant 0 : index
    %849 = vector.load %arg12[%c0_468, %c0_469] : memref<1x128xf32, #tpu.memory_space<vmem>>, vector<1x128xf32>
    %850 = vector.shape_cast %849 : vector<1x128xf32> to vector<1x128xf32>
    %851 = vector.broadcast %850 : vector<1x128xf32> to vector<8x128xf32>
    %c0_470 = arith.constant 0 : index
    %c0_471 = arith.constant 0 : index
    %852 = vector.load %arg16[%c0_470, %c0_471] : memref<64x128xf32, #tpu.memory_space<vmem>>, vector<8x128xf32>
    %c0_472 = arith.constant 0 : index
    %c0_473 = arith.constant 0 : index
    %c0_474 = arith.constant 0 : index
    %853 = vector.load %arg11[%c0_472, %c0_473, %c0_474] : memref<8x128x128xf32, #tpu.memory_space<vmem>>, vector<1x128x128xf32>
    %854 = vector.shape_cast %853 : vector<1x128x128xf32> to vector<128x128xf32>
    %cst_475 = arith.constant dense<0.000000e+00> : vector<8x128xf32>
    %855 = tpu.matmul %852, %854, %cst_475 {dimension_numbers = #tpu.dot_dimension_numbers<[1], [0], [0], [1], [0, 0, 1, 1], [], []>} : vector<8x128xf32>, vector<128x128xf32>, vector<8x128xf32> -> vector<8x128xf32>
    %856 = arith.addf %851, %855 : vector<8x128xf32>
    %c8_476 = arith.constant 8 : index
    %c0_477 = arith.constant 0 : index
    %857 = vector.load %arg16[%c8_476, %c0_477] : memref<64x128xf32, #tpu.memory_space<vmem>>, vector<8x128xf32>
    %c1 = arith.constant 1 : index
    %c0_478 = arith.constant 0 : index
    %c0_479 = arith.constant 0 : index
    %858 = vector.load %arg11[%c1, %c0_478, %c0_479] : memref<8x128x128xf32, #tpu.memory_space<vmem>>, vector<1x128x128xf32>
    %859 = vector.shape_cast %858 : vector<1x128x128xf32> to vector<128x128xf32>
    %cst_480 = arith.constant dense<0.000000e+00> : vector<8x128xf32>
    %860 = tpu.matmul %857, %859, %cst_480 {dimension_numbers = #tpu.dot_dimension_numbers<[1], [0], [0], [1], [0, 0, 1, 1], [], []>} : vector<8x128xf32>, vector<128x128xf32>, vector<8x128xf32> -> vector<8x128xf32>
    %861 = arith.addf %856, %860 : vector<8x128xf32>
    %c16_481 = arith.constant 16 : index
    %c0_482 = arith.constant 0 : index
    %862 = vector.load %arg16[%c16_481, %c0_482] : memref<64x128xf32, #tpu.memory_space<vmem>>, vector<8x128xf32>
    %c2 = arith.constant 2 : index
    %c0_483 = arith.constant 0 : index
    %c0_484 = arith.constant 0 : index
    %863 = vector.load %arg11[%c2, %c0_483, %c0_484] : memref<8x128x128xf32, #tpu.memory_space<vmem>>, vector<1x128x128xf32>
    %864 = vector.shape_cast %863 : vector<1x128x128xf32> to vector<128x128xf32>
    %cst_485 = arith.constant dense<0.000000e+00> : vector<8x128xf32>
    %865 = tpu.matmul %862, %864, %cst_485 {dimension_numbers = #tpu.dot_dimension_numbers<[1], [0], [0], [1], [0, 0, 1, 1], [], []>} : vector<8x128xf32>, vector<128x128xf32>, vector<8x128xf32> -> vector<8x128xf32>
    %866 = arith.addf %861, %865 : vector<8x128xf32>
    %c24_486 = arith.constant 24 : index
    %c0_487 = arith.constant 0 : index
    %867 = vector.load %arg16[%c24_486, %c0_487] : memref<64x128xf32, #tpu.memory_space<vmem>>, vector<8x128xf32>
    %c3 = arith.constant 3 : index
    %c0_488 = arith.constant 0 : index
    %c0_489 = arith.constant 0 : index
    %868 = vector.load %arg11[%c3, %c0_488, %c0_489] : memref<8x128x128xf32, #tpu.memory_space<vmem>>, vector<1x128x128xf32>
    %869 = vector.shape_cast %868 : vector<1x128x128xf32> to vector<128x128xf32>
    %cst_490 = arith.constant dense<0.000000e+00> : vector<8x128xf32>
    %870 = tpu.matmul %867, %869, %cst_490 {dimension_numbers = #tpu.dot_dimension_numbers<[1], [0], [0], [1], [0, 0, 1, 1], [], []>} : vector<8x128xf32>, vector<128x128xf32>, vector<8x128xf32> -> vector<8x128xf32>
    %871 = arith.addf %866, %870 : vector<8x128xf32>
    %c32_491 = arith.constant 32 : index
    %c0_492 = arith.constant 0 : index
    %872 = vector.load %arg16[%c32_491, %c0_492] : memref<64x128xf32, #tpu.memory_space<vmem>>, vector<8x128xf32>
    %c4 = arith.constant 4 : index
    %c0_493 = arith.constant 0 : index
    %c0_494 = arith.constant 0 : index
    %873 = vector.load %arg11[%c4, %c0_493, %c0_494] : memref<8x128x128xf32, #tpu.memory_space<vmem>>, vector<1x128x128xf32>
    %874 = vector.shape_cast %873 : vector<1x128x128xf32> to vector<128x128xf32>
    %cst_495 = arith.constant dense<0.000000e+00> : vector<8x128xf32>
    %875 = tpu.matmul %872, %874, %cst_495 {dimension_numbers = #tpu.dot_dimension_numbers<[1], [0], [0], [1], [0, 0, 1, 1], [], []>} : vector<8x128xf32>, vector<128x128xf32>, vector<8x128xf32> -> vector<8x128xf32>
    %876 = arith.addf %871, %875 : vector<8x128xf32>
    %c40_496 = arith.constant 40 : index
    %c0_497 = arith.constant 0 : index
    %877 = vector.load %arg16[%c40_496, %c0_497] : memref<64x128xf32, #tpu.memory_space<vmem>>, vector<8x128xf32>
    %c5 = arith.constant 5 : index
    %c0_498 = arith.constant 0 : index
    %c0_499 = arith.constant 0 : index
    %878 = vector.load %arg11[%c5, %c0_498, %c0_499] : memref<8x128x128xf32, #tpu.memory_space<vmem>>, vector<1x128x128xf32>
    %879 = vector.shape_cast %878 : vector<1x128x128xf32> to vector<128x128xf32>
    %cst_500 = arith.constant dense<0.000000e+00> : vector<8x128xf32>
    %880 = tpu.matmul %877, %879, %cst_500 {dimension_numbers = #tpu.dot_dimension_numbers<[1], [0], [0], [1], [0, 0, 1, 1], [], []>} : vector<8x128xf32>, vector<128x128xf32>, vector<8x128xf32> -> vector<8x128xf32>
    %881 = arith.addf %876, %880 : vector<8x128xf32>
    %c48_501 = arith.constant 48 : index
    %c0_502 = arith.constant 0 : index
    %882 = vector.load %arg16[%c48_501, %c0_502] : memref<64x128xf32, #tpu.memory_space<vmem>>, vector<8x128xf32>
    %c6 = arith.constant 6 : index
    %c0_503 = arith.constant 0 : index
    %c0_504 = arith.constant 0 : index
    %883 = vector.load %arg11[%c6, %c0_503, %c0_504] : memref<8x128x128xf32, #tpu.memory_space<vmem>>, vector<1x128x128xf32>
    %884 = vector.shape_cast %883 : vector<1x128x128xf32> to vector<128x128xf32>
    %cst_505 = arith.constant dense<0.000000e+00> : vector<8x128xf32>
    %885 = tpu.matmul %882, %884, %cst_505 {dimension_numbers = #tpu.dot_dimension_numbers<[1], [0], [0], [1], [0, 0, 1, 1], [], []>} : vector<8x128xf32>, vector<128x128xf32>, vector<8x128xf32> -> vector<8x128xf32>
    %886 = arith.addf %881, %885 : vector<8x128xf32>
    %c56_506 = arith.constant 56 : index
    %c0_507 = arith.constant 0 : index
    %887 = vector.load %arg16[%c56_506, %c0_507] : memref<64x128xf32, #tpu.memory_space<vmem>>, vector<8x128xf32>
    %c7 = arith.constant 7 : index
    %c0_508 = arith.constant 0 : index
    %c0_509 = arith.constant 0 : index
    %888 = vector.load %arg11[%c7, %c0_508, %c0_509] : memref<8x128x128xf32, #tpu.memory_space<vmem>>, vector<1x128x128xf32>
    %889 = vector.shape_cast %888 : vector<1x128x128xf32> to vector<128x128xf32>
    %cst_510 = arith.constant dense<0.000000e+00> : vector<8x128xf32>
    %890 = tpu.matmul %887, %889, %cst_510 {dimension_numbers = #tpu.dot_dimension_numbers<[1], [0], [0], [1], [0, 0, 1, 1], [], []>} : vector<8x128xf32>, vector<128x128xf32>, vector<8x128xf32> -> vector<8x128xf32>
    %891 = arith.addf %886, %890 : vector<8x128xf32>
    %c0_511 = arith.constant 0 : index
    %c0_512 = arith.constant 0 : index
    %892 = vector.load %arg13[%c0_511, %c0_512] : memref<8x128xf32, #tpu.memory_space<vmem>>, vector<8x128xf32>
    tpu.vector_store %arg13[%c0_511, %c0_512], %891 {strides = array<i32>} : memref<8x128xf32, #tpu.memory_space<vmem>>, vector<8x128xf32>,
    return
  }
  func.func @transform_0(%arg0: i32) -> (i32, i32) {
    %c0_i32 = arith.constant 0 : i32
    %c0_i32_0 = arith.constant 0 : i32
    %c0_i32_1 = arith.constant 0 : i32
    return %c0_i32, %c0_i32_0 : i32, i32
  }
  func.func @transform_1(%arg0: i32) -> (i32, i32) {
    %c0_i32 = arith.constant 0 : i32
    %c0_i32_0 = arith.constant 0 : i32
    %c0_i32_1 = arith.constant 0 : i32
    return %c0_i32, %c0_i32_0 : i32, i32
  }
  func.func @transform_2(%arg0: i32) -> (i32, i32) {
    %c0_i32 = arith.constant 0 : i32
    %c0_i32_0 = arith.constant 0 : i32
    %c0_i32_1 = arith.constant 0 : i32
    return %c0_i32, %c0_i32_0 : i32, i32
  }
  func.func @transform_3(%arg0: i32) -> (i32, i32) {
    %c0_i32 = arith.constant 0 : i32
    %c0_i32_0 = arith.constant 0 : i32
    %c0_i32_1 = arith.constant 0 : i32
    return %c0_i32, %c0_i32_0 : i32, i32
  }
  func.func @transform_4(%arg0: i32) -> (i32, i32) {
    %c0_i32 = arith.constant 0 : i32
    %c0_i32_0 = arith.constant 0 : i32
    %c0_i32_1 = arith.constant 0 : i32
    return %c0_i32, %c0_i32_0 : i32, i32
  }
  func.func @transform_5(%arg0: i32) -> (i32, i32) {
    %c0_i32 = arith.constant 0 : i32
    %c0_i32_0 = arith.constant 0 : i32
    %c0_i32_1 = arith.constant 0 : i32
    return %c0_i32, %c0_i32_0 : i32, i32
  }
  func.func @transform_6(%arg0: i32) -> (i32, i32) {
    %c0_i32 = arith.constant 0 : i32
    %c0_i32_0 = arith.constant 0 : i32
    %c0_i32_1 = arith.constant 0 : i32
    return %c0_i32, %c0_i32_0 : i32, i32
  }
  func.func @transform_7(%arg0: i32) -> (i32, i32) {
    %c0_i32 = arith.constant 0 : i32
    %c0_i32_0 = arith.constant 0 : i32
    %c0_i32_1 = arith.constant 0 : i32
    return %c0_i32, %c0_i32_0 : i32, i32
  }
  func.func @transform_8(%arg0: i32) -> (i32, i32) {
    %c0_i32 = arith.constant 0 : i32
    %c0_i32_0 = arith.constant 0 : i32
    %c0_i32_1 = arith.constant 0 : i32
    return %c0_i32, %c0_i32_0 : i32, i32
  }
  func.func @transform_9(%arg0: i32) -> (i32, i32) {
    %c0_i32 = arith.constant 0 : i32
    %c0_i32_0 = arith.constant 0 : i32
    %c0_i32_1 = arith.constant 0 : i32
    return %c0_i32, %c0_i32_0 : i32, i32
  }
  func.func @transform_10(%arg0: i32) -> (i32, i32, i32) {
    %c0_i32 = arith.constant 0 : i32
    %c0_i32_0 = arith.constant 0 : i32
    %c0_i32_1 = arith.constant 0 : i32
    %c0_i32_2 = arith.constant 0 : i32
    return %c0_i32, %c0_i32_0, %c0_i32_1 : i32, i32, i32
  }
  func.func @transform_11(%arg0: i32) -> (i32, i32) {
    %c0_i32 = arith.constant 0 : i32
    %c0_i32_0 = arith.constant 0 : i32
    %c0_i32_1 = arith.constant 0 : i32
    return %c0_i32, %c0_i32_0 : i32, i32
  }
  func.func @transform_12(%arg0: i32) -> (i32, i32) {
    %c0_i32 = arith.constant 0 : i32
    %c0_i32_0 = arith.constant 0 : i32
    %c0_i32_1 = arith.constant 0 : i32
    return %c0_i32, %c0_i32_0 : i32, i32
  }
}

</mosaic_0001>

<bundles_post_ra>
// kernel: tpu_custom_call.1
= control target key start
LH: loop header
LB: loop body
LE: loop exit
PB: predicated region body
PF: predicated region fallthrough
CT: control target
= control target key end

     0   :  { %17 = vsyncpa [#allocation7], 0  ;;  %s12839_s0 = inlined_call_operand.vmem [shape: f32[64,16], index: 0, kind: input, shape index: {}]   ;;  %s12840_s1 = inlined_call_operand.vmem [shape: f32[16,512], index: 1, kind: input, shape index: {}]   ;;  %s12841_s2 = inlined_call_operand.hbm [shape: f32[128,512], index: 2, kind: input, shape index: {}]   ;;  %s12842_s3 = inlined_call_operand.vmem [shape: f32[1,512], index: 3, kind: input, shape index: {}]   ;;  %s12843_s4 = inlined_call_operand.hbm [shape: f32[128,512], index: 4, kind: input, shape index: {}]   ;;  %s12844_s5 = inlined_call_operand.hbm [shape: f32[128,512], index: 5, kind: input, shape index: {}]   ;;  %s12845_s6 = inlined_call_operand.vmem [shape: f32[1,512], index: 6, kind: input, shape index: {}]   ;;  %s12846_s7 = inlined_call_operand.hbm [shape: f32[128,512], index: 7, kind: input, shape index: {}]   ;;  %s12847_s8 = inlined_call_operand.hbm [shape: f32[128,512], index: 8, kind: input, shape index: {}]   ;;  %s12848_s9 = inlined_call_operand.vmem [shape: f32[1,512], index: 9, kind: input, shape index: {}]   ;;  %s12849_s10 = inlined_call_operand.hbm [shape: f32[8,128,128], index: 10, kind: input, shape index: {}]   ;;  %s12850_s11 = inlined_call_operand.vmem [shape: f32[1,128], index: 11, kind: input, shape index: {}]   ;;  %s12851_s12 = inlined_call_operand.hbm [shape: f32[8,128], index: 12, kind: output, shape index: {}]  }
   0x1   :  { %18 = vsyncpa [#allocation10], 0 }
   0x2   :  { %19 = vsyncpa [#allocation13], 0 }
   0x3   :  { %20 = vsyncpa [#allocation16], 0 }
   0x4   :  { %21 = vsyncpa [#allocation8], 0  ;;  %s10862_s21 = smov [#allocation9]   ;;  %s10863_s23 = smov [#allocation12]  }
   0x5   :  { %s45_s22 = sshll.u32 %s10862_s21, 4  ;;  %s71_s24 = sshll.u32 %s10863_s23, 4  ;;  %s46_s22 = int_to_ptr.vmem [resolvable:$true] %s45_s22  ;;  %s10941_s24 = int_to_ptr.vmem [resolvable:$true] %s71_s24 }
   0x6   :  { %s10698_s27 = scalar_lea.hbm %s12843_s4, 8192 }
   0x7   :  { %p10699_p0 = scmp.ne.s32.totalorder %s12843_s4, %s10698_s27  ;;  %p10702_p1 = scmp.lt.u32.totalorder %s10698_s27, %s12843_s4 }
   0x9   :  { %p10704_p2 = pnand %p10702_p1, %p10699_p0 }
   0xb   :  { %10707 = shalt.err (!%p10704_p2)
}
   0xc   :  { %s10708_s14 = scalar_lea.vmem %s46_s22, 8192  ;;  %p10713_p4 = scmp.lt.s32.totalorder %s46_s22, %s46_s22 }
   0xd   :  { %p10709_p3 = scmp.ne.s32.totalorder %s46_s22, %s10708_s14  ;;  %p10714_p5 = scmp.lt.s32.totalorder %s10708_s14, %s10708_s14 }
   0xf   :  { %p10715_p6 = por %p10714_p5, %p10713_p4 }
  0x11   :  { %p10716_p7 = pnand %p10715_p6, %p10709_p3 }
  0x13   :  { %10719 = shalt.err (!%p10716_p7)
}
  0x14   :  { %s10864_s15 = smov 512   ;;  %s10865_s16 = smov 32  }
  0x15   :  { %51 = dma.hbm_to_vmem [thread:$0]  %s12843_s4, 8192, %s46_s22, [#allocation10], %s10864_s15, %s10864_s15, %s10865_s16  }
  0x16   :  { %s10720_s21 = scalar_lea.hbm %s12846_s7, 8192 }
  0x17   :  { %p10721_p8 = scmp.ne.s32.totalorder %s12846_s7, %s10720_s21  ;;  %p10724_p9 = scmp.lt.u32.totalorder %s10720_s21, %s12846_s7 }
  0x19   :  { %p10726_p10 = pnand %p10724_p9, %p10721_p8 }
  0x1b   :  { %10729 = shalt.err (!%p10726_p10)
}
  0x1c   :  { %s10730_s28 = scalar_lea.vmem %s10941_s24, 8192  ;;  %p10735_p12 = scmp.lt.s32.totalorder %s10941_s24, %s10941_s24 }
  0x1d   :  { %p10731_p11 = scmp.ne.s32.totalorder %s10941_s24, %s10730_s28  ;;  %p10736_p13 = scmp.lt.s32.totalorder %s10730_s28, %s10730_s28 }
  0x1f   :  { %p10737_p0 = por %p10736_p13, %p10735_p12 }
  0x21   :  { %p10738_p1 = pnand %p10737_p0, %p10731_p11 }
  0x23   :  { %10741 = shalt.err (!%p10738_p1)
}
  0x24   :  { %77 = dma.hbm_to_vmem [thread:$0]  %s12846_s7, 8192, %s10941_s24, [#allocation13], %s10864_s15, %s10864_s15, %s10865_s16  }
  0x25   :  { %s10866_s29 = smov [#allocation6]   ;;  %s10867_s13 = smov [#allocation11]  }
  0x26   :  { %s31_s30 = sshll.u32 %s10866_s29, 4  ;;  %s57_s14 = sshll.u32 %s10867_s13, 4  ;;  %s32_s30 = int_to_ptr.vmem [resolvable:$true] %s31_s30  ;;  %s10978_s14 = int_to_ptr.vmem [resolvable:$true] %s57_s14 }
  0x27   :  { %s10742_s19 = scalar_lea.hbm %s12841_s2, 8192 }
  0x28   :  { %p10743_p2 = scmp.ne.s32.totalorder %s12841_s2, %s10742_s19  ;;  %p10746_p3 = scmp.lt.u32.totalorder %s10742_s19, %s12841_s2 }
  0x2a   :  { %p10748_p4 = pnand %p10746_p3, %p10743_p2 }
  0x2c   :  { %10751 = shalt.err (!%p10748_p4)
}
  0x2d   :  { %s10752_s7 = scalar_lea.vmem %s32_s30, 8192  ;;  %p10757_p6 = scmp.lt.s32.totalorder %s32_s30, %s32_s30 }
  0x2e   :  { %p10753_p5 = scmp.ne.s32.totalorder %s32_s30, %s10752_s7  ;;  %p10758_p7 = scmp.lt.s32.totalorder %s10752_s7, %s10752_s7 }
  0x30   :  { %p10759_p8 = por %p10758_p7, %p10757_p6 }
  0x32   :  { %p10760_p9 = pnand %p10759_p8, %p10753_p5 }
  0x34   :  { %10763 = shalt.err (!%p10760_p9)
}
  0x35   :  { %37 = dma.hbm_to_vmem [thread:$0]  %s12841_s2, 8192, %s32_s30, [#allocation7], %s10864_s15, %s10864_s15, %s10865_s16  }
  0x36   :  { %s10764_s4 = scalar_lea.hbm %s12844_s5, 8192 }
  0x37   :  { %p10765_p10 = scmp.ne.s32.totalorder %s12844_s5, %s10764_s4  ;;  %p10768_p11 = scmp.lt.u32.totalorder %s10764_s4, %s12844_s5 }
  0x39   :  { %p10770_p12 = pnand %p10768_p11, %p10765_p10 }
  0x3b   :  { %10773 = shalt.err (!%p10770_p12)
}
  0x3c   :  { %s10774_s18 = scalar_lea.vmem %s10978_s14, 8192  ;;  %p10779_p0 = scmp.lt.s32.totalorder %s10978_s14, %s10978_s14 }
  0x3d   :  { %p10775_p13 = scmp.ne.s32.totalorder %s10978_s14, %s10774_s18  ;;  %p10780_p1 = scmp.lt.s32.totalorder %s10774_s18, %s10774_s18 }
  0x3f   :  { %p10781_p2 = por %p10780_p1, %p10779_p0 }
  0x41   :  { %p10782_p3 = pnand %p10781_p2, %p10775_p13 }
  0x43   :  { %10785 = shalt.err (!%p10782_p3)
}
  0x44   :  { %63 = dma.hbm_to_vmem [thread:$0]  %s12844_s5, 8192, %s10978_s14, [#allocation10], %s10864_s15, %s10864_s15, %s10865_s16  }
  0x45   :  { %s10868_s19 = smov [#allocation14]   ;;  %s10869_s21 = smov [#allocation15]  }
  0x46   :  { %s83_s20 = sshll.u32 %s10868_s19, 4  ;;  %s97_s23 = sshll.u32 %s10869_s21, 4  ;;  %s84_s20 = int_to_ptr.vmem [resolvable:$true] %s83_s20  ;;  %s11015_s23 = int_to_ptr.vmem [resolvable:$true] %s97_s23 }
  0x47   :  { %s10786_s24 = scalar_lea.hbm %s12847_s8, 8192 }
  0x48   :  { %p10787_p4 = scmp.ne.s32.totalorder %s12847_s8, %s10786_s24  ;;  %p10790_p5 = scmp.lt.u32.totalorder %s10786_s24, %s12847_s8 }
  0x4a   :  { %p10792_p6 = pnand %p10790_p5, %p10787_p4 }
  0x4c   :  { %10795 = shalt.err (!%p10792_p6)
}
  0x4d   :  { %s10796_s5 = scalar_lea.vmem %s84_s20, 8192  ;;  %p10801_p8 = scmp.lt.s32.totalorder %s84_s20, %s84_s20 }
  0x4e   :  { %p10797_p7 = scmp.ne.s32.totalorder %s84_s20, %s10796_s5  ;;  %p10802_p9 = scmp.lt.s32.totalorder %s10796_s5, %s10796_s5 }
  0x50   :  { %p10803_p10 = por %p10802_p9, %p10801_p8 }
  0x52   :  { %p10804_p11 = pnand %p10803_p10, %p10797_p7 }
  0x54   :  { %10807 = shalt.err (!%p10804_p11)
}
  0x55   :  { %89 = dma.hbm_to_vmem [thread:$0]  %s12847_s8, 8192, %s84_s20, [#allocation13], %s10864_s15, %s10864_s15, %s10865_s16  }
  0x56   :  { %s10808_s17 = scalar_lea.hbm %s12849_s10, 16384 }
  0x57   :  { %p10809_p12 = scmp.ne.s32.totalorder %s12849_s10, %s10808_s17  ;;  %p10812_p13 = scmp.lt.u32.totalorder %s10808_s17, %s12849_s10 }
  0x59   :  { %p10814_p0 = pnand %p10812_p13, %p10809_p12 }
  0x5b   :  { %10817 = shalt.err (!%p10814_p0)
}
  0x5c   :  { %s10818_s21 = scalar_lea.vmem %s11015_s23, 16384  ;;  %p10823_p2 = scmp.lt.s32.totalorder %s11015_s23, %s11015_s23 }
  0x5d   :  { %p10819_p1 = scmp.ne.s32.totalorder %s11015_s23, %s10818_s21  ;;  %p10824_p3 = scmp.lt.s32.totalorder %s10818_s21, %s10818_s21 }
  0x5f   :  { %p10825_p4 = por %p10824_p3, %p10823_p2 }
  0x61   :  { %p10826_p5 = pnand %p10825_p4, %p10819_p1 }
  0x63   :  { %10829 = shalt.err (!%p10826_p5)
}
  0x64   :  { %s10870_s8 = smov 128   ;;  %s10871_s15 = smov 8  }
  0x65   :  { %103 = dma.hbm_to_vmem [thread:$0]  %s12849_s10, 16384, %s11015_s23, [#allocation16], %s10870_s8, %s10870_s8, %s10871_s15  }
  0x66   :  { %10852 = dma.done.wait [#allocation7], 8192  }
  0x67   :  { %10853 = vsyncadd [#allocation7], 4294959104 }
  0x68   :  { %10854 = dma.done.wait [#allocation10], 16384  }
  0x69   :  { %10855 = vsyncadd [#allocation10], 4294950912 }
  0x6a   :  { %10856 = dma.done.wait [#allocation13], 16384  }
  0x6b   :  { %10857 = vsyncadd [#allocation13], 4294950912 }
  0x6c   :  { %10858 = dma.done.wait [#allocation16], 16384  }
  0x6d   :  { %10859 = vsyncadd [#allocation16], 4294950912  ;;  %v10872_v0 = vmov 0.0   ;;  %v135_v1 = vld [vmem:[%s12840_s1 + $0x18] sm:$0xff]  ;;  %v134_v3 = vld [vmem:[%s12840_s1 + $0x10] sm:$0xff]  ;;  %vm162_vm0 = vcmask 130048  }
  0x6e   :  { %364 = vmatprep.mubr.f32.mxu1 %v10872_v0  ;;  %251 = vmatprep.mubr.f32.mxu0 %v10872_v0  ;;  %v139_v2 = vld [vmem:[%s12840_s1 + $0x38] sm:$0xff]  ;;  %v138_v5 = vld [vmem:[%s12840_s1 + $0x30] sm:$0xff]  ;;  %v453_v6 = vld [vmem:[#allocation6 + $0x8] sm:$0xff]  ;;  %vm10874_vm1 = vmmov 0   ;;  %s10875_s22 = smov [#allocation17]  }
  0x6f   :  { %v8233_v4 = vpack.c.bf16 %v139_v2, %v135_v1  ;;  %v8235_v7 = vpack.c.bf16 %v138_v5, %v134_v3  ;;  %v457_v8 = vld [vmem:[#allocation6 + $0x28] sm:$0xff]  ;;  %v452_v9 = vld [vmem:[#allocation6] sm:$0xff]  ;;  %v126_v28 = vld [vmem:[%s12839_s0 + $0x10] sm:$0xff]  ;;  %s7712_s29 = sshll.u32 %s10875_s22, 4  ;;  %s7713_s29 = int_to_ptr.vmem [resolvable:$true] %s7712_s29 }
  0x70   :  { %v456_v10 = vld [vmem:[#allocation6 + $0x20] sm:$0xff]  ;;  %v11063_v11 = vpack.c.bf16 %v457_v8, %v453_v6  ;;  %v461_v12 = vld [vmem:[#allocation6 + $0x48] sm:$0xff]  ;;  %v127_v41 = vld [vmem:[%s12839_s0 + $0x18] sm:$0xff]  ;;  %s10830_s13 = scalar_lea.vmem %s7713_s29, 128  ;;  %p10835_p7 = scmp.lt.s32.totalorder %s7713_s29, %s7713_s29 }
  0x71   :  { %8234 = vmatprep.subr.bf16.mxu1 %v8233_v4  ;;  %v465_v13 = vld [vmem:[#allocation6 + $0x68] sm:$0xff]  ;;  %v124_v14 = vld [vmem:[%s12839_s0] sm:$0xff]  ;;  %v11068_v15 = vpack.c.bf16 %v456_v10, %v452_v9  ;;  %v130_v62 = vld [vmem:[%s12839_s0 + $0x30] sm:$0xff]  ;;  %p10831_p6 = scmp.ne.s32.totalorder %s7713_s29, %s10830_s13  ;;  %p10836_p8 = scmp.lt.s32.totalorder %s10830_s13, %s10830_s13 }
  0x72   :  { %8236 = vmatpush1.bf16.msra.mxu1 %v8235_v7  ;;  %v11071_v16 = vpack.c.bf16 %v465_v13, %v461_v12  ;;  %v460_v17 = vld [vmem:[#allocation6 + $0x40] sm:$0xff]  ;;  %v469_v19 = vld [vmem:[#allocation6 + $0x88] sm:$0xff]  ;;  %v455_v4 = vld [vmem:[#allocation6 + $0x18] sm:$0xff] }
  0x73   :  { %8238 = vmatprep.subr.bf16.mxu1 %v11063_v11  ;;  %v464_v18 = vld [vmem:[#allocation6 + $0x60] sm:$0xff]  ;;  %v473_v20 = vld [vmem:[#allocation6 + $0xa8] sm:$0xff]  ;;  %v459_v5 = vld [vmem:[#allocation6 + $0x38] sm:$0xff]  ;;  %p10837_p9 = por %p10836_p8, %p10835_p7 }
  0x74   :  { %v125_v21 = vld [vmem:[%s12839_s0 + $0x8] sm:$0xff]  ;;  %v11079_v22 = vpack.c.bf16 %v464_v18, %v460_v17  ;;  %v11082_v23 = vpack.c.bf16 %v473_v20, %v469_v19  ;;  %v468_v24 = vld [vmem:[#allocation6 + $0x80] sm:$0xff]  ;;  %v131_v6 = vld [vmem:[%s12839_s0 + $0x38] sm:$0xff]  ;;  %v11166_v8 = vpack.c.bf16 %v459_v5, %v455_v4 }
  0x75   :  { %7732 = vmatmul.mubr.msk.f32.vlgmr.msra.gmra.mrb[0].mxu1 %vm162_vm0, %v124_v14  ;;  %v472_v25 = vld [vmem:[#allocation6 + $0xa0] sm:$0xff]  ;;  %v477_v26 = vld [vmem:[#allocation6 + $0xc8] sm:$0xff]  ;;  %v454_v9 = vld [vmem:[#allocation6 + $0x10] sm:$0xff]  ;;  %p10838_p10 = pnand %p10837_p9, %p10831_p6 }
  0x76   :  { %8240 = vmatpush1.bf16.msra.mxu1 %v11068_v15  ;;  %370 = vmatprep.mubr.f32.mxu1 %v10872_v0  ;;  %v481_v27 = vld [vmem:[#allocation6 + $0xe8] sm:$0xff]  ;;  %v11090_v29 = vpack.c.bf16 %v472_v25, %v468_v24  ;;  %v476_v30 = vld [vmem:[#allocation6 + $0xc0] sm:$0xff]  ;;  %v458_v10 = vld [vmem:[#allocation6 + $0x30] sm:$0xff] }
  0x77   :  { %8242 = vmatprep.subr.bf16.mxu1 %v11071_v16  ;;  %v480_v31 = vld [vmem:[#allocation6 + $0xe0] sm:$0xff]  ;;  %v11093_v32 = vpack.c.bf16 %v481_v27, %v477_v26  ;;  %v133_v33 = vld [vmem:[%s12840_s1 + $0x8] sm:$0xff]  ;;  %v463_v12 = vld [vmem:[#allocation6 + $0x58] sm:$0xff] }
  0x78   :  { %v137_v34 = vld [vmem:[%s12840_s1 + $0x28] sm:$0xff]  ;;  %v132_v35 = vld [vmem:[%s12840_s1] sm:$0xff]  ;;  %v11113_v42 = vpack.c.bf16 %v480_v31, %v476_v30  ;;  %v467_v13 = vld [vmem:[#allocation6 + $0x78] sm:$0xff] }
  0x79   :  { %7733 = vmatmul.mubr.msk.f32.gmra.mrb[2].mxu1 %vm162_vm0, %v125_v21  ;;  %v485_v36 = vld [vmem:[#allocation6 + $0x108] sm:$0xff]  ;;  %v8229_v38 = vpack.c.bf16 %v137_v34, %v133_v33  ;;  %v136_v39 = vld [vmem:[%s12840_s1 + $0x20] sm:$0xff]  ;;  %v11176_v17 = vpack.c.bf16 %v467_v13, %v463_v12  ;;  %v462_v18 = vld [vmem:[#allocation6 + $0x50] sm:$0xff] }
  0x7a   :  { %8244 = vmatpush1.bf16.msra.mxu1 %v11079_v22  ;;  %376 = vmatprep.mubr.f32.mxu1 %v10872_v0  ;;  %v489_v37 = vld [vmem:[#allocation6 + $0x128] sm:$0xff]  ;;  %v8231_v40 = vpack.c.bf16 %v136_v39, %v132_v35  ;;  %v484_v44 = vld [vmem:[#allocation6 + $0x100] sm:$0xff]  ;;  %v466_v19 = vld [vmem:[#allocation6 + $0x70] sm:$0xff] }
  0x7b   :  { %8246 = vmatprep.subr.bf16.mxu1 %v11082_v23  ;;  %v11116_v43 = vpack.c.bf16 %v489_v37, %v485_v36  ;;  %v488_v45 = vld [vmem:[#allocation6 + $0x120] sm:$0xff]  ;;  %8230 = vmatprep.subr.bf16.mxu0 %v8229_v38  ;;  %v493_v46 = vld [vmem:[#allocation6 + $0x148] sm:$0xff]  ;;  %v471_v20 = vld [vmem:[#allocation6 + $0x98] sm:$0xff]  ;;  %v11182_v24 = vpack.c.bf16 %v466_v19, %v462_v18 }
  0x7c   :  { %v497_v47 = vld [vmem:[#allocation6 + $0x168] sm:$0xff]  ;;  %8232 = vmatpush1.bf16.msra.mxu0 %v8231_v40  ;;  %v128_v48 = vld [vmem:[%s12839_s0 + $0x20] sm:$0xff]  ;;  %v11124_v49 = vpack.c.bf16 %v488_v45, %v484_v44  ;;  %v470_v26 = vld [vmem:[#allocation6 + $0x90] sm:$0xff] }
  0x7d   :  { %7734 = vmatmul.mubr.msk.f32.gmra.mrb[4].mxu1 %vm162_vm0, %v126_v28  ;;  %v11127_v50 = vpack.c.bf16 %v497_v47, %v493_v46  ;;  %v492_v51 = vld [vmem:[#allocation6 + $0x140] sm:$0xff]  ;;  %v501_v53 = vld [vmem:[#allocation6 + $0x188] sm:$0xff]  ;;  %v474_v27 = vld [vmem:[#allocation6 + $0xb0] sm:$0xff] }
  0x7e   :  { %8248 = vmatpush1.bf16.msra.mxu1 %v11090_v29  ;;  %382 = vmatprep.mubr.f32.mxu1 %v10872_v0  ;;  %v496_v52 = vld [vmem:[#allocation6 + $0x160] sm:$0xff]  ;;  %v505_v54 = vld [vmem:[#allocation6 + $0x1a8] sm:$0xff]  ;;  %v483_v30 = vld [vmem:[#allocation6 + $0xf8] sm:$0xff]  ;;  %v11191_v31 = vpack.c.bf16 %v474_v27, %v470_v26 }
  0x7f   :  { %8250 = vmatprep.subr.bf16.mxu1 %v11093_v32  ;;  %7724 = vmatmul.mubr.msk.f32.vlgmr.msra.gmra.mrb[0].mxu0 %vm162_vm0, %v124_v14  ;;  %v129_v55 = vld [vmem:[%s12839_s0 + $0x28] sm:$0xff]  ;;  %v11137_v56 = vpack.c.bf16 %v496_v52, %v492_v51  ;;  %v11140_v57 = vpack.c.bf16 %v505_v54, %v501_v53  ;;  %v500_v58 = vld [vmem:[#allocation6 + $0x180] sm:$0xff]  ;;  %v11173_v14 = vpack.c.bf16 %v458_v10, %v454_v9  ;;  %v478_v34 = vld [vmem:[#allocation6 + $0xd0] sm:$0xff] }
  0x80   :  { %257 = vmatprep.mubr.f32.mxu0 %v10872_v0  ;;  %v504_v59 = vld [vmem:[#allocation6 + $0x1a0] sm:$0xff]  ;;  %v509_v60 = vld [vmem:[#allocation6 + $0x1c8] sm:$0xff]  ;;  %v482_v35 = vld [vmem:[#allocation6 + $0xf0] sm:$0xff] }
  0x81   :  { %7735 = vmatmul.mubr.msk.f32.gmra.mrb[6].mxu1 %vm162_vm0, %v127_v41  ;;  %v513_v61 = vld [vmem:[#allocation6 + $0x1e8] sm:$0xff]  ;;  %v11150_v63 = vpack.c.bf16 %v504_v59, %v500_v58  ;;  %v508_v2 = vld [vmem:[#allocation6 + $0x1c0] sm:$0xff]  ;;  %v487_v36 = vld [vmem:[#allocation6 + $0x118] sm:$0xff]  ;;  %v11199_v38 = vpack.c.bf16 %v482_v35, %v478_v34 }
  0x82   :  { %8252 = vmatpush1.bf16.msra.mxu1 %v11113_v42  ;;  %388 = vmatprep.mubr.f32.mxu1 %v10872_v0  ;;  %v11153_v1 = vpack.c.bf16 %v513_v61, %v509_v60  ;;  %v512_v3 = vld [vmem:[#allocation6 + $0x1e0] sm:$0xff]  ;;  %v491_v37 = vld [vmem:[#allocation6 + $0x138] sm:$0xff]  ;;  %v486_v40 = vld [vmem:[#allocation6 + $0x110] sm:$0xff] }
  0x83   :  { %8254 = vmatprep.subr.bf16.mxu1 %v11116_v43  ;;  %7725 = vmatmul.mubr.msk.f32.gmra.mrb[2].mxu0 %vm162_vm0, %v125_v21  ;;  %v11163_v7 = vpack.c.bf16 %v512_v3, %v508_v2  ;;  %v475_v21 = vld [vmem:[#allocation6 + $0xb8] sm:$0xff]  ;;  %v11202_v39 = vpack.c.bf16 %v491_v37, %v487_v36  ;;  %v498_v51 = vld [vmem:[#allocation6 + $0x170] sm:$0xff] }
  0x84   :  { %263 = vmatprep.mubr.f32.mxu0 %v10872_v0  ;;  %v11186_v25 = vpack.c.bf16 %v475_v21, %v471_v20  ;;  %v495_v44 = vld [vmem:[#allocation6 + $0x158] sm:$0xff]  ;;  %v502_v58 = vld [vmem:[#allocation6 + $0x190] sm:$0xff]  ;;  %v140_v20 = vld [vmem:[%s12842_s3] sm:$0xf] }
  0x85   :  { %7736 = vmatmul.mubr.msk.f32.gmra.mrb[8].mxu1 %vm162_vm0, %v128_v48  ;;  %v499_v45 = vld [vmem:[#allocation6 + $0x178] sm:$0xff]  ;;  %v506_v59 = vld [vmem:[#allocation6 + $0x1b0] sm:$0xff] }
  0x86   :  { %8256 = vmatpush1.bf16.msra.mxu1 %v11124_v49  ;;  %394 = vmatprep.mubr.f32.mxu1 %v10872_v0  ;;  %v11210_v47 = vpack.c.bf16 %v499_v45, %v495_v44  ;;  %v503_v52 = vld [vmem:[#allocation6 + $0x198] sm:$0xff]  ;;  %v510_v3 = vld [vmem:[#allocation6 + $0x1d0] sm:$0xff] }
  0x87   :  { %8258 = vmatprep.subr.bf16.mxu1 %v11127_v50  ;;  %7726 = vmatmul.mubr.msk.f32.gmra.mrb[4].mxu0 %vm162_vm0, %v126_v28  ;;  %v479_v28 = vld [vmem:[#allocation6 + $0xd8] sm:$0xff]  ;;  %v514_v4 = vld [vmem:[#allocation6 + $0x1f0] sm:$0xff] }
  0x88   :  { %269 = vmatprep.mubr.f32.mxu0 %v10872_v0  ;;  %v11194_v33 = vpack.c.bf16 %v483_v30, %v479_v28  ;;  %v507_v53 = vld [vmem:[#allocation6 + $0x1b8] sm:$0xff]  ;;  %v11225_v5 = vpack.c.bf16 %v514_v4, %v510_v3 }
  0x89   :  { %7737 = vmatmul.mubr.msk.f32.gmra.mrb[10].mxu1 %vm162_vm0, %v129_v55  ;;  %v511_v60 = vld [vmem:[#allocation6 + $0x1d8] sm:$0xff] }
  0x8a   :  { %8260 = vmatpush1.bf16.msra.mxu1 %v11137_v56  ;;  %400 = vmatprep.mubr.f32.mxu1 %v10872_v0  ;;  %v515_v61 = vld [vmem:[#allocation6 + $0x1f8] sm:$0xff] }
  0x8b   :  { %8262 = vmatprep.subr.bf16.mxu1 %v11140_v57  ;;  %7727 = vmatmul.mubr.msk.f32.gmra.mrb[6].mxu0 %vm162_vm0, %v127_v41  ;;  %v490_v41 = vld [vmem:[#allocation6 + $0x130] sm:$0xff]  ;;  %v11222_v2 = vpack.c.bf16 %v515_v61, %v511_v60 }
  0x8c   :  { %275 = vmatprep.mubr.f32.mxu0 %v10872_v0  ;;  %v11207_v46 = vpack.c.bf16 %v490_v41, %v486_v40 }
  0x8d   :  { %7738 = vmatmul.mubr.msk.f32.gmra.mrb[12].mxu1 %vm162_vm0, %v130_v62 }
  0x8e   :  { %8264 = vmatpush1.bf16.msra.mxu1 %v11150_v63  ;;  %406 = vmatprep.mubr.f32.mxu1 %v10872_v0 }
  0x8f   :  { %8266 = vmatprep.subr.bf16.mxu1 %v11153_v1  ;;  %7728 = vmatmul.mubr.msk.f32.gmra.mrb[8].mxu0 %vm162_vm0, %v128_v48  ;;  %v494_v48 = vld [vmem:[#allocation6 + $0x150] sm:$0xff] }
  0x90   :  { %281 = vmatprep.mubr.f32.mxu0 %v10872_v0  ;;  %v11213_v54 = vpack.c.bf16 %v498_v51, %v494_v48 }
  0x91   :  { %7739 = vmatmul.mubr.msk.f32.gmra.mrb[14].mxu1 %vm162_vm0, %v131_v6 }
  0x92   :  { %8268 = vmatpush1.bf16.msra.mxu1 %v11163_v7  ;;  %580 = vmatprep.mubr.f32.mxu1 %v10872_v0 }
  0x93   :  { %8270 = vmatprep.subr.bf16.mxu1 %v11166_v8  ;;  %7729 = vmatmul.mubr.msk.f32.gmra.mrb[10].mxu0 %vm162_vm0, %v129_v55  ;;  %v11216_v55 = vpack.c.bf16 %v507_v53, %v503_v52 }
  0x94   :  { %287 = vmatprep.mubr.f32.mxu0 %v10872_v0 }
  0x95   :  { %581 = vmatmul.mubr.f32.vlgmr.msra.gmra.mrb[16].mxu1 %v10872_v0 }
  0x96   :  { %8272 = vmatpush1.bf16.msra.mxu1 %v11173_v14  ;;  %651 = vmatprep.mubr.f32.mxu1 %v10872_v0 }
  0x97   :  { %8274 = vmatprep.subr.bf16.mxu1 %v11176_v17  ;;  %7730 = vmatmul.mubr.msk.f32.gmra.mrb[12].mxu0 %vm162_vm0, %v130_v62  ;;  %v11219_v62 = vpack.c.bf16 %v506_v59, %v502_v58 }
  0x98   :  { %293 = vmatprep.mubr.f32.mxu0 %v10872_v0 }
  0x9a   :  { %8276 = vmatpush1.bf16.msra.mxu1 %v11182_v24 }
  0x9b   :  { %8278 = vmatprep.subr.bf16.mxu1 %v11186_v25  ;;  %7731 = vmatmul.mubr.msk.f32.gmra.mrb[14].mxu0 %vm162_vm0, %v131_v6  ;;  %v142_v6 = vlaneseq }
  0x9c   :  { %1552 = vmatprep.mubr.f32.mxu0 %v10872_v0 }
  0x9d   :  { %v143_v12 = vshrl.u32 %v142_v6, 7 }
  0x9e   :  { %8280 = vmatpush1.bf16.msra.mxu1 %v11191_v31 }
  0x9f   :  { %8282 = vmatprep.subr.bf16.mxu1 %v11194_v33  ;;  %v11252_v19 = vsub.s32 0, %v143_v12  ;;  %v11257_v21 = vsub.s32 1, %v143_v12  ;;  %v11267_v44 = vsub.s32 2, %v143_v12  ;;  %v11269_v48 = vsub.s32 3, %v143_v12 }
  0xa1   :  { %v11260_v26 = vrot.slane %v140_v20, %v11252_v19  ;;  %v11263_v27 = vrot.slane %v140_v20, %v11257_v21  ;;  %v11272_v53 = vrot.slane %v140_v20, %v11267_v44  ;;  %v11275_v59 = vrot.slane %v140_v20, %v11269_v48 }
  0xa2   :  { %8284 = vmatpush1.bf16.msra.mxu1 %v11199_v38 }
  0xa3   :  { %8286 = vmatprep.subr.bf16.mxu1 %v11202_v39 }
  0xa6   :  { %8288 = vmatpush1.bf16.msra.mxu1 %v11207_v46 }
  0xa7   :  { %8290 = vmatprep.subr.bf16.mxu1 %v11210_v47 }
  0xaa   :  { %8292 = vmatpush1.bf16.msra.mxu1 %v11213_v54 }
  0xab   :  { %8294 = vmatprep.subr.bf16.mxu1 %v11216_v55 }
  0xae   :  { %8296 = vmatpush1.bf16.msra.mxu1 %v11219_v62 }
  0xaf   :  { %8298 = vmatprep.subr.bf16.mxu1 %v11222_v2 }
  0xb2   :  { %8300 = vmatpush1.bf16.msra.mxu1 %v11225_v5 }
  0xb3   :  { %8302 = vmatprep.subr.bf16.mxu1 %v11063_v11 }
  0xb5   :  { %652 = vmatmul.mubr.f32.vlgmr.msra.gmra.mrb[0].mxu1 %v10872_v0 }
  0xb6   :  { %8304 = vmatpush1.bf16.msra.mxu1 %v11068_v15  ;;  %823 = vmatprep.mubr.f32.mxu1 %v10872_v0 }
  0xb7   :  { %8306 = vmatprep.subr.bf16.mxu1 %v11071_v16 }
  0xba   :  { %8308 = vmatpush1.bf16.msra.mxu1 %v11079_v22 }
  0xbb   :  { %8310 = vmatprep.subr.bf16.mxu1 %v11082_v23 }
  0xbe   :  { %8312 = vmatpush1.bf16.msra.mxu1 %v11090_v29 }
  0xbf   :  { %8314 = vmatprep.subr.bf16.mxu1 %v11093_v32 }
  0xc2   :  { %8316 = vmatpush1.bf16.msra.mxu1 %v11113_v42 }
  0xc3   :  { %8318 = vmatprep.subr.bf16.mxu1 %v11116_v43 }
  0xc6   :  { %8320 = vmatpush1.bf16.msra.mxu1 %v11124_v49 }
  0xc7   :  { %8322 = vmatprep.subr.bf16.mxu1 %v11127_v50 }
  0xca   :  { %8324 = vmatpush1.bf16.msra.mxu1 %v11137_v56 }
  0xcb   :  { %8326 = vmatprep.subr.bf16.mxu1 %v11140_v57 }
  0xce   :  { %8328 = vmatpush1.bf16.msra.mxu1 %v11150_v63 }
  0xcf   :  { %8330 = vmatprep.subr.bf16.mxu1 %v11153_v1 }
  0xd2   :  { %8332 = vmatpush1.bf16.msra.mxu1 %v11163_v7 }
  0xd3   :  { %8334 = vmatprep.subr.bf16.mxu1 %v11166_v8 }
 0x152   :  { %v253_v9 = vpop.f32.mrb[0].mxu0 }
 0x153   :  { %v255_v10 = vpop.f32.mrb[1].mxu0  ;;  %v254_v28 = vadd.f32 %v253_v9, %v11260_v26 }
 0x154   :  { %v256_v30 = vadd.f32 %v255_v10, %v11263_v27 }
 0x156   :  { %v11248_v13 = vpop.f32.mrb[2].mxu0 }
 0x157   :  { %v11250_v18 = vpop.f32.mrb[3].mxu0 }
 0x168   :  { %v582_v34 = vpop.f32.mrb[16].mxu1 }
 0x169   :  { %v658_v35 = vadd.f32 %v582_v34, %v254_v28  ;;  %v584_v36 = vpop.f32.mrb[17].mxu1 }
 0x16a   :  { %v659_v37 = vadd.f32 %v584_v36, %v256_v30 }
 0x16b   :  { %v7740_v41 = vmul.f32 -1.442695, %v658_v35 }
 0x16c   :  { %v7741_v40 = vmul.f32 -1.442695, %v659_v37 }
 0x16e   :  { %10314 = vpow2.f32 %v7741_v40 }
 0x16f   :  { %10316 = vpow2.f32 %v7740_v41 }
 0x178   :  { %v10315_v45 = vpop.eup %10314 }
 0x179   :  { %v10317_v51 = vpop.eup %10316  ;;  %v671_v52 = vadd.f32 1.0, %v10315_v45 }
 0x17a   :  { %v665_v58 = vadd.f32 1.0, %v10317_v51 }
 0x17b   :  { %10318 = vrcp.f32 %v671_v52 }
 0x17c   :  { %10320 = vrcp.f32 %v665_v58 }
 0x185   :  { %v10319_v9 = vpop.eup %10318 }
 0x186   :  { %v10321_v10 = vpop.eup %10320  ;;  %v682_v28 = vmul.f32 0.0, %v10319_v9 }
 0x188   :  { %v653_v60 = vpop.f32.mrb[0].mxu1 }
 0x189   :  { %v10117_v61 = vadd.f32 %v653_v60, %v11272_v53  ;;  %v655_v3 = vpop.f32.mrb[1].mxu1 }
 0x18a   :  { %v10118_v4 = vadd.f32 %v655_v3, %v11275_v59 }
 0x18b   :  { %10322 = vtanh.f32 %v10117_v61 }
 0x18c   :  { %v7742_v6 = vmul.f32 -1.442695, %v10118_v4 }
 0x18e   :  { %10324 = vpow2.f32 %v7742_v6 }
 0x195   :  { %v10323_v12 = vpop.eup %10322 }
 0x196   :  { %v683_v30 = vmul.f32 %v10323_v12, %v10321_v10 }
 0x198   :  { %v10325_v34 = vpop.eup %10324  ;;  %v11279_v35 = vadd.f32 %v683_v30, %v682_v28  ;;  %v1182_v30 = vld [vmem:[#allocation6 + $0x8] sm:$0xff] }
 0x199   :  { %v678_v20 = vadd.f32 1.0, %v10325_v34  ;;  %v1186_v34 = vld [vmem:[#allocation6 + $0x28] sm:$0xff] }
 0x19a   :  { %10326 = vtanh.f32 %v11279_v35 }
 0x19b   :  { %10328 = vrcp.f32 %v678_v20  ;;  %v1181_v20 = vld [vmem:[#allocation6] sm:$0xff] }
 0x1a4   :  { %v10327_v36 = vpop.eup %10326 }
 0x1a5   :  { %v10329_v37 = vpop.eup %10328 }
 0x1a6   :  { %v11282_v40 = vmul.f32 %v10329_v37, %v10327_v36  ;;  %v1185_v36 = vld [vmem:[#allocation6 + $0x20] sm:$0xff] }
 0x1a7   :  { %v11357_v37 = vpack.c.bf16 %v1185_v36, %v1181_v20  ;;  %v1225_v20 = vld [vmem:[#allocation6 + $0x160] sm:$0xff] }
 0x1a8   :  { %824 = vmatmul.mubr.f32.vlgmr.msra.gmra.mrb[18].mxu1 %v11282_v40 }
 0x1a9   :  { %8336 = vmatpush1.bf16.msra.mxu1 %v11173_v14  ;;  %894 = vmatprep.mubr.f32.mxu1 %v10872_v0 }
 0x1aa   :  { %8338 = vmatprep.subr.bf16.mxu1 %v11176_v17 }
 0x1ad   :  { %8340 = vmatpush1.bf16.msra.mxu1 %v11182_v24 }
 0x1ae   :  { %8342 = vmatprep.subr.bf16.mxu1 %v11186_v25 }
 0x1b1   :  { %8344 = vmatpush1.bf16.msra.mxu1 %v11191_v31 }
 0x1b2   :  { %8346 = vmatprep.subr.bf16.mxu1 %v11194_v33 }
 0x1b5   :  { %8348 = vmatpush1.bf16.msra.mxu1 %v11199_v38 }
 0x1b6   :  { %8350 = vmatprep.subr.bf16.mxu1 %v11202_v39 }
 0x1b9   :  { %8352 = vmatpush1.bf16.msra.mxu1 %v11207_v46 }
 0x1ba   :  { %8354 = vmatprep.subr.bf16.mxu1 %v11210_v47 }
 0x1bd   :  { %8356 = vmatpush1.bf16.msra.mxu1 %v11213_v54 }
 0x1be   :  { %8358 = vmatprep.subr.bf16.mxu1 %v11216_v55 }
 0x1c1   :  { %8360 = vmatpush1.bf16.msra.mxu1 %v11219_v62 }
 0x1c2   :  { %8362 = vmatprep.subr.bf16.mxu1 %v11222_v2 }
 0x1c5   :  { %8364 = vmatpush1.bf16.msra.mxu1 %v11225_v5 }
 0x1c6   :  { %8366 = vmatprep.subr.bf16.mxu1 %v11063_v11  ;;  %v11320_v11 = vpop.f32.mrb[4].mxu0 }
 0x1c8   :  { %895 = vmatmul.mubr.f32.vlgmr.msra.gmra.mrb[2].mxu1 %v11282_v40 }
 0x1c9   :  { %8368 = vmatpush1.bf16.msra.mxu1 %v11068_v15  ;;  %1066 = vmatprep.mubr.f32.mxu1 %v10872_v0  ;;  %v11322_v15 = vpop.f32.mrb[5].mxu0 }
 0x1ca   :  { %8370 = vmatprep.subr.bf16.mxu1 %v11071_v16  ;;  %v260_v16 = vadd.f32 %v11248_v13, %v11260_v26 }
 0x1cd   :  { %8372 = vmatpush1.bf16.msra.mxu1 %v11079_v22  ;;  %v262_v22 = vadd.f32 %v11250_v18, %v11263_v27 }
 0x1ce   :  { %8374 = vmatprep.subr.bf16.mxu1 %v11082_v23 }
 0x1d1   :  { %8376 = vmatpush1.bf16.msra.mxu1 %v11090_v29 }
 0x1d2   :  { %8378 = vmatprep.subr.bf16.mxu1 %v11093_v32 }
 0x1d5   :  { %8380 = vmatpush1.bf16.msra.mxu1 %v11113_v42 }
 0x1d6   :  { %8382 = vmatprep.subr.bf16.mxu1 %v11116_v43 }
 0x1d9   :  { %8384 = vmatpush1.bf16.msra.mxu1 %v11124_v49 }
 0x1da   :  { %8386 = vmatprep.subr.bf16.mxu1 %v11127_v50 }
 0x1dd   :  { %8388 = vmatpush1.bf16.msra.mxu1 %v11137_v56 }
 0x1de   :  { %8390 = vmatprep.subr.bf16.mxu1 %v11140_v57 }
 0x1e1   :  { %8392 = vmatpush1.bf16.msra.mxu1 %v11150_v63 }
 0x1e2   :  { %8394 = vmatprep.subr.bf16.mxu1 %v11153_v1 }
 0x1e5   :  { %8396 = vmatpush1.bf16.msra.mxu1 %v11163_v7 }
 0x1e6   :  { %8398 = vmatprep.subr.bf16.mxu1 %v11166_v8 }
 0x27b   :  { %v825_v23 = vpop.f32.mrb[18].mxu1 }
 0x27c   :  { %v901_v29 = vadd.f32 %v825_v23, %v260_v16  ;;  %v827_v32 = vpop.f32.mrb[19].mxu1  ;;  %v1190_v16 = vld [vmem:[#allocation6 + $0x48] sm:$0xff] }
 0x27d   :  { %v902_v42 = vadd.f32 %v827_v32, %v262_v22  ;;  %v1194_v22 = vld [vmem:[#allocation6 + $0x68] sm:$0xff]  ;;  %v1193_v32 = vld [vmem:[#allocation6 + $0x60] sm:$0xff] }
 0x27e   :  { %v7743_v49 = vmul.f32 -1.442695, %v901_v29  ;;  %v11363_v23 = vpack.c.bf16 %v1194_v22, %v1190_v16  ;;  %v1189_v29 = vld [vmem:[#allocation6 + $0x40] sm:$0xff]  ;;  %v1230_v16 = vld [vmem:[#allocation6 + $0x188] sm:$0xff] }
 0x27f   :  { %v7744_v43 = vmul.f32 -1.442695, %v902_v42  ;;  %v11365_v42 = vpack.c.bf16 %v1193_v32, %v1189_v29  ;;  %v1234_v22 = vld [vmem:[#allocation6 + $0x1a8] sm:$0xff]  ;;  %v1229_v29 = vld [vmem:[#allocation6 + $0x180] sm:$0xff] }
 0x280   :  { %v11402_v32 = vpack.c.bf16 %v1234_v22, %v1230_v16 }
 0x281   :  { %10330 = vpow2.f32 %v7744_v43  ;;  %v1198_v43 = vld [vmem:[#allocation6 + $0x88] sm:$0xff] }
 0x282   :  { %10332 = vpow2.f32 %v7743_v49  ;;  %v1202_v49 = vld [vmem:[#allocation6 + $0xa8] sm:$0xff] }
 0x28b   :  { %v10331_v50 = vpop.eup %10330 }
 0x28c   :  { %v10333_v56 = vpop.eup %10332  ;;  %v914_v57 = vadd.f32 1.0, %v10331_v50  ;;  %v11371_v50 = vpack.c.bf16 %v1202_v49, %v1198_v43  ;;  %v1233_v43 = vld [vmem:[#allocation6 + $0x1a0] sm:$0xff] }
 0x28d   :  { %v908_v63 = vadd.f32 1.0, %v10333_v56  ;;  %v1197_v56 = vld [vmem:[#allocation6 + $0x80] sm:$0xff]  ;;  %v11405_v49 = vpack.c.bf16 %v1233_v43, %v1229_v29 }
 0x28e   :  { %10334 = vrcp.f32 %v914_v57  ;;  %v1201_v57 = vld [vmem:[#allocation6 + $0xa0] sm:$0xff] }
 0x28f   :  { %10336 = vrcp.f32 %v908_v63  ;;  %v11373_v63 = vpack.c.bf16 %v1201_v57, %v1197_v56  ;;  %v11414_v56 = vpop.f32.mrb[6].mxu0 }
 0x290   :  { %v11416_v57 = vpop.f32.mrb[7].mxu0 }
 0x298   :  { %v10335_v52 = vpop.eup %10334 }
 0x299   :  { %v10337_v58 = vpop.eup %10336  ;;  %v925_v61 = vmul.f32 %v10335_v52, %v11279_v35  ;;  %v11355_v35 = vpack.c.bf16 %v1186_v34, %v1182_v30  ;;  %v1221_v34 = vld [vmem:[#allocation6 + $0x140] sm:$0xff] }
 0x29a   :  { %v11397_v36 = vpack.c.bf16 %v1225_v20, %v1221_v34 }
 0x29b   :  { %v896_v41 = vpop.f32.mrb[2].mxu1  ;;  %8494 = vmatprep.subr.bf16.mxu0 %v11355_v35 }
 0x29c   :  { %v10119_v45 = vadd.f32 %v896_v41, %v11272_v53  ;;  %v898_v13 = vpop.f32.mrb[3].mxu1  ;;  %8496 = vmatpush1.bf16.msra.mxu0 %v11357_v37  ;;  %v1206_v41 = vld [vmem:[#allocation6 + $0xc8] sm:$0xff] }
 0x29d   :  { %v10120_v18 = vadd.f32 %v898_v13, %v11275_v59  ;;  %8498 = vmatprep.subr.bf16.mxu0 %v11363_v23 }
 0x29e   :  { %10338 = vtanh.f32 %v10119_v45  ;;  %v1210_v45 = vld [vmem:[#allocation6 + $0xe8] sm:$0xff] }
 0x29f   :  { %v7745_v51 = vmul.f32 -1.442695, %v10120_v18  ;;  %v11379_v13 = vpack.c.bf16 %v1210_v45, %v1206_v41  ;;  %v1205_v18 = vld [vmem:[#allocation6 + $0xc0] sm:$0xff]  ;;  %v266_v41 = vadd.f32 %v11320_v11, %v11260_v26  ;;  %v268_v45 = vadd.f32 %v11322_v15, %v11263_v27 }
 0x2a0   :  { %8500 = vmatpush1.bf16.msra.mxu0 %v11365_v42 }
 0x2a1   :  { %10340 = vpow2.f32 %v7745_v51  ;;  %8502 = vmatprep.subr.bf16.mxu0 %v11371_v50  ;;  %v1209_v51 = vld [vmem:[#allocation6 + $0xe0] sm:$0xff] }
 0x2a2   :  { %v11381_v52 = vpack.c.bf16 %v1209_v51, %v1205_v18 }
 0x2a4   :  { %8504 = vmatpush1.bf16.msra.mxu0 %v11373_v63 }
 0x2a5   :  { %8506 = vmatprep.subr.bf16.mxu0 %v11379_v13 }
 0x2a8   :  { %v10339_v60 = vpop.eup %10338  ;;  %8508 = vmatpush1.bf16.msra.mxu0 %v11381_v52 }
 0x2a9   :  { %v926_v3 = vmul.f32 %v10339_v60, %v10337_v58  ;;  %v1214_v58 = vld [vmem:[#allocation6 + $0x108] sm:$0xff] }
 0x2aa   :  { %v1218_v60 = vld [vmem:[#allocation6 + $0x128] sm:$0xff] }
 0x2ab   :  { %v10341_v4 = vpop.eup %10340  ;;  %v11331_v6 = vadd.f32 %v926_v3, %v925_v61  ;;  %v11387_v61 = vpack.c.bf16 %v1218_v60, %v1214_v58  ;;  %v1213_v3 = vld [vmem:[#allocation6 + $0x100] sm:$0xff] }
 0x2ac   :  { %v921_v9 = vadd.f32 1.0, %v10341_v4  ;;  %v1217_v4 = vld [vmem:[#allocation6 + $0x120] sm:$0xff] }
 0x2ad   :  { %10342 = vtanh.f32 %v11331_v6  ;;  %8510 = vmatprep.subr.bf16.mxu0 %v11387_v61 }
 0x2ae   :  { %10344 = vrcp.f32 %v921_v9  ;;  %v11389_v9 = vpack.c.bf16 %v1217_v4, %v1213_v3 }
 0x2b0   :  { %8512 = vmatpush1.bf16.msra.mxu0 %v11389_v9 }
 0x2b7   :  { %v10343_v10 = vpop.eup %10342 }
 0x2b8   :  { %v10345_v12 = vpop.eup %10344 }
 0x2b9   :  { %v11334_v28 = vmul.f32 %v10345_v12, %v10343_v10  ;;  %v1222_v10 = vld [vmem:[#allocation6 + $0x148] sm:$0xff] }
 0x2ba   :  { %v1226_v12 = vld [vmem:[#allocation6 + $0x168] sm:$0xff] }
 0x2bb   :  { %1067 = vmatmul.mubr.f32.vlgmr.msra.gmra.mrb[20].mxu1 %v11334_v28  ;;  %v11395_v30 = vpack.c.bf16 %v1226_v12, %v1222_v10 }
 0x2bc   :  { %8400 = vmatpush1.bf16.msra.mxu1 %v11173_v14  ;;  %1137 = vmatprep.mubr.f32.mxu1 %v10872_v0 }
 0x2bd   :  { %8402 = vmatprep.subr.bf16.mxu1 %v11176_v17  ;;  %8514 = vmatprep.subr.bf16.mxu0 %v11395_v30 }
 0x2be   :  { %8516 = vmatpush1.bf16.msra.mxu0 %v11397_v36 }
 0x2bf   :  { %8518 = vmatprep.subr.bf16.mxu0 %v11402_v32 }
 0x2c0   :  { %8404 = vmatpush1.bf16.msra.mxu1 %v11182_v24 }
 0x2c1   :  { %8406 = vmatprep.subr.bf16.mxu1 %v11186_v25 }
 0x2c2   :  { %8520 = vmatpush1.bf16.msra.mxu0 %v11405_v49 }
 0x2c4   :  { %8408 = vmatpush1.bf16.msra.mxu1 %v11191_v31 }
 0x2c5   :  { %8410 = vmatprep.subr.bf16.mxu1 %v11194_v33 }
 0x2c8   :  { %8412 = vmatpush1.bf16.msra.mxu1 %v11199_v38 }
 0x2c9   :  { %8414 = vmatprep.subr.bf16.mxu1 %v11202_v39 }
 0x2cc   :  { %8416 = vmatpush1.bf16.msra.mxu1 %v11207_v46 }
 0x2cd   :  { %8418 = vmatprep.subr.bf16.mxu1 %v11210_v47 }
 0x2d0   :  { %8420 = vmatpush1.bf16.msra.mxu1 %v11213_v54 }
 0x2d1   :  { %8422 = vmatprep.subr.bf16.mxu1 %v11216_v55 }
 0x2d4   :  { %8424 = vmatpush1.bf16.msra.mxu1 %v11219_v62 }
 0x2d5   :  { %8426 = vmatprep.subr.bf16.mxu1 %v11222_v2 }
 0x2d8   :  { %8428 = vmatpush1.bf16.msra.mxu1 %v11225_v5 }
 0x2d9   :  { %8430 = vmatprep.subr.bf16.mxu1 %v11355_v35 }
 0x2db   :  { %1138 = vmatmul.mubr.f32.vlgmr.msra.gmra.mrb[4].mxu1 %v11334_v28 }
 0x2dc   :  { %1309 = vmatprep.mubr.f32.mxu1 %v10872_v0  ;;  %8432 = vmatpush1.bf16.msra.mxu1 %v11357_v37 }
 0x2dd   :  { %8434 = vmatprep.subr.bf16.mxu1 %v11363_v23 }
 0x2e0   :  { %8436 = vmatpush1.bf16.msra.mxu1 %v11365_v42 }
 0x2e1   :  { %8438 = vmatprep.subr.bf16.mxu1 %v11371_v50 }
 0x2e4   :  { %8440 = vmatpush1.bf16.msra.mxu1 %v11373_v63 }
 0x2e5   :  { %8442 = vmatprep.subr.bf16.mxu1 %v11379_v13 }
 0x2e8   :  { %8444 = vmatpush1.bf16.msra.mxu1 %v11381_v52 }
 0x2e9   :  { %8446 = vmatprep.subr.bf16.mxu1 %v11387_v61 }
 0x2ec   :  { %8448 = vmatpush1.bf16.msra.mxu1 %v11389_v9 }
 0x2ed   :  { %8450 = vmatprep.subr.bf16.mxu1 %v11395_v30 }
 0x2f0   :  { %8452 = vmatpush1.bf16.msra.mxu1 %v11397_v36 }
 0x2f1   :  { %8454 = vmatprep.subr.bf16.mxu1 %v11402_v32 }
 0x2f4   :  { %8456 = vmatpush1.bf16.msra.mxu1 %v11405_v49 }
 0x2f5   :  { %8458 = vmatprep.subr.bf16.mxu1 %v11153_v1 }
 0x2f8   :  { %8460 = vmatpush1.bf16.msra.mxu1 %v11163_v7 }
 0x2f9   :  { %8462 = vmatprep.subr.bf16.mxu1 %v11166_v8 }
 0x38e   :  { %v1068_v18 = vpop.f32.mrb[20].mxu1 }
 0x38f   :  { %v1144_v51 = vadd.f32 %v1068_v18, %v266_v41  ;;  %v1070_v58 = vpop.f32.mrb[21].mxu1 }
 0x390   :  { %v1145_v60 = vadd.f32 %v1070_v58, %v268_v45 }
 0x391   :  { %v7746_v1 = vmul.f32 -1.442695, %v1144_v51 }
 0x392   :  { %v7747_v3 = vmul.f32 -1.442695, %v1145_v60 }
 0x394   :  { %10346 = vpow2.f32 %v7747_v3 }
 0x395   :  { %10348 = vpow2.f32 %v7746_v1  ;;  %v1446_v1 = vld [vmem:[#allocation6 + $0xb0] sm:$0xff] }
 0x39e   :  { %v10347_v7 = vpop.eup %10346 }
 0x39f   :  { %v10349_v8 = vpop.eup %10348  ;;  %v1157_v4 = vadd.f32 1.0, %v10347_v7 }
 0x3a0   :  { %v1151_v10 = vadd.f32 1.0, %v10349_v8  ;;  %v1451_v8 = vld [vmem:[#allocation6 + $0xd8] sm:$0xff] }
 0x3a1   :  { %10350 = vrcp.f32 %v1157_v4  ;;  %v1455_v4 = vld [vmem:[#allocation6 + $0xf8] sm:$0xff] }
 0x3a2   :  { %10352 = vrcp.f32 %v1151_v10  ;;  %v11467_v10 = vpack.c.bf16 %v1455_v4, %v1451_v8  ;;  %v1483_v8 = vld [vmem:[#allocation6 + $0x1d8] sm:$0xff] }
 0x3ab   :  { %v10351_v16 = vpop.eup %10350 }
 0x3ac   :  { %v10353_v22 = vpop.eup %10352  ;;  %v1168_v43 = vmul.f32 %v10351_v16, %v11331_v6  ;;  %v1442_v6 = vld [vmem:[#allocation6 + $0x90] sm:$0xff] }
 0x3ad   :  { %v11463_v7 = vpack.c.bf16 %v1446_v1, %v1442_v6  ;;  %v1480_v6 = vld [vmem:[#allocation6 + $0x1c0] sm:$0xff] }
 0x3ae   :  { %v1139_v12 = vpop.f32.mrb[4].mxu1  ;;  %v1484_v1 = vld [vmem:[#allocation6 + $0x1e0] sm:$0xff] }
 0x3af   :  { %v10121_v34 = vadd.f32 %v1139_v12, %v11272_v53  ;;  %v1141_v11 = vpop.f32.mrb[5].mxu1  ;;  %v1450_v12 = vld [vmem:[#allocation6 + $0xd0] sm:$0xff]  ;;  %v11492_v4 = vpack.c.bf16 %v1484_v1, %v1480_v6 }
 0x3b0   :  { %v10122_v15 = vadd.f32 %v1141_v11, %v11275_v59 }
 0x3b1   :  { %10354 = vtanh.f32 %v10121_v34  ;;  %v1454_v34 = vld [vmem:[#allocation6 + $0xf0] sm:$0xff] }
 0x3b2   :  { %v7748_v20 = vmul.f32 -1.442695, %v10122_v15  ;;  %v11469_v11 = vpack.c.bf16 %v1454_v34, %v1450_v12  ;;  %v1459_v15 = vld [vmem:[#allocation6 + $0x118] sm:$0xff]  ;;  %v1482_v34 = vld [vmem:[#allocation6 + $0x1d0] sm:$0xff] }
 0x3b3   :  { %v1487_v12 = vld [vmem:[#allocation6 + $0x1f8] sm:$0xff] }
 0x3b4   :  { %10356 = vpow2.f32 %v7748_v20  ;;  %v1463_v20 = vld [vmem:[#allocation6 + $0x138] sm:$0xff] }
 0x3b5   :  { %v11473_v16 = vpack.c.bf16 %v1463_v20, %v1459_v15  ;;  %v1486_v15 = vld [vmem:[#allocation6 + $0x1f0] sm:$0xff]  ;;  %v11495_v20 = vpack.c.bf16 %v1487_v12, %v1483_v8 }
 0x3bb   :  { %v10355_v29 = vpop.eup %10354 }
 0x3bc   :  { %v1169_v41 = vmul.f32 %v10355_v29, %v10353_v22  ;;  %v1458_v22 = vld [vmem:[#allocation6 + $0x110] sm:$0xff] }
 0x3bd   :  { %v1462_v29 = vld [vmem:[#allocation6 + $0x130] sm:$0xff] }
 0x3be   :  { %v10357_v45 = vpop.eup %10356  ;;  %v11425_v18 = vadd.f32 %v1169_v41, %v1168_v43  ;;  %v11475_v43 = vpack.c.bf16 %v1462_v29, %v1458_v22  ;;  %v1467_v41 = vld [vmem:[#allocation6 + $0x158] sm:$0xff]  ;;  %v11499_v22 = vpack.c.bf16 %v1486_v15, %v1482_v34  ;;  %v272_v29 = vadd.f32 %v11414_v56, %v11260_v26 }
 0x3bf   :  { %v1164_v51 = vadd.f32 1.0, %v10357_v45  ;;  %v1471_v45 = vld [vmem:[#allocation6 + $0x178] sm:$0xff] }
 0x3c0   :  { %10358 = vtanh.f32 %v11425_v18 }
 0x3c1   :  { %10360 = vrcp.f32 %v1164_v51  ;;  %v11479_v51 = vpack.c.bf16 %v1471_v45, %v1467_v41  ;;  %v274_v41 = vadd.f32 %v11416_v57, %v11263_v27 }
 0x3ca   :  { %v10359_v58 = vpop.eup %10358 }
 0x3cb   :  { %v10361_v60 = vpop.eup %10360 }
 0x3cc   :  { %v11428_v3 = vmul.f32 %v10361_v60, %v10359_v58  ;;  %v1466_v58 = vld [vmem:[#allocation6 + $0x150] sm:$0xff] }
 0x3cd   :  { %v1470_v60 = vld [vmem:[#allocation6 + $0x170] sm:$0xff] }
 0x3ce   :  { %1310 = vmatmul.mubr.f32.vlgmr.msra.gmra.mrb[22].mxu1 %v11428_v3 }
 0x3cf   :  { %8464 = vmatpush1.bf16.msra.mxu1 %v11173_v14  ;;  %1380 = vmatprep.mubr.f32.mxu1 %v10872_v0  ;;  %v1427_v14 = vld [vmem:[#allocation6 + $0x18] sm:$0xff] }
 0x3d0   :  { %8466 = vmatprep.subr.bf16.mxu1 %v11176_v17  ;;  %v1431_v17 = vld [vmem:[#allocation6 + $0x38] sm:$0xff] }
 0x3d3   :  { %8468 = vmatpush1.bf16.msra.mxu1 %v11182_v24  ;;  %v11449_v24 = vpack.c.bf16 %v1431_v17, %v1427_v14  ;;  %v11481_v14 = vpack.c.bf16 %v1470_v60, %v1466_v58  ;;  %v1475_v17 = vld [vmem:[#allocation6 + $0x198] sm:$0xff] }
 0x3d4   :  { %8470 = vmatprep.subr.bf16.mxu1 %v11186_v25  ;;  %v1426_v25 = vld [vmem:[#allocation6 + $0x10] sm:$0xff] }
 0x3d7   :  { %8472 = vmatpush1.bf16.msra.mxu1 %v11191_v31  ;;  %v1430_v31 = vld [vmem:[#allocation6 + $0x30] sm:$0xff] }
 0x3d8   :  { %8474 = vmatprep.subr.bf16.mxu1 %v11194_v33  ;;  %v11451_v33 = vpack.c.bf16 %v1430_v31, %v1426_v25  ;;  %v1479_v25 = vld [vmem:[#allocation6 + $0x1b8] sm:$0xff]  ;;  %v1474_v31 = vld [vmem:[#allocation6 + $0x190] sm:$0xff] }
 0x3db   :  { %8476 = vmatpush1.bf16.msra.mxu1 %v11199_v38  ;;  %v1435_v38 = vld [vmem:[#allocation6 + $0x58] sm:$0xff] }
 0x3dc   :  { %8478 = vmatprep.subr.bf16.mxu1 %v11202_v39  ;;  %v1439_v39 = vld [vmem:[#allocation6 + $0x78] sm:$0xff] }
 0x3df   :  { %8480 = vmatpush1.bf16.msra.mxu1 %v11207_v46  ;;  %v11455_v46 = vpack.c.bf16 %v1439_v39, %v1435_v38  ;;  %v11484_v38 = vpack.c.bf16 %v1479_v25, %v1475_v17  ;;  %v1478_v39 = vld [vmem:[#allocation6 + $0x1b0] sm:$0xff] }
 0x3e0   :  { %8482 = vmatprep.subr.bf16.mxu1 %v11210_v47  ;;  %v1434_v47 = vld [vmem:[#allocation6 + $0x50] sm:$0xff] }
 0x3e3   :  { %8484 = vmatpush1.bf16.msra.mxu1 %v11213_v54  ;;  %v1438_v54 = vld [vmem:[#allocation6 + $0x70] sm:$0xff] }
 0x3e4   :  { %8486 = vmatprep.subr.bf16.mxu1 %v11216_v55  ;;  %v11457_v55 = vpack.c.bf16 %v1438_v54, %v1434_v47  ;;  %v1481_v47 = vld [vmem:[#allocation6 + $0x1c8] sm:$0xff] }
 0x3e5   :  { %v1485_v54 = vld [vmem:[#allocation6 + $0x1e8] sm:$0xff] }
 0x3e7   :  { %8488 = vmatpush1.bf16.msra.mxu1 %v11219_v62  ;;  %v1443_v62 = vld [vmem:[#allocation6 + $0x98] sm:$0xff] }
 0x3e8   :  { %8490 = vmatprep.subr.bf16.mxu1 %v11222_v2  ;;  %v1447_v2 = vld [vmem:[#allocation6 + $0xb8] sm:$0xff] }
 0x3eb   :  { %8492 = vmatpush1.bf16.msra.mxu1 %v11225_v5  ;;  %v11461_v5 = vpack.c.bf16 %v1447_v2, %v1443_v62  ;;  %v11487_v62 = vpack.c.bf16 %v1478_v39, %v1474_v31  ;;  %v11489_v2 = vpack.c.bf16 %v1485_v54, %v1481_v47 }
 0x3ec   :  { %8526 = vmatprep.subr.bf16.mxu1 %v11449_v24 }
 0x3ed   :  { %8522 = vmatprep.subr.bf16.mxu0 %v11489_v2 }
 0x3ee   :  { %1381 = vmatmul.mubr.f32.vlgmr.msra.gmra.mrb[6].mxu1 %v11428_v3  ;;  %8524 = vmatpush1.bf16.msra.mxu0 %v11492_v4 }
 0x3ef   :  { %1623 = vmatprep.mubr.f32.mxu1 %v10872_v0  ;;  %8528 = vmatpush1.bf16.msra.mxu1 %v11451_v33 }
 0x3f0   :  { %8530 = vmatprep.subr.bf16.mxu1 %v11455_v46  ;;  %8558 = vmatprep.subr.bf16.mxu0 %v11355_v35 }
 0x3f3   :  { %8532 = vmatpush1.bf16.msra.mxu1 %v11457_v55 }
 0x3f4   :  { %8534 = vmatprep.subr.bf16.mxu1 %v11461_v5 }
 0x3f7   :  { %8536 = vmatpush1.bf16.msra.mxu1 %v11463_v7 }
 0x3f8   :  { %8538 = vmatprep.subr.bf16.mxu1 %v11467_v10 }
 0x3fb   :  { %8540 = vmatpush1.bf16.msra.mxu1 %v11469_v11 }
 0x3fc   :  { %8542 = vmatprep.subr.bf16.mxu1 %v11473_v16 }
 0x3ff   :  { %8544 = vmatpush1.bf16.msra.mxu1 %v11475_v43 }
 0x400   :  { %8546 = vmatprep.subr.bf16.mxu1 %v11479_v51 }
 0x403   :  { %8548 = vmatpush1.bf16.msra.mxu1 %v11481_v14 }
 0x404   :  { %8550 = vmatprep.subr.bf16.mxu1 %v11484_v38 }
 0x407   :  { %8552 = vmatpush1.bf16.msra.mxu1 %v11487_v62 }
 0x408   :  { %8554 = vmatprep.subr.bf16.mxu1 %v11495_v20 }
 0x40b   :  { %8556 = vmatpush1.bf16.msra.mxu1 %v11499_v22 }
 0x40c   :  { %8590 = vmatprep.subr.bf16.mxu1 %v11449_v24 }
 0x4a1   :  { %v1311_v45 = vpop.f32.mrb[22].mxu1 }
 0x4a2   :  { %v1387_v58 = vadd.f32 %v1311_v45, %v272_v29  ;;  %v1313_v60 = vpop.f32.mrb[23].mxu1 }
 0x4a3   :  { %v1388_v17 = vadd.f32 %v1313_v60, %v274_v41 }
 0x4a4   :  { %v7749_v31 = vmul.f32 -1.442695, %v1387_v58 }
 0x4a5   :  { %v7750_v25 = vmul.f32 -1.442695, %v1388_v17 }
 0x4a7   :  { %10362 = vpow2.f32 %v7750_v25 }
 0x4a8   :  { %10364 = vpow2.f32 %v7749_v31 }
 0x4b1   :  { %v10363_v39 = vpop.eup %10362 }
 0x4b2   :  { %v10365_v47 = vpop.eup %10364  ;;  %v1400_v54 = vadd.f32 1.0, %v10363_v39 }
 0x4b3   :  { %v1394_v6 = vadd.f32 1.0, %v10365_v47 }
 0x4b4   :  { %10366 = vrcp.f32 %v1400_v54 }
 0x4b5   :  { %10368 = vrcp.f32 %v1394_v6 }
 0x4be   :  { %v10367_v34 = vpop.eup %10366 }
 0x4bf   :  { %v10369_v15 = vpop.eup %10368  ;;  %v1411_v41 = vmul.f32 %v10367_v34, %v11425_v18 }
 0x4c1   :  { %v1382_v1 = vpop.f32.mrb[6].mxu1 }
 0x4c2   :  { %v10123_v8 = vadd.f32 %v1382_v1, %v11272_v53  ;;  %v1384_v56 = vpop.f32.mrb[7].mxu1 }
 0x4c3   :  { %v10124_v57 = vadd.f32 %v1384_v56, %v11275_v59 }
 0x4c4   :  { %10370 = vtanh.f32 %v10123_v8 }
 0x4c5   :  { %v7751_v12 = vmul.f32 -1.442695, %v10124_v57 }
 0x4c7   :  { %10372 = vpow2.f32 %v7751_v12 }
 0x4ce   :  { %v10371_v29 = vpop.eup %10370 }
 0x4cf   :  { %v1412_v45 = vmul.f32 %v10371_v29, %v10369_v15 }
 0x4d1   :  { %v10373_v58 = vpop.eup %10372  ;;  %v11512_v60 = vadd.f32 %v1412_v45, %v1411_v41 }
 0x4d2   :  { %v1407_v17 = vadd.f32 1.0, %v10373_v58 }
 0x4d3   :  { %10374 = vtanh.f32 %v11512_v60 }
 0x4d4   :  { %10376 = vrcp.f32 %v1407_v17 }
 0x4dd   :  { %v10375_v25 = vpop.eup %10374 }
 0x4de   :  { %v10377_v31 = vpop.eup %10376 }
 0x4df   :  { %v11515_v39 = vmul.f32 %v10377_v31, %v10375_v25 }
 0x4e1   :  { %1553 = vmatmul.mubr.f32.vlgmr.msra.gmra.mrb[8].mxu0 %v11515_v39  ;;  %1624 = vmatmul.mubr.f32.vlgmr.msra.gmra.mrb[8].mxu1 %v11515_v39 }
 0x4e2   :  { %8560 = vmatpush1.bf16.msra.mxu0 %v11357_v37  ;;  %8592 = vmatpush1.bf16.msra.mxu1 %v11451_v33 }
 0x4e3   :  { %8562 = vmatprep.subr.bf16.mxu0 %v11363_v23  ;;  %8594 = vmatprep.subr.bf16.mxu1 %v11455_v46 }
 0x4e4   :  { %1795 = vmatprep.mubr.f32.mxu0 %v10872_v0  ;;  %1866 = vmatprep.mubr.f32.mxu1 %v10872_v0 }
 0x4e6   :  { %8564 = vmatpush1.bf16.msra.mxu0 %v11365_v42  ;;  %8596 = vmatpush1.bf16.msra.mxu1 %v11457_v55 }
 0x4e7   :  { %8566 = vmatprep.subr.bf16.mxu0 %v11371_v50  ;;  %8598 = vmatprep.subr.bf16.mxu1 %v11461_v5 }
 0x4ea   :  { %8568 = vmatpush1.bf16.msra.mxu0 %v11373_v63  ;;  %8600 = vmatpush1.bf16.msra.mxu1 %v11463_v7 }
 0x4eb   :  { %8570 = vmatprep.subr.bf16.mxu0 %v11379_v13  ;;  %8602 = vmatprep.subr.bf16.mxu1 %v11467_v10 }
 0x4ee   :  { %8572 = vmatpush1.bf16.msra.mxu0 %v11381_v52  ;;  %8604 = vmatpush1.bf16.msra.mxu1 %v11469_v11 }
 0x4ef   :  { %8574 = vmatprep.subr.bf16.mxu0 %v11387_v61  ;;  %8606 = vmatprep.subr.bf16.mxu1 %v11473_v16 }
 0x4f2   :  { %8576 = vmatpush1.bf16.msra.mxu0 %v11389_v9  ;;  %8608 = vmatpush1.bf16.msra.mxu1 %v11475_v43 }
 0x4f3   :  { %8578 = vmatprep.subr.bf16.mxu0 %v11395_v30  ;;  %8610 = vmatprep.subr.bf16.mxu1 %v11479_v51 }
 0x4f6   :  { %8580 = vmatpush1.bf16.msra.mxu0 %v11397_v36  ;;  %8612 = vmatpush1.bf16.msra.mxu1 %v11481_v14 }
 0x4f7   :  { %8582 = vmatprep.subr.bf16.mxu0 %v11402_v32  ;;  %8614 = vmatprep.subr.bf16.mxu1 %v11484_v38 }
 0x4fa   :  { %8584 = vmatpush1.bf16.msra.mxu0 %v11405_v49  ;;  %8616 = vmatpush1.bf16.msra.mxu1 %v11487_v62 }
 0x4fb   :  { %8586 = vmatprep.subr.bf16.mxu0 %v11489_v2  ;;  %8618 = vmatprep.subr.bf16.mxu1 %v11495_v20 }
 0x4fe   :  { %8588 = vmatpush1.bf16.msra.mxu0 %v11492_v4  ;;  %8620 = vmatpush1.bf16.msra.mxu1 %v11499_v22 }
 0x4ff   :  { %8622 = vmatprep.subr.bf16.mxu0 %v11355_v35  ;;  %8654 = vmatprep.subr.bf16.mxu1 %v11449_v24 }
 0x5b4   :  { %v1554_v52 = vpop.f32.mrb[8].mxu0  ;;  %v1625_v61 = vpop.f32.mrb[8].mxu1 }
 0x5b5   :  { %v10109_v9 = vadd.f32 %v1554_v52, %v11260_v26  ;;  %v1556_v30 = vpop.f32.mrb[9].mxu0  ;;  %v1627_v36 = vpop.f32.mrb[9].mxu1  ;;  %v10125_v6 = vadd.f32 %v1625_v61, %v11272_v53  ;;  %v1946_v52 = vld [vmem:[#allocation6 + $0x120] sm:$0xff] }
 0x5b6   :  { %v10110_v32 = vadd.f32 %v1556_v30, %v11263_v27  ;;  %v10126_v47 = vadd.f32 %v1627_v36, %v11275_v59  ;;  %v1955_v30 = vld [vmem:[#allocation6 + $0x168] sm:$0xff]  ;;  %v1950_v36 = vld [vmem:[#allocation6 + $0x140] sm:$0xff] }
 0x5b7   :  { %v7752_v49 = vmul.f32 -1.442695, %v10109_v9  ;;  %v1951_v9 = vld [vmem:[#allocation6 + $0x148] sm:$0xff] }
 0x5b8   :  { %v7753_v18 = vmul.f32 -1.442695, %v10110_v32  ;;  %v7754_v54 = vmul.f32 -1.442695, %v10126_v47  ;;  %v1954_v32 = vld [vmem:[#allocation6 + $0x160] sm:$0xff] }
 0x5b9   :  { %10378 = vpow2.f32 %v7752_v49  ;;  %v1959_v49 = vld [vmem:[#allocation6 + $0x188] sm:$0xff]  ;;  %v11600_v47 = vpack.c.bf16 %v1954_v32, %v1950_v36 }
 0x5ba   :  { %10380 = vpow2.f32 %v7753_v18  ;;  %v1963_v18 = vld [vmem:[#allocation6 + $0x1a8] sm:$0xff] }
 0x5bb   :  { %10382 = vpow2.f32 %v7754_v54  ;;  %v11602_v54 = vpack.c.bf16 %v1963_v18, %v1959_v49 }
 0x5bc   :  { %10384 = vtanh.f32 %v10125_v6  ;;  %v1958_v6 = vld [vmem:[#allocation6 + $0x180] sm:$0xff] }
 0x5c3   :  { %v10379_v35 = vpop.eup %10378 }
 0x5c4   :  { %v10381_v1 = vpop.eup %10380  ;;  %v1637_v8 = vadd.f32 1.0, %v10379_v35  ;;  %v1962_v35 = vld [vmem:[#allocation6 + $0x1a0] sm:$0xff] }
 0x5c5   :  { %v1643_v56 = vadd.f32 1.0, %v10381_v1  ;;  %v10383_v57 = vpop.eup %10382  ;;  %v11606_v1 = vpack.c.bf16 %v1962_v35, %v1958_v6 }
 0x5c6   :  { %10386 = vrcp.f32 %v1637_v8  ;;  %v10385_v12 = vpop.eup %10384  ;;  %v1650_v41 = vadd.f32 1.0, %v10383_v57 }
 0x5c7   :  { %10388 = vrcp.f32 %v1643_v56 }
 0x5c8   :  { %10390 = vrcp.f32 %v1650_v41 }
 0x5d0   :  { %v10387_v34 = vpop.eup %10386 }
 0x5d1   :  { %v10389_v15 = vpop.eup %10388  ;;  %v1655_v29 = vmul.f32 %v10387_v34, %v10385_v12 }
 0x5d2   :  { %v1654_v45 = vmul.f32 %v10389_v15, %v11512_v60  ;;  %v10391_v17 = vpop.eup %10390  ;;  %v1942_v60 = vld [vmem:[#allocation6 + $0x100] sm:$0xff] }
 0x5d3   :  { %v11594_v61 = vpack.c.bf16 %v1946_v52, %v1942_v60 }
 0x5d4   :  { %v11558_v58 = vadd.f32 %v1655_v29, %v1654_v45 }
 0x5d6   :  { %10392 = vtanh.f32 %v11558_v58 }
 0x5e0   :  { %v10393_v25 = vpop.eup %10392 }
 0x5e1   :  { %v11561_v31 = vmul.f32 %v10393_v25, %v10391_v17 }
 0x5e3   :  { %1796 = vmatmul.mubr.f32.vlgmr.msra.gmra.mrb[10].mxu0 %v11561_v31  ;;  %1867 = vmatmul.mubr.f32.vlgmr.msra.gmra.mrb[10].mxu1 %v11561_v31 }
 0x5e4   :  { %8624 = vmatpush1.bf16.msra.mxu0 %v11357_v37  ;;  %8656 = vmatpush1.bf16.msra.mxu1 %v11451_v33  ;;  %v1934_v37 = vld [vmem:[#allocation6 + $0xc0] sm:$0xff] }
 0x5e5   :  { %8626 = vmatprep.subr.bf16.mxu0 %v11363_v23  ;;  %8658 = vmatprep.subr.bf16.mxu1 %v11455_v46  ;;  %v1938_v23 = vld [vmem:[#allocation6 + $0xe0] sm:$0xff] }
 0x5e6   :  { %2038 = vmatprep.mubr.f32.mxu0 %v10872_v0  ;;  %2109 = vmatprep.mubr.f32.mxu1 %v10872_v0 }
 0x5e8   :  { %8628 = vmatpush1.bf16.msra.mxu0 %v11365_v42  ;;  %8660 = vmatpush1.bf16.msra.mxu1 %v11457_v55  ;;  %v11589_v42 = vpack.c.bf16 %v1938_v23, %v1934_v37 }
 0x5e9   :  { %8630 = vmatprep.subr.bf16.mxu0 %v11371_v50  ;;  %8662 = vmatprep.subr.bf16.mxu1 %v11461_v5  ;;  %v1943_v50 = vld [vmem:[#allocation6 + $0x108] sm:$0xff] }
 0x5ec   :  { %8632 = vmatpush1.bf16.msra.mxu0 %v11373_v63  ;;  %8664 = vmatpush1.bf16.msra.mxu1 %v11463_v7  ;;  %v1947_v63 = vld [vmem:[#allocation6 + $0x128] sm:$0xff] }
 0x5ed   :  { %8634 = vmatprep.subr.bf16.mxu0 %v11379_v13  ;;  %8666 = vmatprep.subr.bf16.mxu1 %v11467_v10  ;;  %v11592_v13 = vpack.c.bf16 %v1947_v63, %v1943_v50 }
 0x5f0   :  { %8668 = vmatpush1.bf16.msra.mxu1 %v11469_v11  ;;  %8636 = vmatpush1.bf16.msra.mxu0 %v11589_v42 }
 0x5f1   :  { %8670 = vmatprep.subr.bf16.mxu1 %v11473_v16  ;;  %8638 = vmatprep.subr.bf16.mxu0 %v11592_v13 }
 0x5f4   :  { %8672 = vmatpush1.bf16.msra.mxu1 %v11475_v43  ;;  %8640 = vmatpush1.bf16.msra.mxu0 %v11594_v61 }
 0x5f5   :  { %8674 = vmatprep.subr.bf16.mxu1 %v11479_v51 }
 0x5f8   :  { %8676 = vmatpush1.bf16.msra.mxu1 %v11481_v14 }
 0x5f9   :  { %8678 = vmatprep.subr.bf16.mxu1 %v11484_v38 }
 0x5fc   :  { %8680 = vmatpush1.bf16.msra.mxu1 %v11487_v62 }
 0x5fd   :  { %8682 = vmatprep.subr.bf16.mxu1 %v11495_v20 }
 0x600   :  { %8684 = vmatpush1.bf16.msra.mxu1 %v11499_v22 }
 0x601   :  { %8718 = vmatprep.subr.bf16.mxu1 %v11449_v24  ;;  %v11598_v24 = vpack.c.bf16 %v1955_v30, %v1951_v9 }
 0x603   :  { %8642 = vmatprep.subr.bf16.mxu0 %v11598_v24 }
 0x604   :  { %8644 = vmatpush1.bf16.msra.mxu0 %v11600_v47 }
 0x605   :  { %8646 = vmatprep.subr.bf16.mxu0 %v11602_v54 }
 0x608   :  { %8648 = vmatpush1.bf16.msra.mxu0 %v11606_v1 }
 0x609   :  { %8650 = vmatprep.subr.bf16.mxu0 %v11489_v2 }
 0x60c   :  { %8652 = vmatpush1.bf16.msra.mxu0 %v11492_v4 }
 0x6b6   :  { %v1797_v8 = vpop.f32.mrb[10].mxu0  ;;  %v1868_v56 = vpop.f32.mrb[10].mxu1 }
 0x6b7   :  { %v10111_v57 = vadd.f32 %v1797_v8, %v11260_v26  ;;  %v1799_v12 = vpop.f32.mrb[11].mxu0  ;;  %v1870_v34 = vpop.f32.mrb[11].mxu1  ;;  %v10127_v25 = vadd.f32 %v1868_v56, %v11272_v53  ;;  %v2173_v56 = vld [vmem:[#allocation6 + $0xa0] sm:$0xff] }
 0x6b8   :  { %v10112_v15 = vadd.f32 %v1799_v12, %v11263_v27  ;;  %v10128_v45 = vadd.f32 %v1870_v34, %v11275_v59  ;;  %v2178_v12 = vld [vmem:[#allocation6 + $0xc8] sm:$0xff] }
 0x6b9   :  { %v7755_v29 = vmul.f32 -1.442695, %v10111_v57  ;;  %v2182_v34 = vld [vmem:[#allocation6 + $0xe8] sm:$0xff] }
 0x6ba   :  { %v7756_v41 = vmul.f32 -1.442695, %v10112_v15  ;;  %v7757_v17 = vmul.f32 -1.442695, %v10128_v45  ;;  %v8697_v15 = vpack.c.bf16 %v2182_v34, %v2178_v12  ;;  %v2409_v12 = vld [vmem:[#allocation9 + $0x50] sm:$0xff] }
 0x6bb   :  { %10394 = vpow2.f32 %v7755_v29  ;;  %v2402_v29 = vld [vmem:[#allocation9 + $0x18] sm:$0xff]  ;;  %v2413_v34 = vld [vmem:[#allocation9 + $0x70] sm:$0xff] }
 0x6bc   :  { %10396 = vpow2.f32 %v7756_v41  ;;  %v2406_v41 = vld [vmem:[#allocation9 + $0x38] sm:$0xff] }
 0x6bd   :  { %10398 = vpow2.f32 %v7757_v17  ;;  %v8781_v45 = vpack.c.bf16 %v2406_v41, %v2402_v29  ;;  %v2400_v17 = vld [vmem:[#allocation9 + $0x8] sm:$0xff]  ;;  %v2418_v41 = vld [vmem:[#allocation9 + $0x98] sm:$0xff] }
 0x6be   :  { %10400 = vtanh.f32 %v10127_v25  ;;  %v2404_v25 = vld [vmem:[#allocation9 + $0x28] sm:$0xff] }
 0x6bf   :  { %v2420_v29 = vld [vmem:[#allocation9 + $0xa8] sm:$0xff] }
 0x6c5   :  { %v10395_v37 = vpop.eup %10394 }
 0x6c6   :  { %v10397_v23 = vpop.eup %10396  ;;  %v1880_v50 = vadd.f32 1.0, %v10395_v37 }
 0x6c7   :  { %v1886_v63 = vadd.f32 1.0, %v10397_v23  ;;  %v10399_v60 = vpop.eup %10398 }
 0x6c8   :  { %10402 = vrcp.f32 %v1880_v50  ;;  %v10401_v52 = vpop.eup %10400  ;;  %v1893_v32 = vadd.f32 1.0, %v10399_v60 }
 0x6c9   :  { %10404 = vrcp.f32 %v1886_v63 }
 0x6ca   :  { %10406 = vrcp.f32 %v1893_v32 }
 0x6d2   :  { %v10403_v9 = vpop.eup %10402 }
 0x6d3   :  { %v10405_v30 = vpop.eup %10404  ;;  %v1898_v36 = vmul.f32 %v10403_v9, %v10401_v52 }
 0x6d4   :  { %v1897_v49 = vmul.f32 %v10405_v30, %v11558_v58  ;;  %v10407_v6 = vpop.eup %10406 }
 0x6d6   :  { %v11617_v18 = vadd.f32 %v1898_v36, %v1897_v49 }
 0x6d8   :  { %10408 = vtanh.f32 %v11617_v18 }
 0x6e2   :  { %v10409_v35 = vpop.eup %10408 }
 0x6e3   :  { %v11620_v8 = vmul.f32 %v10409_v35, %v10407_v6 }
 0x6e5   :  { %2039 = vmatmul.mubr.f32.vlgmr.msra.gmra.mrb[12].mxu0 %v11620_v8  ;;  %2110 = vmatmul.mubr.f32.vlgmr.msra.gmra.mrb[12].mxu1 %v11620_v8 }
 0x6e6   :  { %8720 = vmatpush1.bf16.msra.mxu1 %v11451_v33  ;;  %2281 = vmatprep.mubr.f32.mxu0 %v10872_v0  ;;  %v2154_v33 = vld [vmem:[#allocation6 + $0x8] sm:$0xff] }
 0x6e7   :  { %8722 = vmatprep.subr.bf16.mxu1 %v11455_v46  ;;  %2352 = vmatprep.mubr.f32.mxu1 %v10872_v0  ;;  %v2158_v46 = vld [vmem:[#allocation6 + $0x28] sm:$0xff] }
 0x6ea   :  { %8724 = vmatpush1.bf16.msra.mxu1 %v11457_v55  ;;  %v8685_v55 = vpack.c.bf16 %v2158_v46, %v2154_v33 }
 0x6eb   :  { %8726 = vmatprep.subr.bf16.mxu1 %v11461_v5  ;;  %v2153_v5 = vld [vmem:[#allocation6] sm:$0xff] }
 0x6ec   :  { %8686 = vmatprep.subr.bf16.mxu0 %v8685_v55  ;;  %v2399_v55 = vld [vmem:[#allocation9] sm:$0xff] }
 0x6ee   :  { %8728 = vmatpush1.bf16.msra.mxu1 %v11463_v7  ;;  %v2157_v7 = vld [vmem:[#allocation6 + $0x20] sm:$0xff] }
 0x6ef   :  { %8730 = vmatprep.subr.bf16.mxu1 %v11467_v10  ;;  %v8687_v10 = vpack.c.bf16 %v2157_v7, %v2153_v5  ;;  %v2403_v5 = vld [vmem:[#allocation9 + $0x20] sm:$0xff]  ;;  %v2401_v7 = vld [vmem:[#allocation9 + $0x10] sm:$0xff] }
 0x6f1   :  { %8688 = vmatpush1.bf16.msra.mxu0 %v8687_v10  ;;  %v2405_v10 = vld [vmem:[#allocation9 + $0x30] sm:$0xff] }
 0x6f2   :  { %8732 = vmatpush1.bf16.msra.mxu1 %v11469_v11  ;;  %v2162_v11 = vld [vmem:[#allocation6 + $0x48] sm:$0xff] }
 0x6f3   :  { %8734 = vmatprep.subr.bf16.mxu1 %v11473_v16  ;;  %v2166_v16 = vld [vmem:[#allocation6 + $0x68] sm:$0xff] }
 0x6f6   :  { %8736 = vmatpush1.bf16.msra.mxu1 %v11475_v43  ;;  %v8689_v43 = vpack.c.bf16 %v2166_v16, %v2162_v11  ;;  %v2408_v11 = vld [vmem:[#allocation9 + $0x48] sm:$0xff] }
 0x6f7   :  { %8738 = vmatprep.subr.bf16.mxu1 %v11479_v51  ;;  %v2161_v51 = vld [vmem:[#allocation6 + $0x40] sm:$0xff]  ;;  %v2412_v16 = vld [vmem:[#allocation9 + $0x68] sm:$0xff] }
 0x6f8   :  { %8690 = vmatprep.subr.bf16.mxu0 %v8689_v43  ;;  %v2410_v43 = vld [vmem:[#allocation9 + $0x58] sm:$0xff] }
 0x6fa   :  { %8740 = vmatpush1.bf16.msra.mxu1 %v11481_v14  ;;  %v2165_v14 = vld [vmem:[#allocation6 + $0x60] sm:$0xff] }
 0x6fb   :  { %8742 = vmatprep.subr.bf16.mxu1 %v11484_v38  ;;  %v8691_v38 = vpack.c.bf16 %v2165_v14, %v2161_v51  ;;  %v2414_v51 = vld [vmem:[#allocation9 + $0x78] sm:$0xff] }
 0x6fd   :  { %8692 = vmatpush1.bf16.msra.mxu0 %v8691_v38 }
 0x6fe   :  { %8744 = vmatpush1.bf16.msra.mxu1 %v11487_v62  ;;  %v2170_v62 = vld [vmem:[#allocation6 + $0x88] sm:$0xff] }
 0x6ff   :  { %8746 = vmatprep.subr.bf16.mxu1 %v11495_v20  ;;  %v2174_v20 = vld [vmem:[#allocation6 + $0xa8] sm:$0xff] }
 0x700   :  { %v8693_v58 = vpack.c.bf16 %v2174_v20, %v2170_v62  ;;  %v8751_v62 = vpack.c.bf16 %v2403_v5, %v2399_v55  ;;  %v8783_v20 = vpack.c.bf16 %v2405_v10, %v2401_v7  ;;  %v2431_v5 = vld [vmem:[#allocation9 + $0x100] sm:$0xff] }
 0x701   :  { %v2435_v7 = vld [vmem:[#allocation9 + $0x120] sm:$0xff] }
 0x702   :  { %8748 = vmatpush1.bf16.msra.mxu1 %v11499_v22  ;;  %v2169_v22 = vld [vmem:[#allocation6 + $0x80] sm:$0xff]  ;;  %8694 = vmatprep.subr.bf16.mxu0 %v8693_v58 }
 0x703   :  { %v8695_v57 = vpack.c.bf16 %v2173_v56, %v2169_v22  ;;  %8782 = vmatprep.subr.bf16.mxu1 %v8781_v45  ;;  %v2407_v58 = vld [vmem:[#allocation9 + $0x40] sm:$0xff]  ;;  %v8753_v56 = vpack.c.bf16 %v2412_v16, %v2408_v11  ;;  %v2422_v45 = vld [vmem:[#allocation9 + $0xb8] sm:$0xff]  ;;  %v2433_v16 = vld [vmem:[#allocation9 + $0x110] sm:$0xff] }
 0x704   :  { %v2411_v22 = vld [vmem:[#allocation9 + $0x60] sm:$0xff] }
 0x705   :  { %8696 = vmatpush1.bf16.msra.mxu0 %v8695_v57  ;;  %v8785_v57 = vpack.c.bf16 %v2414_v51, %v2410_v43  ;;  %v2437_v43 = vld [vmem:[#allocation9 + $0x130] sm:$0xff]  ;;  %v2440_v51 = vld [vmem:[#allocation9 + $0x148] sm:$0xff] }
 0x706   :  { %8698 = vmatprep.subr.bf16.mxu0 %v8697_v15  ;;  %v2416_v15 = vld [vmem:[#allocation9 + $0x88] sm:$0xff] }
 0x709   :  { %8700 = vmatpush1.bf16.msra.mxu0 %v11589_v42  ;;  %v8749_v42 = vpack.c.bf16 %v2404_v25, %v2400_v17  ;;  %v8755_v17 = vpack.c.bf16 %v2411_v22, %v2407_v58  ;;  %v8787_v25 = vpack.c.bf16 %v2413_v34, %v2409_v12  ;;  %v8799_v58 = vpack.c.bf16 %v2437_v43, %v2433_v16  ;;  %v2439_v22 = vld [vmem:[#allocation9 + $0x140] sm:$0xff]  ;;  %v2441_v34 = vld [vmem:[#allocation9 + $0x150] sm:$0xff]  ;;  %v2761_v16 = vld [vmem:[#allocation11 + $0x58] sm:$0xff] }
 0x70a   :  { %8702 = vmatprep.subr.bf16.mxu0 %v11592_v13 }
 0x70d   :  { %8704 = vmatpush1.bf16.msra.mxu0 %v11594_v61 }
 0x70e   :  { %8706 = vmatprep.subr.bf16.mxu0 %v11598_v24 }
 0x711   :  { %8708 = vmatpush1.bf16.msra.mxu0 %v11600_v47 }
 0x712   :  { %8710 = vmatprep.subr.bf16.mxu0 %v11602_v54 }
 0x715   :  { %8712 = vmatpush1.bf16.msra.mxu0 %v11606_v1 }
 0x716   :  { %8714 = vmatprep.subr.bf16.mxu0 %v11489_v2 }
 0x719   :  { %8716 = vmatpush1.bf16.msra.mxu0 %v11492_v4 }
 0x71a   :  { %8750 = vmatprep.subr.bf16.mxu0 %v8749_v42  ;;  %v2415_v42 = vld [vmem:[#allocation9 + $0x80] sm:$0xff] }
 0x7b8   :  { %v2040_v13 = vpop.f32.mrb[12].mxu0  ;;  %v2111_v61 = vpop.f32.mrb[12].mxu1 }
 0x7b9   :  { %v10113_v24 = vadd.f32 %v2040_v13, %v11260_v26  ;;  %v2042_v37 = vpop.f32.mrb[13].mxu0  ;;  %v2113_v23 = vpop.f32.mrb[13].mxu1  ;;  %v10129_v2 = vadd.f32 %v2111_v61, %v11272_v53  ;;  %v2419_v13 = vld [vmem:[#allocation9 + $0xa0] sm:$0xff]  ;;  %v8757_v61 = vpack.c.bf16 %v2420_v29, %v2416_v15  ;;  %v2445_v15 = vld [vmem:[#allocation9 + $0x170] sm:$0xff]  ;;  %v2448_v29 = vld [vmem:[#allocation9 + $0x188] sm:$0xff] }
 0x7ba   :  { %v10114_v47 = vadd.f32 %v2042_v37, %v11263_v27  ;;  %v10130_v1 = vadd.f32 %v2113_v23, %v11275_v59  ;;  %v2417_v37 = vld [vmem:[#allocation9 + $0x90] sm:$0xff] }
 0x7bb   :  { %v7758_v50 = vmul.f32 -1.442695, %v10113_v24  ;;  %v8789_v24 = vpack.c.bf16 %v2422_v45, %v2418_v41  ;;  %v2421_v23 = vld [vmem:[#allocation9 + $0xb0] sm:$0xff]  ;;  %v2452_v41 = vld [vmem:[#allocation9 + $0x1a8] sm:$0xff]  ;;  %v2450_v45 = vld [vmem:[#allocation9 + $0x198] sm:$0xff] }
 0x7bc   :  { %v7759_v54 = vmul.f32 -1.442695, %v10114_v47  ;;  %v7760_v63 = vmul.f32 -1.442695, %v10130_v1  ;;  %v2424_v47 = vld [vmem:[#allocation9 + $0xc8] sm:$0xff]  ;;  %v2430_v1 = vld [vmem:[#allocation9 + $0xf8] sm:$0xff] }
 0x7bd   :  { %10410 = vpow2.f32 %v7758_v50  ;;  %v2428_v50 = vld [vmem:[#allocation9 + $0xe8] sm:$0xff] }
 0x7be   :  { %10412 = vpow2.f32 %v7759_v54  ;;  %v2426_v54 = vld [vmem:[#allocation9 + $0xd8] sm:$0xff] }
 0x7bf   :  { %10414 = vpow2.f32 %v7760_v63  ;;  %v8759_v63 = vpack.c.bf16 %v2419_v13, %v2415_v42  ;;  %v8803_v42 = vpack.c.bf16 %v2445_v15, %v2441_v34  ;;  %v2447_v13 = vld [vmem:[#allocation9 + $0x180] sm:$0xff]  ;;  %v2769_v34 = vld [vmem:[#allocation11 + $0x98] sm:$0xff] }
 0x7c0   :  { %10416 = vtanh.f32 %v10129_v2  ;;  %v8791_v2 = vpack.c.bf16 %v2421_v23, %v2417_v37  ;;  %v2449_v23 = vld [vmem:[#allocation9 + $0x190] sm:$0xff] }
 0x7c7   :  { %v10411_v60 = vpop.eup %10410 }
 0x7c8   :  { %v10413_v4 = vpop.eup %10412  ;;  %v2123_v52 = vadd.f32 1.0, %v10411_v60  ;;  %v2423_v60 = vld [vmem:[#allocation9 + $0xc0] sm:$0xff] }
 0x7c9   :  { %v2129_v9 = vadd.f32 1.0, %v10413_v4  ;;  %v10415_v30 = vpop.eup %10414  ;;  %v2427_v4 = vld [vmem:[#allocation9 + $0xe0] sm:$0xff] }
 0x7ca   :  { %10418 = vrcp.f32 %v2123_v52  ;;  %v10417_v36 = vpop.eup %10416  ;;  %v2136_v35 = vadd.f32 1.0, %v10415_v30  ;;  %v8761_v52 = vpack.c.bf16 %v2428_v50, %v2424_v47  ;;  %v2425_v30 = vld [vmem:[#allocation9 + $0xd0] sm:$0xff]  ;;  %v2456_v50 = vld [vmem:[#allocation9 + $0x1c8] sm:$0xff] }
 0x7cb   :  { %10420 = vrcp.f32 %v2129_v9  ;;  %v8793_v9 = vpack.c.bf16 %v2430_v1, %v2426_v54  ;;  %v2453_v47 = vld [vmem:[#allocation9 + $0x1b0] sm:$0xff]  ;;  %v2460_v54 = vld [vmem:[#allocation9 + $0x1e8] sm:$0xff]  ;;  %v2458_v1 = vld [vmem:[#allocation9 + $0x1d8] sm:$0xff] }
 0x7cc   :  { %10422 = vrcp.f32 %v2136_v35  ;;  %v2438_v35 = vld [vmem:[#allocation9 + $0x138] sm:$0xff] }
 0x7d4   :  { %v10419_v32 = vpop.eup %10418 }
 0x7d5   :  { %v10421_v49 = vpop.eup %10420  ;;  %v2141_v6 = vmul.f32 %v10419_v32, %v10417_v36  ;;  %v2429_v36 = vld [vmem:[#allocation9 + $0xf0] sm:$0xff]  ;;  %v2432_v32 = vld [vmem:[#allocation9 + $0x108] sm:$0xff] }
 0x7d6   :  { %v2140_v33 = vmul.f32 %v10421_v49, %v11617_v18  ;;  %v10423_v14 = vpop.eup %10422  ;;  %v2436_v49 = vld [vmem:[#allocation9 + $0x128] sm:$0xff]  ;;  %v8795_v55 = vpack.c.bf16 %v2429_v36, %v2425_v30  ;;  %v2459_v30 = vld [vmem:[#allocation9 + $0x1e0] sm:$0xff]  ;;  %v2457_v36 = vld [vmem:[#allocation9 + $0x1d0] sm:$0xff] }
 0x7d7   :  { %v8765_v10 = vpack.c.bf16 %v2436_v49, %v2432_v32  ;;  %v2461_v32 = vld [vmem:[#allocation9 + $0x1f0] sm:$0xff] }
 0x7d8   :  { %v11655_v46 = vadd.f32 %v2141_v6, %v2140_v33  ;;  %v2434_v6 = vld [vmem:[#allocation9 + $0x118] sm:$0xff]  ;;  %v8763_v33 = vpack.c.bf16 %v2427_v4, %v2423_v60  ;;  %v8807_v60 = vpack.c.bf16 %v2453_v47, %v2449_v23  ;;  %v2455_v4 = vld [vmem:[#allocation9 + $0x1c0] sm:$0xff] }
 0x7d9   :  { %v8797_v11 = vpack.c.bf16 %v2438_v35, %v2434_v6  ;;  %v8779_v49 = vpack.c.bf16 %v2459_v30, %v2455_v4  ;;  %v8811_v6 = vpack.c.bf16 %v2461_v32, %v2457_v36  ;;  %v2754_v35 = vld [vmem:[#allocation11 + $0x20] sm:$0xff]  ;;  %v2777_v23 = vld [vmem:[#allocation11 + $0xd8] sm:$0xff]  ;;  %v2780_v4 = vld [vmem:[#allocation11 + $0xf0] sm:$0xff] }
 0x7da   :  { %10424 = vtanh.f32 %v11655_v46  ;;  %v2787_v30 = vld [vmem:[#allocation11 + $0x128] sm:$0xff]  ;;  %v2782_v36 = vld [vmem:[#allocation11 + $0x100] sm:$0xff] }
 0x7db   :  { %v2786_v32 = vld [vmem:[#allocation11 + $0x120] sm:$0xff] }
 0x7e4   :  { %v10425_v38 = vpop.eup %10424 }
 0x7e5   :  { %v11658_v18 = vmul.f32 %v10425_v38, %v10423_v14  ;;  %v2444_v14 = vld [vmem:[#allocation9 + $0x168] sm:$0xff]  ;;  %v2442_v38 = vld [vmem:[#allocation9 + $0x158] sm:$0xff] }
 0x7e7   :  { %2282 = vmatmul.mubr.f32.vlgmr.msra.gmra.mrb[14].mxu0 %v11658_v18  ;;  %2353 = vmatmul.mubr.f32.vlgmr.msra.gmra.mrb[14].mxu1 %v11658_v18 }
 0x7e8   :  { %8752 = vmatpush1.bf16.msra.mxu0 %v8751_v62  ;;  %8784 = vmatpush1.bf16.msra.mxu1 %v8783_v20  ;;  %v2446_v62 = vld [vmem:[#allocation9 + $0x178] sm:$0xff]  ;;  %v8767_v20 = vpack.c.bf16 %v2435_v7, %v2431_v5  ;;  %v2752_v5 = vld [vmem:[#allocation11 + $0x10] sm:$0xff] }
 0x7e9   :  { %8754 = vmatprep.subr.bf16.mxu0 %v8753_v56  ;;  %8786 = vmatprep.subr.bf16.mxu1 %v8785_v57  ;;  %v2443_v56 = vld [vmem:[#allocation9 + $0x160] sm:$0xff]  ;;  %v8769_v57 = vpack.c.bf16 %v2444_v14, %v2440_v51  ;;  %v8801_v12 = vpack.c.bf16 %v2446_v62, %v2442_v38  ;;  %v2756_v7 = vld [vmem:[#allocation11 + $0x30] sm:$0xff]  ;;  %v2765_v38 = vld [vmem:[#allocation11 + $0x78] sm:$0xff] }
 0x7ea   :  { %2549 = vmatprep.mubr.f32.mxu0 %v10872_v0  ;;  %2662 = vmatprep.mubr.f32.mxu1 %v10872_v0  ;;  %v2758_v51 = vld [vmem:[#allocation11 + $0x40] sm:$0xff] }
 0x7eb   :  { %v2762_v14 = vld [vmem:[#allocation11 + $0x60] sm:$0xff] }
 0x7ec   :  { %8756 = vmatpush1.bf16.msra.mxu0 %v8755_v17  ;;  %8788 = vmatpush1.bf16.msra.mxu1 %v8787_v25  ;;  %v2454_v17 = vld [vmem:[#allocation9 + $0x1b8] sm:$0xff]  ;;  %v8771_v25 = vpack.c.bf16 %v2443_v56, %v2439_v22  ;;  %v11706_v62 = vpack.c.bf16 %v2762_v14, %v2758_v51  ;;  %v2764_v22 = vld [vmem:[#allocation11 + $0x70] sm:$0xff] }
 0x7ed   :  { %8758 = vmatprep.subr.bf16.mxu0 %v8757_v61  ;;  %8790 = vmatprep.subr.bf16.mxu1 %v8789_v24  ;;  %v2451_v61 = vld [vmem:[#allocation9 + $0x1a0] sm:$0xff]  ;;  %v8773_v24 = vpack.c.bf16 %v2452_v41, %v2448_v29  ;;  %v8805_v37 = vpack.c.bf16 %v2454_v17, %v2450_v45  ;;  %v2773_v45 = vld [vmem:[#allocation11 + $0xb8] sm:$0xff] }
 0x7ee   :  { %v2766_v29 = vld [vmem:[#allocation11 + $0x80] sm:$0xff]  ;;  %v2793_v51 = vld [vmem:[#allocation11 + $0x158] sm:$0xff] }
 0x7ef   :  { %v2770_v41 = vld [vmem:[#allocation11 + $0xa0] sm:$0xff]  ;;  %v2797_v14 = vld [vmem:[#allocation11 + $0x178] sm:$0xff] }
 0x7f0   :  { %8760 = vmatpush1.bf16.msra.mxu0 %v8759_v63  ;;  %8792 = vmatpush1.bf16.msra.mxu1 %v8791_v2  ;;  %v2462_v63 = vld [vmem:[#allocation9 + $0x1f8] sm:$0xff]  ;;  %v8775_v2 = vpack.c.bf16 %v2451_v61, %v2447_v13  ;;  %v11718_v17 = vpack.c.bf16 %v2770_v41, %v2766_v29  ;;  %v2772_v13 = vld [vmem:[#allocation11 + $0xb0] sm:$0xff]  ;;  %v2798_v29 = vld [vmem:[#allocation11 + $0x180] sm:$0xff] }
 0x7f1   :  { %8762 = vmatprep.subr.bf16.mxu0 %v8761_v52  ;;  %8794 = vmatprep.subr.bf16.mxu1 %v8793_v9  ;;  %v8777_v52 = vpack.c.bf16 %v2460_v54, %v2456_v50  ;;  %v8809_v9 = vpack.c.bf16 %v2462_v63, %v2458_v1  ;;  %v2774_v50 = vld [vmem:[#allocation11 + $0xc0] sm:$0xff]  ;;  %v2781_v1 = vld [vmem:[#allocation11 + $0xf8] sm:$0xff] }
 0x7f2   :  { %v2778_v54 = vld [vmem:[#allocation11 + $0xe0] sm:$0xff] }
 0x7f3   :  { %v11730_v63 = vpack.c.bf16 %v2778_v54, %v2774_v50  ;;  %v2804_v50 = vld [vmem:[#allocation11 + $0x1b0] sm:$0xff]  ;;  %v2807_v54 = vld [vmem:[#allocation11 + $0x1c8] sm:$0xff] }
 0x7f4   :  { %8764 = vmatpush1.bf16.msra.mxu0 %v8763_v33  ;;  %8796 = vmatpush1.bf16.msra.mxu1 %v8795_v55 }
 0x7f5   :  { %8766 = vmatprep.subr.bf16.mxu0 %v8765_v10  ;;  %8798 = vmatprep.subr.bf16.mxu1 %v8797_v11  ;;  %v2759_v10 = vld [vmem:[#allocation11 + $0x48] sm:$0xff] }
 0x7f6   :  { %v2763_v11 = vld [vmem:[#allocation11 + $0x68] sm:$0xff] }
 0x7f7   :  { %v11704_v43 = vpack.c.bf16 %v2763_v11, %v2759_v10  ;;  %v2790_v11 = vld [vmem:[#allocation11 + $0x140] sm:$0xff] }
 0x7f8   :  { %8768 = vmatpush1.bf16.msra.mxu0 %v8767_v20  ;;  %8800 = vmatpush1.bf16.msra.mxu1 %v8799_v58  ;;  %v11708_v20 = vpack.c.bf16 %v2765_v38, %v2761_v16  ;;  %v2760_v58 = vld [vmem:[#allocation11 + $0x50] sm:$0xff]  ;;  %v2794_v16 = vld [vmem:[#allocation11 + $0x160] sm:$0xff] }
 0x7f9   :  { %8770 = vmatprep.subr.bf16.mxu0 %v8769_v57  ;;  %8802 = vmatprep.subr.bf16.mxu1 %v8801_v12  ;;  %v11711_v56 = vpack.c.bf16 %v2764_v22, %v2760_v58  ;;  %v2767_v57 = vld [vmem:[#allocation11 + $0x88] sm:$0xff]  ;;  %v2792_v38 = vld [vmem:[#allocation11 + $0x150] sm:$0xff]  ;;  %v11753_v22 = vpack.c.bf16 %v2794_v16, %v2790_v11 }
 0x7fa   :  { %v2771_v12 = vld [vmem:[#allocation11 + $0xa8] sm:$0xff]  ;;  %v2796_v58 = vld [vmem:[#allocation11 + $0x170] sm:$0xff] }
 0x7fb   :  { %v11716_v15 = vpack.c.bf16 %v2771_v12, %v2767_v57  ;;  %v11755_v57 = vpack.c.bf16 %v2797_v14, %v2793_v51  ;;  %v2799_v12 = vld [vmem:[#allocation11 + $0x188] sm:$0xff]  ;;  %v11759_v41 = vpack.c.bf16 %v2796_v58, %v2792_v38 }
 0x7fc   :  { %8772 = vmatpush1.bf16.msra.mxu0 %v8771_v25  ;;  %8804 = vmatpush1.bf16.msra.mxu1 %v8803_v42  ;;  %v11720_v25 = vpack.c.bf16 %v2773_v45, %v2769_v34  ;;  %v2768_v42 = vld [vmem:[#allocation11 + $0x90] sm:$0xff]  ;;  %v2803_v34 = vld [vmem:[#allocation11 + $0x1a8] sm:$0xff] }
 0x7fd   :  { %8774 = vmatprep.subr.bf16.mxu0 %v8773_v24  ;;  %8806 = vmatprep.subr.bf16.mxu1 %v8805_v37  ;;  %v11723_v61 = vpack.c.bf16 %v2772_v13, %v2768_v42  ;;  %v2775_v24 = vld [vmem:[#allocation11 + $0xc8] sm:$0xff]  ;;  %v11761_v45 = vpack.c.bf16 %v2803_v34, %v2799_v12  ;;  %v2802_v42 = vld [vmem:[#allocation11 + $0x1a0] sm:$0xff]  ;;  %v2801_v13 = vld [vmem:[#allocation11 + $0x198] sm:$0xff] }
 0x7fe   :  { %v2779_v37 = vld [vmem:[#allocation11 + $0xe8] sm:$0xff] }
 0x7ff   :  { %v11728_v47 = vpack.c.bf16 %v2779_v37, %v2775_v24  ;;  %v2805_v24 = vld [vmem:[#allocation11 + $0x1b8] sm:$0xff] }
 0x800   :  { %8776 = vmatpush1.bf16.msra.mxu0 %v8775_v2  ;;  %8808 = vmatpush1.bf16.msra.mxu1 %v8807_v60  ;;  %v11732_v2 = vpack.c.bf16 %v2781_v1, %v2777_v23  ;;  %v2776_v60 = vld [vmem:[#allocation11 + $0xd0] sm:$0xff]  ;;  %v11764_v37 = vpack.c.bf16 %v2805_v24, %v2801_v13  ;;  %v2811_v1 = vld [vmem:[#allocation11 + $0x1e8] sm:$0xff] }
 0x801   :  { %8778 = vmatprep.subr.bf16.mxu0 %v8777_v52  ;;  %8810 = vmatprep.subr.bf16.mxu1 %v8809_v9  ;;  %v2783_v52 = vld [vmem:[#allocation11 + $0x108] sm:$0xff]  ;;  %v11735_v9 = vpack.c.bf16 %v2780_v4, %v2776_v60  ;;  %v2800_v23 = vld [vmem:[#allocation11 + $0x190] sm:$0xff]  ;;  %v11767_v60 = vpack.c.bf16 %v2802_v42, %v2798_v29 }
 0x802   :  { %v11771_v4 = vpack.c.bf16 %v2804_v50, %v2800_v23 }
 0x804   :  { %8780 = vmatpush1.bf16.msra.mxu0 %v8779_v49  ;;  %8812 = vmatpush1.bf16.msra.mxu1 %v8811_v6  ;;  %v11739_v49 = vpack.c.bf16 %v2787_v30, %v2783_v52  ;;  %v11741_v6 = vpack.c.bf16 %v2786_v32, %v2782_v36  ;;  %v11773_v52 = vpack.c.bf16 %v2811_v1, %v2807_v54  ;;  %v2809_v30 = vld [vmem:[#allocation11 + $0x1d8] sm:$0xff]  ;;  %v2806_v32 = vld [vmem:[#allocation11 + $0x1c0] sm:$0xff] }
 0x805   :  { %v2813_v36 = vld [vmem:[#allocation11 + $0x1f8] sm:$0xff] }
 0x807   :  { %2550 = vmatmul.mubr.f32.vlgmr.msra.gmra.mrb[16].mxu0 %v11282_v40  ;;  %2663 = vmatmul.mubr.f32.vlgmr.msra.gmra.mrb[24].mxu1 %v11282_v40  ;;  %v2751_v40 = vld [vmem:[#allocation11 + $0x8] sm:$0xff] }
 0x808   :  { %2555 = vmatprep.mubr.f32.mxu0 %v10872_v0  ;;  %2668 = vmatprep.mubr.f32.mxu1 %v10872_v0 }
 0x80b   :  { %2556 = vmatmul.mubr.f32.gmra.mrb[18].mxu0 %v11334_v28  ;;  %2669 = vmatmul.mubr.f32.gmra.mrb[26].mxu1 %v11334_v28  ;;  %v2755_v28 = vld [vmem:[#allocation11 + $0x28] sm:$0xff] }
 0x80c   :  { %2561 = vmatprep.mubr.f32.mxu0 %v10872_v0  ;;  %2674 = vmatprep.mubr.f32.mxu1 %v10872_v0 }
 0x80f   :  { %2562 = vmatmul.mubr.f32.gmra.mrb[20].mxu0 %v11428_v3  ;;  %2675 = vmatmul.mubr.f32.gmra.mrb[28].mxu1 %v11428_v3  ;;  %v2753_v3 = vld [vmem:[#allocation11 + $0x18] sm:$0xff] }
 0x810   :  { %2567 = vmatprep.mubr.f32.mxu0 %v10872_v0  ;;  %2680 = vmatprep.mubr.f32.mxu1 %v10872_v0 }
 0x813   :  { %2568 = vmatmul.mubr.f32.gmra.mrb[22].mxu0 %v11515_v39  ;;  %2681 = vmatmul.mubr.f32.gmra.mrb[30].mxu1 %v11515_v39  ;;  %v11692_v39 = vpack.c.bf16 %v2755_v28, %v2751_v40  ;;  %v2785_v40 = vld [vmem:[#allocation11 + $0x118] sm:$0xff] }
 0x814   :  { %2573 = vmatprep.mubr.f32.mxu0 %v10872_v0  ;;  %2686 = vmatprep.mubr.f32.mxu1 %v10872_v0  ;;  %v2789_v28 = vld [vmem:[#allocation11 + $0x138] sm:$0xff] }
 0x815   :  { %8814 = vmatprep.subr.bf16.mxu0 %v11692_v39 }
 0x817   :  { %2574 = vmatmul.mubr.f32.gmra.mrb[24].mxu0 %v11561_v31  ;;  %2687 = vmatmul.mubr.f32.gmra.mrb[32].mxu1 %v11561_v31  ;;  %v2750_v31 = vld [vmem:[#allocation11] sm:$0xff] }
 0x818   :  { %2579 = vmatprep.mubr.f32.mxu0 %v10872_v0  ;;  %2692 = vmatprep.mubr.f32.mxu1 %v10872_v0  ;;  %v11694_v33 = vpack.c.bf16 %v2754_v35, %v2750_v31  ;;  %v11744_v31 = vpack.c.bf16 %v2789_v28, %v2785_v40  ;;  %v2788_v35 = vld [vmem:[#allocation11 + $0x130] sm:$0xff]  ;;  %v2810_v40 = vld [vmem:[#allocation11 + $0x1e0] sm:$0xff]  ;;  %v11779_v28 = vpack.c.bf16 %v2813_v36, %v2809_v30 }
 0x81a   :  { %8816 = vmatpush1.bf16.msra.mxu0 %v11694_v33 }
 0x81b   :  { %2580 = vmatmul.mubr.f32.gmra.mrb[26].mxu0 %v11620_v8  ;;  %2693 = vmatmul.mubr.f32.gmra.mrb[34].mxu1 %v11620_v8  ;;  %v2757_v8 = vld [vmem:[#allocation11 + $0x38] sm:$0xff] }
 0x81c   :  { %2585 = vmatprep.mubr.f32.mxu0 %v10872_v0  ;;  %2698 = vmatprep.mubr.f32.mxu1 %v10872_v0  ;;  %v11696_v55 = vpack.c.bf16 %v2757_v8, %v2753_v3  ;;  %v2784_v3 = vld [vmem:[#allocation11 + $0x110] sm:$0xff]  ;;  %v2791_v8 = vld [vmem:[#allocation11 + $0x148] sm:$0xff] }
 0x81d   :  { %8818 = vmatprep.subr.bf16.mxu0 %v11704_v43 }
 0x81e   :  { %8846 = vmatprep.subr.bf16.mxu1 %v11696_v55  ;;  %8820 = vmatpush1.bf16.msra.mxu0 %v11706_v62 }
 0x81f   :  { %2586 = vmatmul.mubr.f32.gmra.mrb[28].mxu0 %v11658_v18  ;;  %2699 = vmatmul.mubr.f32.gmra.mrb[36].mxu1 %v11658_v18  ;;  %v11699_v18 = vpack.c.bf16 %v2756_v7, %v2752_v5  ;;  %v2795_v5 = vld [vmem:[#allocation11 + $0x168] sm:$0xff]  ;;  %v11747_v7 = vpack.c.bf16 %v2788_v35, %v2784_v3  ;;  %v2808_v3 = vld [vmem:[#allocation11 + $0x1d0] sm:$0xff]  ;;  %v11781_v35 = vpack.c.bf16 %v2810_v40, %v2806_v32 }
 0x820   :  { %2591 = vmatprep.mubr.f32.mxu0 %v10872_v0  ;;  %2704 = vmatprep.mubr.f32.mxu1 %v10872_v0  ;;  %v11749_v10 = vpack.c.bf16 %v2795_v5, %v2791_v8  ;;  %v2812_v8 = vld [vmem:[#allocation11 + $0x1f0] sm:$0xff] }
 0x821   :  { %8848 = vmatpush1.bf16.msra.mxu1 %v11699_v18  ;;  %8822 = vmatprep.subr.bf16.mxu0 %v11716_v15  ;;  %v11784_v5 = vpack.c.bf16 %v2812_v8, %v2808_v3 }
 0x822   :  { %8850 = vmatprep.subr.bf16.mxu1 %v11708_v20  ;;  %8824 = vmatpush1.bf16.msra.mxu0 %v11718_v17 }
 0x823   :  { %8826 = vmatprep.subr.bf16.mxu0 %v11728_v47 }
 0x825   :  { %8852 = vmatpush1.bf16.msra.mxu1 %v11711_v56 }
 0x826   :  { %8854 = vmatprep.subr.bf16.mxu1 %v11720_v25  ;;  %8828 = vmatpush1.bf16.msra.mxu0 %v11730_v63 }
 0x827   :  { %8830 = vmatprep.subr.bf16.mxu0 %v11739_v49 }
 0x829   :  { %8856 = vmatpush1.bf16.msra.mxu1 %v11723_v61 }
 0x82a   :  { %8858 = vmatprep.subr.bf16.mxu1 %v11732_v2  ;;  %8832 = vmatpush1.bf16.msra.mxu0 %v11741_v6 }
 0x82b   :  { %8834 = vmatprep.subr.bf16.mxu0 %v11749_v10 }
 0x82d   :  { %8860 = vmatpush1.bf16.msra.mxu1 %v11735_v9 }
 0x82e   :  { %8862 = vmatprep.subr.bf16.mxu1 %v11744_v31  ;;  %8836 = vmatpush1.bf16.msra.mxu0 %v11753_v22 }
 0x82f   :  { %8838 = vmatprep.subr.bf16.mxu0 %v11761_v45 }
 0x831   :  { %8864 = vmatpush1.bf16.msra.mxu1 %v11747_v7 }
 0x832   :  { %8866 = vmatprep.subr.bf16.mxu1 %v11755_v57  ;;  %8840 = vmatpush1.bf16.msra.mxu0 %v11767_v60 }
 0x833   :  { %8842 = vmatprep.subr.bf16.mxu0 %v11773_v52 }
 0x835   :  { %8868 = vmatpush1.bf16.msra.mxu1 %v11759_v41 }
 0x836   :  { %8870 = vmatprep.subr.bf16.mxu1 %v11764_v37  ;;  %8844 = vmatpush1.bf16.msra.mxu0 %v11781_v35 }
 0x837   :  { %8878 = vmatprep.subr.bf16.mxu0 %v11692_v39 }
 0x839   :  { %8872 = vmatpush1.bf16.msra.mxu1 %v11771_v4 }
 0x83a   :  { %8874 = vmatprep.subr.bf16.mxu1 %v11779_v28 }
 0x83d   :  { %8876 = vmatpush1.bf16.msra.mxu1 %v11784_v5 }
 0x83e   :  { %8910 = vmatprep.subr.bf16.mxu1 %v11696_v55 }
 0x8ba   :  { %v2283_v11 = vpop.f32.mrb[14].mxu0  ;;  %v2354_v16 = vpop.f32.mrb[14].mxu1 }
 0x8bb   :  { %v10115_v51 = vadd.f32 %v2283_v11, %v11260_v26  ;;  %v2285_v14 = vpop.f32.mrb[15].mxu0  ;;  %v2356_v38 = vpop.f32.mrb[15].mxu1  ;;  %v10131_v13 = vadd.f32 %v2354_v16, %v11272_v53 }
 0x8bc   :  { %v10116_v58 = vadd.f32 %v2285_v14, %v11263_v27  ;;  %v10132_v29 = vadd.f32 %v2356_v38, %v11275_v59 }
 0x8bd   :  { %v7761_v12 = vmul.f32 -1.442695, %v10115_v51 }
 0x8be   :  { %v7762_v34 = vmul.f32 -1.442695, %v10116_v58  ;;  %v7763_v42 = vmul.f32 -1.442695, %v10132_v29 }
 0x8bf   :  { %10426 = vpow2.f32 %v7761_v12 }
 0x8c0   :  { %10428 = vpow2.f32 %v7762_v34 }
 0x8c1   :  { %10430 = vpow2.f32 %v7763_v42 }
 0x8c2   :  { %10432 = vtanh.f32 %v10131_v13 }
 0x8c9   :  { %v10427_v24 = vpop.eup %10426 }
 0x8ca   :  { %v10429_v23 = vpop.eup %10428  ;;  %v2366_v50 = vadd.f32 1.0, %v10427_v24 }
 0x8cb   :  { %v2372_v54 = vadd.f32 1.0, %v10429_v23  ;;  %v10431_v26 = vpop.eup %10430 }
 0x8cc   :  { %10434 = vrcp.f32 %v2366_v50  ;;  %v10433_v1 = vpop.eup %10432  ;;  %v2379_v32 = vadd.f32 1.0, %v10431_v26 }
 0x8cd   :  { %10436 = vrcp.f32 %v2372_v54 }
 0x8ce   :  { %10438 = vrcp.f32 %v2379_v32 }
 0x8d6   :  { %v10435_v27 = vpop.eup %10434 }
 0x8d7   :  { %v10437_v30 = vpop.eup %10436  ;;  %v2384_v36 = vmul.f32 %v10435_v27, %v10433_v1 }
 0x8d8   :  { %v2383_v40 = vmul.f32 %v10437_v30, %v11655_v46  ;;  %v10439_v53 = vpop.eup %10438  ;;  %v2463_v46 = vld [vmem:[%s12845_s6] sm:$0xf] }
 0x8d9   :  { %v11837_v11 = vrot.slane %v2463_v46, %v11252_v19  ;;  %v11840_v16 = vrot.slane %v2463_v46, %v11257_v21  ;;  %v11845_v13 = vrot.slane %v2463_v46, %v11269_v48  ;;  %v11849_v23 = vrot.slane %v2463_v46, %v11267_v44 }
 0x8da   :  { %v2385_v59 = vadd.f32 %v2384_v36, %v2383_v40 }
 0x8dc   :  { %10440 = vtanh.f32 %v2385_v59 }
 0x8e6   :  { %v10441_v3 = vpop.eup %10440 }
 0x8e7   :  { %v2387_v8 = vmul.f32 %v10441_v3, %v10439_v53 }
 0x8e9   :  { %2592 = vmatmul.mubr.f32.gmra.mrb[30].mxu0 %v2387_v8  ;;  %2705 = vmatmul.mubr.f32.gmra.mrb[38].mxu1 %v2387_v8 }
 0x8ea   :  { %2878 = vmatprep.mubr.f32.mxu0 %v10872_v0  ;;  %2949 = vmatprep.mubr.f32.mxu1 %v10872_v0 }
 0x8ed   :  { %2879 = vmatmul.mubr.f32.vlgmr.msra.gmra.mrb[16].mxu0 %v10872_v0  ;;  %2950 = vmatmul.mubr.f32.vlgmr.msra.gmra.mrb[24].mxu1 %v10872_v0 }
 0x8ee   :  { %8880 = vmatpush1.bf16.msra.mxu0 %v11694_v33  ;;  %8912 = vmatpush1.bf16.msra.mxu1 %v11699_v18 }
 0x8ef   :  { %8882 = vmatprep.subr.bf16.mxu0 %v11704_v43  ;;  %8914 = vmatprep.subr.bf16.mxu1 %v11708_v20 }
 0x8f0   :  { %3121 = vmatprep.mubr.f32.mxu0 %v10872_v0  ;;  %3192 = vmatprep.mubr.f32.mxu1 %v10872_v0 }
 0x8f2   :  { %8884 = vmatpush1.bf16.msra.mxu0 %v11706_v62  ;;  %8916 = vmatpush1.bf16.msra.mxu1 %v11711_v56 }
 0x8f3   :  { %8886 = vmatprep.subr.bf16.mxu0 %v11716_v15  ;;  %8918 = vmatprep.subr.bf16.mxu1 %v11720_v25 }
 0x8f6   :  { %8888 = vmatpush1.bf16.msra.mxu0 %v11718_v17  ;;  %8920 = vmatpush1.bf16.msra.mxu1 %v11723_v61 }
 0x8f7   :  { %8890 = vmatprep.subr.bf16.mxu0 %v11728_v47  ;;  %8922 = vmatprep.subr.bf16.mxu1 %v11732_v2 }
 0x8fa   :  { %8892 = vmatpush1.bf16.msra.mxu0 %v11730_v63  ;;  %8924 = vmatpush1.bf16.msra.mxu1 %v11735_v9 }
 0x8fb   :  { %8894 = vmatprep.subr.bf16.mxu0 %v11739_v49  ;;  %8926 = vmatprep.subr.bf16.mxu1 %v11744_v31 }
 0x8fe   :  { %8896 = vmatpush1.bf16.msra.mxu0 %v11741_v6  ;;  %8928 = vmatpush1.bf16.msra.mxu1 %v11747_v7 }
 0x8ff   :  { %8898 = vmatprep.subr.bf16.mxu0 %v11749_v10  ;;  %8930 = vmatprep.subr.bf16.mxu1 %v11755_v57 }
 0x902   :  { %8900 = vmatpush1.bf16.msra.mxu0 %v11753_v22  ;;  %8932 = vmatpush1.bf16.msra.mxu1 %v11759_v41 }
 0x903   :  { %8902 = vmatprep.subr.bf16.mxu0 %v11761_v45  ;;  %8934 = vmatprep.subr.bf16.mxu1 %v11764_v37 }
 0x906   :  { %8904 = vmatpush1.bf16.msra.mxu0 %v11767_v60  ;;  %8936 = vmatpush1.bf16.msra.mxu1 %v11771_v4 }
 0x907   :  { %8906 = vmatprep.subr.bf16.mxu0 %v11773_v52  ;;  %8938 = vmatprep.subr.bf16.mxu1 %v11779_v28 }
 0x90a   :  { %8908 = vmatpush1.bf16.msra.mxu0 %v11781_v35  ;;  %8940 = vmatpush1.bf16.msra.mxu1 %v11784_v5 }
 0x90b   :  { %8942 = vmatprep.subr.bf16.mxu0 %v11692_v39  ;;  %8974 = vmatprep.subr.bf16.mxu1 %v11696_v55 }
 0x9c0   :  { %v2880_v51 = vpop.f32.mrb[16].mxu0  ;;  %v2951_v14 = vpop.f32.mrb[24].mxu1 }
 0x9c1   :  { %v10133_v38 = vadd.f32 %v2880_v51, %v11837_v11  ;;  %v2882_v58 = vpop.f32.mrb[17].mxu0  ;;  %v2953_v12 = vpop.f32.mrb[25].mxu1  ;;  %v10149_v54 = vadd.f32 %v2951_v14, %v11849_v23 }
 0x9c2   :  { %v10134_v34 = vadd.f32 %v2882_v58, %v11840_v16  ;;  %v10150_v24 = vadd.f32 %v2953_v12, %v11845_v13 }
 0x9c3   :  { %v7764_v29 = vmul.f32 -1.442695, %v10133_v38 }
 0x9c4   :  { %v7765_v42 = vmul.f32 -1.442695, %v10134_v34  ;;  %v7766_v50 = vmul.f32 -1.442695, %v10150_v24 }
 0x9c5   :  { %10442 = vpow2.f32 %v7764_v29 }
 0x9c6   :  { %10444 = vpow2.f32 %v7765_v42 }
 0x9c7   :  { %10446 = vpow2.f32 %v7766_v50 }
 0x9c8   :  { %10448 = vtanh.f32 %v10149_v54 }
 0x9cf   :  { %v10443_v26 = vpop.eup %10442 }
 0x9d0   :  { %v10445_v1 = vpop.eup %10444  ;;  %v2963_v27 = vadd.f32 1.0, %v10443_v26 }
 0x9d1   :  { %v2969_v30 = vadd.f32 1.0, %v10445_v1  ;;  %v10447_v36 = vpop.eup %10446 }
 0x9d2   :  { %10450 = vrcp.f32 %v2963_v27  ;;  %v10449_v32 = vpop.eup %10448  ;;  %v2976_v3 = vadd.f32 1.0, %v10447_v36 }
 0x9d3   :  { %10452 = vrcp.f32 %v2969_v30 }
 0x9d4   :  { %10454 = vrcp.f32 %v2976_v3 }
 0x9dc   :  { %v10451_v40 = vpop.eup %10450 }
 0x9dd   :  { %v10453_v59 = vpop.eup %10452  ;;  %v2981_v53 = vmul.f32 %v10451_v40, %v10449_v32 }
 0x9de   :  { %v2980_v8 = vmul.f32 0.0, %v10453_v59  ;;  %v10455_v51 = vpop.eup %10454 }
 0x9e0   :  { %v11852_v46 = vadd.f32 %v2981_v53, %v2980_v8 }
 0x9e2   :  { %10456 = vtanh.f32 %v11852_v46 }
 0x9ec   :  { %v10457_v14 = vpop.eup %10456 }
 0x9ed   :  { %v11855_v38 = vmul.f32 %v10457_v14, %v10455_v51 }
 0x9ef   :  { %3122 = vmatmul.mubr.f32.vlgmr.msra.gmra.mrb[18].mxu0 %v11855_v38  ;;  %3193 = vmatmul.mubr.f32.vlgmr.msra.gmra.mrb[26].mxu1 %v11855_v38 }
 0x9f0   :  { %8944 = vmatpush1.bf16.msra.mxu0 %v11694_v33  ;;  %8976 = vmatpush1.bf16.msra.mxu1 %v11699_v18 }
 0x9f1   :  { %8946 = vmatprep.subr.bf16.mxu0 %v11704_v43  ;;  %8978 = vmatprep.subr.bf16.mxu1 %v11708_v20 }
 0x9f2   :  { %3364 = vmatprep.mubr.f32.mxu0 %v10872_v0  ;;  %3435 = vmatprep.mubr.f32.mxu1 %v10872_v0 }
 0x9f4   :  { %8948 = vmatpush1.bf16.msra.mxu0 %v11706_v62  ;;  %8980 = vmatpush1.bf16.msra.mxu1 %v11711_v56 }
 0x9f5   :  { %8950 = vmatprep.subr.bf16.mxu0 %v11716_v15  ;;  %8982 = vmatprep.subr.bf16.mxu1 %v11720_v25 }
 0x9f8   :  { %8952 = vmatpush1.bf16.msra.mxu0 %v11718_v17  ;;  %8984 = vmatpush1.bf16.msra.mxu1 %v11723_v61 }
 0x9f9   :  { %8954 = vmatprep.subr.bf16.mxu0 %v11728_v47  ;;  %8986 = vmatprep.subr.bf16.mxu1 %v11732_v2 }
 0x9fc   :  { %8956 = vmatpush1.bf16.msra.mxu0 %v11730_v63  ;;  %8988 = vmatpush1.bf16.msra.mxu1 %v11735_v9 }
 0x9fd   :  { %8958 = vmatprep.subr.bf16.mxu0 %v11739_v49  ;;  %8990 = vmatprep.subr.bf16.mxu1 %v11744_v31 }
 0xa00   :  { %8960 = vmatpush1.bf16.msra.mxu0 %v11741_v6  ;;  %8992 = vmatpush1.bf16.msra.mxu1 %v11747_v7 }
 0xa01   :  { %8962 = vmatprep.subr.bf16.mxu0 %v11749_v10  ;;  %8994 = vmatprep.subr.bf16.mxu1 %v11755_v57 }
 0xa04   :  { %8964 = vmatpush1.bf16.msra.mxu0 %v11753_v22  ;;  %8996 = vmatpush1.bf16.msra.mxu1 %v11759_v41 }
 0xa05   :  { %8966 = vmatprep.subr.bf16.mxu0 %v11761_v45  ;;  %8998 = vmatprep.subr.bf16.mxu1 %v11764_v37 }
 0xa08   :  { %8968 = vmatpush1.bf16.msra.mxu0 %v11767_v60  ;;  %9000 = vmatpush1.bf16.msra.mxu1 %v11771_v4 }
 0xa09   :  { %8970 = vmatprep.subr.bf16.mxu0 %v11773_v52  ;;  %9002 = vmatprep.subr.bf16.mxu1 %v11779_v28 }
 0xa0c   :  { %8972 = vmatpush1.bf16.msra.mxu0 %v11781_v35  ;;  %9004 = vmatpush1.bf16.msra.mxu1 %v11784_v5 }
 0xa0d   :  { %9006 = vmatprep.subr.bf16.mxu0 %v11692_v39  ;;  %9038 = vmatprep.subr.bf16.mxu1 %v11696_v55 }
 0xac2   :  { %v3123_v58 = vpop.f32.mrb[18].mxu0  ;;  %v3194_v12 = vpop.f32.mrb[26].mxu1 }
 0xac3   :  { %v10135_v34 = vadd.f32 %v3123_v58, %v11837_v11  ;;  %v3125_v29 = vpop.f32.mrb[19].mxu0  ;;  %v3196_v42 = vpop.f32.mrb[27].mxu1  ;;  %v10151_v27 = vadd.f32 %v3194_v12, %v11849_v23 }
 0xac4   :  { %v10136_v24 = vadd.f32 %v3125_v29, %v11840_v16  ;;  %v10152_v26 = vadd.f32 %v3196_v42, %v11845_v13  ;;  %v3722_v29 = vld [vmem:[#allocation11] sm:$0xff] }
 0xac5   :  { %v7767_v50 = vmul.f32 -1.442695, %v10135_v34  ;;  %v3726_v42 = vld [vmem:[#allocation11 + $0x20] sm:$0xff] }
 0xac6   :  { %v7768_v54 = vmul.f32 -1.442695, %v10136_v24  ;;  %v7769_v1 = vmul.f32 -1.442695, %v10152_v26  ;;  %v3728_v26 = vld [vmem:[#allocation11 + $0x30] sm:$0xff] }
 0xac7   :  { %10458 = vpow2.f32 %v7767_v50  ;;  %v11955_v50 = vpack.c.bf16 %v3726_v42, %v3722_v29 }
 0xac8   :  { %10460 = vpow2.f32 %v7768_v54  ;;  %v3724_v54 = vld [vmem:[#allocation11 + $0x10] sm:$0xff] }
 0xac9   :  { %10462 = vpow2.f32 %v7769_v1  ;;  %v11958_v1 = vpack.c.bf16 %v3728_v26, %v3724_v54  ;;  %v3756_v54 = vld [vmem:[#allocation11 + $0x110] sm:$0xff] }
 0xaca   :  { %10464 = vtanh.f32 %v10151_v27  ;;  %v3731_v27 = vld [vmem:[#allocation11 + $0x48] sm:$0xff]  ;;  %v3760_v26 = vld [vmem:[#allocation11 + $0x130] sm:$0xff] }
 0xad1   :  { %v10459_v39 = vpop.eup %10458 }
 0xad2   :  { %v10461_v30 = vpop.eup %10460  ;;  %v3206_v55 = vadd.f32 1.0, %v10459_v39  ;;  %v3735_v39 = vld [vmem:[#allocation11 + $0x68] sm:$0xff] }
 0xad3   :  { %v3212_v36 = vadd.f32 1.0, %v10461_v30  ;;  %v10463_v32 = vpop.eup %10462  ;;  %v3733_v30 = vld [vmem:[#allocation11 + $0x58] sm:$0xff] }
 0xad4   :  { %10466 = vrcp.f32 %v3206_v55  ;;  %v10465_v40 = vpop.eup %10464  ;;  %v3219_v8 = vadd.f32 1.0, %v10463_v32  ;;  %v11963_v55 = vpack.c.bf16 %v3735_v39, %v3731_v27  ;;  %v3730_v32 = vld [vmem:[#allocation11 + $0x40] sm:$0xff]  ;;  %v12006_v27 = vpack.c.bf16 %v3760_v26, %v3756_v54  ;;  %v3763_v39 = vld [vmem:[#allocation11 + $0x148] sm:$0xff] }
 0xad5   :  { %10468 = vrcp.f32 %v3212_v36  ;;  %v3737_v36 = vld [vmem:[#allocation11 + $0x78] sm:$0xff]  ;;  %v3778_v54 = vld [vmem:[#allocation11 + $0x1c0] sm:$0xff] }
 0xad6   :  { %10470 = vrcp.f32 %v3219_v8  ;;  %v3736_v8 = vld [vmem:[#allocation11 + $0x70] sm:$0xff] }
 0xade   :  { %v10467_v59 = vpop.eup %10466 }
 0xadf   :  { %v10469_v53 = vpop.eup %10468  ;;  %v3224_v3 = vmul.f32 %v10467_v59, %v10465_v40  ;;  %v3734_v40 = vld [vmem:[#allocation11 + $0x60] sm:$0xff]  ;;  %v11965_v59 = vpack.c.bf16 %v3737_v36, %v3733_v30  ;;  %v3767_v30 = vld [vmem:[#allocation11 + $0x168] sm:$0xff]  ;;  %v3765_v36 = vld [vmem:[#allocation11 + $0x158] sm:$0xff] }
 0xae0   :  { %v3223_v51 = vmul.f32 %v10469_v53, %v11852_v46  ;;  %v10471_v58 = vpop.eup %10470  ;;  %v3729_v46 = vld [vmem:[#allocation11 + $0x38] sm:$0xff]  ;;  %v11967_v53 = vpack.c.bf16 %v3734_v40, %v3730_v32  ;;  %v12010_v32 = vpack.c.bf16 %v3767_v30, %v3763_v39  ;;  %v3782_v39 = vld [vmem:[#allocation11 + $0x1e0] sm:$0xff]  ;;  %v3780_v30 = vld [vmem:[#allocation11 + $0x1d0] sm:$0xff] }
 0xae1   :  { %v3769_v40 = vld [vmem:[#allocation11 + $0x178] sm:$0xff] }
 0xae2   :  { %v11898_v14 = vadd.f32 %v3224_v3, %v3223_v51  ;;  %v3732_v3 = vld [vmem:[#allocation11 + $0x50] sm:$0xff] }
 0xae3   :  { %v11970_v51 = vpack.c.bf16 %v3736_v8, %v3732_v3  ;;  %v3762_v3 = vld [vmem:[#allocation11 + $0x140] sm:$0xff] }
 0xae4   :  { %10472 = vtanh.f32 %v11898_v14  ;;  %v3766_v8 = vld [vmem:[#allocation11 + $0x160] sm:$0xff] }
 0xaee   :  { %v10473_v12 = vpop.eup %10472 }
 0xaef   :  { %v11901_v34 = vmul.f32 %v10473_v12, %v10471_v58  ;;  %v3743_v58 = vld [vmem:[#allocation11 + $0xa8] sm:$0xff]  ;;  %v3741_v12 = vld [vmem:[#allocation11 + $0x98] sm:$0xff] }
 0xaf1   :  { %3365 = vmatmul.mubr.f32.vlgmr.msra.gmra.mrb[20].mxu0 %v11901_v34  ;;  %3436 = vmatmul.mubr.f32.vlgmr.msra.gmra.mrb[28].mxu1 %v11901_v34 }
 0xaf2   :  { %9008 = vmatpush1.bf16.msra.mxu0 %v11694_v33  ;;  %9040 = vmatpush1.bf16.msra.mxu1 %v11699_v18 }
 0xaf3   :  { %9010 = vmatprep.subr.bf16.mxu0 %v11704_v43  ;;  %9042 = vmatprep.subr.bf16.mxu1 %v11708_v20 }
 0xaf4   :  { %3607 = vmatprep.mubr.f32.mxu0 %v10872_v0  ;;  %3678 = vmatprep.mubr.f32.mxu1 %v10872_v0 }
 0xaf6   :  { %9012 = vmatpush1.bf16.msra.mxu0 %v11706_v62  ;;  %9044 = vmatpush1.bf16.msra.mxu1 %v11711_v56 }
 0xaf7   :  { %9014 = vmatprep.subr.bf16.mxu0 %v11716_v15  ;;  %9046 = vmatprep.subr.bf16.mxu1 %v11720_v25 }
 0xafa   :  { %9016 = vmatpush1.bf16.msra.mxu0 %v11718_v17  ;;  %9048 = vmatpush1.bf16.msra.mxu1 %v11723_v61 }
 0xafb   :  { %9018 = vmatprep.subr.bf16.mxu0 %v11728_v47  ;;  %9050 = vmatprep.subr.bf16.mxu1 %v11732_v2 }
 0xafe   :  { %9020 = vmatpush1.bf16.msra.mxu0 %v11730_v63  ;;  %9052 = vmatpush1.bf16.msra.mxu1 %v11735_v9 }
 0xaff   :  { %9022 = vmatprep.subr.bf16.mxu0 %v11739_v49  ;;  %9054 = vmatprep.subr.bf16.mxu1 %v11744_v31 }
 0xb02   :  { %9024 = vmatpush1.bf16.msra.mxu0 %v11741_v6  ;;  %9056 = vmatpush1.bf16.msra.mxu1 %v11747_v7 }
 0xb03   :  { %9026 = vmatprep.subr.bf16.mxu0 %v11749_v10  ;;  %9058 = vmatprep.subr.bf16.mxu1 %v11755_v57 }
 0xb06   :  { %9028 = vmatpush1.bf16.msra.mxu0 %v11753_v22  ;;  %9060 = vmatpush1.bf16.msra.mxu1 %v11759_v41 }
 0xb07   :  { %9030 = vmatprep.subr.bf16.mxu0 %v11761_v45  ;;  %9062 = vmatprep.subr.bf16.mxu1 %v11764_v37 }
 0xb0a   :  { %9032 = vmatpush1.bf16.msra.mxu0 %v11767_v60  ;;  %9064 = vmatpush1.bf16.msra.mxu1 %v11771_v4 }
 0xb0b   :  { %9034 = vmatprep.subr.bf16.mxu0 %v11773_v52  ;;  %9066 = vmatprep.subr.bf16.mxu1 %v11779_v28  ;;  %v3723_v52 = vld [vmem:[#allocation11 + $0x8] sm:$0xff] }
 0xb0c   :  { %v3727_v28 = vld [vmem:[#allocation11 + $0x28] sm:$0xff] }
 0xb0e   :  { %9036 = vmatpush1.bf16.msra.mxu0 %v11781_v35  ;;  %9068 = vmatpush1.bf16.msra.mxu1 %v11784_v5  ;;  %v3725_v35 = vld [vmem:[#allocation11 + $0x18] sm:$0xff]  ;;  %v11951_v5 = vpack.c.bf16 %v3727_v28, %v3723_v52 }
 0xb0f   :  { %v11953_v24 = vpack.c.bf16 %v3729_v46, %v3725_v35  ;;  %v3761_v28 = vld [vmem:[#allocation11 + $0x138] sm:$0xff]  ;;  %v3754_v35 = vld [vmem:[#allocation11 + $0x100] sm:$0xff] }
 0xb10   :  { %9070 = vmatprep.subr.bf16.mxu0 %v11951_v5  ;;  %v3758_v46 = vld [vmem:[#allocation11 + $0x120] sm:$0xff] }
 0xb11   :  { %9102 = vmatprep.subr.bf16.mxu1 %v11953_v24  ;;  %v12003_v42 = vpack.c.bf16 %v3758_v46, %v3754_v35  ;;  %v3781_v35 = vld [vmem:[#allocation11 + $0x1d8] sm:$0xff] }
 0xb12   :  { %v3785_v46 = vld [vmem:[#allocation11 + $0x1f8] sm:$0xff] }
 0xb13   :  { %v12035_v26 = vpack.c.bf16 %v3785_v46, %v3781_v35 }
 0xbc4   :  { %v3366_v33 = vpop.f32.mrb[20].mxu0  ;;  %v3437_v18 = vpop.f32.mrb[28].mxu1 }
 0xbc5   :  { %v10137_v43 = vadd.f32 %v3366_v33, %v11837_v11  ;;  %v3368_v62 = vpop.f32.mrb[21].mxu0  ;;  %v3439_v20 = vpop.f32.mrb[29].mxu1  ;;  %v10153_v47 = vadd.f32 %v3437_v18, %v11849_v23  ;;  %v3745_v18 = vld [vmem:[#allocation11 + $0xb8] sm:$0xff] }
 0xbc6   :  { %v10138_v56 = vadd.f32 %v3368_v62, %v11840_v16  ;;  %v10154_v25 = vadd.f32 %v3439_v20, %v11845_v13  ;;  %v3742_v62 = vld [vmem:[#allocation11 + $0xa0] sm:$0xff]  ;;  %v11977_v20 = vpack.c.bf16 %v3745_v18, %v3741_v12  ;;  %v3764_v12 = vld [vmem:[#allocation11 + $0x150] sm:$0xff] }
 0xbc7   :  { %v7770_v15 = vmul.f32 -1.442695, %v10137_v43  ;;  %v3738_v43 = vld [vmem:[#allocation11 + $0x80] sm:$0xff]  ;;  %v3768_v18 = vld [vmem:[#allocation11 + $0x170] sm:$0xff] }
 0xbc8   :  { %v7771_v17 = vmul.f32 -1.442695, %v10138_v56  ;;  %v7772_v61 = vmul.f32 -1.442695, %v10154_v25  ;;  %v11979_v56 = vpack.c.bf16 %v3742_v62, %v3738_v43  ;;  %v3771_v43 = vld [vmem:[#allocation11 + $0x188] sm:$0xff]  ;;  %v12018_v62 = vpack.c.bf16 %v3768_v18, %v3764_v12 }
 0xbc9   :  { %10474 = vpow2.f32 %v7770_v15  ;;  %v3740_v15 = vld [vmem:[#allocation11 + $0x90] sm:$0xff] }
 0xbca   :  { %10476 = vpow2.f32 %v7771_v17  ;;  %v3744_v17 = vld [vmem:[#allocation11 + $0xb0] sm:$0xff] }
 0xbcb   :  { %10478 = vpow2.f32 %v7772_v61  ;;  %v11982_v25 = vpack.c.bf16 %v3744_v17, %v3740_v15  ;;  %v3747_v61 = vld [vmem:[#allocation11 + $0xc8] sm:$0xff]  ;;  %v3773_v17 = vld [vmem:[#allocation11 + $0x198] sm:$0xff] }
 0xbcc   :  { %10480 = vtanh.f32 %v10153_v47  ;;  %v3751_v47 = vld [vmem:[#allocation11 + $0xe8] sm:$0xff] }
 0xbcd   :  { %v3775_v15 = vld [vmem:[#allocation11 + $0x1a8] sm:$0xff] }
 0xbd3   :  { %v10475_v63 = vpop.eup %10474 }
 0xbd4   :  { %v10477_v2 = vpop.eup %10476  ;;  %v3449_v9 = vadd.f32 1.0, %v10475_v63  ;;  %v3749_v63 = vld [vmem:[#allocation11 + $0xd8] sm:$0xff] }
 0xbd5   :  { %v3455_v49 = vadd.f32 1.0, %v10477_v2  ;;  %v10479_v6 = vpop.eup %10478  ;;  %v11987_v2 = vpack.c.bf16 %v3751_v47, %v3747_v61  ;;  %v3777_v61 = vld [vmem:[#allocation11 + $0x1b8] sm:$0xff]  ;;  %v12021_v47 = vpack.c.bf16 %v3775_v15, %v3771_v43 }
 0xbd6   :  { %10482 = vrcp.f32 %v3449_v9  ;;  %v10481_v31 = vpop.eup %10480  ;;  %v3462_v57 = vadd.f32 1.0, %v10479_v6  ;;  %v3753_v9 = vld [vmem:[#allocation11 + $0xf8] sm:$0xff]  ;;  %v3750_v6 = vld [vmem:[#allocation11 + $0xe0] sm:$0xff] }
 0xbd7   :  { %10484 = vrcp.f32 %v3455_v49  ;;  %v3746_v49 = vld [vmem:[#allocation11 + $0xc0] sm:$0xff] }
 0xbd8   :  { %10486 = vrcp.f32 %v3462_v57 }
 0xbe0   :  { %v10483_v7 = vpop.eup %10482 }
 0xbe1   :  { %v10485_v10 = vpop.eup %10484  ;;  %v3467_v22 = vmul.f32 %v10483_v7, %v10481_v31  ;;  %v11989_v31 = vpack.c.bf16 %v3753_v9, %v3749_v63  ;;  %v11991_v7 = vpack.c.bf16 %v3750_v6, %v3746_v49  ;;  %v12023_v63 = vpack.c.bf16 %v3777_v61, %v3773_v17  ;;  %v3770_v9 = vld [vmem:[#allocation11 + $0x180] sm:$0xff]  ;;  %v3772_v6 = vld [vmem:[#allocation11 + $0x190] sm:$0xff] }
 0xbe2   :  { %v3466_v41 = vmul.f32 %v10485_v10, %v11898_v14  ;;  %v10487_v37 = vpop.eup %10486  ;;  %v3739_v14 = vld [vmem:[#allocation11 + $0x88] sm:$0xff]  ;;  %v3748_v10 = vld [vmem:[#allocation11 + $0xd0] sm:$0xff]  ;;  %v3774_v49 = vld [vmem:[#allocation11 + $0x1a0] sm:$0xff] }
 0xbe3   :  { %v11975_v33 = vpack.c.bf16 %v3743_v58, %v3739_v14  ;;  %v12013_v14 = vpack.c.bf16 %v3769_v40, %v3765_v36  ;;  %v12015_v58 = vpack.c.bf16 %v3766_v8, %v3762_v3  ;;  %v3784_v36 = vld [vmem:[#allocation11 + $0x1f0] sm:$0xff]  ;;  %v12038_v40 = vpack.c.bf16 %v3782_v39, %v3778_v54 }
 0xbe4   :  { %v11942_v45 = vadd.f32 %v3467_v22, %v3466_v41  ;;  %v3752_v22 = vld [vmem:[#allocation11 + $0xf0] sm:$0xff]  ;;  %v3755_v41 = vld [vmem:[#allocation11 + $0x108] sm:$0xff]  ;;  %v12042_v3 = vpack.c.bf16 %v3784_v36, %v3780_v30 }
 0xbe5   :  { %v11994_v57 = vpack.c.bf16 %v3752_v22, %v3748_v10  ;;  %v12026_v10 = vpack.c.bf16 %v3774_v49, %v3770_v9  ;;  %v3776_v22 = vld [vmem:[#allocation11 + $0x1b0] sm:$0xff] }
 0xbe6   :  { %10488 = vtanh.f32 %v11942_v45 }
 0xbf0   :  { %v10489_v60 = vpop.eup %10488 }
 0xbf1   :  { %v11945_v4 = vmul.f32 %v10489_v60, %v10487_v37  ;;  %v3759_v37 = vld [vmem:[#allocation11 + $0x128] sm:$0xff]  ;;  %v3757_v60 = vld [vmem:[#allocation11 + $0x118] sm:$0xff] }
 0xbf2   :  { %v11999_v52 = vpack.c.bf16 %v3759_v37, %v3755_v41  ;;  %v12001_v29 = vpack.c.bf16 %v3761_v28, %v3757_v60  ;;  %v3779_v41 = vld [vmem:[#allocation11 + $0x1c8] sm:$0xff]  ;;  %v12030_v60 = vpack.c.bf16 %v3776_v22, %v3772_v6 }
 0xbf3   :  { %3608 = vmatmul.mubr.f32.vlgmr.msra.gmra.mrb[22].mxu0 %v11945_v4  ;;  %3679 = vmatmul.mubr.f32.vlgmr.msra.gmra.mrb[30].mxu1 %v11945_v4  ;;  %v3783_v37 = vld [vmem:[#allocation11 + $0x1e8] sm:$0xff] }
 0xbf4   :  { %3850 = vmatprep.mubr.f32.mxu0 %v10872_v0  ;;  %3921 = vmatprep.mubr.f32.mxu1 %v10872_v0  ;;  %v12032_v28 = vpack.c.bf16 %v3783_v37, %v3779_v41 }
 0xbf5   :  { %9072 = vmatpush1.bf16.msra.mxu0 %v11955_v50  ;;  %9104 = vmatpush1.bf16.msra.mxu1 %v11958_v1 }
 0xbf6   :  { %9074 = vmatprep.subr.bf16.mxu0 %v11963_v55  ;;  %9106 = vmatprep.subr.bf16.mxu1 %v11965_v59 }
 0xbf9   :  { %9076 = vmatpush1.bf16.msra.mxu0 %v11967_v53  ;;  %9108 = vmatpush1.bf16.msra.mxu1 %v11970_v51 }
 0xbfa   :  { %9078 = vmatprep.subr.bf16.mxu0 %v11975_v33  ;;  %9110 = vmatprep.subr.bf16.mxu1 %v11977_v20 }
 0xbfd   :  { %9080 = vmatpush1.bf16.msra.mxu0 %v11979_v56  ;;  %9112 = vmatpush1.bf16.msra.mxu1 %v11982_v25 }
 0xbfe   :  { %9082 = vmatprep.subr.bf16.mxu0 %v11987_v2  ;;  %9114 = vmatprep.subr.bf16.mxu1 %v11989_v31 }
 0xc01   :  { %9084 = vmatpush1.bf16.msra.mxu0 %v11991_v7  ;;  %9116 = vmatpush1.bf16.msra.mxu1 %v11994_v57 }
 0xc02   :  { %9086 = vmatprep.subr.bf16.mxu0 %v11999_v52  ;;  %9118 = vmatprep.subr.bf16.mxu1 %v12001_v29 }
 0xc05   :  { %9088 = vmatpush1.bf16.msra.mxu0 %v12003_v42  ;;  %9120 = vmatpush1.bf16.msra.mxu1 %v12006_v27 }
 0xc06   :  { %9090 = vmatprep.subr.bf16.mxu0 %v12010_v32  ;;  %9122 = vmatprep.subr.bf16.mxu1 %v12013_v14 }
 0xc09   :  { %9092 = vmatpush1.bf16.msra.mxu0 %v12015_v58  ;;  %9124 = vmatpush1.bf16.msra.mxu1 %v12018_v62 }
 0xc0a   :  { %9094 = vmatprep.subr.bf16.mxu0 %v12021_v47  ;;  %9126 = vmatprep.subr.bf16.mxu1 %v12023_v63 }
 0xc0d   :  { %9096 = vmatpush1.bf16.msra.mxu0 %v12026_v10  ;;  %9128 = vmatpush1.bf16.msra.mxu1 %v12030_v60 }
 0xc0e   :  { %9098 = vmatprep.subr.bf16.mxu0 %v12032_v28  ;;  %9130 = vmatprep.subr.bf16.mxu1 %v12035_v26 }
 0xc11   :  { %9100 = vmatpush1.bf16.msra.mxu0 %v12038_v40  ;;  %9132 = vmatpush1.bf16.msra.mxu1 %v12042_v3 }
 0xc12   :  { %9134 = vmatprep.subr.bf16.mxu0 %v11951_v5  ;;  %9166 = vmatprep.subr.bf16.mxu1 %v11953_v24 }
 0xcc6   :  { %v3609_v8 = vpop.f32.mrb[22].mxu0  ;;  %v3680_v12 = vpop.f32.mrb[30].mxu1 }
 0xcc7   :  { %v10139_v18 = vadd.f32 %v3609_v8, %v11837_v11  ;;  %v3611_v43 = vpop.f32.mrb[23].mxu0  ;;  %v3682_v15 = vpop.f32.mrb[31].mxu1  ;;  %v10155_v22 = vadd.f32 %v3680_v12, %v11849_v23 }
 0xcc8   :  { %v10140_v17 = vadd.f32 %v3611_v43, %v11840_v16  ;;  %v10156_v49 = vadd.f32 %v3682_v15, %v11845_v13 }
 0xcc9   :  { %v7773_v61 = vmul.f32 -1.442695, %v10139_v18 }
 0xcca   :  { %v7774_v9 = vmul.f32 -1.442695, %v10140_v17  ;;  %v7775_v6 = vmul.f32 -1.442695, %v10156_v49 }
 0xccb   :  { %10490 = vpow2.f32 %v7773_v61 }
 0xccc   :  { %10492 = vpow2.f32 %v7774_v9 }
 0xccd   :  { %10494 = vpow2.f32 %v7775_v6 }
 0xcce   :  { %10496 = vtanh.f32 %v10155_v22 }
 0xcd5   :  { %v10491_v41 = vpop.eup %10490 }
 0xcd6   :  { %v10493_v37 = vpop.eup %10492  ;;  %v3692_v35 = vadd.f32 1.0, %v10491_v41 }
 0xcd7   :  { %v3698_v46 = vadd.f32 1.0, %v10493_v37  ;;  %v10495_v54 = vpop.eup %10494 }
 0xcd8   :  { %10498 = vrcp.f32 %v3692_v35  ;;  %v10497_v39 = vpop.eup %10496  ;;  %v3705_v18 = vadd.f32 1.0, %v10495_v54 }
 0xcd9   :  { %10500 = vrcp.f32 %v3698_v46 }
 0xcda   :  { %10502 = vrcp.f32 %v3705_v18 }
 0xce2   :  { %v10499_v30 = vpop.eup %10498 }
 0xce3   :  { %v10501_v36 = vpop.eup %10500  ;;  %v3710_v8 = vmul.f32 %v10499_v30, %v10497_v39 }
 0xce4   :  { %v3709_v43 = vmul.f32 %v10501_v36, %v11942_v45  ;;  %v10503_v12 = vpop.eup %10502 }
 0xce6   :  { %v12054_v15 = vadd.f32 %v3710_v8, %v3709_v43 }
 0xce8   :  { %10504 = vtanh.f32 %v12054_v15 }
 0xcf2   :  { %v10505_v17 = vpop.eup %10504 }
 0xcf3   :  { %v12057_v61 = vmul.f32 %v10505_v17, %v10503_v12 }
 0xcf5   :  { %3851 = vmatmul.mubr.f32.vlgmr.msra.gmra.mrb[24].mxu0 %v12057_v61  ;;  %3922 = vmatmul.mubr.f32.vlgmr.msra.gmra.mrb[32].mxu1 %v12057_v61 }
 0xcf6   :  { %9136 = vmatpush1.bf16.msra.mxu0 %v11955_v50  ;;  %9168 = vmatpush1.bf16.msra.mxu1 %v11958_v1 }
 0xcf7   :  { %9138 = vmatprep.subr.bf16.mxu0 %v11963_v55  ;;  %9170 = vmatprep.subr.bf16.mxu1 %v11965_v59 }
 0xcf8   :  { %4093 = vmatprep.mubr.f32.mxu0 %v10872_v0  ;;  %4164 = vmatprep.mubr.f32.mxu1 %v10872_v0 }
 0xcfa   :  { %9140 = vmatpush1.bf16.msra.mxu0 %v11967_v53  ;;  %9172 = vmatpush1.bf16.msra.mxu1 %v11970_v51 }
 0xcfb   :  { %9142 = vmatprep.subr.bf16.mxu0 %v11975_v33  ;;  %9174 = vmatprep.subr.bf16.mxu1 %v11977_v20 }
 0xcfe   :  { %9144 = vmatpush1.bf16.msra.mxu0 %v11979_v56  ;;  %9176 = vmatpush1.bf16.msra.mxu1 %v11982_v25 }
 0xcff   :  { %9146 = vmatprep.subr.bf16.mxu0 %v11987_v2  ;;  %9178 = vmatprep.subr.bf16.mxu1 %v11989_v31 }
 0xd02   :  { %9148 = vmatpush1.bf16.msra.mxu0 %v11991_v7  ;;  %9180 = vmatpush1.bf16.msra.mxu1 %v11994_v57 }
 0xd03   :  { %9150 = vmatprep.subr.bf16.mxu0 %v11999_v52  ;;  %9182 = vmatprep.subr.bf16.mxu1 %v12001_v29 }
 0xd06   :  { %9152 = vmatpush1.bf16.msra.mxu0 %v12003_v42  ;;  %9184 = vmatpush1.bf16.msra.mxu1 %v12006_v27 }
 0xd07   :  { %9154 = vmatprep.subr.bf16.mxu0 %v12010_v32  ;;  %9186 = vmatprep.subr.bf16.mxu1 %v12013_v14 }
 0xd0a   :  { %9156 = vmatpush1.bf16.msra.mxu0 %v12015_v58  ;;  %9188 = vmatpush1.bf16.msra.mxu1 %v12018_v62 }
 0xd0b   :  { %9158 = vmatprep.subr.bf16.mxu0 %v12021_v47  ;;  %9190 = vmatprep.subr.bf16.mxu1 %v12023_v63 }
 0xd0e   :  { %9160 = vmatpush1.bf16.msra.mxu0 %v12026_v10  ;;  %9192 = vmatpush1.bf16.msra.mxu1 %v12030_v60 }
 0xd0f   :  { %9162 = vmatprep.subr.bf16.mxu0 %v12032_v28  ;;  %9194 = vmatprep.subr.bf16.mxu1 %v12035_v26 }
 0xd12   :  { %9164 = vmatpush1.bf16.msra.mxu0 %v12038_v40  ;;  %9196 = vmatpush1.bf16.msra.mxu1 %v12042_v3 }
 0xd13   :  { %9198 = vmatprep.subr.bf16.mxu0 %v11951_v5  ;;  %9230 = vmatprep.subr.bf16.mxu1 %v11953_v24 }
 0xdc8   :  { %v3852_v45 = vpop.f32.mrb[24].mxu0  ;;  %v3923_v9 = vpop.f32.mrb[32].mxu1 }
 0xdc9   :  { %v10141_v49 = vadd.f32 %v3852_v45, %v11837_v11  ;;  %v3854_v6 = vpop.f32.mrb[25].mxu0  ;;  %v3925_v22 = vpop.f32.mrb[33].mxu1  ;;  %v10157_v39 = vadd.f32 %v3923_v9, %v11849_v23 }
 0xdca   :  { %v10142_v41 = vadd.f32 %v3854_v6, %v11840_v16  ;;  %v10158_v46 = vadd.f32 %v3925_v22, %v11845_v13 }
 0xdcb   :  { %v7776_v37 = vmul.f32 -1.442695, %v10141_v49 }
 0xdcc   :  { %v7777_v35 = vmul.f32 -1.442695, %v10142_v41  ;;  %v7778_v54 = vmul.f32 -1.442695, %v10158_v46 }
 0xdcd   :  { %10506 = vpow2.f32 %v7776_v37 }
 0xdce   :  { %10508 = vpow2.f32 %v7777_v35 }
 0xdcf   :  { %10510 = vpow2.f32 %v7778_v54 }
 0xdd0   :  { %10512 = vtanh.f32 %v10157_v39 }
 0xdd7   :  { %v10507_v30 = vpop.eup %10506 }
 0xdd8   :  { %v10509_v36 = vpop.eup %10508  ;;  %v3935_v8 = vadd.f32 1.0, %v10507_v30 }
 0xdd9   :  { %v3941_v18 = vadd.f32 1.0, %v10509_v36  ;;  %v10511_v43 = vpop.eup %10510 }
 0xdda   :  { %10514 = vrcp.f32 %v3935_v8  ;;  %v10513_v12 = vpop.eup %10512  ;;  %v3948_v6 = vadd.f32 1.0, %v10511_v43 }
 0xddb   :  { %10516 = vrcp.f32 %v3941_v18 }
 0xddc   :  { %10518 = vrcp.f32 %v3948_v6 }
 0xde4   :  { %v10515_v17 = vpop.eup %10514 }
 0xde5   :  { %v10517_v45 = vpop.eup %10516  ;;  %v3953_v49 = vmul.f32 %v10515_v17, %v10513_v12 }
 0xde6   :  { %v3952_v41 = vmul.f32 %v10517_v45, %v12054_v15  ;;  %v10519_v9 = vpop.eup %10518 }
 0xde8   :  { %v12100_v22 = vadd.f32 %v3953_v49, %v3952_v41 }
 0xdea   :  { %10520 = vtanh.f32 %v12100_v22 }
 0xdf4   :  { %v10521_v37 = vpop.eup %10520 }
 0xdf5   :  { %v12103_v35 = vmul.f32 %v10521_v37, %v10519_v9 }
 0xdf7   :  { %4094 = vmatmul.mubr.f32.vlgmr.msra.gmra.mrb[26].mxu0 %v12103_v35  ;;  %4165 = vmatmul.mubr.f32.vlgmr.msra.gmra.mrb[34].mxu1 %v12103_v35 }
 0xdf8   :  { %9200 = vmatpush1.bf16.msra.mxu0 %v11955_v50  ;;  %9232 = vmatpush1.bf16.msra.mxu1 %v11958_v1 }
 0xdf9   :  { %9202 = vmatprep.subr.bf16.mxu0 %v11963_v55  ;;  %9234 = vmatprep.subr.bf16.mxu1 %v11965_v59 }
 0xdfa   :  { %4336 = vmatprep.mubr.f32.mxu0 %v10872_v0  ;;  %4407 = vmatprep.mubr.f32.mxu1 %v10872_v0 }
 0xdfc   :  { %9204 = vmatpush1.bf16.msra.mxu0 %v11967_v53  ;;  %9236 = vmatpush1.bf16.msra.mxu1 %v11970_v51 }
 0xdfd   :  { %9206 = vmatprep.subr.bf16.mxu0 %v11975_v33  ;;  %9238 = vmatprep.subr.bf16.mxu1 %v11977_v20 }
 0xe00   :  { %9208 = vmatpush1.bf16.msra.mxu0 %v11979_v56  ;;  %9240 = vmatpush1.bf16.msra.mxu1 %v11982_v25 }
 0xe01   :  { %9210 = vmatprep.subr.bf16.mxu0 %v11987_v2  ;;  %9242 = vmatprep.subr.bf16.mxu1 %v11989_v31 }
 0xe04   :  { %9212 = vmatpush1.bf16.msra.mxu0 %v11991_v7  ;;  %9244 = vmatpush1.bf16.msra.mxu1 %v11994_v57 }
 0xe05   :  { %9214 = vmatprep.subr.bf16.mxu0 %v11999_v52  ;;  %9246 = vmatprep.subr.bf16.mxu1 %v12001_v29 }
 0xe08   :  { %9216 = vmatpush1.bf16.msra.mxu0 %v12003_v42  ;;  %9248 = vmatpush1.bf16.msra.mxu1 %v12006_v27 }
 0xe09   :  { %9218 = vmatprep.subr.bf16.mxu0 %v12010_v32  ;;  %9250 = vmatprep.subr.bf16.mxu1 %v12013_v14 }
 0xe0c   :  { %9220 = vmatpush1.bf16.msra.mxu0 %v12015_v58  ;;  %9252 = vmatpush1.bf16.msra.mxu1 %v12018_v62 }
 0xe0d   :  { %9222 = vmatprep.subr.bf16.mxu0 %v12021_v47  ;;  %9254 = vmatprep.subr.bf16.mxu1 %v12023_v63 }
 0xe10   :  { %9224 = vmatpush1.bf16.msra.mxu0 %v12026_v10  ;;  %9256 = vmatpush1.bf16.msra.mxu1 %v12030_v60 }
 0xe11   :  { %9226 = vmatprep.subr.bf16.mxu0 %v12032_v28  ;;  %9258 = vmatprep.subr.bf16.mxu1 %v12035_v26 }
 0xe14   :  { %9228 = vmatpush1.bf16.msra.mxu0 %v12038_v40  ;;  %9260 = vmatpush1.bf16.msra.mxu1 %v12042_v3 }
 0xe15   :  { %9262 = vmatprep.subr.bf16.mxu0 %v11951_v5  ;;  %9294 = vmatprep.subr.bf16.mxu1 %v11953_v24 }
 0xeca   :  { %v4095_v15 = vpop.f32.mrb[26].mxu0  ;;  %v4166_v46 = vpop.f32.mrb[34].mxu1 }
 0xecb   :  { %v10143_v54 = vadd.f32 %v4095_v15, %v11837_v11  ;;  %v4097_v39 = vpop.f32.mrb[27].mxu0  ;;  %v4168_v30 = vpop.f32.mrb[35].mxu1  ;;  %v10159_v17 = vadd.f32 %v4166_v46, %v11849_v23 }
 0xecc   :  { %v10144_v36 = vadd.f32 %v4097_v39, %v11840_v16  ;;  %v10160_v43 = vadd.f32 %v4168_v30, %v11845_v13 }
 0xecd   :  { %v7779_v8 = vmul.f32 -1.442695, %v10143_v54 }
 0xece   :  { %v7780_v18 = vmul.f32 -1.442695, %v10144_v36  ;;  %v7781_v12 = vmul.f32 -1.442695, %v10160_v43  ;;  %v4703_v43 = vld [vmem:[#allocation12 + $0x30] sm:$0xff] }
 0xecf   :  { %10522 = vpow2.f32 %v7779_v8 }
 0xed0   :  { %10524 = vpow2.f32 %v7780_v18  ;;  %v4699_v18 = vld [vmem:[#allocation12 + $0x10] sm:$0xff] }
 0xed1   :  { %10526 = vpow2.f32 %v7781_v12  ;;  %v4706_v12 = vld [vmem:[#allocation12 + $0x48] sm:$0xff] }
 0xed2   :  { %10528 = vtanh.f32 %v10159_v17  ;;  %v4710_v17 = vld [vmem:[#allocation12 + $0x68] sm:$0xff] }
 0xed9   :  { %v10523_v5 = vpop.eup %10522 }
 0xeda   :  { %v10525_v45 = vpop.eup %10524  ;;  %v4178_v24 = vadd.f32 1.0, %v10523_v5  ;;  %v4708_v5 = vld [vmem:[#allocation12 + $0x58] sm:$0xff] }
 0xedb   :  { %v4184_v49 = vadd.f32 1.0, %v10525_v45  ;;  %v10527_v6 = vpop.eup %10526  ;;  %v4712_v45 = vld [vmem:[#allocation12 + $0x78] sm:$0xff] }
 0xedc   :  { %10530 = vrcp.f32 %v4178_v24  ;;  %v10529_v41 = vpop.eup %10528  ;;  %v4191_v54 = vadd.f32 1.0, %v10527_v6 }
 0xedd   :  { %10532 = vrcp.f32 %v4184_v49 }
 0xede   :  { %10534 = vrcp.f32 %v4191_v54  ;;  %v9329_v54 = vpack.c.bf16 %v4710_v17, %v4706_v12  ;;  %v4731_v17 = vld [vmem:[#allocation12 + $0x110] sm:$0xff] }
 0xee6   :  { %v10531_v9 = vpop.eup %10530 }
 0xee7   :  { %v10533_v37 = vpop.eup %10532  ;;  %v4196_v15 = vmul.f32 %v10531_v9, %v10529_v41  ;;  %v9359_v41 = vpack.c.bf16 %v4703_v43, %v4699_v18  ;;  %v4705_v9 = vld [vmem:[#allocation12 + $0x40] sm:$0xff] }
 0xee8   :  { %v4195_v39 = vmul.f32 %v10533_v37, %v12100_v22  ;;  %v10535_v46 = vpop.eup %10534  ;;  %v4701_v22 = vld [vmem:[#allocation12 + $0x20] sm:$0xff] }
 0xee9   :  { %v4709_v37 = vld [vmem:[#allocation12 + $0x60] sm:$0xff] }
 0xeea   :  { %v12146_v30 = vadd.f32 %v4196_v15, %v4195_v39  ;;  %v9361_v39 = vpack.c.bf16 %v4712_v45, %v4708_v5  ;;  %v4733_v18 = vld [vmem:[#allocation12 + $0x120] sm:$0xff]  ;;  %v4735_v5 = vld [vmem:[#allocation12 + $0x130] sm:$0xff]  ;;  %v4738_v45 = vld [vmem:[#allocation12 + $0x148] sm:$0xff] }
 0xeec   :  { %10536 = vtanh.f32 %v12146_v30 }
 0xef6   :  { %v10537_v36 = vpop.eup %10536 }
 0xef7   :  { %v12149_v8 = vmul.f32 %v10537_v36, %v10535_v46  ;;  %v4711_v46 = vld [vmem:[#allocation12 + $0x70] sm:$0xff]  ;;  %v4714_v36 = vld [vmem:[#allocation12 + $0x88] sm:$0xff] }
 0xef9   :  { %4337 = vmatmul.mubr.f32.vlgmr.msra.gmra.mrb[28].mxu0 %v12149_v8  ;;  %4408 = vmatmul.mubr.f32.vlgmr.msra.gmra.mrb[36].mxu1 %v12149_v8 }
 0xefa   :  { %9264 = vmatpush1.bf16.msra.mxu0 %v11955_v50  ;;  %9296 = vmatpush1.bf16.msra.mxu1 %v11958_v1  ;;  %v4698_v50 = vld [vmem:[#allocation12 + $0x8] sm:$0xff] }
 0xefb   :  { %9266 = vmatprep.subr.bf16.mxu0 %v11963_v55  ;;  %9298 = vmatprep.subr.bf16.mxu1 %v11965_v59  ;;  %v4702_v1 = vld [vmem:[#allocation12 + $0x28] sm:$0xff]  ;;  %v4700_v55 = vld [vmem:[#allocation12 + $0x18] sm:$0xff] }
 0xefc   :  { %4579 = vmatprep.mubr.f32.mxu0 %v10872_v0  ;;  %4650 = vmatprep.mubr.f32.mxu1 %v10872_v0  ;;  %v9325_v59 = vpack.c.bf16 %v4702_v1, %v4698_v50  ;;  %v4718_v50 = vld [vmem:[#allocation12 + $0xa8] sm:$0xff]  ;;  %v4716_v1 = vld [vmem:[#allocation12 + $0x98] sm:$0xff] }
 0xefe   :  { %9268 = vmatpush1.bf16.msra.mxu0 %v11967_v53  ;;  %9300 = vmatpush1.bf16.msra.mxu1 %v11970_v51  ;;  %v4704_v53 = vld [vmem:[#allocation12 + $0x38] sm:$0xff] }
 0xeff   :  { %9270 = vmatprep.subr.bf16.mxu0 %v11975_v33  ;;  %9302 = vmatprep.subr.bf16.mxu1 %v11977_v20  ;;  %v9357_v51 = vpack.c.bf16 %v4704_v53, %v4700_v55  ;;  %v4720_v55 = vld [vmem:[#allocation12 + $0xb8] sm:$0xff] }
 0xf02   :  { %9272 = vmatpush1.bf16.msra.mxu0 %v11979_v56  ;;  %9304 = vmatpush1.bf16.msra.mxu1 %v11982_v25 }
 0xf03   :  { %9274 = vmatprep.subr.bf16.mxu0 %v11987_v2  ;;  %9306 = vmatprep.subr.bf16.mxu1 %v11989_v31 }
 0xf06   :  { %9276 = vmatpush1.bf16.msra.mxu0 %v11991_v7  ;;  %9308 = vmatpush1.bf16.msra.mxu1 %v11994_v57 }
 0xf07   :  { %9278 = vmatprep.subr.bf16.mxu0 %v11999_v52  ;;  %9310 = vmatprep.subr.bf16.mxu1 %v12001_v29 }
 0xf0a   :  { %9280 = vmatpush1.bf16.msra.mxu0 %v12003_v42  ;;  %9312 = vmatpush1.bf16.msra.mxu1 %v12006_v27 }
 0xf0b   :  { %9282 = vmatprep.subr.bf16.mxu0 %v12010_v32  ;;  %9314 = vmatprep.subr.bf16.mxu1 %v12013_v14 }
 0xf0e   :  { %9284 = vmatpush1.bf16.msra.mxu0 %v12015_v58  ;;  %9316 = vmatpush1.bf16.msra.mxu1 %v12018_v62 }
 0xf0f   :  { %9286 = vmatprep.subr.bf16.mxu0 %v12021_v47  ;;  %9318 = vmatprep.subr.bf16.mxu1 %v12023_v63 }
 0xf12   :  { %9288 = vmatpush1.bf16.msra.mxu0 %v12026_v10  ;;  %9320 = vmatpush1.bf16.msra.mxu1 %v12030_v60 }
 0xf13   :  { %9290 = vmatprep.subr.bf16.mxu0 %v12032_v28  ;;  %9322 = vmatprep.subr.bf16.mxu1 %v12035_v26 }
 0xf16   :  { %9292 = vmatpush1.bf16.msra.mxu0 %v12038_v40  ;;  %9324 = vmatpush1.bf16.msra.mxu1 %v12042_v3  ;;  %v4697_v3 = vld [vmem:[#allocation12] sm:$0xff] }
 0xf17   :  { %9326 = vmatprep.subr.bf16.mxu0 %v9325_v59  ;;  %9358 = vmatprep.subr.bf16.mxu1 %v9357_v51  ;;  %v9327_v6 = vpack.c.bf16 %v4701_v22, %v4697_v3  ;;  %v9331_v59 = vpack.c.bf16 %v4709_v37, %v4705_v9  ;;  %v4713_v51 = vld [vmem:[#allocation12 + $0x80] sm:$0xff]  ;;  %v9375_v9 = vpack.c.bf16 %v4735_v5, %v4731_v17  ;;  %v5059_v17 = vld [vmem:[#allocation14 + $0x58] sm:$0xff] }
 0xf18   :  { %v4729_v22 = vld [vmem:[#allocation12 + $0x100] sm:$0xff] }
 0xf19   :  { %v4737_v37 = vld [vmem:[#allocation12 + $0x140] sm:$0xff] }
 0xfcc   :  { %v4338_v33 = vpop.f32.mrb[28].mxu0  ;;  %v4409_v20 = vpop.f32.mrb[36].mxu1 }
 0xfcd   :  { %v10145_v56 = vadd.f32 %v4338_v33, %v11837_v11  ;;  %v4340_v25 = vpop.f32.mrb[29].mxu0  ;;  %v4411_v2 = vpop.f32.mrb[37].mxu1  ;;  %v10161_v42 = vadd.f32 %v4409_v20, %v11849_v23  ;;  %v4717_v33 = vld [vmem:[#allocation12 + $0xa0] sm:$0xff]  ;;  %v9333_v20 = vpack.c.bf16 %v4718_v50, %v4714_v36  ;;  %v4743_v36 = vld [vmem:[#allocation12 + $0x170] sm:$0xff]  ;;  %v4746_v50 = vld [vmem:[#allocation12 + $0x188] sm:$0xff] }
 0xfce   :  { %v10146_v31 = vadd.f32 %v4340_v25, %v11840_v16  ;;  %v10162_v52 = vadd.f32 %v4411_v2, %v11845_v13  ;;  %v4715_v25 = vld [vmem:[#allocation12 + $0x90] sm:$0xff] }
 0xfcf   :  { %v7782_v7 = vmul.f32 -1.442695, %v10145_v56  ;;  %v9365_v56 = vpack.c.bf16 %v4720_v55, %v4716_v1  ;;  %v4719_v2 = vld [vmem:[#allocation12 + $0xb0] sm:$0xff]  ;;  %v4750_v1 = vld [vmem:[#allocation12 + $0x1a8] sm:$0xff]  ;;  %v4748_v55 = vld [vmem:[#allocation12 + $0x198] sm:$0xff] }
 0xfd0   :  { %v7783_v57 = vmul.f32 -1.442695, %v10146_v31  ;;  %v7784_v29 = vmul.f32 -1.442695, %v10162_v52  ;;  %v4722_v31 = vld [vmem:[#allocation12 + $0xc8] sm:$0xff]  ;;  %v4728_v52 = vld [vmem:[#allocation12 + $0xf8] sm:$0xff] }
 0xfd1   :  { %10538 = vpow2.f32 %v7782_v7  ;;  %v4726_v7 = vld [vmem:[#allocation12 + $0xe8] sm:$0xff] }
 0xfd2   :  { %10540 = vpow2.f32 %v7783_v57  ;;  %v4724_v57 = vld [vmem:[#allocation12 + $0xd8] sm:$0xff] }
 0xfd3   :  { %10542 = vpow2.f32 %v7784_v29  ;;  %v9335_v29 = vpack.c.bf16 %v4717_v33, %v4713_v51  ;;  %v4745_v33 = vld [vmem:[#allocation12 + $0x180] sm:$0xff] }
 0xfd4   :  { %10544 = vtanh.f32 %v10161_v42  ;;  %v9367_v42 = vpack.c.bf16 %v4719_v2, %v4715_v25  ;;  %v4747_v2 = vld [vmem:[#allocation12 + $0x190] sm:$0xff] }
 0xfdb   :  { %v10539_v27 = vpop.eup %10538 }
 0xfdc   :  { %v10541_v32 = vpop.eup %10540  ;;  %v4421_v14 = vadd.f32 1.0, %v10539_v27  ;;  %v4721_v27 = vld [vmem:[#allocation12 + $0xc0] sm:$0xff] }
 0xfdd   :  { %v4427_v58 = vadd.f32 1.0, %v10541_v32  ;;  %v10543_v62 = vpop.eup %10542  ;;  %v4725_v32 = vld [vmem:[#allocation12 + $0xe0] sm:$0xff] }
 0xfde   :  { %10546 = vrcp.f32 %v4421_v14  ;;  %v10545_v47 = vpop.eup %10544  ;;  %v4434_v28 = vadd.f32 1.0, %v10543_v62  ;;  %v9337_v14 = vpack.c.bf16 %v4726_v7, %v4722_v31  ;;  %v4723_v62 = vld [vmem:[#allocation12 + $0xd0] sm:$0xff]  ;;  %v4754_v7 = vld [vmem:[#allocation12 + $0x1c8] sm:$0xff] }
 0xfdf   :  { %10548 = vrcp.f32 %v4427_v58  ;;  %v9369_v58 = vpack.c.bf16 %v4728_v52, %v4724_v57  ;;  %v4751_v31 = vld [vmem:[#allocation12 + $0x1b0] sm:$0xff]  ;;  %v4758_v57 = vld [vmem:[#allocation12 + $0x1e8] sm:$0xff]  ;;  %v4756_v52 = vld [vmem:[#allocation12 + $0x1d8] sm:$0xff] }
 0xfe0   :  { %10550 = vrcp.f32 %v4434_v28  ;;  %v4736_v28 = vld [vmem:[#allocation12 + $0x138] sm:$0xff] }
 0xfe8   :  { %v10547_v63 = vpop.eup %10546 }
 0xfe9   :  { %v10549_v10 = vpop.eup %10548  ;;  %v4439_v60 = vmul.f32 %v10547_v63, %v10545_v47  ;;  %v4727_v47 = vld [vmem:[#allocation12 + $0xf0] sm:$0xff]  ;;  %v4730_v63 = vld [vmem:[#allocation12 + $0x108] sm:$0xff] }
 0xfea   :  { %v4438_v26 = vmul.f32 %v10549_v10, %v12146_v30  ;;  %v10551_v24 = vpop.eup %10550  ;;  %v4707_v30 = vld [vmem:[#allocation12 + $0x50] sm:$0xff]  ;;  %v4734_v10 = vld [vmem:[#allocation12 + $0x128] sm:$0xff]  ;;  %v9371_v3 = vpack.c.bf16 %v4727_v47, %v4723_v62  ;;  %v4757_v62 = vld [vmem:[#allocation12 + $0x1e0] sm:$0xff] }
 0xfeb   :  { %v9363_v53 = vpack.c.bf16 %v4711_v46, %v4707_v30  ;;  %v9341_v43 = vpack.c.bf16 %v4734_v10, %v4730_v63  ;;  %v4739_v46 = vld [vmem:[#allocation12 + $0x150] sm:$0xff] }
 0xfec   :  { %v12190_v40 = vadd.f32 %v4439_v60, %v4438_v26  ;;  %v4732_v60 = vld [vmem:[#allocation12 + $0x118] sm:$0xff]  ;;  %v9339_v26 = vpack.c.bf16 %v4725_v32, %v4721_v27  ;;  %v9379_v51 = vpack.c.bf16 %v4743_v36, %v4739_v46  ;;  %v9383_v27 = vpack.c.bf16 %v4751_v31, %v4747_v2  ;;  %v4753_v32 = vld [vmem:[#allocation12 + $0x1c0] sm:$0xff]  ;;  %v4755_v47 = vld [vmem:[#allocation12 + $0x1d0] sm:$0xff] }
 0xfed   :  { %v9373_v12 = vpack.c.bf16 %v4736_v28, %v4732_v60  ;;  %v4759_v63 = vld [vmem:[#allocation12 + $0x1f0] sm:$0xff]  ;;  %v9355_v10 = vpack.c.bf16 %v4757_v62, %v4753_v32  ;;  %v5052_v28 = vld [vmem:[#allocation14 + $0x20] sm:$0xff]  ;;  %v5067_v46 = vld [vmem:[#allocation14 + $0x98] sm:$0xff] }
 0xfee   :  { %10552 = vtanh.f32 %v12190_v40  ;;  %v9387_v60 = vpack.c.bf16 %v4759_v63, %v4755_v47  ;;  %v5075_v2 = vld [vmem:[#allocation14 + $0xd8] sm:$0xff]  ;;  %v5078_v32 = vld [vmem:[#allocation14 + $0xf0] sm:$0xff]  ;;  %v5085_v62 = vld [vmem:[#allocation14 + $0x128] sm:$0xff] }
 0xfef   :  { %v5080_v47 = vld [vmem:[#allocation14 + $0x100] sm:$0xff] }
 0xff0   :  { %v5084_v63 = vld [vmem:[#allocation14 + $0x120] sm:$0xff] }
 0xff8   :  { %v10553_v49 = vpop.eup %10552 }
 0xff9   :  { %v12193_v15 = vmul.f32 %v10553_v49, %v10551_v24  ;;  %v4742_v24 = vld [vmem:[#allocation12 + $0x168] sm:$0xff]  ;;  %v4740_v49 = vld [vmem:[#allocation12 + $0x158] sm:$0xff] }
 0xffb   :  { %4580 = vmatmul.mubr.f32.vlgmr.msra.gmra.mrb[30].mxu0 %v12193_v15  ;;  %4651 = vmatmul.mubr.f32.vlgmr.msra.gmra.mrb[38].mxu1 %v12193_v15 }
 0xffc   :  { %9328 = vmatpush1.bf16.msra.mxu0 %v9327_v6  ;;  %9360 = vmatpush1.bf16.msra.mxu1 %v9359_v41  ;;  %v4744_v6 = vld [vmem:[#allocation12 + $0x178] sm:$0xff]  ;;  %v9343_v41 = vpack.c.bf16 %v4733_v18, %v4729_v22  ;;  %v5050_v22 = vld [vmem:[#allocation14 + $0x10] sm:$0xff] }
 0xffd   :  { %9330 = vmatprep.subr.bf16.mxu0 %v9329_v54  ;;  %9362 = vmatprep.subr.bf16.mxu1 %v9361_v39  ;;  %v4741_v54 = vld [vmem:[#allocation12 + $0x160] sm:$0xff]  ;;  %v9345_v39 = vpack.c.bf16 %v4742_v24, %v4738_v45  ;;  %v9377_v30 = vpack.c.bf16 %v4744_v6, %v4740_v49  ;;  %v5054_v18 = vld [vmem:[#allocation14 + $0x30] sm:$0xff]  ;;  %v5063_v49 = vld [vmem:[#allocation14 + $0x78] sm:$0xff] }
 0xffe   :  { %4847 = vmatprep.mubr.f32.mxu0 %v10872_v0  ;;  %4960 = vmatprep.mubr.f32.mxu1 %v10872_v0  ;;  %v5056_v45 = vld [vmem:[#allocation14 + $0x40] sm:$0xff] }
 0xfff   :  { %v5060_v24 = vld [vmem:[#allocation14 + $0x60] sm:$0xff] }
0x1000   :  { %9332 = vmatpush1.bf16.msra.mxu0 %v9331_v59  ;;  %9364 = vmatpush1.bf16.msra.mxu1 %v9363_v53  ;;  %v4752_v59 = vld [vmem:[#allocation12 + $0x1b8] sm:$0xff]  ;;  %v9347_v53 = vpack.c.bf16 %v4741_v54, %v4737_v37  ;;  %v12241_v6 = vpack.c.bf16 %v5060_v24, %v5056_v45  ;;  %v5062_v37 = vld [vmem:[#allocation14 + $0x70] sm:$0xff] }
0x1001   :  { %9334 = vmatprep.subr.bf16.mxu0 %v9333_v20  ;;  %9366 = vmatprep.subr.bf16.mxu1 %v9365_v56  ;;  %v4749_v20 = vld [vmem:[#allocation12 + $0x1a0] sm:$0xff]  ;;  %v9349_v56 = vpack.c.bf16 %v4750_v1, %v4746_v50  ;;  %v9381_v25 = vpack.c.bf16 %v4752_v59, %v4748_v55  ;;  %v5071_v55 = vld [vmem:[#allocation14 + $0xb8] sm:$0xff] }
0x1002   :  { %v5064_v50 = vld [vmem:[#allocation14 + $0x80] sm:$0xff]  ;;  %v5091_v45 = vld [vmem:[#allocation14 + $0x158] sm:$0xff] }
0x1003   :  { %v5068_v1 = vld [vmem:[#allocation14 + $0xa0] sm:$0xff]  ;;  %v5095_v24 = vld [vmem:[#allocation14 + $0x178] sm:$0xff] }
0x1004   :  { %9336 = vmatpush1.bf16.msra.mxu0 %v9335_v29  ;;  %9368 = vmatpush1.bf16.msra.mxu1 %v9367_v42  ;;  %v4760_v29 = vld [vmem:[#allocation12 + $0x1f8] sm:$0xff]  ;;  %v9351_v42 = vpack.c.bf16 %v4749_v20, %v4745_v33  ;;  %v12253_v59 = vpack.c.bf16 %v5068_v1, %v5064_v50  ;;  %v5070_v33 = vld [vmem:[#allocation14 + $0xb0] sm:$0xff]  ;;  %v5096_v50 = vld [vmem:[#allocation14 + $0x180] sm:$0xff] }
0x1005   :  { %9338 = vmatprep.subr.bf16.mxu0 %v9337_v14  ;;  %9370 = vmatprep.subr.bf16.mxu1 %v9369_v58  ;;  %v9353_v14 = vpack.c.bf16 %v4758_v57, %v4754_v7  ;;  %v9385_v58 = vpack.c.bf16 %v4760_v29, %v4756_v52  ;;  %v5072_v7 = vld [vmem:[#allocation14 + $0xc0] sm:$0xff]  ;;  %v5079_v52 = vld [vmem:[#allocation14 + $0xf8] sm:$0xff] }
0x1006   :  { %v5076_v57 = vld [vmem:[#allocation14 + $0xe0] sm:$0xff] }
0x1007   :  { %v12265_v29 = vpack.c.bf16 %v5076_v57, %v5072_v7  ;;  %v5102_v7 = vld [vmem:[#allocation14 + $0x1b0] sm:$0xff]  ;;  %v5105_v57 = vld [vmem:[#allocation14 + $0x1c8] sm:$0xff] }
0x1008   :  { %9340 = vmatpush1.bf16.msra.mxu0 %v9339_v26  ;;  %9372 = vmatpush1.bf16.msra.mxu1 %v9371_v3 }
0x1009   :  { %9342 = vmatprep.subr.bf16.mxu0 %v9341_v43  ;;  %9374 = vmatprep.subr.bf16.mxu1 %v9373_v12  ;;  %v5057_v43 = vld [vmem:[#allocation14 + $0x48] sm:$0xff] }
0x100a   :  { %v5061_v12 = vld [vmem:[#allocation14 + $0x68] sm:$0xff] }
0x100b   :  { %v12239_v5 = vpack.c.bf16 %v5061_v12, %v5057_v43  ;;  %v5088_v12 = vld [vmem:[#allocation14 + $0x140] sm:$0xff] }
0x100c   :  { %9344 = vmatpush1.bf16.msra.mxu0 %v9343_v41  ;;  %9376 = vmatpush1.bf16.msra.mxu1 %v9375_v9  ;;  %v12243_v41 = vpack.c.bf16 %v5063_v49, %v5059_v17  ;;  %v5058_v9 = vld [vmem:[#allocation14 + $0x50] sm:$0xff]  ;;  %v5092_v17 = vld [vmem:[#allocation14 + $0x160] sm:$0xff] }
0x100d   :  { %9346 = vmatprep.subr.bf16.mxu0 %v9345_v39  ;;  %9378 = vmatprep.subr.bf16.mxu1 %v9377_v30  ;;  %v12246_v54 = vpack.c.bf16 %v5062_v37, %v5058_v9  ;;  %v5065_v39 = vld [vmem:[#allocation14 + $0x88] sm:$0xff]  ;;  %v5090_v49 = vld [vmem:[#allocation14 + $0x150] sm:$0xff]  ;;  %v12288_v37 = vpack.c.bf16 %v5092_v17, %v5088_v12 }
0x100e   :  { %v5069_v30 = vld [vmem:[#allocation14 + $0xa8] sm:$0xff]  ;;  %v5094_v9 = vld [vmem:[#allocation14 + $0x170] sm:$0xff] }
0x100f   :  { %v12251_v36 = vpack.c.bf16 %v5069_v30, %v5065_v39  ;;  %v12290_v39 = vpack.c.bf16 %v5095_v24, %v5091_v45  ;;  %v5097_v30 = vld [vmem:[#allocation14 + $0x188] sm:$0xff]  ;;  %v12294_v1 = vpack.c.bf16 %v5094_v9, %v5090_v49 }
0x1010   :  { %9348 = vmatpush1.bf16.msra.mxu0 %v9347_v53  ;;  %9380 = vmatpush1.bf16.msra.mxu1 %v9379_v51  ;;  %v12255_v53 = vpack.c.bf16 %v5071_v55, %v5067_v46  ;;  %v5066_v51 = vld [vmem:[#allocation14 + $0x90] sm:$0xff]  ;;  %v5101_v46 = vld [vmem:[#allocation14 + $0x1a8] sm:$0xff] }
0x1011   :  { %9350 = vmatprep.subr.bf16.mxu0 %v9349_v56  ;;  %9382 = vmatprep.subr.bf16.mxu1 %v9381_v25  ;;  %v12258_v20 = vpack.c.bf16 %v5070_v33, %v5066_v51  ;;  %v5073_v56 = vld [vmem:[#allocation14 + $0xc8] sm:$0xff]  ;;  %v12296_v55 = vpack.c.bf16 %v5101_v46, %v5097_v30  ;;  %v5100_v51 = vld [vmem:[#allocation14 + $0x1a0] sm:$0xff]  ;;  %v5099_v33 = vld [vmem:[#allocation14 + $0x198] sm:$0xff] }
0x1012   :  { %v5077_v25 = vld [vmem:[#allocation14 + $0xe8] sm:$0xff] }
0x1013   :  { %v12263_v31 = vpack.c.bf16 %v5077_v25, %v5073_v56  ;;  %v5103_v56 = vld [vmem:[#allocation14 + $0x1b8] sm:$0xff] }
0x1014   :  { %9352 = vmatpush1.bf16.msra.mxu0 %v9351_v42  ;;  %9384 = vmatpush1.bf16.msra.mxu1 %v9383_v27  ;;  %v12267_v42 = vpack.c.bf16 %v5079_v52, %v5075_v2  ;;  %v5074_v27 = vld [vmem:[#allocation14 + $0xd0] sm:$0xff]  ;;  %v12299_v25 = vpack.c.bf16 %v5103_v56, %v5099_v33  ;;  %v5109_v52 = vld [vmem:[#allocation14 + $0x1e8] sm:$0xff] }
0x1015   :  { %9354 = vmatprep.subr.bf16.mxu0 %v9353_v14  ;;  %9386 = vmatprep.subr.bf16.mxu1 %v9385_v58  ;;  %v5081_v14 = vld [vmem:[#allocation14 + $0x108] sm:$0xff]  ;;  %v12270_v58 = vpack.c.bf16 %v5078_v32, %v5074_v27  ;;  %v5098_v2 = vld [vmem:[#allocation14 + $0x190] sm:$0xff]  ;;  %v12302_v27 = vpack.c.bf16 %v5100_v51, %v5096_v50 }
0x1016   :  { %v12306_v32 = vpack.c.bf16 %v5102_v7, %v5098_v2 }
0x1018   :  { %9356 = vmatpush1.bf16.msra.mxu0 %v9355_v10  ;;  %9388 = vmatpush1.bf16.msra.mxu1 %v9387_v60  ;;  %v12274_v10 = vpack.c.bf16 %v5085_v62, %v5081_v14  ;;  %v12276_v60 = vpack.c.bf16 %v5084_v63, %v5080_v47  ;;  %v12308_v14 = vpack.c.bf16 %v5109_v52, %v5105_v57  ;;  %v5107_v62 = vld [vmem:[#allocation14 + $0x1d8] sm:$0xff]  ;;  %v5104_v63 = vld [vmem:[#allocation14 + $0x1c0] sm:$0xff] }
0x1019   :  { %v5111_v47 = vld [vmem:[#allocation14 + $0x1f8] sm:$0xff] }
0x101b   :  { %4848 = vmatmul.mubr.f32.vlgmr.msra.gmra.mrb[32].mxu0 %v11855_v38  ;;  %4961 = vmatmul.mubr.f32.vlgmr.msra.gmra.mrb[40].mxu1 %v11855_v38  ;;  %v5049_v38 = vld [vmem:[#allocation14 + $0x8] sm:$0xff] }
0x101c   :  { %4853 = vmatprep.mubr.f32.mxu0 %v10872_v0  ;;  %4966 = vmatprep.mubr.f32.mxu1 %v10872_v0 }
0x101f   :  { %4854 = vmatmul.mubr.f32.gmra.mrb[34].mxu0 %v11901_v34  ;;  %4967 = vmatmul.mubr.f32.gmra.mrb[42].mxu1 %v11901_v34  ;;  %v5053_v34 = vld [vmem:[#allocation14 + $0x28] sm:$0xff] }
0x1020   :  { %4859 = vmatprep.mubr.f32.mxu0 %v10872_v0  ;;  %4972 = vmatprep.mubr.f32.mxu1 %v10872_v0 }
0x1023   :  { %4860 = vmatmul.mubr.f32.gmra.mrb[36].mxu0 %v11945_v4  ;;  %4973 = vmatmul.mubr.f32.gmra.mrb[44].mxu1 %v11945_v4  ;;  %v5051_v4 = vld [vmem:[#allocation14 + $0x18] sm:$0xff] }
0x1024   :  { %4865 = vmatprep.mubr.f32.mxu0 %v10872_v0  ;;  %4978 = vmatprep.mubr.f32.mxu1 %v10872_v0 }
0x1027   :  { %4866 = vmatmul.mubr.f32.gmra.mrb[38].mxu0 %v12057_v61  ;;  %4979 = vmatmul.mubr.f32.gmra.mrb[46].mxu1 %v12057_v61  ;;  %v12227_v61 = vpack.c.bf16 %v5053_v34, %v5049_v38  ;;  %v5083_v38 = vld [vmem:[#allocation14 + $0x118] sm:$0xff] }
0x1028   :  { %4871 = vmatprep.mubr.f32.mxu0 %v10872_v0  ;;  %4984 = vmatprep.mubr.f32.mxu1 %v10872_v0  ;;  %v5087_v34 = vld [vmem:[#allocation14 + $0x138] sm:$0xff] }
0x1029   :  { %9390 = vmatprep.subr.bf16.mxu0 %v12227_v61 }
0x102b   :  { %4872 = vmatmul.mubr.f32.gmra.mrb[40].mxu0 %v12103_v35  ;;  %4985 = vmatmul.mubr.f32.gmra.mrb[48].mxu1 %v12103_v35  ;;  %v5048_v35 = vld [vmem:[#allocation14] sm:$0xff] }
0x102c   :  { %4877 = vmatprep.mubr.f32.mxu0 %v10872_v0  ;;  %4990 = vmatprep.mubr.f32.mxu1 %v10872_v0  ;;  %v12229_v26 = vpack.c.bf16 %v5052_v28, %v5048_v35  ;;  %v12279_v35 = vpack.c.bf16 %v5087_v34, %v5083_v38  ;;  %v5086_v28 = vld [vmem:[#allocation14 + $0x130] sm:$0xff]  ;;  %v5108_v38 = vld [vmem:[#allocation14 + $0x1e0] sm:$0xff]  ;;  %v12314_v34 = vpack.c.bf16 %v5111_v47, %v5107_v62 }
0x102e   :  { %9392 = vmatpush1.bf16.msra.mxu0 %v12229_v26 }
0x102f   :  { %4878 = vmatmul.mubr.f32.gmra.mrb[42].mxu0 %v12149_v8  ;;  %4991 = vmatmul.mubr.f32.gmra.mrb[50].mxu1 %v12149_v8  ;;  %v5055_v8 = vld [vmem:[#allocation14 + $0x38] sm:$0xff] }
0x1030   :  { %4883 = vmatprep.mubr.f32.mxu0 %v10872_v0  ;;  %4996 = vmatprep.mubr.f32.mxu1 %v10872_v0  ;;  %v12231_v3 = vpack.c.bf16 %v5055_v8, %v5051_v4  ;;  %v5082_v4 = vld [vmem:[#allocation14 + $0x110] sm:$0xff]  ;;  %v5089_v8 = vld [vmem:[#allocation14 + $0x148] sm:$0xff] }
0x1031   :  { %9394 = vmatprep.subr.bf16.mxu0 %v12239_v5 }
0x1032   :  { %9422 = vmatprep.subr.bf16.mxu1 %v12231_v3  ;;  %9396 = vmatpush1.bf16.msra.mxu0 %v12241_v6 }
0x1033   :  { %4884 = vmatmul.mubr.f32.gmra.mrb[44].mxu0 %v12193_v15  ;;  %4997 = vmatmul.mubr.f32.gmra.mrb[52].mxu1 %v12193_v15  ;;  %v12234_v15 = vpack.c.bf16 %v5054_v18, %v5050_v22  ;;  %v5093_v22 = vld [vmem:[#allocation14 + $0x168] sm:$0xff]  ;;  %v12282_v18 = vpack.c.bf16 %v5086_v28, %v5082_v4  ;;  %v5106_v4 = vld [vmem:[#allocation14 + $0x1d0] sm:$0xff]  ;;  %v12316_v28 = vpack.c.bf16 %v5108_v38, %v5104_v63 }
0x1034   :  { %4889 = vmatprep.mubr.f32.mxu0 %v10872_v0  ;;  %5002 = vmatprep.mubr.f32.mxu1 %v10872_v0  ;;  %v12284_v43 = vpack.c.bf16 %v5093_v22, %v5089_v8  ;;  %v5110_v8 = vld [vmem:[#allocation14 + $0x1f0] sm:$0xff] }
0x1035   :  { %9424 = vmatpush1.bf16.msra.mxu1 %v12234_v15  ;;  %9398 = vmatprep.subr.bf16.mxu0 %v12251_v36  ;;  %v12319_v22 = vpack.c.bf16 %v5110_v8, %v5106_v4 }
0x1036   :  { %9426 = vmatprep.subr.bf16.mxu1 %v12243_v41  ;;  %9400 = vmatpush1.bf16.msra.mxu0 %v12253_v59 }
0x1037   :  { %9402 = vmatprep.subr.bf16.mxu0 %v12263_v31 }
0x1039   :  { %9428 = vmatpush1.bf16.msra.mxu1 %v12246_v54 }
0x103a   :  { %9430 = vmatprep.subr.bf16.mxu1 %v12255_v53  ;;  %9404 = vmatpush1.bf16.msra.mxu0 %v12265_v29 }
0x103b   :  { %9406 = vmatprep.subr.bf16.mxu0 %v12274_v10 }
0x103d   :  { %9432 = vmatpush1.bf16.msra.mxu1 %v12258_v20 }
0x103e   :  { %9434 = vmatprep.subr.bf16.mxu1 %v12267_v42  ;;  %9408 = vmatpush1.bf16.msra.mxu0 %v12276_v60 }
0x103f   :  { %9410 = vmatprep.subr.bf16.mxu0 %v12284_v43 }
0x1041   :  { %9436 = vmatpush1.bf16.msra.mxu1 %v12270_v58 }
0x1042   :  { %9438 = vmatprep.subr.bf16.mxu1 %v12279_v35  ;;  %9412 = vmatpush1.bf16.msra.mxu0 %v12288_v37 }
0x1043   :  { %9414 = vmatprep.subr.bf16.mxu0 %v12296_v55 }
0x1045   :  { %9440 = vmatpush1.bf16.msra.mxu1 %v12282_v18 }
0x1046   :  { %9442 = vmatprep.subr.bf16.mxu1 %v12290_v39  ;;  %9416 = vmatpush1.bf16.msra.mxu0 %v12302_v27 }
0x1047   :  { %9418 = vmatprep.subr.bf16.mxu0 %v12308_v14 }
0x1049   :  { %9444 = vmatpush1.bf16.msra.mxu1 %v12294_v1 }
0x104a   :  { %9446 = vmatprep.subr.bf16.mxu1 %v12299_v25  ;;  %9420 = vmatpush1.bf16.msra.mxu0 %v12316_v28 }
0x104b   :  { %9454 = vmatprep.subr.bf16.mxu0 %v12227_v61 }
0x104d   :  { %9448 = vmatpush1.bf16.msra.mxu1 %v12306_v32 }
0x104e   :  { %9450 = vmatprep.subr.bf16.mxu1 %v12314_v34 }
0x1051   :  { %9452 = vmatpush1.bf16.msra.mxu1 %v12319_v22 }
0x1052   :  { %9486 = vmatprep.subr.bf16.mxu1 %v12231_v3 }
0x10ce   :  { %v4581_v12 = vpop.f32.mrb[30].mxu0  ;;  %v4652_v17 = vpop.f32.mrb[38].mxu1 }
0x10cf   :  { %v10147_v45 = vadd.f32 %v4581_v12, %v11837_v11  ;;  %v4583_v24 = vpop.f32.mrb[31].mxu0  ;;  %v4654_v49 = vpop.f32.mrb[39].mxu1  ;;  %v10163_v33 = vadd.f32 %v4652_v17, %v11849_v23 }
0x10d0   :  { %v10148_v9 = vadd.f32 %v4583_v24, %v11840_v16  ;;  %v10164_v50 = vadd.f32 %v4654_v49, %v11845_v13 }
0x10d1   :  { %v7785_v30 = vmul.f32 -1.442695, %v10147_v45 }
0x10d2   :  { %v7786_v46 = vmul.f32 -1.442695, %v10148_v9  ;;  %v7787_v51 = vmul.f32 -1.442695, %v10164_v50 }
0x10d3   :  { %10554 = vpow2.f32 %v7785_v30 }
0x10d4   :  { %10556 = vpow2.f32 %v7786_v46 }
0x10d5   :  { %10558 = vpow2.f32 %v7787_v51 }
0x10d6   :  { %10560 = vtanh.f32 %v10163_v33 }
0x10dd   :  { %v10555_v56 = vpop.eup %10554 }
0x10de   :  { %v10557_v2 = vpop.eup %10556  ;;  %v4664_v7 = vadd.f32 1.0, %v10555_v56 }
0x10df   :  { %v4670_v57 = vadd.f32 1.0, %v10557_v2  ;;  %v10559_v11 = vpop.eup %10558 }
0x10e0   :  { %10562 = vrcp.f32 %v4664_v7  ;;  %v10561_v52 = vpop.eup %10560  ;;  %v4677_v63 = vadd.f32 1.0, %v10559_v11 }
0x10e1   :  { %10564 = vrcp.f32 %v4670_v57 }
0x10e2   :  { %10566 = vrcp.f32 %v4677_v63 }
0x10ea   :  { %v10563_v16 = vpop.eup %10562 }
0x10eb   :  { %v10565_v62 = vpop.eup %10564  ;;  %v4682_v47 = vmul.f32 %v10563_v16, %v10561_v52 }
0x10ec   :  { %v4681_v38 = vmul.f32 %v10565_v62, %v12190_v40  ;;  %v10567_v23 = vpop.eup %10566  ;;  %v4761_v40 = vld [vmem:[%s12848_s9] sm:$0xf] }
0x10ed   :  { %v12372_v12 = vrot.slane %v4761_v40, %v11252_v19  ;;  %v12375_v17 = vrot.slane %v4761_v40, %v11257_v21  ;;  %v12380_v33 = vrot.slane %v4761_v40, %v11269_v48  ;;  %v12384_v21 = vrot.slane %v4761_v40, %v11267_v44 }
0x10ee   :  { %v4683_v13 = vadd.f32 %v4682_v47, %v4681_v38 }
0x10f0   :  { %10568 = vtanh.f32 %v4683_v13 }
0x10fa   :  { %v10569_v4 = vpop.eup %10568 }
0x10fb   :  { %v4685_v8 = vmul.f32 %v10569_v4, %v10567_v23 }
0x10fd   :  { %4890 = vmatmul.mubr.f32.gmra.mrb[46].mxu0 %v4685_v8  ;;  %5003 = vmatmul.mubr.f32.gmra.mrb[54].mxu1 %v4685_v8 }
0x10fe   :  { %5176 = vmatprep.mubr.f32.mxu0 %v10872_v0  ;;  %5247 = vmatprep.mubr.f32.mxu1 %v10872_v0 }
0x1101   :  { %5177 = vmatmul.mubr.f32.vlgmr.msra.gmra.mrb[32].mxu0 %v10872_v0  ;;  %5248 = vmatmul.mubr.f32.vlgmr.msra.gmra.mrb[40].mxu1 %v10872_v0 }
0x1102   :  { %9456 = vmatpush1.bf16.msra.mxu0 %v12229_v26  ;;  %9488 = vmatpush1.bf16.msra.mxu1 %v12234_v15 }
0x1103   :  { %9458 = vmatprep.subr.bf16.mxu0 %v12239_v5  ;;  %9490 = vmatprep.subr.bf16.mxu1 %v12243_v41 }
0x1104   :  { %5419 = vmatprep.mubr.f32.mxu0 %v10872_v0  ;;  %5490 = vmatprep.mubr.f32.mxu1 %v10872_v0 }
0x1106   :  { %9460 = vmatpush1.bf16.msra.mxu0 %v12241_v6  ;;  %9492 = vmatpush1.bf16.msra.mxu1 %v12246_v54 }
0x1107   :  { %9462 = vmatprep.subr.bf16.mxu0 %v12251_v36  ;;  %9494 = vmatprep.subr.bf16.mxu1 %v12255_v53 }
0x110a   :  { %9464 = vmatpush1.bf16.msra.mxu0 %v12253_v59  ;;  %9496 = vmatpush1.bf16.msra.mxu1 %v12258_v20 }
0x110b   :  { %9466 = vmatprep.subr.bf16.mxu0 %v12263_v31  ;;  %9498 = vmatprep.subr.bf16.mxu1 %v12267_v42 }
0x110e   :  { %9468 = vmatpush1.bf16.msra.mxu0 %v12265_v29  ;;  %9500 = vmatpush1.bf16.msra.mxu1 %v12270_v58 }
0x110f   :  { %9470 = vmatprep.subr.bf16.mxu0 %v12274_v10  ;;  %9502 = vmatprep.subr.bf16.mxu1 %v12279_v35 }
0x1112   :  { %9472 = vmatpush1.bf16.msra.mxu0 %v12276_v60  ;;  %9504 = vmatpush1.bf16.msra.mxu1 %v12282_v18 }
0x1113   :  { %9474 = vmatprep.subr.bf16.mxu0 %v12284_v43  ;;  %9506 = vmatprep.subr.bf16.mxu1 %v12290_v39 }
0x1116   :  { %9476 = vmatpush1.bf16.msra.mxu0 %v12288_v37  ;;  %9508 = vmatpush1.bf16.msra.mxu1 %v12294_v1 }
0x1117   :  { %9478 = vmatprep.subr.bf16.mxu0 %v12296_v55  ;;  %9510 = vmatprep.subr.bf16.mxu1 %v12299_v25 }
0x111a   :  { %9480 = vmatpush1.bf16.msra.mxu0 %v12302_v27  ;;  %9512 = vmatpush1.bf16.msra.mxu1 %v12306_v32 }
0x111b   :  { %9482 = vmatprep.subr.bf16.mxu0 %v12308_v14  ;;  %9514 = vmatprep.subr.bf16.mxu1 %v12314_v34 }
0x111e   :  { %9484 = vmatpush1.bf16.msra.mxu0 %v12316_v28  ;;  %9516 = vmatpush1.bf16.msra.mxu1 %v12319_v22 }
0x111f   :  { %9518 = vmatprep.subr.bf16.mxu0 %v12227_v61  ;;  %9550 = vmatprep.subr.bf16.mxu1 %v12231_v3 }
0x11d4   :  { %v5178_v45 = vpop.f32.mrb[32].mxu0  ;;  %v5249_v24 = vpop.f32.mrb[40].mxu1 }
0x11d5   :  { %v10165_v49 = vadd.f32 %v5178_v45, %v12372_v12  ;;  %v5180_v9 = vpop.f32.mrb[33].mxu0  ;;  %v5251_v30 = vpop.f32.mrb[41].mxu1  ;;  %v10181_v2 = vadd.f32 %v5249_v24, %v12384_v21 }
0x11d6   :  { %v10166_v46 = vadd.f32 %v5180_v9, %v12375_v17  ;;  %v10182_v19 = vadd.f32 %v5251_v30, %v12380_v33 }
0x11d7   :  { %v7788_v50 = vmul.f32 -1.442695, %v10165_v49 }
0x11d8   :  { %v7789_v51 = vmul.f32 -1.442695, %v10166_v46  ;;  %v7790_v56 = vmul.f32 -1.442695, %v10182_v19 }
0x11d9   :  { %10570 = vpow2.f32 %v7788_v50 }
0x11da   :  { %10572 = vpow2.f32 %v7789_v51 }
0x11db   :  { %10574 = vpow2.f32 %v7790_v56 }
0x11dc   :  { %10576 = vtanh.f32 %v10181_v2 }
0x11e3   :  { %v10571_v7 = vpop.eup %10570 }
0x11e4   :  { %v10573_v57 = vpop.eup %10572  ;;  %v5261_v11 = vadd.f32 1.0, %v10571_v7 }
0x11e5   :  { %v5267_v52 = vadd.f32 1.0, %v10573_v57  ;;  %v10575_v48 = vpop.eup %10574 }
0x11e6   :  { %10578 = vrcp.f32 %v5261_v11  ;;  %v10577_v16 = vpop.eup %10576  ;;  %v5274_v38 = vadd.f32 1.0, %v10575_v48 }
0x11e7   :  { %10580 = vrcp.f32 %v5267_v52 }
0x11e8   :  { %10582 = vrcp.f32 %v5274_v38 }
0x11f0   :  { %v10579_v62 = vpop.eup %10578 }
0x11f1   :  { %v10581_v47 = vpop.eup %10580  ;;  %v5279_v63 = vmul.f32 %v10579_v62, %v10577_v16 }
0x11f2   :  { %v5278_v13 = vmul.f32 0.0, %v10581_v47  ;;  %v10583_v23 = vpop.eup %10582 }
0x11f4   :  { %v12387_v44 = vadd.f32 %v5279_v63, %v5278_v13 }
0x11f6   :  { %10584 = vtanh.f32 %v12387_v44 }
0x1200   :  { %v10585_v4 = vpop.eup %10584 }
0x1201   :  { %v12390_v8 = vmul.f32 %v10585_v4, %v10583_v23  ;;  %v6020_v4 = vld [vmem:[#allocation14] sm:$0xff] }
0x1203   :  { %5420 = vmatmul.mubr.f32.vlgmr.msra.gmra.mrb[34].mxu0 %v12390_v8  ;;  %5491 = vmatmul.mubr.f32.vlgmr.msra.gmra.mrb[42].mxu1 %v12390_v8 }
0x1204   :  { %9520 = vmatpush1.bf16.msra.mxu0 %v12229_v26  ;;  %9552 = vmatpush1.bf16.msra.mxu1 %v12234_v15 }
0x1205   :  { %9522 = vmatprep.subr.bf16.mxu0 %v12239_v5  ;;  %9554 = vmatprep.subr.bf16.mxu1 %v12243_v41 }
0x1206   :  { %5662 = vmatprep.mubr.f32.mxu0 %v10872_v0  ;;  %5733 = vmatprep.mubr.f32.mxu1 %v10872_v0 }
0x1208   :  { %9524 = vmatpush1.bf16.msra.mxu0 %v12241_v6  ;;  %9556 = vmatpush1.bf16.msra.mxu1 %v12246_v54 }
0x1209   :  { %9526 = vmatprep.subr.bf16.mxu0 %v12251_v36  ;;  %9558 = vmatprep.subr.bf16.mxu1 %v12255_v53 }
0x120c   :  { %9528 = vmatpush1.bf16.msra.mxu0 %v12253_v59  ;;  %9560 = vmatpush1.bf16.msra.mxu1 %v12258_v20 }
0x120d   :  { %9530 = vmatprep.subr.bf16.mxu0 %v12263_v31  ;;  %9562 = vmatprep.subr.bf16.mxu1 %v12267_v42 }
0x1210   :  { %9532 = vmatpush1.bf16.msra.mxu0 %v12265_v29  ;;  %9564 = vmatpush1.bf16.msra.mxu1 %v12270_v58 }
0x1211   :  { %9534 = vmatprep.subr.bf16.mxu0 %v12274_v10  ;;  %9566 = vmatprep.subr.bf16.mxu1 %v12279_v35 }
0x1214   :  { %9536 = vmatpush1.bf16.msra.mxu0 %v12276_v60  ;;  %9568 = vmatpush1.bf16.msra.mxu1 %v12282_v18 }
0x1215   :  { %9538 = vmatprep.subr.bf16.mxu0 %v12284_v43  ;;  %9570 = vmatprep.subr.bf16.mxu1 %v12290_v39 }
0x1218   :  { %9540 = vmatpush1.bf16.msra.mxu0 %v12288_v37  ;;  %9572 = vmatpush1.bf16.msra.mxu1 %v12294_v1 }
0x1219   :  { %9542 = vmatprep.subr.bf16.mxu0 %v12296_v55  ;;  %9574 = vmatprep.subr.bf16.mxu1 %v12299_v25 }
0x121c   :  { %9544 = vmatpush1.bf16.msra.mxu0 %v12302_v27  ;;  %9576 = vmatpush1.bf16.msra.mxu1 %v12306_v32 }
0x121d   :  { %9546 = vmatprep.subr.bf16.mxu0 %v12308_v14  ;;  %9578 = vmatprep.subr.bf16.mxu1 %v12314_v34 }
0x1220   :  { %9548 = vmatpush1.bf16.msra.mxu0 %v12316_v28  ;;  %9580 = vmatpush1.bf16.msra.mxu1 %v12319_v22 }
0x1221   :  { %9582 = vmatprep.subr.bf16.mxu0 %v12227_v61  ;;  %9614 = vmatprep.subr.bf16.mxu1 %v12231_v3 }
0x12d6   :  { %v5421_v40 = vpop.f32.mrb[34].mxu0  ;;  %v5492_v45 = vpop.f32.mrb[42].mxu1 }
0x12d7   :  { %v10167_v24 = vadd.f32 %v5421_v40, %v12372_v12  ;;  %v5423_v49 = vpop.f32.mrb[35].mxu0  ;;  %v5494_v9 = vpop.f32.mrb[43].mxu1  ;;  %v10183_v56 = vadd.f32 %v5492_v45, %v12384_v21  ;;  %v6024_v40 = vld [vmem:[#allocation14 + $0x20] sm:$0xff] }
0x12d8   :  { %v10168_v30 = vadd.f32 %v5423_v49, %v12375_v17  ;;  %v10184_v51 = vadd.f32 %v5494_v9, %v12380_v33  ;;  %v6022_v49 = vld [vmem:[#allocation14 + $0x10] sm:$0xff] }
0x12d9   :  { %v7791_v46 = vmul.f32 -1.442695, %v10167_v24  ;;  %v12490_v24 = vpack.c.bf16 %v6024_v40, %v6020_v4  ;;  %v6026_v9 = vld [vmem:[#allocation14 + $0x30] sm:$0xff]  ;;  %v6061_v40 = vld [vmem:[#allocation14 + $0x148] sm:$0xff] }
0x12da   :  { %v7792_v50 = vmul.f32 -1.442695, %v10168_v30  ;;  %v7793_v19 = vmul.f32 -1.442695, %v10184_v51  ;;  %v12493_v30 = vpack.c.bf16 %v6026_v9, %v6022_v49  ;;  %v6031_v51 = vld [vmem:[#allocation14 + $0x58] sm:$0xff]  ;;  %v6065_v49 = vld [vmem:[#allocation14 + $0x168] sm:$0xff] }
0x12db   :  { %10586 = vpow2.f32 %v7791_v46  ;;  %v6029_v46 = vld [vmem:[#allocation14 + $0x48] sm:$0xff]  ;;  %v6063_v9 = vld [vmem:[#allocation14 + $0x158] sm:$0xff] }
0x12dc   :  { %10588 = vpow2.f32 %v7792_v50  ;;  %v6033_v50 = vld [vmem:[#allocation14 + $0x68] sm:$0xff] }
0x12dd   :  { %10590 = vpow2.f32 %v7793_v19  ;;  %v12498_v19 = vpack.c.bf16 %v6033_v50, %v6029_v46  ;;  %v12545_v46 = vpack.c.bf16 %v6065_v49, %v6061_v40  ;;  %v6067_v50 = vld [vmem:[#allocation14 + $0x178] sm:$0xff] }
0x12de   :  { %10592 = vtanh.f32 %v10183_v56  ;;  %v6035_v56 = vld [vmem:[#allocation14 + $0x78] sm:$0xff] }
0x12e5   :  { %v10587_v61 = vpop.eup %10586 }
0x12e6   :  { %v10589_v2 = vpop.eup %10588  ;;  %v5504_v3 = vadd.f32 1.0, %v10587_v61  ;;  %v6028_v61 = vld [vmem:[#allocation14 + $0x40] sm:$0xff] }
0x12e7   :  { %v5510_v7 = vadd.f32 1.0, %v10589_v2  ;;  %v10591_v57 = vpop.eup %10590  ;;  %v6032_v2 = vld [vmem:[#allocation14 + $0x60] sm:$0xff] }
0x12e8   :  { %10594 = vrcp.f32 %v5504_v3  ;;  %v10593_v11 = vpop.eup %10592  ;;  %v5517_v62 = vadd.f32 1.0, %v10591_v57  ;;  %v12500_v3 = vpack.c.bf16 %v6035_v56, %v6031_v51  ;;  %v6030_v57 = vld [vmem:[#allocation14 + $0x50] sm:$0xff]  ;;  %v6060_v51 = vld [vmem:[#allocation14 + $0x140] sm:$0xff] }
0x12e9   :  { %10596 = vrcp.f32 %v5510_v7  ;;  %v12502_v7 = vpack.c.bf16 %v6032_v2, %v6028_v61  ;;  %v6064_v56 = vld [vmem:[#allocation14 + $0x160] sm:$0xff]  ;;  %v12548_v61 = vpack.c.bf16 %v6067_v50, %v6063_v9 }
0x12ea   :  { %10598 = vrcp.f32 %v5517_v62  ;;  %v6039_v62 = vld [vmem:[#allocation14 + $0x98] sm:$0xff]  ;;  %v12550_v2 = vpack.c.bf16 %v6064_v56, %v6060_v51 }
0x12f2   :  { %v10595_v52 = vpop.eup %10594 }
0x12f3   :  { %v10597_v48 = vpop.eup %10596  ;;  %v5522_v16 = vmul.f32 %v10595_v52, %v10593_v11  ;;  %v6034_v11 = vld [vmem:[#allocation14 + $0x70] sm:$0xff] }
0x12f4   :  { %v5521_v47 = vmul.f32 %v10597_v48, %v12387_v44  ;;  %v10599_v38 = vpop.eup %10598  ;;  %v6027_v44 = vld [vmem:[#allocation14 + $0x38] sm:$0xff]  ;;  %v12505_v52 = vpack.c.bf16 %v6034_v11, %v6030_v57  ;;  %v6037_v48 = vld [vmem:[#allocation14 + $0x88] sm:$0xff]  ;;  %v6062_v57 = vld [vmem:[#allocation14 + $0x150] sm:$0xff] }
0x12f5   :  { %v6066_v11 = vld [vmem:[#allocation14 + $0x170] sm:$0xff] }
0x12f6   :  { %v12433_v63 = vadd.f32 %v5522_v16, %v5521_v47  ;;  %v6041_v16 = vld [vmem:[#allocation14 + $0xa8] sm:$0xff] }
0x12f7   :  { %v12510_v47 = vpack.c.bf16 %v6041_v16, %v6037_v48  ;;  %v6069_v48 = vld [vmem:[#allocation14 + $0x188] sm:$0xff]  ;;  %v12553_v16 = vpack.c.bf16 %v6066_v11, %v6062_v57 }
0x12f8   :  { %10600 = vtanh.f32 %v12433_v63 }
0x1302   :  { %v10601_v13 = vpop.eup %10600 }
0x1303   :  { %v12436_v23 = vmul.f32 %v10601_v13, %v10599_v38  ;;  %v6036_v38 = vld [vmem:[#allocation14 + $0x80] sm:$0xff] }
0x1304   :  { %v6040_v13 = vld [vmem:[#allocation14 + $0xa0] sm:$0xff] }
0x1305   :  { %5663 = vmatmul.mubr.f32.vlgmr.msra.gmra.mrb[36].mxu0 %v12436_v23  ;;  %5734 = vmatmul.mubr.f32.vlgmr.msra.gmra.mrb[44].mxu1 %v12436_v23 }
0x1306   :  { %9584 = vmatpush1.bf16.msra.mxu0 %v12229_v26  ;;  %9616 = vmatpush1.bf16.msra.mxu1 %v12234_v15 }
0x1307   :  { %9586 = vmatprep.subr.bf16.mxu0 %v12239_v5  ;;  %9618 = vmatprep.subr.bf16.mxu1 %v12243_v41 }
0x1308   :  { %5905 = vmatprep.mubr.f32.mxu0 %v10872_v0  ;;  %5976 = vmatprep.mubr.f32.mxu1 %v10872_v0 }
0x130a   :  { %9588 = vmatpush1.bf16.msra.mxu0 %v12241_v6  ;;  %9620 = vmatpush1.bf16.msra.mxu1 %v12246_v54 }
0x130b   :  { %9590 = vmatprep.subr.bf16.mxu0 %v12251_v36  ;;  %9622 = vmatprep.subr.bf16.mxu1 %v12255_v53 }
0x130e   :  { %9592 = vmatpush1.bf16.msra.mxu0 %v12253_v59  ;;  %9624 = vmatpush1.bf16.msra.mxu1 %v12258_v20 }
0x130f   :  { %9594 = vmatprep.subr.bf16.mxu0 %v12263_v31  ;;  %9626 = vmatprep.subr.bf16.mxu1 %v12267_v42 }
0x1312   :  { %9596 = vmatpush1.bf16.msra.mxu0 %v12265_v29  ;;  %9628 = vmatpush1.bf16.msra.mxu1 %v12270_v58 }
0x1313   :  { %9598 = vmatprep.subr.bf16.mxu0 %v12274_v10  ;;  %9630 = vmatprep.subr.bf16.mxu1 %v12279_v35 }
0x1316   :  { %9600 = vmatpush1.bf16.msra.mxu0 %v12276_v60  ;;  %9632 = vmatpush1.bf16.msra.mxu1 %v12282_v18 }
0x1317   :  { %9602 = vmatprep.subr.bf16.mxu0 %v12284_v43  ;;  %9634 = vmatprep.subr.bf16.mxu1 %v12290_v39 }
0x131a   :  { %9604 = vmatpush1.bf16.msra.mxu0 %v12288_v37  ;;  %9636 = vmatpush1.bf16.msra.mxu1 %v12294_v1 }
0x131b   :  { %9606 = vmatprep.subr.bf16.mxu0 %v12296_v55  ;;  %9638 = vmatprep.subr.bf16.mxu1 %v12299_v25 }
0x131e   :  { %9608 = vmatpush1.bf16.msra.mxu0 %v12302_v27  ;;  %9640 = vmatpush1.bf16.msra.mxu1 %v12306_v32 }
0x131f   :  { %9610 = vmatprep.subr.bf16.mxu0 %v12308_v14  ;;  %9642 = vmatprep.subr.bf16.mxu1 %v12314_v34  ;;  %v6021_v14 = vld [vmem:[#allocation14 + $0x8] sm:$0xff] }
0x1320   :  { %v6025_v34 = vld [vmem:[#allocation14 + $0x28] sm:$0xff] }
0x1322   :  { %9612 = vmatpush1.bf16.msra.mxu0 %v12316_v28  ;;  %9644 = vmatpush1.bf16.msra.mxu1 %v12319_v22  ;;  %v6023_v28 = vld [vmem:[#allocation14 + $0x18] sm:$0xff]  ;;  %v12486_v22 = vpack.c.bf16 %v6025_v34, %v6021_v14 }
0x1323   :  { %v12488_v45 = vpack.c.bf16 %v6027_v44, %v6023_v28  ;;  %v6054_v28 = vld [vmem:[#allocation14 + $0x110] sm:$0xff] }
0x1324   :  { %9646 = vmatprep.subr.bf16.mxu0 %v12486_v22  ;;  %v6058_v44 = vld [vmem:[#allocation14 + $0x130] sm:$0xff] }
0x1325   :  { %9678 = vmatprep.subr.bf16.mxu1 %v12488_v45  ;;  %v12541_v4 = vpack.c.bf16 %v6058_v44, %v6054_v28  ;;  %v6082_v28 = vld [vmem:[#allocation14 + $0x1f0] sm:$0xff] }
0x13d8   :  { %v5664_v26 = vpop.f32.mrb[36].mxu0  ;;  %v5735_v15 = vpop.f32.mrb[44].mxu1 }
0x13d9   :  { %v10169_v5 = vadd.f32 %v5664_v26, %v12372_v12  ;;  %v5666_v6 = vpop.f32.mrb[37].mxu0  ;;  %v5737_v41 = vpop.f32.mrb[45].mxu1  ;;  %v10185_v31 = vadd.f32 %v5735_v15, %v12384_v21  ;;  %v12514_v15 = vpack.c.bf16 %v6040_v13, %v6036_v38  ;;  %v6075_v38 = vld [vmem:[#allocation14 + $0x1b8] sm:$0xff] }
0x13da   :  { %v10170_v54 = vadd.f32 %v5666_v6, %v12375_v17  ;;  %v10186_v53 = vadd.f32 %v5737_v41, %v12380_v33  ;;  %v6042_v6 = vld [vmem:[#allocation14 + $0xb0] sm:$0xff] }
0x13db   :  { %v7794_v36 = vmul.f32 -1.442695, %v10169_v5  ;;  %v6038_v5 = vld [vmem:[#allocation14 + $0x90] sm:$0xff] }
0x13dc   :  { %v7795_v59 = vmul.f32 -1.442695, %v10170_v54  ;;  %v7796_v20 = vmul.f32 -1.442695, %v10186_v53  ;;  %v12517_v41 = vpack.c.bf16 %v6042_v6, %v6038_v5  ;;  %v6045_v54 = vld [vmem:[#allocation14 + $0xc8] sm:$0xff]  ;;  %v6068_v6 = vld [vmem:[#allocation14 + $0x180] sm:$0xff] }
0x13dd   :  { %10602 = vpow2.f32 %v7794_v36  ;;  %v6049_v36 = vld [vmem:[#allocation14 + $0xe8] sm:$0xff] }
0x13de   :  { %10604 = vpow2.f32 %v7795_v59  ;;  %v6047_v59 = vld [vmem:[#allocation14 + $0xd8] sm:$0xff]  ;;  %v12522_v53 = vpack.c.bf16 %v6049_v36, %v6045_v54  ;;  %v6072_v54 = vld [vmem:[#allocation14 + $0x1a0] sm:$0xff]  ;;  %v6070_v36 = vld [vmem:[#allocation14 + $0x190] sm:$0xff] }
0x13df   :  { %10606 = vpow2.f32 %v7796_v20  ;;  %v6051_v20 = vld [vmem:[#allocation14 + $0xf8] sm:$0xff] }
0x13e0   :  { %10608 = vtanh.f32 %v10185_v31  ;;  %v6044_v31 = vld [vmem:[#allocation14 + $0xc0] sm:$0xff] }
0x13e7   :  { %v10603_v29 = vpop.eup %10602 }
0x13e8   :  { %v10605_v42 = vpop.eup %10604  ;;  %v5747_v58 = vadd.f32 1.0, %v10603_v29  ;;  %v6048_v29 = vld [vmem:[#allocation14 + $0xe0] sm:$0xff] }
0x13e9   :  { %v5753_v10 = vadd.f32 1.0, %v10605_v42  ;;  %v10607_v60 = vpop.eup %10606  ;;  %v12524_v42 = vpack.c.bf16 %v6051_v20, %v6047_v59  ;;  %v12561_v59 = vpack.c.bf16 %v6072_v54, %v6068_v6  ;;  %v6074_v20 = vld [vmem:[#allocation14 + $0x1b0] sm:$0xff] }
0x13ea   :  { %10610 = vrcp.f32 %v5747_v58  ;;  %v10609_v35 = vpop.eup %10608  ;;  %v5760_v39 = vadd.f32 1.0, %v10607_v60  ;;  %v12526_v58 = vpack.c.bf16 %v6048_v29, %v6044_v31  ;;  %v6050_v60 = vld [vmem:[#allocation14 + $0xf0] sm:$0xff]  ;;  %v6077_v31 = vld [vmem:[#allocation14 + $0x1c8] sm:$0xff] }
0x13eb   :  { %10612 = vrcp.f32 %v5753_v10  ;;  %v6046_v10 = vld [vmem:[#allocation14 + $0xd0] sm:$0xff]  ;;  %v6081_v29 = vld [vmem:[#allocation14 + $0x1e8] sm:$0xff] }
0x13ec   :  { %10614 = vrcp.f32 %v5760_v39 }
0x13f4   :  { %v10611_v18 = vpop.eup %10610 }
0x13f5   :  { %v10613_v43 = vpop.eup %10612  ;;  %v5765_v37 = vmul.f32 %v10611_v18, %v10609_v35  ;;  %v12529_v35 = vpack.c.bf16 %v6050_v60, %v6046_v10  ;;  %v6053_v18 = vld [vmem:[#allocation14 + $0x108] sm:$0xff]  ;;  %v12565_v10 = vpack.c.bf16 %v6074_v20, %v6070_v36  ;;  %v12567_v60 = vpack.c.bf16 %v6081_v29, %v6077_v31 }
0x13f6   :  { %v5764_v1 = vmul.f32 %v10613_v43, %v12433_v63  ;;  %v10615_v25 = vpop.eup %10614  ;;  %v6043_v63 = vld [vmem:[#allocation14 + $0xb8] sm:$0xff]  ;;  %v6057_v43 = vld [vmem:[#allocation14 + $0x128] sm:$0xff] }
0x13f7   :  { %v12512_v26 = vpack.c.bf16 %v6043_v63, %v6039_v62  ;;  %v12534_v39 = vpack.c.bf16 %v6057_v43, %v6053_v18  ;;  %v6073_v62 = vld [vmem:[#allocation14 + $0x1a8] sm:$0xff]  ;;  %v6071_v63 = vld [vmem:[#allocation14 + $0x198] sm:$0xff] }
0x13f8   :  { %v12477_v55 = vadd.f32 %v5765_v37, %v5764_v1  ;;  %v6055_v37 = vld [vmem:[#allocation14 + $0x118] sm:$0xff]  ;;  %v12556_v13 = vpack.c.bf16 %v6073_v62, %v6069_v48  ;;  %v12558_v5 = vpack.c.bf16 %v6075_v38, %v6071_v63 }
0x13f9   :  { %v6059_v1 = vld [vmem:[#allocation14 + $0x138] sm:$0xff] }
0x13fa   :  { %10616 = vtanh.f32 %v12477_v55  ;;  %v12536_v14 = vpack.c.bf16 %v6059_v1, %v6055_v37  ;;  %v6079_v18 = vld [vmem:[#allocation14 + $0x1d8] sm:$0xff]  ;;  %v6076_v37 = vld [vmem:[#allocation14 + $0x1c0] sm:$0xff] }
0x13fb   :  { %v6083_v43 = vld [vmem:[#allocation14 + $0x1f8] sm:$0xff] }
0x13fc   :  { %v12570_v1 = vpack.c.bf16 %v6083_v43, %v6079_v18 }
0x1404   :  { %v10617_v27 = vpop.eup %10616 }
0x1405   :  { %v12480_v32 = vmul.f32 %v10617_v27, %v10615_v25  ;;  %v6052_v25 = vld [vmem:[#allocation14 + $0x100] sm:$0xff] }
0x1406   :  { %v6056_v27 = vld [vmem:[#allocation14 + $0x120] sm:$0xff] }
0x1407   :  { %5906 = vmatmul.mubr.f32.vlgmr.msra.gmra.mrb[38].mxu0 %v12480_v32  ;;  %5977 = vmatmul.mubr.f32.vlgmr.msra.gmra.mrb[46].mxu1 %v12480_v32  ;;  %v12538_v34 = vpack.c.bf16 %v6056_v27, %v6052_v25  ;;  %v6080_v25 = vld [vmem:[#allocation14 + $0x1e0] sm:$0xff]  ;;  %v6078_v27 = vld [vmem:[#allocation14 + $0x1d0] sm:$0xff] }
0x1408   :  { %6148 = vmatprep.mubr.f32.mxu0 %v10872_v0  ;;  %6219 = vmatprep.mubr.f32.mxu1 %v10872_v0  ;;  %v12573_v44 = vpack.c.bf16 %v6080_v25, %v6076_v37  ;;  %v12577_v40 = vpack.c.bf16 %v6082_v28, %v6078_v27 }
0x1409   :  { %9648 = vmatpush1.bf16.msra.mxu0 %v12490_v24  ;;  %9680 = vmatpush1.bf16.msra.mxu1 %v12493_v30 }
0x140a   :  { %9650 = vmatprep.subr.bf16.mxu0 %v12498_v19  ;;  %9682 = vmatprep.subr.bf16.mxu1 %v12500_v3 }
0x140d   :  { %9652 = vmatpush1.bf16.msra.mxu0 %v12502_v7  ;;  %9684 = vmatpush1.bf16.msra.mxu1 %v12505_v52 }
0x140e   :  { %9654 = vmatprep.subr.bf16.mxu0 %v12510_v47  ;;  %9686 = vmatprep.subr.bf16.mxu1 %v12512_v26 }
0x1411   :  { %9656 = vmatpush1.bf16.msra.mxu0 %v12514_v15  ;;  %9688 = vmatpush1.bf16.msra.mxu1 %v12517_v41 }
0x1412   :  { %9658 = vmatprep.subr.bf16.mxu0 %v12522_v53  ;;  %9690 = vmatprep.subr.bf16.mxu1 %v12524_v42 }
0x1415   :  { %9660 = vmatpush1.bf16.msra.mxu0 %v12526_v58  ;;  %9692 = vmatpush1.bf16.msra.mxu1 %v12529_v35 }
0x1416   :  { %9662 = vmatprep.subr.bf16.mxu0 %v12534_v39  ;;  %9694 = vmatprep.subr.bf16.mxu1 %v12536_v14 }
0x1419   :  { %9664 = vmatpush1.bf16.msra.mxu0 %v12538_v34  ;;  %9696 = vmatpush1.bf16.msra.mxu1 %v12541_v4 }
0x141a   :  { %9666 = vmatprep.subr.bf16.mxu0 %v12545_v46  ;;  %9698 = vmatprep.subr.bf16.mxu1 %v12548_v61 }
0x141d   :  { %9668 = vmatpush1.bf16.msra.mxu0 %v12550_v2  ;;  %9700 = vmatpush1.bf16.msra.mxu1 %v12553_v16 }
0x141e   :  { %9670 = vmatprep.subr.bf16.mxu0 %v12556_v13  ;;  %9702 = vmatprep.subr.bf16.mxu1 %v12558_v5 }
0x1421   :  { %9672 = vmatpush1.bf16.msra.mxu0 %v12561_v59  ;;  %9704 = vmatpush1.bf16.msra.mxu1 %v12565_v10 }
0x1422   :  { %9674 = vmatprep.subr.bf16.mxu0 %v12567_v60  ;;  %9706 = vmatprep.subr.bf16.mxu1 %v12570_v1 }
0x1425   :  { %9676 = vmatpush1.bf16.msra.mxu0 %v12573_v44  ;;  %9708 = vmatpush1.bf16.msra.mxu1 %v12577_v40 }
0x1426   :  { %9710 = vmatprep.subr.bf16.mxu0 %v12486_v22  ;;  %9742 = vmatprep.subr.bf16.mxu1 %v12488_v45 }
0x14da   :  { %v5907_v49 = vpop.f32.mrb[38].mxu0  ;;  %v5978_v9 = vpop.f32.mrb[46].mxu1 }
0x14db   :  { %v10171_v50 = vadd.f32 %v5907_v49, %v12372_v12  ;;  %v5909_v51 = vpop.f32.mrb[39].mxu0  ;;  %v5980_v56 = vpop.f32.mrb[47].mxu1  ;;  %v10187_v38 = vadd.f32 %v5978_v9, %v12384_v21 }
0x14dc   :  { %v10172_v57 = vadd.f32 %v5909_v51, %v12375_v17  ;;  %v10188_v62 = vadd.f32 %v5980_v56, %v12380_v33 }
0x14dd   :  { %v7797_v11 = vmul.f32 -1.442695, %v10171_v50 }
0x14de   :  { %v7798_v48 = vmul.f32 -1.442695, %v10172_v57  ;;  %v7799_v63 = vmul.f32 -1.442695, %v10188_v62 }
0x14df   :  { %10618 = vpow2.f32 %v7797_v11 }
0x14e0   :  { %10620 = vpow2.f32 %v7798_v48 }
0x14e1   :  { %10622 = vpow2.f32 %v7799_v63 }
0x14e2   :  { %10624 = vtanh.f32 %v10187_v38 }
0x14e9   :  { %v10619_v6 = vpop.eup %10618 }
0x14ea   :  { %v10621_v54 = vpop.eup %10620  ;;  %v5990_v36 = vadd.f32 1.0, %v10619_v6 }
0x14eb   :  { %v5996_v20 = vadd.f32 1.0, %v10621_v54  ;;  %v10623_v31 = vpop.eup %10622 }
0x14ec   :  { %10626 = vrcp.f32 %v5990_v36  ;;  %v10625_v29 = vpop.eup %10624  ;;  %v6003_v25 = vadd.f32 1.0, %v10623_v31 }
0x14ed   :  { %10628 = vrcp.f32 %v5996_v20 }
0x14ee   :  { %10630 = vrcp.f32 %v6003_v25 }
0x14f6   :  { %v10627_v18 = vpop.eup %10626 }
0x14f7   :  { %v10629_v43 = vpop.eup %10628  ;;  %v6008_v37 = vmul.f32 %v10627_v18, %v10625_v29 }
0x14f8   :  { %v6007_v27 = vmul.f32 %v10629_v43, %v12477_v55  ;;  %v10631_v49 = vpop.eup %10630 }
0x14fa   :  { %v12589_v28 = vadd.f32 %v6008_v37, %v6007_v27 }
0x14fc   :  { %10632 = vtanh.f32 %v12589_v28 }
0x1506   :  { %v10633_v9 = vpop.eup %10632 }
0x1507   :  { %v12592_v50 = vmul.f32 %v10633_v9, %v10631_v49 }
0x1509   :  { %6149 = vmatmul.mubr.f32.vlgmr.msra.gmra.mrb[40].mxu0 %v12592_v50  ;;  %6220 = vmatmul.mubr.f32.vlgmr.msra.gmra.mrb[48].mxu1 %v12592_v50 }
0x150a   :  { %9712 = vmatpush1.bf16.msra.mxu0 %v12490_v24  ;;  %9744 = vmatpush1.bf16.msra.mxu1 %v12493_v30 }
0x150b   :  { %9714 = vmatprep.subr.bf16.mxu0 %v12498_v19  ;;  %9746 = vmatprep.subr.bf16.mxu1 %v12500_v3 }
0x150c   :  { %6391 = vmatprep.mubr.f32.mxu0 %v10872_v0  ;;  %6462 = vmatprep.mubr.f32.mxu1 %v10872_v0 }
0x150e   :  { %9716 = vmatpush1.bf16.msra.mxu0 %v12502_v7  ;;  %9748 = vmatpush1.bf16.msra.mxu1 %v12505_v52 }
0x150f   :  { %9718 = vmatprep.subr.bf16.mxu0 %v12510_v47  ;;  %9750 = vmatprep.subr.bf16.mxu1 %v12512_v26 }
0x1512   :  { %9720 = vmatpush1.bf16.msra.mxu0 %v12514_v15  ;;  %9752 = vmatpush1.bf16.msra.mxu1 %v12517_v41 }
0x1513   :  { %9722 = vmatprep.subr.bf16.mxu0 %v12522_v53  ;;  %9754 = vmatprep.subr.bf16.mxu1 %v12524_v42 }
0x1516   :  { %9724 = vmatpush1.bf16.msra.mxu0 %v12526_v58  ;;  %9756 = vmatpush1.bf16.msra.mxu1 %v12529_v35 }
0x1517   :  { %9726 = vmatprep.subr.bf16.mxu0 %v12534_v39  ;;  %9758 = vmatprep.subr.bf16.mxu1 %v12536_v14 }
0x151a   :  { %9728 = vmatpush1.bf16.msra.mxu0 %v12538_v34  ;;  %9760 = vmatpush1.bf16.msra.mxu1 %v12541_v4 }
0x151b   :  { %9730 = vmatprep.subr.bf16.mxu0 %v12545_v46  ;;  %9762 = vmatprep.subr.bf16.mxu1 %v12548_v61 }
0x151e   :  { %9732 = vmatpush1.bf16.msra.mxu0 %v12550_v2  ;;  %9764 = vmatpush1.bf16.msra.mxu1 %v12553_v16 }
0x151f   :  { %9734 = vmatprep.subr.bf16.mxu0 %v12556_v13  ;;  %9766 = vmatprep.subr.bf16.mxu1 %v12558_v5 }
0x1522   :  { %9736 = vmatpush1.bf16.msra.mxu0 %v12561_v59  ;;  %9768 = vmatpush1.bf16.msra.mxu1 %v12565_v10 }
0x1523   :  { %9738 = vmatprep.subr.bf16.mxu0 %v12567_v60  ;;  %9770 = vmatprep.subr.bf16.mxu1 %v12570_v1 }
0x1526   :  { %9740 = vmatpush1.bf16.msra.mxu0 %v12573_v44  ;;  %9772 = vmatpush1.bf16.msra.mxu1 %v12577_v40 }
0x1527   :  { %9774 = vmatprep.subr.bf16.mxu0 %v12486_v22  ;;  %9806 = vmatprep.subr.bf16.mxu1 %v12488_v45 }
0x15dc   :  { %v6150_v55 = vpop.f32.mrb[40].mxu0  ;;  %v6221_v51 = vpop.f32.mrb[48].mxu1 }
0x15dd   :  { %v10173_v56 = vadd.f32 %v6150_v55, %v12372_v12  ;;  %v6152_v57 = vpop.f32.mrb[41].mxu0  ;;  %v6223_v11 = vpop.f32.mrb[49].mxu1  ;;  %v10189_v54 = vadd.f32 %v6221_v51, %v12384_v21 }
0x15de   :  { %v10174_v48 = vadd.f32 %v6152_v57, %v12375_v17  ;;  %v10190_v38 = vadd.f32 %v6223_v11, %v12380_v33 }
0x15df   :  { %v7800_v62 = vmul.f32 -1.442695, %v10173_v56 }
0x15e0   :  { %v7801_v63 = vmul.f32 -1.442695, %v10174_v48  ;;  %v7802_v6 = vmul.f32 -1.442695, %v10190_v38 }
0x15e1   :  { %10634 = vpow2.f32 %v7800_v62 }
0x15e2   :  { %10636 = vpow2.f32 %v7801_v63 }
0x15e3   :  { %10638 = vpow2.f32 %v7802_v6 }
0x15e4   :  { %10640 = vtanh.f32 %v10189_v54 }
0x15eb   :  { %v10635_v36 = vpop.eup %10634 }
0x15ec   :  { %v10637_v20 = vpop.eup %10636  ;;  %v6233_v31 = vadd.f32 1.0, %v10635_v36 }
0x15ed   :  { %v6239_v29 = vadd.f32 1.0, %v10637_v20  ;;  %v10639_v18 = vpop.eup %10638 }
0x15ee   :  { %10642 = vrcp.f32 %v6233_v31  ;;  %v10641_v43 = vpop.eup %10640  ;;  %v6246_v49 = vadd.f32 1.0, %v10639_v18 }
0x15ef   :  { %10644 = vrcp.f32 %v6239_v29 }
0x15f0   :  { %10646 = vrcp.f32 %v6246_v49 }
0x15f8   :  { %v10643_v37 = vpop.eup %10642 }
0x15f9   :  { %v10645_v25 = vpop.eup %10644  ;;  %v6251_v27 = vmul.f32 %v10643_v37, %v10641_v43 }
0x15fa   :  { %v6250_v9 = vmul.f32 %v10645_v25, %v12589_v28  ;;  %v10647_v51 = vpop.eup %10646 }
0x15fc   :  { %v12635_v55 = vadd.f32 %v6251_v27, %v6250_v9 }
0x15fe   :  { %10648 = vtanh.f32 %v12635_v55 }
0x1608   :  { %v10649_v56 = vpop.eup %10648 }
0x1609   :  { %v12638_v57 = vmul.f32 %v10649_v56, %v10647_v51 }
0x160b   :  { %6392 = vmatmul.mubr.f32.vlgmr.msra.gmra.mrb[42].mxu0 %v12638_v57  ;;  %6463 = vmatmul.mubr.f32.vlgmr.msra.gmra.mrb[50].mxu1 %v12638_v57 }
0x160c   :  { %9776 = vmatpush1.bf16.msra.mxu0 %v12490_v24  ;;  %9808 = vmatpush1.bf16.msra.mxu1 %v12493_v30 }
0x160d   :  { %9778 = vmatprep.subr.bf16.mxu0 %v12498_v19  ;;  %9810 = vmatprep.subr.bf16.mxu1 %v12500_v3 }
0x160e   :  { %6634 = vmatprep.mubr.f32.mxu0 %v10872_v0  ;;  %6705 = vmatprep.mubr.f32.mxu1 %v10872_v0 }
0x1610   :  { %9780 = vmatpush1.bf16.msra.mxu0 %v12502_v7  ;;  %9812 = vmatpush1.bf16.msra.mxu1 %v12505_v52 }
0x1611   :  { %9782 = vmatprep.subr.bf16.mxu0 %v12510_v47  ;;  %9814 = vmatprep.subr.bf16.mxu1 %v12512_v26 }
0x1614   :  { %9784 = vmatpush1.bf16.msra.mxu0 %v12514_v15  ;;  %9816 = vmatpush1.bf16.msra.mxu1 %v12517_v41 }
0x1615   :  { %9786 = vmatprep.subr.bf16.mxu0 %v12522_v53  ;;  %9818 = vmatprep.subr.bf16.mxu1 %v12524_v42 }
0x1618   :  { %9788 = vmatpush1.bf16.msra.mxu0 %v12526_v58  ;;  %9820 = vmatpush1.bf16.msra.mxu1 %v12529_v35 }
0x1619   :  { %9790 = vmatprep.subr.bf16.mxu0 %v12534_v39  ;;  %9822 = vmatprep.subr.bf16.mxu1 %v12536_v14 }
0x161c   :  { %9792 = vmatpush1.bf16.msra.mxu0 %v12538_v34  ;;  %9824 = vmatpush1.bf16.msra.mxu1 %v12541_v4 }
0x161d   :  { %9794 = vmatprep.subr.bf16.mxu0 %v12545_v46  ;;  %9826 = vmatprep.subr.bf16.mxu1 %v12548_v61 }
0x1620   :  { %9796 = vmatpush1.bf16.msra.mxu0 %v12550_v2  ;;  %9828 = vmatpush1.bf16.msra.mxu1 %v12553_v16 }
0x1621   :  { %9798 = vmatprep.subr.bf16.mxu0 %v12556_v13  ;;  %9830 = vmatprep.subr.bf16.mxu1 %v12558_v5 }
0x1624   :  { %9800 = vmatpush1.bf16.msra.mxu0 %v12561_v59  ;;  %9832 = vmatpush1.bf16.msra.mxu1 %v12565_v10 }
0x1625   :  { %9802 = vmatprep.subr.bf16.mxu0 %v12567_v60  ;;  %9834 = vmatprep.subr.bf16.mxu1 %v12570_v1 }
0x1628   :  { %9804 = vmatpush1.bf16.msra.mxu0 %v12573_v44  ;;  %9836 = vmatpush1.bf16.msra.mxu1 %v12577_v40 }
0x1629   :  { %9838 = vmatprep.subr.bf16.mxu0 %v12486_v22  ;;  %9870 = vmatprep.subr.bf16.mxu1 %v12488_v45 }
0x16de   :  { %v6393_v28 = vpop.f32.mrb[42].mxu0  ;;  %v6464_v11 = vpop.f32.mrb[50].mxu1 }
0x16df   :  { %v10175_v48 = vadd.f32 %v6393_v28, %v12372_v12  ;;  %v6395_v62 = vpop.f32.mrb[43].mxu0  ;;  %v6466_v63 = vpop.f32.mrb[51].mxu1  ;;  %v10191_v31 = vadd.f32 %v6464_v11, %v12384_v21 }
0x16e0   :  { %v10176_v38 = vadd.f32 %v6395_v62, %v12375_v17  ;;  %v10192_v36 = vadd.f32 %v6466_v63, %v12380_v33  ;;  %v6998_v62 = vld [vmem:[#allocation15 + $0x18] sm:$0xff] }
0x16e1   :  { %v7803_v6 = vmul.f32 -1.442695, %v10175_v48 }
0x16e2   :  { %v7804_v54 = vmul.f32 -1.442695, %v10176_v38  ;;  %v7805_v20 = vmul.f32 -1.442695, %v10192_v36  ;;  %v6999_v38 = vld [vmem:[#allocation15 + $0x20] sm:$0xff]  ;;  %v7001_v36 = vld [vmem:[#allocation15 + $0x30] sm:$0xff] }
0x16e3   :  { %10650 = vpow2.f32 %v7803_v6  ;;  %v7000_v6 = vld [vmem:[#allocation15 + $0x28] sm:$0xff] }
0x16e4   :  { %10652 = vpow2.f32 %v7804_v54  ;;  %v9908_v54 = vpack.c.bf16 %v7000_v6, %v6999_v38  ;;  %v7179_v38 = vld [vmem:[#allocation15 + $0x130] sm:$0xff]  ;;  %v7180_v6 = vld [vmem:[#allocation15 + $0x138] sm:$0xff] }
0x16e5   :  { %10654 = vpow2.f32 %v7805_v20  ;;  %v7002_v20 = vld [vmem:[#allocation15 + $0x38] sm:$0xff] }
0x16e6   :  { %10656 = vtanh.f32 %v10191_v31  ;;  %v9911_v31 = vpack.c.bf16 %v7002_v20, %v7001_v36  ;;  %v7182_v36 = vld [vmem:[#allocation15 + $0x148] sm:$0xff] }
0x16ed   :  { %v10651_v22 = vpop.eup %10650 }
0x16ee   :  { %v10653_v29 = vpop.eup %10652  ;;  %v6476_v45 = vadd.f32 1.0, %v10651_v22  ;;  %v7003_v22 = vld [vmem:[#allocation15 + $0x40] sm:$0xff] }
0x16ef   :  { %v6482_v18 = vadd.f32 1.0, %v10653_v29  ;;  %v10655_v43 = vpop.eup %10654  ;;  %v7004_v29 = vld [vmem:[#allocation15 + $0x48] sm:$0xff] }
0x16f0   :  { %10658 = vrcp.f32 %v6476_v45  ;;  %v10657_v37 = vpop.eup %10656  ;;  %v6489_v9 = vadd.f32 1.0, %v10655_v43  ;;  %v9914_v45 = vpack.c.bf16 %v7004_v29, %v7003_v22  ;;  %v7006_v43 = vld [vmem:[#allocation15 + $0x58] sm:$0xff] }
0x16f1   :  { %10660 = vrcp.f32 %v6482_v18  ;;  %v7005_v18 = vld [vmem:[#allocation15 + $0x50] sm:$0xff]  ;;  %v7184_v22 = vld [vmem:[#allocation15 + $0x158] sm:$0xff] }
0x16f2   :  { %10662 = vrcp.f32 %v6489_v9  ;;  %v7009_v9 = vld [vmem:[#allocation15 + $0x70] sm:$0xff] }
0x16fa   :  { %v10659_v25 = vpop.eup %10658 }
0x16fb   :  { %v10661_v27 = vpop.eup %10660  ;;  %v6494_v49 = vmul.f32 %v10659_v25, %v10657_v37  ;;  %v9917_v37 = vpack.c.bf16 %v7006_v43, %v7005_v18  ;;  %v7007_v25 = vld [vmem:[#allocation15 + $0x60] sm:$0xff]  ;;  %v7186_v18 = vld [vmem:[#allocation15 + $0x168] sm:$0xff] }
0x16fc   :  { %v6493_v51 = vmul.f32 %v10661_v27, %v12635_v55  ;;  %v10663_v28 = vpop.eup %10662  ;;  %v6997_v55 = vld [vmem:[#allocation15 + $0x10] sm:$0xff]  ;;  %v7008_v27 = vld [vmem:[#allocation15 + $0x68] sm:$0xff] }
0x16fd   :  { %v9905_v63 = vpack.c.bf16 %v6998_v62, %v6997_v55  ;;  %v7177_v55 = vld [vmem:[#allocation15 + $0x120] sm:$0xff]  ;;  %v7178_v62 = vld [vmem:[#allocation15 + $0x128] sm:$0xff] }
0x16fe   :  { %v12681_v56 = vadd.f32 %v6494_v49, %v6493_v51  ;;  %v9920_v49 = vpack.c.bf16 %v7008_v27, %v7007_v25  ;;  %v7010_v51 = vld [vmem:[#allocation15 + $0x78] sm:$0xff] }
0x16ff   :  { %v7188_v25 = vld [vmem:[#allocation15 + $0x178] sm:$0xff] }
0x1700   :  { %10664 = vtanh.f32 %v12681_v56 }
0x170a   :  { %v10665_v11 = vpop.eup %10664 }
0x170b   :  { %v12684_v48 = vmul.f32 %v10665_v11, %v10663_v28  ;;  %v7084_v28 = vld [vmem:[#allocation15 + $0x80] sm:$0xff]  ;;  %v7085_v11 = vld [vmem:[#allocation15 + $0x88] sm:$0xff] }
0x170d   :  { %6635 = vmatmul.mubr.f32.vlgmr.msra.gmra.mrb[44].mxu0 %v12684_v48  ;;  %6706 = vmatmul.mubr.f32.vlgmr.msra.gmra.mrb[52].mxu1 %v12684_v48 }
0x170e   :  { %9840 = vmatpush1.bf16.msra.mxu0 %v12490_v24  ;;  %9872 = vmatpush1.bf16.msra.mxu1 %v12493_v30  ;;  %v10873_v24 = vmov 0.0|0.0  }
0x170f   :  { %9842 = vmatprep.subr.bf16.mxu0 %v12498_v19  ;;  %9874 = vmatprep.subr.bf16.mxu1 %v12500_v3 }
0x1710   :  { %6877 = vmatprep.mubr.f32.mxu0 %v10872_v0  ;;  %6948 = vmatprep.mubr.f32.mxu1 %v10872_v0 }
0x1712   :  { %9844 = vmatpush1.bf16.msra.mxu0 %v12502_v7  ;;  %9876 = vmatpush1.bf16.msra.mxu1 %v12505_v52 }
0x1713   :  { %9846 = vmatprep.subr.bf16.mxu0 %v12510_v47  ;;  %9878 = vmatprep.subr.bf16.mxu1 %v12512_v26 }
0x1716   :  { %9848 = vmatpush1.bf16.msra.mxu0 %v12514_v15  ;;  %9880 = vmatpush1.bf16.msra.mxu1 %v12517_v41 }
0x1717   :  { %9850 = vmatprep.subr.bf16.mxu0 %v12522_v53  ;;  %9882 = vmatprep.subr.bf16.mxu1 %v12524_v42 }
0x171a   :  { %9852 = vmatpush1.bf16.msra.mxu0 %v12526_v58  ;;  %9884 = vmatpush1.bf16.msra.mxu1 %v12529_v35 }
0x171b   :  { %9854 = vmatprep.subr.bf16.mxu0 %v12534_v39  ;;  %9886 = vmatprep.subr.bf16.mxu1 %v12536_v14 }
0x171e   :  { %9856 = vmatpush1.bf16.msra.mxu0 %v12538_v34  ;;  %9888 = vmatpush1.bf16.msra.mxu1 %v12541_v4 }
0x171f   :  { %9858 = vmatprep.subr.bf16.mxu0 %v12545_v46  ;;  %9890 = vmatprep.subr.bf16.mxu1 %v12548_v61 }
0x1722   :  { %9860 = vmatpush1.bf16.msra.mxu0 %v12550_v2  ;;  %9892 = vmatpush1.bf16.msra.mxu1 %v12553_v16 }
0x1723   :  { %9862 = vmatprep.subr.bf16.mxu0 %v12556_v13  ;;  %9894 = vmatprep.subr.bf16.mxu1 %v12558_v5 }
0x1726   :  { %9864 = vmatpush1.bf16.msra.mxu0 %v12561_v59  ;;  %9896 = vmatpush1.bf16.msra.mxu1 %v12565_v10  ;;  %v6995_v59 = vld [vmem:[#allocation15] sm:$0xff]  ;;  %v6996_v10 = vld [vmem:[#allocation15 + $0x8] sm:$0xff] }
0x1727   :  { %9866 = vmatprep.subr.bf16.mxu0 %v12567_v60  ;;  %9898 = vmatprep.subr.bf16.mxu1 %v12570_v1 }
0x172a   :  { %9868 = vmatpush1.bf16.msra.mxu0 %v12573_v44  ;;  %9900 = vmatpush1.bf16.msra.mxu1 %v12577_v40  ;;  %v9902_v44 = vpack.c.bf16 %v6996_v10, %v6995_v59  ;;  %v7174_v59 = vld [vmem:[#allocation15 + $0x108] sm:$0xff] }
0x172b   :  { %9901 = vmatprep.subr.bf16.mxu0 %v10873_v24 }
0x17e0   :  { %v6636_v30 = vpop.f32.mrb[44].mxu0  ;;  %v6707_v19 = vpop.f32.mrb[52].mxu1 }
0x17e1   :  { %v10177_v3 = vadd.f32 %v6636_v30, %v12372_v12  ;;  %v6638_v7 = vpop.f32.mrb[45].mxu0  ;;  %v6709_v52 = vpop.f32.mrb[53].mxu1  ;;  %v10193_v42 = vadd.f32 %v6707_v19, %v12384_v21  ;;  %v9926_v30 = vpack.c.bf16 %v7085_v11, %v7084_v28  ;;  %v7086_v19 = vld [vmem:[#allocation15 + $0x90] sm:$0xff]  ;;  %v7265_v28 = vld [vmem:[#allocation15 + $0x198] sm:$0xff] }
0x17e2   :  { %v10178_v47 = vadd.f32 %v6638_v7, %v12375_v17  ;;  %v10194_v41 = vadd.f32 %v6709_v52, %v12380_v33  ;;  %v7088_v52 = vld [vmem:[#allocation15 + $0xa0] sm:$0xff] }
0x17e3   :  { %v7806_v26 = vmul.f32 -1.442695, %v10177_v3  ;;  %v7087_v3 = vld [vmem:[#allocation15 + $0x98] sm:$0xff] }
0x17e4   :  { %v7807_v15 = vmul.f32 -1.442695, %v10178_v47  ;;  %v7808_v53 = vmul.f32 -1.442695, %v10194_v41  ;;  %v9929_v7 = vpack.c.bf16 %v7087_v3, %v7086_v19  ;;  %v7089_v47 = vld [vmem:[#allocation15 + $0xa8] sm:$0xff]  ;;  %v7091_v41 = vld [vmem:[#allocation15 + $0xb8] sm:$0xff] }
0x17e5   :  { %10666 = vpow2.f32 %v7806_v26  ;;  %v9932_v26 = vpack.c.bf16 %v7089_v47, %v7088_v52  ;;  %v7267_v19 = vld [vmem:[#allocation15 + $0x1a8] sm:$0xff]  ;;  %v7269_v52 = vld [vmem:[#allocation15 + $0x1b8] sm:$0xff] }
0x17e6   :  { %10668 = vpow2.f32 %v7807_v15  ;;  %v7090_v15 = vld [vmem:[#allocation15 + $0xb0] sm:$0xff] }
0x17e7   :  { %10670 = vpow2.f32 %v7808_v53  ;;  %v9935_v53 = vpack.c.bf16 %v7091_v41, %v7090_v15  ;;  %v7272_v41 = vld [vmem:[#allocation15 + $0x1d0] sm:$0xff] }
0x17e8   :  { %10672 = vtanh.f32 %v10193_v42  ;;  %v7093_v42 = vld [vmem:[#allocation15 + $0xc8] sm:$0xff] }
0x17ef   :  { %v10667_v58 = vpop.eup %10666 }
0x17f0   :  { %v10669_v35 = vpop.eup %10668  ;;  %v6719_v39 = vadd.f32 1.0, %v10667_v58 }
0x17f1   :  { %v6725_v14 = vadd.f32 1.0, %v10669_v35  ;;  %v10671_v34 = vpop.eup %10670  ;;  %v7094_v35 = vld [vmem:[#allocation15 + $0xd0] sm:$0xff] }
0x17f2   :  { %10674 = vrcp.f32 %v6719_v39  ;;  %v10673_v4 = vpop.eup %10672  ;;  %v6732_v16 = vadd.f32 1.0, %v10671_v34  ;;  %v7095_v39 = vld [vmem:[#allocation15 + $0xd8] sm:$0xff]  ;;  %v7096_v34 = vld [vmem:[#allocation15 + $0xe0] sm:$0xff] }
0x17f3   :  { %10676 = vrcp.f32 %v6725_v14  ;;  %v9941_v14 = vpack.c.bf16 %v7095_v39, %v7094_v35  ;;  %v7276_v39 = vld [vmem:[#allocation15 + $0x1f0] sm:$0xff] }
0x17f4   :  { %10678 = vrcp.f32 %v6732_v16 }
0x17fc   :  { %v10675_v46 = vpop.eup %10674 }
0x17fd   :  { %v10677_v61 = vpop.eup %10676  ;;  %v6737_v2 = vmul.f32 %v10675_v46, %v10673_v4  ;;  %v7097_v4 = vld [vmem:[#allocation15 + $0xe8] sm:$0xff] }
0x17fe   :  { %v6736_v13 = vmul.f32 %v10677_v61, %v12681_v56  ;;  %v10679_v60 = vpop.eup %10678  ;;  %v9923_v56 = vpack.c.bf16 %v7010_v51, %v7009_v9  ;;  %v9944_v46 = vpack.c.bf16 %v7097_v4, %v7096_v34  ;;  %v7098_v61 = vld [vmem:[#allocation15 + $0xf0] sm:$0xff]  ;;  %v7263_v9 = vld [vmem:[#allocation15 + $0x188] sm:$0xff]  ;;  %v7351_v4 = vld [vmem:[#allocation15 + $0x200] sm:$0xff] }
0x1800   :  { %v12726_v5 = vadd.f32 %v6737_v2, %v6736_v13  ;;  %v7099_v2 = vld [vmem:[#allocation15 + $0xf8] sm:$0xff]  ;;  %v7173_v13 = vld [vmem:[#allocation15 + $0x100] sm:$0xff] }
0x1801   :  { %v9947_v16 = vpack.c.bf16 %v7099_v2, %v7098_v61  ;;  %v9950_v10 = vpack.c.bf16 %v7174_v59, %v7173_v13  ;;  %v7353_v2 = vld [vmem:[#allocation15 + $0x210] sm:$0xff]  ;;  %v7355_v59 = vld [vmem:[#allocation15 + $0x220] sm:$0xff] }
0x1802   :  { %10680 = vtanh.f32 %v12726_v5 }
0x180c   :  { %v10681_v1 = vpop.eup %10680 }
0x180d   :  { %v12729_v40 = vmul.f32 %v10681_v1, %v10679_v60  ;;  %v7175_v60 = vld [vmem:[#allocation15 + $0x110] sm:$0xff]  ;;  %v7176_v1 = vld [vmem:[#allocation15 + $0x118] sm:$0xff] }
0x180f   :  { %6878 = vmatmul.mubr.f32.vlgmr.msra.gmra.mrb[46].mxu0 %v12729_v40  ;;  %6949 = vmatmul.mubr.f32.vlgmr.msra.gmra.mrb[54].mxu1 %v12729_v40 }
0x1810   :  { %9903 = vmatpush3.bf16.msra.mxu0 %v9902_v44  ;;  %7981 = vmatprep.mubr.msk.f32.mxu0 %vm10874_vm1, %v10872_v0  ;;  %v9953_v44 = vpack.c.bf16 %v7176_v1, %v7175_v60  ;;  %v7357_v1 = vld [vmem:[#allocation15 + $0x230] sm:$0xff] }
0x1811   :  { %9904 = vmatprep.subr.bf16.mxu0 %v10873_v24 }
0x1814   :  { %9906 = vmatpush3.bf16.msra.mxu0 %v9905_v63  ;;  %v9956_v63 = vpack.c.bf16 %v7178_v62, %v7177_v55  ;;  %v7360_v62 = vld [vmem:[#allocation15 + $0x248] sm:$0xff] }
0x1815   :  { %9907 = vmatprep.subr.bf16.mxu0 %v10873_v24 }
0x1818   :  { %9909 = vmatpush3.bf16.msra.mxu0 %v9908_v54  ;;  %v9959_v54 = vpack.c.bf16 %v7180_v6, %v7179_v38  ;;  %v7361_v38 = vld [vmem:[#allocation15 + $0x250] sm:$0xff]  ;;  %v7362_v6 = vld [vmem:[#allocation15 + $0x258] sm:$0xff] }
0x1819   :  { %9910 = vmatprep.subr.bf16.mxu0 %v10873_v24 }
0x181c   :  { %9912 = vmatpush3.bf16.msra.mxu0 %v9911_v31  ;;  %v7183_v31 = vld [vmem:[#allocation15 + $0x150] sm:$0xff] }
0x181d   :  { %9913 = vmatprep.subr.bf16.mxu0 %v10873_v24  ;;  %v9965_v29 = vpack.c.bf16 %v7184_v22, %v7183_v31  ;;  %v7365_v31 = vld [vmem:[#allocation15 + $0x270] sm:$0xff]  ;;  %v7366_v22 = vld [vmem:[#allocation15 + $0x278] sm:$0xff] }
0x1820   :  { %9915 = vmatpush3.bf16.msra.mxu0 %v9914_v45  ;;  %v7185_v45 = vld [vmem:[#allocation15 + $0x160] sm:$0xff] }
0x1821   :  { %9916 = vmatprep.subr.bf16.mxu0 %v10873_v24  ;;  %v9968_v43 = vpack.c.bf16 %v7186_v18, %v7185_v45  ;;  %v7440_v45 = vld [vmem:[#allocation15 + $0x280] sm:$0xff]  ;;  %v7441_v18 = vld [vmem:[#allocation15 + $0x288] sm:$0xff] }
0x1824   :  { %9918 = vmatpush3.bf16.msra.mxu0 %v9917_v37  ;;  %v7187_v37 = vld [vmem:[#allocation15 + $0x170] sm:$0xff] }
0x1825   :  { %9919 = vmatprep.subr.bf16.mxu0 %v10873_v24  ;;  %v9971_v27 = vpack.c.bf16 %v7188_v25, %v7187_v37  ;;  %v7442_v37 = vld [vmem:[#allocation15 + $0x290] sm:$0xff]  ;;  %v7443_v25 = vld [vmem:[#allocation15 + $0x298] sm:$0xff] }
0x1828   :  { %9921 = vmatpush3.bf16.msra.mxu0 %v9920_v49  ;;  %v7262_v49 = vld [vmem:[#allocation15 + $0x180] sm:$0xff] }
0x1829   :  { %9922 = vmatprep.subr.bf16.mxu0 %v10873_v24  ;;  %v9974_v51 = vpack.c.bf16 %v7263_v9, %v7262_v49  ;;  %v7444_v49 = vld [vmem:[#allocation15 + $0x2a0] sm:$0xff]  ;;  %v7445_v9 = vld [vmem:[#allocation15 + $0x2a8] sm:$0xff] }
0x182c   :  { %9924 = vmatpush3.bf16.msra.mxu0 %v9923_v56  ;;  %v7264_v56 = vld [vmem:[#allocation15 + $0x190] sm:$0xff] }
0x182d   :  { %9925 = vmatprep.subr.bf16.mxu0 %v10873_v24  ;;  %v9977_v11 = vpack.c.bf16 %v7265_v28, %v7264_v56  ;;  %v7446_v56 = vld [vmem:[#allocation15 + $0x2b0] sm:$0xff]  ;;  %v7447_v28 = vld [vmem:[#allocation15 + $0x2b8] sm:$0xff] }
0x182f   :  { %7982 = vmatmul.mubr.f32.vlgmr.msra.gmra.mrb[48].mxu0 %v12390_v8  ;;  %v7092_v8 = vld [vmem:[#allocation15 + $0xc0] sm:$0xff] }
0x1830   :  { %9927 = vmatpush3.bf16.msra.mxu0 %v9926_v30  ;;  %8016 = vmatprep.mubr.msk.f32.mxu0 %vm10874_vm1, %v10872_v0  ;;  %v9938_v58 = vpack.c.bf16 %v7093_v42, %v7092_v8  ;;  %v7266_v30 = vld [vmem:[#allocation15 + $0x1a0] sm:$0xff] }
0x1831   :  { %9928 = vmatprep.subr.bf16.mxu0 %v10873_v24  ;;  %v9980_v3 = vpack.c.bf16 %v7267_v19, %v7266_v30  ;;  %v7274_v42 = vld [vmem:[#allocation15 + $0x1e0] sm:$0xff]  ;;  %v7449_v30 = vld [vmem:[#allocation15 + $0x2c8] sm:$0xff] }
0x1834   :  { %9930 = vmatpush3.bf16.msra.mxu0 %v9929_v7  ;;  %v7268_v7 = vld [vmem:[#allocation15 + $0x1b0] sm:$0xff] }
0x1835   :  { %9931 = vmatprep.subr.bf16.mxu0 %v10873_v24  ;;  %v9983_v47 = vpack.c.bf16 %v7269_v52, %v7268_v7  ;;  %v7451_v7 = vld [vmem:[#allocation15 + $0x2d8] sm:$0xff] }
0x1838   :  { %9933 = vmatpush3.bf16.msra.mxu0 %v9932_v26  ;;  %v7271_v26 = vld [vmem:[#allocation15 + $0x1c8] sm:$0xff] }
0x1839   :  { %9934 = vmatprep.subr.bf16.mxu0 %v10873_v24 }
0x183c   :  { %9936 = vmatpush3.bf16.msra.mxu0 %v9935_v53  ;;  %v7273_v53 = vld [vmem:[#allocation15 + $0x1d8] sm:$0xff] }
0x183d   :  { %9937 = vmatprep.subr.bf16.mxu0 %v10873_v24  ;;  %v9989_v8 = vpack.c.bf16 %v7273_v53, %v7272_v41  ;;  %v7455_v41 = vld [vmem:[#allocation15 + $0x2f8] sm:$0xff] }
0x1840   :  { %9939 = vmatpush3.bf16.msra.mxu0 %v9938_v58  ;;  %v7275_v58 = vld [vmem:[#allocation15 + $0x1e8] sm:$0xff] }
0x1841   :  { %9940 = vmatprep.subr.bf16.mxu0 %v10873_v24  ;;  %v9992_v35 = vpack.c.bf16 %v7275_v58, %v7274_v42  ;;  %v7530_v42 = vld [vmem:[#allocation15 + $0x308] sm:$0xff] }
0x1844   :  { %9942 = vmatpush3.bf16.msra.mxu0 %v9941_v14  ;;  %v7277_v14 = vld [vmem:[#allocation15 + $0x1f8] sm:$0xff] }
0x1845   :  { %9943 = vmatprep.subr.bf16.mxu0 %v10873_v24  ;;  %v9995_v34 = vpack.c.bf16 %v7277_v14, %v7276_v39  ;;  %v7532_v39 = vld [vmem:[#allocation15 + $0x318] sm:$0xff] }
0x1848   :  { %9945 = vmatpush3.bf16.msra.mxu0 %v9944_v46  ;;  %v7352_v46 = vld [vmem:[#allocation15 + $0x208] sm:$0xff] }
0x1849   :  { %9946 = vmatprep.subr.bf16.mxu0 %v10873_v24  ;;  %v9998_v61 = vpack.c.bf16 %v7352_v46, %v7351_v4  ;;  %v7534_v4 = vld [vmem:[#allocation15 + $0x328] sm:$0xff] }
0x184c   :  { %9948 = vmatpush3.bf16.msra.mxu0 %v9947_v16  ;;  %v7354_v16 = vld [vmem:[#allocation15 + $0x218] sm:$0xff] }
0x184d   :  { %9949 = vmatprep.subr.bf16.mxu0 %v10873_v24  ;;  %v10001_v13 = vpack.c.bf16 %v7354_v16, %v7353_v2  ;;  %v7536_v2 = vld [vmem:[#allocation15 + $0x338] sm:$0xff] }
0x184f   :  { %8017 = vmatmul.mubr.f32.vlgmr.msra.gmra.mrb[48].mxu0 %v12436_v23  ;;  %v7181_v23 = vld [vmem:[#allocation15 + $0x140] sm:$0xff] }
0x1850   :  { %9951 = vmatpush3.bf16.msra.mxu0 %v9950_v10  ;;  %8051 = vmatprep.mubr.msk.f32.mxu0 %vm10874_vm1, %v10872_v0  ;;  %v9962_v20 = vpack.c.bf16 %v7182_v36, %v7181_v23  ;;  %v7356_v10 = vld [vmem:[#allocation15 + $0x228] sm:$0xff]  ;;  %v7363_v23 = vld [vmem:[#allocation15 + $0x260] sm:$0xff] }
0x1851   :  { %9952 = vmatprep.subr.bf16.mxu0 %v10873_v24  ;;  %v10004_v60 = vpack.c.bf16 %v7356_v10, %v7355_v59  ;;  %v7364_v36 = vld [vmem:[#allocation15 + $0x268] sm:$0xff]  ;;  %v7539_v10 = vld [vmem:[#allocation15 + $0x350] sm:$0xff] }
0x1854   :  { %9954 = vmatpush3.bf16.msra.mxu0 %v9953_v44  ;;  %v7358_v44 = vld [vmem:[#allocation15 + $0x238] sm:$0xff] }
0x1855   :  { %9955 = vmatprep.subr.bf16.mxu0 %v10873_v24  ;;  %v10007_v55 = vpack.c.bf16 %v7358_v44, %v7357_v1  ;;  %v7541_v44 = vld [vmem:[#allocation15 + $0x360] sm:$0xff] }
0x1858   :  { %9957 = vmatpush3.bf16.msra.mxu0 %v9956_v63 }
0x1859   :  { %9958 = vmatprep.subr.bf16.mxu0 %v10873_v24 }
0x185c   :  { %9960 = vmatpush3.bf16.msra.mxu0 %v9959_v54  ;;  %v10013_v54 = vpack.c.bf16 %v7362_v6, %v7361_v38 }
0x185d   :  { %9961 = vmatprep.subr.bf16.mxu0 %v10873_v24 }
0x1860   :  { %9963 = vmatpush3.bf16.msra.mxu0 %v9962_v20  ;;  %v10016_v20 = vpack.c.bf16 %v7364_v36, %v7363_v23 }
0x1861   :  { %9964 = vmatprep.subr.bf16.mxu0 %v10873_v24 }
0x1864   :  { %9966 = vmatpush3.bf16.msra.mxu0 %v9965_v29  ;;  %v10019_v29 = vpack.c.bf16 %v7366_v22, %v7365_v31  ;;  %v7544_v31 = vld [vmem:[#allocation15 + $0x378] sm:$0xff] }
0x1865   :  { %9967 = vmatprep.subr.bf16.mxu0 %v10873_v24 }
0x1868   :  { %9969 = vmatpush3.bf16.msra.mxu0 %v9968_v43  ;;  %v10022_v43 = vpack.c.bf16 %v7441_v18, %v7440_v45  ;;  %v7618_v45 = vld [vmem:[#allocation15 + $0x380] sm:$0xff] }
0x1869   :  { %9970 = vmatprep.subr.bf16.mxu0 %v10873_v24 }
0x186c   :  { %9972 = vmatpush3.bf16.msra.mxu0 %v9971_v27  ;;  %v10025_v27 = vpack.c.bf16 %v7443_v25, %v7442_v37  ;;  %v7621_v37 = vld [vmem:[#allocation15 + $0x398] sm:$0xff] }
0x186d   :  { %9973 = vmatprep.subr.bf16.mxu0 %v10873_v24 }
0x186f   :  { %8052 = vmatmul.mubr.f32.vlgmr.msra.gmra.mrb[48].mxu0 %v12480_v32  ;;  %v7270_v32 = vld [vmem:[#allocation15 + $0x1c0] sm:$0xff] }
0x1870   :  { %9975 = vmatpush3.bf16.msra.mxu0 %v9974_v51  ;;  %8086 = vmatprep.mubr.msk.f32.mxu0 %vm10874_vm1, %v10872_v0  ;;  %v9986_v15 = vpack.c.bf16 %v7271_v26, %v7270_v32  ;;  %v10028_v51 = vpack.c.bf16 %v7445_v9, %v7444_v49  ;;  %v7453_v32 = vld [vmem:[#allocation15 + $0x2e8] sm:$0xff] }
0x1871   :  { %9976 = vmatprep.subr.bf16.mxu0 %v10873_v24 }
0x1874   :  { %9978 = vmatpush3.bf16.msra.mxu0 %v9977_v11  ;;  %v10031_v11 = vpack.c.bf16 %v7447_v28, %v7446_v56 }
0x1875   :  { %9979 = vmatprep.subr.bf16.mxu0 %v10873_v24 }
0x1878   :  { %9981 = vmatpush3.bf16.msra.mxu0 %v9980_v3  ;;  %v7450_v3 = vld [vmem:[#allocation15 + $0x2d0] sm:$0xff] }
0x1879   :  { %9982 = vmatprep.subr.bf16.mxu0 %v10873_v24  ;;  %v10037_v52 = vpack.c.bf16 %v7451_v7, %v7450_v3 }
0x187c   :  { %9984 = vmatpush3.bf16.msra.mxu0 %v9983_v47  ;;  %v7452_v47 = vld [vmem:[#allocation15 + $0x2e0] sm:$0xff] }
0x187d   :  { %9985 = vmatprep.subr.bf16.mxu0 %v10873_v24  ;;  %v10040_v26 = vpack.c.bf16 %v7453_v32, %v7452_v47  ;;  %v7628_v47 = vld [vmem:[#allocation15 + $0x3d0] sm:$0xff]  ;;  %v7629_v32 = vld [vmem:[#allocation15 + $0x3d8] sm:$0xff] }
0x1880   :  { %9987 = vmatpush3.bf16.msra.mxu0 %v9986_v15  ;;  %v7454_v15 = vld [vmem:[#allocation15 + $0x2f0] sm:$0xff] }
0x1881   :  { %9988 = vmatprep.subr.bf16.mxu0 %v10873_v24  ;;  %v10043_v53 = vpack.c.bf16 %v7455_v41, %v7454_v15 }
0x1884   :  { %9990 = vmatpush3.bf16.msra.mxu0 %v9989_v8  ;;  %v7529_v8 = vld [vmem:[#allocation15 + $0x300] sm:$0xff] }
0x1885   :  { %9991 = vmatprep.subr.bf16.mxu0 %v10873_v24  ;;  %v10046_v58 = vpack.c.bf16 %v7530_v42, %v7529_v8  ;;  %v10085_v42 = vpack.c.bf16 %v7629_v32, %v7628_v47 }
0x1888   :  { %9993 = vmatpush3.bf16.msra.mxu0 %v9992_v35  ;;  %v7531_v35 = vld [vmem:[#allocation15 + $0x310] sm:$0xff] }
0x1889   :  { %9994 = vmatprep.subr.bf16.mxu0 %v10873_v24  ;;  %v10049_v14 = vpack.c.bf16 %v7532_v39, %v7531_v35  ;;  %v7631_v35 = vld [vmem:[#allocation15 + $0x3e8] sm:$0xff] }
0x188c   :  { %9996 = vmatpush3.bf16.msra.mxu0 %v9995_v34  ;;  %v7533_v34 = vld [vmem:[#allocation15 + $0x320] sm:$0xff] }
0x188d   :  { %9997 = vmatprep.subr.bf16.mxu0 %v10873_v24  ;;  %v10052_v46 = vpack.c.bf16 %v7534_v4, %v7533_v34  ;;  %v7632_v34 = vld [vmem:[#allocation15 + $0x3f0] sm:$0xff]  ;;  %v7633_v4 = vld [vmem:[#allocation15 + $0x3f8] sm:$0xff] }
0x188f   :  { %8087 = vmatmul.mubr.f32.vlgmr.msra.gmra.mrb[48].mxu0 %v12592_v50  ;;  %v7359_v50 = vld [vmem:[#allocation15 + $0x240] sm:$0xff] }
0x1890   :  { %9999 = vmatpush3.bf16.msra.mxu0 %v9998_v61  ;;  %8121 = vmatprep.mubr.msk.f32.mxu0 %vm10874_vm1, %v10872_v0  ;;  %v10010_v63 = vpack.c.bf16 %v7360_v62, %v7359_v50  ;;  %v7535_v61 = vld [vmem:[#allocation15 + $0x330] sm:$0xff] }
0x1891   :  { %10000 = vmatprep.subr.bf16.mxu0 %v10873_v24  ;;  %v10055_v16 = vpack.c.bf16 %v7536_v2, %v7535_v61 }
0x1894   :  { %10002 = vmatpush3.bf16.msra.mxu0 %v10001_v13  ;;  %v7538_v13 = vld [vmem:[#allocation15 + $0x348] sm:$0xff] }
0x1895   :  { %10003 = vmatprep.subr.bf16.mxu0 %v10873_v24 }
0x1898   :  { %10005 = vmatpush3.bf16.msra.mxu0 %v10004_v60  ;;  %v7540_v60 = vld [vmem:[#allocation15 + $0x358] sm:$0xff] }
0x1899   :  { %10006 = vmatprep.subr.bf16.mxu0 %v10873_v24  ;;  %v10061_v1 = vpack.c.bf16 %v7540_v60, %v7539_v10 }
0x189c   :  { %10008 = vmatpush3.bf16.msra.mxu0 %v10007_v55  ;;  %v7542_v55 = vld [vmem:[#allocation15 + $0x368] sm:$0xff] }
0x189d   :  { %10009 = vmatprep.subr.bf16.mxu0 %v10873_v24  ;;  %v10064_v23 = vpack.c.bf16 %v7542_v55, %v7541_v44 }
0x18a0   :  { %10011 = vmatpush3.bf16.msra.mxu0 %v10010_v63 }
0x18a1   :  { %10012 = vmatprep.subr.bf16.mxu0 %v10873_v24 }
0x18a4   :  { %10014 = vmatpush3.bf16.msra.mxu0 %v10013_v54 }
0x18a5   :  { %10015 = vmatprep.subr.bf16.mxu0 %v10873_v24 }
0x18a8   :  { %10017 = vmatpush3.bf16.msra.mxu0 %v10016_v20  ;;  %v7543_v20 = vld [vmem:[#allocation15 + $0x370] sm:$0xff] }
0x18a9   :  { %10018 = vmatprep.subr.bf16.mxu0 %v10873_v24 }
0x18ac   :  { %10020 = vmatpush3.bf16.msra.mxu0 %v10019_v29  ;;  %v10067_v29 = vpack.c.bf16 %v7544_v31, %v7543_v20 }
0x18ad   :  { %10021 = vmatprep.subr.bf16.mxu0 %v10873_v24 }
0x18af   :  { %8122 = vmatmul.mubr.f32.vlgmr.msra.gmra.mrb[48].mxu0 %v12638_v57  ;;  %v7448_v57 = vld [vmem:[#allocation15 + $0x2c0] sm:$0xff] }
0x18b0   :  { %10023 = vmatpush3.bf16.msra.mxu0 %v10022_v43  ;;  %8156 = vmatprep.mubr.msk.f32.mxu0 %vm10874_vm1, %v10872_v0  ;;  %v10034_v19 = vpack.c.bf16 %v7449_v30, %v7448_v57  ;;  %v7620_v43 = vld [vmem:[#allocation15 + $0x390] sm:$0xff]  ;;  %v7625_v57 = vld [vmem:[#allocation15 + $0x3b8] sm:$0xff]  ;;  %v7626_v30 = vld [vmem:[#allocation15 + $0x3c0] sm:$0xff] }
0x18b1   :  { %10024 = vmatprep.subr.bf16.mxu0 %v10873_v24  ;;  %v10073_v49 = vpack.c.bf16 %v7621_v37, %v7620_v43 }
0x18b4   :  { %10026 = vmatpush3.bf16.msra.mxu0 %v10025_v27 }
0x18b5   :  { %10027 = vmatprep.subr.bf16.mxu0 %v10873_v24 }
0x18b8   :  { %10029 = vmatpush3.bf16.msra.mxu0 %v10028_v51  ;;  %v7623_v51 = vld [vmem:[#allocation15 + $0x3a8] sm:$0xff] }
0x18b9   :  { %10030 = vmatprep.subr.bf16.mxu0 %v10873_v24 }
0x18bc   :  { %10032 = vmatpush3.bf16.msra.mxu0 %v10031_v11 }
0x18bd   :  { %10033 = vmatprep.subr.bf16.mxu0 %v10873_v24 }
0x18c0   :  { %10035 = vmatpush3.bf16.msra.mxu0 %v10034_v19  ;;  %v7627_v19 = vld [vmem:[#allocation15 + $0x3c8] sm:$0xff] }
0x18c1   :  { %10036 = vmatprep.subr.bf16.mxu0 %v10873_v24  ;;  %v10082_v7 = vpack.c.bf16 %v7627_v19, %v7626_v30 }
0x18c4   :  { %10038 = vmatpush3.bf16.msra.mxu0 %v10037_v52 }
0x18c5   :  { %10039 = vmatprep.subr.bf16.mxu0 %v10873_v24 }
0x18c8   :  { %10041 = vmatpush3.bf16.msra.mxu0 %v10040_v26 }
0x18c9   :  { %10042 = vmatprep.subr.bf16.mxu0 %v10873_v24 }
0x18cc   :  { %10044 = vmatpush3.bf16.msra.mxu0 %v10043_v53 }
0x18cd   :  { %10045 = vmatprep.subr.bf16.mxu0 %v10873_v24 }
0x18cf   :  { %8157 = vmatmul.mubr.f32.vlgmr.msra.gmra.mrb[48].mxu0 %v12684_v48  ;;  %v7537_v48 = vld [vmem:[#allocation15 + $0x340] sm:$0xff] }
0x18d0   :  { %10047 = vmatpush3.bf16.msra.mxu0 %v10046_v58  ;;  %8191 = vmatprep.mubr.msk.f32.mxu0 %vm10874_vm1, %v10872_v0  ;;  %v10058_v59 = vpack.c.bf16 %v7538_v13, %v7537_v48  ;;  %v7630_v58 = vld [vmem:[#allocation15 + $0x3e0] sm:$0xff] }
0x18d1   :  { %10048 = vmatprep.subr.bf16.mxu0 %v10873_v24 }
0x18d4   :  { %10050 = vmatpush3.bf16.msra.mxu0 %v10049_v14  ;;  %v10088_v14 = vpack.c.bf16 %v7631_v35, %v7630_v58 }
0x18d5   :  { %10051 = vmatprep.subr.bf16.mxu0 %v10873_v24 }
0x18d8   :  { %10053 = vmatpush3.bf16.msra.mxu0 %v10052_v46  ;;  %v10091_v46 = vpack.c.bf16 %v7633_v4, %v7632_v34 }
0x18d9   :  { %10054 = vmatprep.subr.bf16.mxu0 %v10873_v24 }
0x18dc   :  { %10056 = vmatpush3.bf16.msra.mxu0 %v10055_v16  ;;  %v7812_v16 = vld [vmem:[%s12850_s11] ss:$0 sm:$0xff] }
0x18dd   :  { %10057 = vmatprep.subr.bf16.mxu0 %v10873_v24 }
0x18e0   :  { %10059 = vmatpush3.bf16.msra.mxu0 %v10058_v59 }
0x18e1   :  { %10060 = vmatprep.subr.bf16.mxu0 %v10873_v24 }
0x18e2   :  { %v6879_v50 = vpop.f32.mrb[46].mxu0  ;;  %v6950_v62 = vpop.f32.mrb[54].mxu1 }
0x18e3   :  { %v10179_v63 = vadd.f32 %v6879_v50, %v12372_v12  ;;  %v6881_v38 = vpop.f32.mrb[47].mxu0  ;;  %v6952_v6 = vpop.f32.mrb[55].mxu1  ;;  %v7619_v12 = vld [vmem:[#allocation15 + $0x388] sm:$0xff]  ;;  %v10195_v27 = vadd.f32 %v6950_v62, %v12384_v21 }
0x18e4   :  { %v10180_v54 = vadd.f32 %v6881_v38, %v12375_v17  ;;  %10062 = vmatpush3.bf16.msra.mxu0 %v10061_v1  ;;  %v10196_v18 = vadd.f32 %v6952_v6, %v12380_v33  ;;  %v10070_v17 = vpack.c.bf16 %v7619_v12, %v7618_v45  ;;  %v7622_v33 = vld [vmem:[#allocation15 + $0x3a0] sm:$0xff] }
0x18e5   :  { %v7809_v36 = vmul.f32 -1.442695, %v10179_v63  ;;  %10063 = vmatprep.subr.bf16.mxu0 %v10873_v24  ;;  %v10076_v21 = vpack.c.bf16 %v7623_v51, %v7622_v33 }
0x18e6   :  { %v7810_v22 = vmul.f32 -1.442695, %v10180_v54  ;;  %v7811_v25 = vmul.f32 -1.442695, %v10196_v18 }
0x18e7   :  { %10682 = vpow2.f32 %v7809_v36 }
0x18e8   :  { %10684 = vpow2.f32 %v7810_v22  ;;  %10065 = vmatpush3.bf16.msra.mxu0 %v10064_v23 }
0x18e9   :  { %10066 = vmatprep.subr.bf16.mxu0 %v10873_v24  ;;  %10686 = vpow2.f32 %v7811_v25 }
0x18ea   :  { %10688 = vtanh.f32 %v10195_v27 }
0x18ec   :  { %10068 = vmatpush3.bf16.msra.mxu0 %v10067_v29 }
0x18ed   :  { %10069 = vmatprep.subr.bf16.mxu0 %v10873_v24 }
0x18ef   :  { %8192 = vmatmul.mubr.f32.vlgmr.msra.gmra.mrb[48].mxu0 %v12729_v40  ;;  %v7624_v40 = vld [vmem:[#allocation15 + $0x3b0] sm:$0xff] }
0x18f0   :  { %10071 = vmatpush3.bf16.msra.mxu0 %v10070_v17  ;;  %8226 = vmatprep.mubr.msk.f32.mxu0 %vm10874_vm1, %v10872_v0  ;;  %v10079_v0 = vpack.c.bf16 %v7625_v57, %v7624_v40 }
0x18f1   :  { %v10683_v9 = vpop.eup %10682  ;;  %10072 = vmatprep.subr.bf16.mxu0 %v10873_v24 }
0x18f2   :  { %v10685_v56 = vpop.eup %10684  ;;  %v6962_v28 = vadd.f32 1.0, %v10683_v9 }
0x18f3   :  { %v6968_v11 = vadd.f32 1.0, %v10685_v56  ;;  %v10687_v3 = vpop.eup %10686 }
0x18f4   :  { %10690 = vrcp.f32 %v6962_v28  ;;  %10074 = vmatpush3.bf16.msra.mxu0 %v10073_v49  ;;  %v10689_v52 = vpop.eup %10688  ;;  %v6975_v53 = vadd.f32 1.0, %v10687_v3 }
0x18f5   :  { %10692 = vrcp.f32 %v6968_v11  ;;  %10075 = vmatprep.subr.bf16.mxu0 %v10873_v24 }
0x18f6   :  { %10694 = vrcp.f32 %v6975_v53 }
0x18f8   :  { %10077 = vmatpush3.bf16.msra.mxu0 %v10076_v21 }
0x18f9   :  { %10078 = vmatprep.subr.bf16.mxu0 %v10873_v24 }
0x18fc   :  { %10080 = vmatpush3.bf16.msra.mxu0 %v10079_v0 }
0x18fd   :  { %10081 = vmatprep.subr.bf16.mxu0 %v10873_v24 }
0x18fe   :  { %v10691_v26 = vpop.eup %10690 }
0x18ff   :  { %v10693_v15 = vpop.eup %10692  ;;  %v6980_v41 = vmul.f32 %v10691_v26, %v10689_v52 }
0x1900   :  { %v6979_v8 = vmul.f32 %v10693_v15, %v12726_v5  ;;  %10083 = vmatpush3.bf16.msra.mxu0 %v10082_v7  ;;  %v10695_v5 = vpop.eup %10694 }
0x1901   :  { %10084 = vmatprep.subr.bf16.mxu0 %v10873_v24 }
0x1902   :  { %v6981_v39 = vadd.f32 %v6980_v41, %v6979_v8 }
0x1904   :  { %10696 = vtanh.f32 %v6981_v39  ;;  %10086 = vmatpush3.bf16.msra.mxu0 %v10085_v42 }
0x1905   :  { %10087 = vmatprep.subr.bf16.mxu0 %v10873_v24 }
0x1908   :  { %10089 = vmatpush3.bf16.msra.mxu0 %v10088_v14 }
0x1909   :  { %10090 = vmatprep.subr.bf16.mxu0 %v10873_v24 }
0x190c   :  { %10092 = vmatpush3.bf16.msra.mxu0 %v10091_v46 }
0x190e   :  { %v10697_v61 = vpop.eup %10696 }
0x190f   :  { %v6983_v2 = vmul.f32 %v10697_v61, %v10695_v5 }
0x1911   :  { %8227 = vmatmul.mubr.f32.vlgmr.msra.gmra.mrb[48].mxu0 %v6983_v2 }
0x19e4   :  { %v7700_v48 = vpop.f32.mrb[48].mxu0 }
0x19e5   :  { %v10197_v13 = vadd.f32 %v7812_v16, %v7700_v48  ;;  %v8228_v59 = vpop.f32.mrb[49].mxu0 }
0x19e7   :  { %7705 = vst [vmem:[#allocation17] sm:$0xff] %v10197_v13 }
0x19e8   :  { %10841 = shalt.err (!%p10838_p10)
}
0x19e9   :  { %s10842_s2 = scalar_lea.hbm %s12851_s12, 128 }
0x19ea   :  { %p10843_p11 = scmp.ne.s32.totalorder %s12851_s12, %s10842_s2  ;;  %p10846_p12 = scmp.lt.u32.totalorder %s10842_s2, %s12851_s12 }
0x19ec   :  { %p10848_p13 = pnand %p10846_p12, %p10843_p11 }
0x19ee   :  { %10851 = shalt.err (!%p10848_p13)
}
0x19ef   :  { %7715 = dma.vmem_to_hbm [thread:$0]  %s7713_s29, 128, %s12851_s12, [#allocation8]  }
0x19f0   :  { %10860 = dma.done.wait [#allocation8], 128  }
0x19f1   :  { %10861 = vsyncadd [#allocation8], 4294967168 }
0x19f2   :  { %7719 = vsyncpa [#allocation7], 1 }
0x19f3   :  { %7720 = vsyncpa [#allocation10], 1 }
0x19f4   :  { %7721 = vsyncpa [#allocation13], 1 }
0x19f5   :  { %7722 = vsyncpa [#allocation16], 1 }
0x19f6   :  { %7723 = vsyncpa [#allocation8], 1 }

</bundles_post_ra>
